<compile_context>
chip_gen: v6e
topology: v6e:2x2x1
jax: 0.10.0
libtpu: 0.0.40
codegen_flags: <defaults>
</compile_context>

<pallas_src>
import math

import numpy as np

import jax
import jax.numpy as jnp
from jax.experimental import pallas as pl
from jax.experimental.pallas import tpu as pltpu

_VMEM = pl.BlockSpec(memory_space=pltpu.MemorySpace.VMEM)


def _nbytes(shape, dtype):
    return int(math.prod(shape)) * jnp.dtype(dtype).itemsize


def _round_up(x, m):
    return ((x + m - 1) // m) * m


# ---------------------------------------------------------------------------
# Static scatter pattern shared by both convs (compile-time constant).
#
# A 5x5/stride-2 conv followed by a 2x2/stride-2 max-pool reads, for pooled
# output (ph, pw) and pool parity (a, b), the input pixel (4*ph + r, 4*pw + c)
# with r = 2*a + kh, c = 2*b + kw (r, c in 0..6).  After a 4x4 space-to-depth
# of the input and a 2x2-block im2col (4 shifted slices), that pixel sits in
# patch-column block
#     blk = dh*32 + dw*16 + (r % 4)*4 + (c % 4),  dh = r // 4, dw = c // 4.
# S[p, blk, tap] selects which conv tap (kh*5 + kw) feeds which patch block for
# parity p = a*2 + b.
# ---------------------------------------------------------------------------
def _parity_tap_selector():
    S = np.zeros((4, 64, 25), np.float32)
    for a in range(2):
        for b in range(2):
            p = a * 2 + b
            for kh in range(5):
                for kw in range(5):
                    r, c = 2 * a + kh, 2 * b + kw
                    blk = (r // 4) * 32 + (c // 4) * 16 + (r % 4) * 4 + (c % 4)
                    S[p, blk, kh * 5 + kw] = 1.0
    return S


# ---------------------------------------------------------------------------
# Pallas kernels
# ---------------------------------------------------------------------------
def _conv1_pool_kernel(c_ref, w_ref, b_ref, o_ref):
    """conv1 as ONE GEMM against a block-structured weight (4 pool-parity column
    blocks of 32), 2x2 max-pool = max over the column blocks, bias + ReLU."""
    y = jnp.dot(c_ref[...], w_ref[...], preferred_element_type=jnp.float32)   # [m,128]
    m = jnp.maximum(jnp.maximum(y[:, 0:32], y[:, 32:64]),
                    jnp.maximum(y[:, 64:96], y[:, 96:128]))                    # pool
    o_ref[...] = jnp.maximum(m + b_ref[...], 0.0).astype(o_ref.dtype)          # bias+ReLU


def _conv2_fc_kernel(c_ref, w2_ref, b2_ref, w1_ref, b1_ref,
                     wf2_ref, bf2_ref, wf3_ref, bf3_ref, o_ref):
    """conv2-as-GEMM + 2x2 max-pool + bias + ReLU, then fc1+ReLU -> fc2+ReLU ->
    fc3+sigmoid.  Everything stays VMEM-resident; no HBM round trips."""
    nb = o_ref.shape[0]                       # batch
    ns = w1_ref.shape[0]                      # 49 spatial positions (7*7)

    y = jnp.dot(c_ref[...], w2_ref[...], preferred_element_type=jnp.float32)  # [ns*nb,256]
    m = jnp.maximum(jnp.maximum(y[:, 0:64], y[:, 64:128]),
                    jnp.maximum(y[:, 128:192], y[:, 192:256]))                 # pool
    m = jnp.maximum(m + b2_ref[...], 0.0)                                      # [ns*nb,64]

    # fc1 as a sum over the spatial positions; rows of m are (s, n) with n
    # fastest, so each position is a contiguous [nb, 64] slice (no relayout).
    h = jnp.zeros((nb, b1_ref.shape[1]), jnp.float32)
    for s in range(ns):
        xs = m[s * nb:(s + 1) * nb, :].astype(w1_ref.dtype)
        h = h + jnp.dot(xs, w1_ref[s], preferred_element_type=jnp.float32)
    h = jnp.maximum(h + b1_ref[...], 0.0)

    h = jnp.dot(h.astype(wf2_ref.dtype), wf2_ref[...],
                preferred_element_type=jnp.float32)
    h = jnp.maximum(h + bf2_ref[...], 0.0)

    z = jnp.dot(h.astype(wf3_ref.dtype), wf3_ref[...],
                preferred_element_type=jnp.float32)
    o_ref[...] = jax.nn.sigmoid(z[:, 0:1] + bf3_ref[...]).astype(o_ref.dtype)


# ---------------------------------------------------------------------------
# Wrappers
# ---------------------------------------------------------------------------
def conv1_pool(cols, w64, b, *, out_dtype, vmem_budget_bytes=24 << 20):
    """cols: [M, 64] patch matrix; w64: [64, 128] block-structured weight."""
    M, K = cols.shape
    Co4 = w64.shape[1]
    Co = Co4 // 4
    b2d = b.reshape(1, Co).astype(jnp.float32)
    cost = pl.CostEstimate(
        flops=int(2 * M * K * Co4 + 6 * M * Co),
        transcendentals=0,
        bytes_accessed=int(_nbytes((M, K), cols.dtype) + _nbytes((K, Co4), w64.dtype)
                           + _nbytes((1, Co), jnp.float32) + _nbytes((M, Co), out_dtype)),
    )
    out_shape = jax.ShapeDtypeStruct((M, Co), out_dtype)

    # VMEM guard (v7x has half the VMEM of v5e/v6e): double-buffered in/out
    # plus the f32 GEMM intermediate must fit comfortably in scoped VMEM.
    footprint = (2 * (_nbytes((M, K), cols.dtype) + _nbytes((M, Co), out_dtype))
                 + _nbytes((M, Co4), jnp.float32) + _nbytes((K, Co4), w64.dtype))
    if footprint <= vmem_budget_bytes:
        # Single block, no grid: at this size a grid only adds pipeline overhead.
        return pl.pallas_call(
            _conv1_pool_kernel, out_shape=out_shape,
            in_specs=[_VMEM] * 3, out_specs=_VMEM,
            compiler_params=pltpu.CompilerParams(vmem_limit_bytes=32 << 20),
            cost_estimate=cost,
        )(cols, w64, b2d)

    # Large-batch fallback: even, 8-aligned M-split ("parallel" for v7x megacore).
    n_blocks = max(2, -(-footprint // vmem_budget_bytes))
    tile_m = _round_up(pl.cdiv(M, n_blocks), 8)
    return pl.pallas_call(
        _conv1_pool_kernel, out_shape=out_shape,
        grid=(pl.cdiv(M, tile_m),),
        in_specs=[pl.BlockSpec((tile_m, K), lambda i: (i, 0)),
                  pl.BlockSpec((K, Co4), lambda i: (0, 0)),
                  pl.BlockSpec((1, Co), lambda i: (0, 0))],
        out_specs=pl.BlockSpec((tile_m, Co), lambda i: (i, 0)),
        compiler_params=pltpu.CompilerParams(
            dimension_semantics=("parallel",), vmem_limit_bytes=32 << 20),
        cost_estimate=cost,
    )(cols, w64, b2d)


def conv2_fc_head(cols, p, *, batch):
    """cols: [49*batch, 2048] conv2 patch matrix (rows ordered (spatial, n))."""
    M, K = cols.shape
    w2, b2 = p["conv2_wbig"], p["conv2_b64"]
    w1, b1 = p["fc1_w"], p["fc1_b"]
    wf2, bf2 = p["fc2_w"], p["fc2_b"]
    wf3, bf3 = p["fc3_w"], p["fc3_b"]
    ns, hin, h1 = w1.shape
    cost = pl.CostEstimate(
        flops=int(2 * M * K * w2.shape[1] + 10 * M * 64
                  + 2 * batch * (ns * hin * h1 + h1 * wf2.shape[1]
                                 + wf2.shape[1] * wf3.shape[1])),
        transcendentals=int(batch),
        bytes_accessed=int(_nbytes(cols.shape, cols.dtype) + _nbytes(w2.shape, w2.dtype)
                           + _nbytes(w1.shape, w1.dtype) + _nbytes(wf2.shape, wf2.dtype)
                           + _nbytes(wf3.shape, wf3.dtype) + _nbytes((batch, 1), jnp.float32)),
    )
    # TODO(synk): for much larger batches this single-block call would need an
    # M/batch grid with an fc accumulation; unnecessary at these sizes.
    return pl.pallas_call(
        _conv2_fc_kernel,
        out_shape=jax.ShapeDtypeStruct((batch, 1), jnp.float32),
        in_specs=[_VMEM] * 9, out_specs=_VMEM,
        compiler_params=pltpu.CompilerParams(vmem_limit_bytes=32 << 20),
        cost_estimate=cost,
    )(cols, w2, b2, w1, b1, wf2, bf2, wf3, bf3)


# ---------------------------------------------------------------------------
# XLA glue: space-to-depth + 2x2-block patch gather (cheap, layout-only)
# ---------------------------------------------------------------------------
def _space_to_depth4(x):
    """[N, H, W, C] -> [N, H//4, W//4, 16*C]; channel index = ((h%4)*4+(w%4))*C+c."""
    N, H, W, C = x.shape
    x = x.reshape(N, H // 4, 4, W // 4, 4, C)
    x = x.transpose(0, 1, 3, 2, 4, 5)
    return x.reshape(N, H // 4, W // 4, 16 * C)


def _pooled_conv_patches(x, ph, pw):
    """Concatenate the 2x2 neighbouring s2d blocks per pooled output position."""
    return jnp.concatenate(
        [x[:, dh:dh + ph, dw:dw + pw, :] for dh in (0, 1) for dw in (0, 1)],
        axis=-1)


# ---------------------------------------------------------------------------
# Parameters (deterministic synthetic init, PyTorch-default-style uniform)
# ---------------------------------------------------------------------------
def init_params(key):
    ks = jax.random.split(key, 10)

    def u(k, shape, fan_in):
        bound = 1.0 / math.sqrt(fan_in)
        return jax.random.uniform(k, shape, jnp.float32, -bound, bound)

    return {
        # conv weights in HWIO; real PyTorch weights (OIHW) must be transposed
        # to HWIO before prepare_params (the synthetic init hides this).
        "conv1_w": u(ks[0], (5, 5, 1, 32), 25),
        "conv1_b": u(ks[1], (32,), 25),
        "conv2_w": u(ks[2], (5, 5, 32, 48), 800),
        "conv2_b": u(ks[3], (48,), 800),
        # fc weights [in, out]; fc1 rows in PyTorch NCHW-flatten order c*49+h*7+w
        "fc1_w": u(ks[4], (48 * 7 * 7, 100), 48 * 7 * 7),
        "fc1_b": u(ks[5], (100,), 48 * 7 * 7),
        "fc2_w": u(ks[6], (100, 100), 100),
        "fc2_b": u(ks[7], (100,), 100),
        "fc3_w": u(ks[8], (100, 1), 100),
        "fc3_b": u(ks[9], (1,), 100),
    }


def prepare_params(params, compute_dtype=jnp.bfloat16):
    """One-time layout/dtype prep (outside the hot path)."""
    S = jnp.asarray(_parity_tap_selector())                     # [4, 64, 25]

    # conv1: block-structured [64, 4*32] weight (4 pool-parity column blocks).
    w1c = params["conv1_w"].reshape(25, 32)                     # (tap, co)
    conv1_w64 = jnp.einsum("pbt,to->bpo", S, w1c).reshape(64, 128)

    # conv2: block-structured [2048, 4*64] weight; per-parity co padded 48->64
    # so the pool-max column slices are 64-lane aligned.
    w2c = params["conv2_w"].reshape(25, 32, 48)                 # (tap, ci, co)
    w2big = jnp.einsum("pbt,tio->bipo", S, w2c)                 # [64, 32, 4, 48]
    w2big = jnp.pad(w2big, ((0, 0), (0, 0), (0, 0), (0, 16)))   # [64, 32, 4, 64]
    w2big = w2big.reshape(2048, 256)

    # fc1: [2352,100] (NCHW-ordered rows) -> [49, 64, 128] = (spatial, ci_pad, out_pad)
    fc1 = params["fc1_w"].reshape(48, 49, 100).transpose(1, 0, 2)
    fc1 = jnp.pad(fc1, ((0, 0), (0, 16), (0, 28)))

    return {
        "conv1_w64": conv1_w64.astype(compute_dtype),
        "conv1_b": params["conv1_b"].astype(jnp.float32),
        "conv2_wbig": w2big.astype(compute_dtype),
        "conv2_b64": jnp.pad(params["conv2_b"], (0, 16)).reshape(1, 64).astype(jnp.float32),
        "fc1_w": fc1.astype(compute_dtype),
        "fc1_b": jnp.pad(params["fc1_b"], (0, 28)).reshape(1, 128).astype(jnp.float32),
        "fc2_w": jnp.pad(params["fc2_w"], ((0, 28), (0, 28))).astype(compute_dtype),
        "fc2_b": jnp.pad(params["fc2_b"], (0, 28)).reshape(1, 128).astype(jnp.float32),
        "fc3_w": jnp.pad(params["fc3_w"], ((0, 28), (0, 127))).astype(compute_dtype),
        "fc3_b": params["fc3_b"].reshape(1, 1).astype(jnp.float32),
    }


# ---------------------------------------------------------------------------
# Forward pass (domainClassifierNet semantics)
# ---------------------------------------------------------------------------
def domain_classifier_forward(p, x_nchw, *, compute_dtype=jnp.bfloat16):
    N, C, H, W = x_nchw.shape
    assert C == 1, "featureExtractNet expects a single input channel"
    assert H % 4 == 0 and W % 4 == 0
    h1c, w1c = (H - 5) // 2 + 1, (W - 5) // 2 + 1          # conv1 output (62, 62)
    assert h1c % 2 == 0 and w1c % 2 == 0, "pool parity split needs even conv1 output"
    P1h, P1w = h1c // 2, w1c // 2                          # pooled conv1 (31, 31)

    # --- featureExtractNet: conv1(1->32, k5, s2) + ReLU + maxpool(2,2) ---
    x = x_nchw.reshape(N, H, W, 1).astype(compute_dtype)
    x4 = _space_to_depth4(x)                               # [N, 32, 32, 16]
    c1 = _pooled_conv_patches(x4, P1h, P1w)                # [N, 31, 31, 64]
    c1 = c1.reshape(N * P1h * P1w, 64)
    y1 = conv1_pool(c1, p["conv1_w64"], p["conv1_b"], out_dtype=compute_dtype)
    x1 = y1.reshape(N, P1h, P1w, 32)                       # pooled conv1, NHWC

    # --- conv2(32->48, k5, s2) + ReLU + maxpool(2,2) + domainPredictNet, fused ---
    h2c, w2c = (P1h - 5) // 2 + 1, (P1w - 5) // 2 + 1      # conv2 output (14, 14)
    assert h2c % 2 == 0 and w2c % 2 == 0
    P2h, P2w = h2c // 2, w2c // 2                          # pooled conv2 (7, 7)
    assert P2h == 7 and P2w == 7, "domainPredictNet.fc1 expects 48*7*7 features"

    pad_h, pad_w = _round_up(P1h, 4) - P1h, _round_up(P1w, 4) - P1w
    x1p = jnp.pad(x1, ((0, 0), (0, pad_h), (0, pad_w), (0, 0)))
    x42 = _space_to_depth4(x1p)                            # [N, 8, 8, 512]
    c2 = _pooled_conv_patches(x42, P2h, P2w)               # [N, 7, 7, 2048]
    c2 = c2.transpose(1, 2, 0, 3).reshape(P2h * P2w * N, 2048)   # rows = (s, n)

    out = conv2_fc_head(c2, p, batch=N)                    # GRL forward = identity
    # TODO(synk): original domainClassifierNet.forward has no return statement
    # (returns None); we return the sigmoid domain prediction instead.
    return out


if __name__ == "__main__":
    key = jax.random.PRNGKey(0)
    pkey, xkey = jax.random.split(key)
    params = prepare_params(init_params(pkey))

    # fc1 expects 48*7*7 features => input must be 1x128x128 (NCHW); batch = 2.
    x = jax.random.normal(xkey, (2, 1, 128, 128), jnp.float32)

    out = jax.jit(domain_classifier_forward)(params, x)
    out = jax.block_until_ready(out)

    assert out.shape == (2, 1), out.shape
    assert bool(jnp.all(jnp.isfinite(out)))
    assert bool(jnp.all((out >= 0.0) & (out <= 1.0)))
    print("KERNEL_OK")
</pallas_src>

<mosaic_0001>
module attributes {stable_mosaic.version = 11 : i64} {
  func.func @_conv1_pool_kernel(%arg0: memref<1922x64xbf16, #tpu.memory_space<vmem>>, %arg1: memref<64x128xbf16, #tpu.memory_space<vmem>>, %arg2: memref<1x32xf32, #tpu.memory_space<vmem>>, %arg3: memref<1922x32xbf16, #tpu.memory_space<vmem>>) attributes {dimension_semantics = [], scalar_prefetch = 0 : i64, scratch_operands = 0 : i64, tpu.core_type = #tpu.core_type<tc>} {
    %c0 = arith.constant 0 : index
    %c0_0 = arith.constant 0 : index
    %0 = vector.load %arg0[%c0, %c0_0] : memref<1922x64xbf16, #tpu.memory_space<vmem>>, vector<1922x64xbf16>
    %c0_1 = arith.constant 0 : index
    %c0_2 = arith.constant 0 : index
    %1 = vector.load %arg1[%c0_1, %c0_2] : memref<64x128xbf16, #tpu.memory_space<vmem>>, vector<64x128xbf16>
    %cst = arith.constant dense<0.000000e+00> : vector<1922x128xf32>
    %2 = tpu.matmul %0, %1, %cst {dimension_numbers = #tpu.dot_dimension_numbers<[1], [0], [0], [1], [0, 0, 1, 1], [], []>} : vector<1922x64xbf16>, vector<64x128xbf16>, vector<1922x128xf32> -> vector<1922x128xf32>
    %3 = vector.extract_strided_slice %2 {offsets = [0, 0], sizes = [1922, 32], strides = [1, 1]} : vector<1922x128xf32> to vector<1922x32xf32>
    %4 = vector.extract_strided_slice %2 {offsets = [0, 32], sizes = [1922, 32], strides = [1, 1]} : vector<1922x128xf32> to vector<1922x32xf32>
    %5 = arith.maximumf %3, %4 : vector<1922x32xf32>
    %6 = vector.extract_strided_slice %2 {offsets = [0, 64], sizes = [1922, 32], strides = [1, 1]} : vector<1922x128xf32> to vector<1922x32xf32>
    %7 = vector.extract_strided_slice %2 {offsets = [0, 96], sizes = [1922, 32], strides = [1, 1]} : vector<1922x128xf32> to vector<1922x32xf32>
    %8 = arith.maximumf %6, %7 : vector<1922x32xf32>
    %9 = arith.maximumf %5, %8 : vector<1922x32xf32>
    %c0_3 = arith.constant 0 : index
    %c0_4 = arith.constant 0 : index
    %10 = vector.load %arg2[%c0_3, %c0_4] : memref<1x32xf32, #tpu.memory_space<vmem>>, vector<1x32xf32>
    %11 = vector.broadcast %10 : vector<1x32xf32> to vector<1922x32xf32>
    %12 = arith.addf %9, %11 : vector<1922x32xf32>
    %cst_5 = arith.constant 0.000000e+00 : f32
    %13 = vector.broadcast %cst_5 : f32 to vector<1922x32xf32>
    %14 = arith.maximumf %12, %13 : vector<1922x32xf32>
    %15 = arith.truncf %14 : vector<1922x32xf32> to vector<1922x32xbf16>
    %c0_6 = arith.constant 0 : index
    %c0_7 = arith.constant 0 : index
    %16 = vector.load %arg3[%c0_6, %c0_7] : memref<1922x32xbf16, #tpu.memory_space<vmem>>, vector<1922x32xbf16>
    tpu.vector_store %arg3[%c0_6, %c0_7], %15 {strides = array<i32>} : memref<1922x32xbf16, #tpu.memory_space<vmem>>, vector<1922x32xbf16>,
    return
  }
}

module attributes {stable_mosaic.version = 11 : i64} {
  func.func @_conv2_fc_kernel(%arg0: memref<98x2048xbf16, #tpu.memory_space<vmem>>, %arg1: memref<2048x256xbf16, #tpu.memory_space<vmem>>, %arg2: memref<1x64xf32, #tpu.memory_space<vmem>>, %arg3: memref<49x64x128xbf16, #tpu.memory_space<vmem>>, %arg4: memref<1x128xf32, #tpu.memory_space<vmem>>, %arg5: memref<128x128xbf16, #tpu.memory_space<vmem>>, %arg6: memref<1x128xf32, #tpu.memory_space<vmem>>, %arg7: memref<128x128xbf16, #tpu.memory_space<vmem>>, %arg8: memref<1x1xf32, #tpu.memory_space<vmem>>, %arg9: memref<2x1xf32, #tpu.memory_space<vmem>>) attributes {dimension_semantics = [], scalar_prefetch = 0 : i64, scratch_operands = 0 : i64, tpu.core_type = #tpu.core_type<tc>} {
    %c0 = arith.constant 0 : index
    %c0_0 = arith.constant 0 : index
    %0 = vector.load %arg0[%c0, %c0_0] : memref<98x2048xbf16, #tpu.memory_space<vmem>>, vector<98x2048xbf16>
    %c0_1 = arith.constant 0 : index
    %c0_2 = arith.constant 0 : index
    %1 = vector.load %arg1[%c0_1, %c0_2] : memref<2048x256xbf16, #tpu.memory_space<vmem>>, vector<2048x256xbf16>
    %cst = arith.constant dense<0.000000e+00> : vector<98x256xf32>
    %2 = tpu.matmul %0, %1, %cst {dimension_numbers = #tpu.dot_dimension_numbers<[1], [0], [0], [1], [0, 0, 1, 1], [], []>} : vector<98x2048xbf16>, vector<2048x256xbf16>, vector<98x256xf32> -> vector<98x256xf32>
    %3 = vector.extract_strided_slice %2 {offsets = [0, 0], sizes = [98, 64], strides = [1, 1]} : vector<98x256xf32> to vector<98x64xf32>
    %4 = vector.extract_strided_slice %2 {offsets = [0, 64], sizes = [98, 64], strides = [1, 1]} : vector<98x256xf32> to vector<98x64xf32>
    %5 = arith.maximumf %3, %4 : vector<98x64xf32>
    %6 = vector.extract_strided_slice %2 {offsets = [0, 128], sizes = [98, 64], strides = [1, 1]} : vector<98x256xf32> to vector<98x64xf32>
    %7 = vector.extract_strided_slice %2 {offsets = [0, 192], sizes = [98, 64], strides = [1, 1]} : vector<98x256xf32> to vector<98x64xf32>
    %8 = arith.maximumf %6, %7 : vector<98x64xf32>
    %9 = arith.maximumf %5, %8 : vector<98x64xf32>
    %c0_3 = arith.constant 0 : index
    %c0_4 = arith.constant 0 : index
    %10 = vector.load %arg2[%c0_3, %c0_4] : memref<1x64xf32, #tpu.memory_space<vmem>>, vector<1x64xf32>
    %11 = vector.broadcast %10 : vector<1x64xf32> to vector<98x64xf32>
    %12 = arith.addf %9, %11 : vector<98x64xf32>
    %cst_5 = arith.constant 0.000000e+00 : f32
    %13 = vector.broadcast %cst_5 : f32 to vector<98x64xf32>
    %14 = arith.maximumf %12, %13 : vector<98x64xf32>
    %cst_6 = arith.constant 0.000000e+00 : f32
    %15 = vector.broadcast %cst_6 : f32 to vector<2x128xf32>
    %16 = vector.extract_strided_slice %14 {offsets = [0, 0], sizes = [2, 64], strides = [1, 1]} : vector<98x64xf32> to vector<2x64xf32>
    %17 = arith.truncf %16 : vector<2x64xf32> to vector<2x64xbf16>
    %c0_7 = arith.constant 0 : index
    %c0_8 = arith.constant 0 : index
    %c0_9 = arith.constant 0 : index
    %18 = vector.load %arg3[%c0_7, %c0_8, %c0_9] : memref<49x64x128xbf16, #tpu.memory_space<vmem>>, vector<1x64x128xbf16>
    %19 = vector.shape_cast %18 : vector<1x64x128xbf16> to vector<64x128xbf16>
    %cst_10 = arith.constant dense<0.000000e+00> : vector<2x128xf32>
    %20 = tpu.matmul %17, %19, %cst_10 {dimension_numbers = #tpu.dot_dimension_numbers<[1], [0], [0], [1], [0, 0, 1, 1], [], []>} : vector<2x64xbf16>, vector<64x128xbf16>, vector<2x128xf32> -> vector<2x128xf32>
    %21 = arith.addf %15, %20 : vector<2x128xf32>
    %22 = vector.extract_strided_slice %14 {offsets = [2, 0], sizes = [2, 64], strides = [1, 1]} : vector<98x64xf32> to vector<2x64xf32>
    %23 = arith.truncf %22 : vector<2x64xf32> to vector<2x64xbf16>
    %c1 = arith.constant 1 : index
    %c0_11 = arith.constant 0 : index
    %c0_12 = arith.constant 0 : index
    %24 = vector.load %arg3[%c1, %c0_11, %c0_12] : memref<49x64x128xbf16, #tpu.memory_space<vmem>>, vector<1x64x128xbf16>
    %25 = vector.shape_cast %24 : vector<1x64x128xbf16> to vector<64x128xbf16>
    %cst_13 = arith.constant dense<0.000000e+00> : vector<2x128xf32>
    %26 = tpu.matmul %23, %25, %cst_13 {dimension_numbers = #tpu.dot_dimension_numbers<[1], [0], [0], [1], [0, 0, 1, 1], [], []>} : vector<2x64xbf16>, vector<64x128xbf16>, vector<2x128xf32> -> vector<2x128xf32>
    %27 = arith.addf %21, %26 : vector<2x128xf32>
    %28 = vector.extract_strided_slice %14 {offsets = [4, 0], sizes = [2, 64], strides = [1, 1]} : vector<98x64xf32> to vector<2x64xf32>
    %29 = arith.truncf %28 : vector<2x64xf32> to vector<2x64xbf16>
    %c2 = arith.constant 2 : index
    %c0_14 = arith.constant 0 : index
    %c0_15 = arith.constant 0 : index
    %30 = vector.load %arg3[%c2, %c0_14, %c0_15] : memref<49x64x128xbf16, #tpu.memory_space<vmem>>, vector<1x64x128xbf16>
    %31 = vector.shape_cast %30 : vector<1x64x128xbf16> to vector<64x128xbf16>
    %cst_16 = arith.constant dense<0.000000e+00> : vector<2x128xf32>
    %32 = tpu.matmul %29, %31, %cst_16 {dimension_numbers = #tpu.dot_dimension_numbers<[1], [0], [0], [1], [0, 0, 1, 1], [], []>} : vector<2x64xbf16>, vector<64x128xbf16>, vector<2x128xf32> -> vector<2x128xf32>
    %33 = arith.addf %27, %32 : vector<2x128xf32>
    %34 = vector.extract_strided_slice %14 {offsets = [6, 0], sizes = [2, 64], strides = [1, 1]} : vector<98x64xf32> to vector<2x64xf32>
    %35 = arith.truncf %34 : vector<2x64xf32> to vector<2x64xbf16>
    %c3 = arith.constant 3 : index
    %c0_17 = arith.constant 0 : index
    %c0_18 = arith.constant 0 : index
    %36 = vector.load %arg3[%c3, %c0_17, %c0_18] : memref<49x64x128xbf16, #tpu.memory_space<vmem>>, vector<1x64x128xbf16>
    %37 = vector.shape_cast %36 : vector<1x64x128xbf16> to vector<64x128xbf16>
    %cst_19 = arith.constant dense<0.000000e+00> : vector<2x128xf32>
    %38 = tpu.matmul %35, %37, %cst_19 {dimension_numbers = #tpu.dot_dimension_numbers<[1], [0], [0], [1], [0, 0, 1, 1], [], []>} : vector<2x64xbf16>, vector<64x128xbf16>, vector<2x128xf32> -> vector<2x128xf32>
    %39 = arith.addf %33, %38 : vector<2x128xf32>
    %40 = vector.extract_strided_slice %14 {offsets = [8, 0], sizes = [2, 64], strides = [1, 1]} : vector<98x64xf32> to vector<2x64xf32>
    %41 = arith.truncf %40 : vector<2x64xf32> to vector<2x64xbf16>
    %c4 = arith.constant 4 : index
    %c0_20 = arith.constant 0 : index
    %c0_21 = arith.constant 0 : index
    %42 = vector.load %arg3[%c4, %c0_20, %c0_21] : memref<49x64x128xbf16, #tpu.memory_space<vmem>>, vector<1x64x128xbf16>
    %43 = vector.shape_cast %42 : vector<1x64x128xbf16> to vector<64x128xbf16>
    %cst_22 = arith.constant dense<0.000000e+00> : vector<2x128xf32>
    %44 = tpu.matmul %41, %43, %cst_22 {dimension_numbers = #tpu.dot_dimension_numbers<[1], [0], [0], [1], [0, 0, 1, 1], [], []>} : vector<2x64xbf16>, vector<64x128xbf16>, vector<2x128xf32> -> vector<2x128xf32>
    %45 = arith.addf %39, %44 : vector<2x128xf32>
    %46 = vector.extract_strided_slice %14 {offsets = [10, 0], sizes = [2, 64], strides = [1, 1]} : vector<98x64xf32> to vector<2x64xf32>
    %47 = arith.truncf %46 : vector<2x64xf32> to vector<2x64xbf16>
    %c5 = arith.constant 5 : index
    %c0_23 = arith.constant 0 : index
    %c0_24 = arith.constant 0 : index
    %48 = vector.load %arg3[%c5, %c0_23, %c0_24] : memref<49x64x128xbf16, #tpu.memory_space<vmem>>, vector<1x64x128xbf16>
    %49 = vector.shape_cast %48 : vector<1x64x128xbf16> to vector<64x128xbf16>
    %cst_25 = arith.constant dense<0.000000e+00> : vector<2x128xf32>
    %50 = tpu.matmul %47, %49, %cst_25 {dimension_numbers = #tpu.dot_dimension_numbers<[1], [0], [0], [1], [0, 0, 1, 1], [], []>} : vector<2x64xbf16>, vector<64x128xbf16>, vector<2x128xf32> -> vector<2x128xf32>
    %51 = arith.addf %45, %50 : vector<2x128xf32>
    %52 = vector.extract_strided_slice %14 {offsets = [12, 0], sizes = [2, 64], strides = [1, 1]} : vector<98x64xf32> to vector<2x64xf32>
    %53 = arith.truncf %52 : vector<2x64xf32> to vector<2x64xbf16>
    %c6 = arith.constant 6 : index
    %c0_26 = arith.constant 0 : index
    %c0_27 = arith.constant 0 : index
    %54 = vector.load %arg3[%c6, %c0_26, %c0_27] : memref<49x64x128xbf16, #tpu.memory_space<vmem>>, vector<1x64x128xbf16>
    %55 = vector.shape_cast %54 : vector<1x64x128xbf16> to vector<64x128xbf16>
    %cst_28 = arith.constant dense<0.000000e+00> : vector<2x128xf32>
    %56 = tpu.matmul %53, %55, %cst_28 {dimension_numbers = #tpu.dot_dimension_numbers<[1], [0], [0], [1], [0, 0, 1, 1], [], []>} : vector<2x64xbf16>, vector<64x128xbf16>, vector<2x128xf32> -> vector<2x128xf32>
    %57 = arith.addf %51, %56 : vector<2x128xf32>
    %58 = vector.extract_strided_slice %14 {offsets = [14, 0], sizes = [2, 64], strides = [1, 1]} : vector<98x64xf32> to vector<2x64xf32>
    %59 = arith.truncf %58 : vector<2x64xf32> to vector<2x64xbf16>
    %c7 = arith.constant 7 : index
    %c0_29 = arith.constant 0 : index
    %c0_30 = arith.constant 0 : index
    %60 = vector.load %arg3[%c7, %c0_29, %c0_30] : memref<49x64x128xbf16, #tpu.memory_space<vmem>>, vector<1x64x128xbf16>
    %61 = vector.shape_cast %60 : vector<1x64x128xbf16> to vector<64x128xbf16>
    %cst_31 = arith.constant dense<0.000000e+00> : vector<2x128xf32>
    %62 = tpu.matmul %59, %61, %cst_31 {dimension_numbers = #tpu.dot_dimension_numbers<[1], [0], [0], [1], [0, 0, 1, 1], [], []>} : vector<2x64xbf16>, vector<64x128xbf16>, vector<2x128xf32> -> vector<2x128xf32>
    %63 = arith.addf %57, %62 : vector<2x128xf32>
    %64 = vector.extract_strided_slice %14 {offsets = [16, 0], sizes = [2, 64], strides = [1, 1]} : vector<98x64xf32> to vector<2x64xf32>
    %65 = arith.truncf %64 : vector<2x64xf32> to vector<2x64xbf16>
    %c8 = arith.constant 8 : index
    %c0_32 = arith.constant 0 : index
    %c0_33 = arith.constant 0 : index
    %66 = vector.load %arg3[%c8, %c0_32, %c0_33] : memref<49x64x128xbf16, #tpu.memory_space<vmem>>, vector<1x64x128xbf16>
    %67 = vector.shape_cast %66 : vector<1x64x128xbf16> to vector<64x128xbf16>
    %cst_34 = arith.constant dense<0.000000e+00> : vector<2x128xf32>
    %68 = tpu.matmul %65, %67, %cst_34 {dimension_numbers = #tpu.dot_dimension_numbers<[1], [0], [0], [1], [0, 0, 1, 1], [], []>} : vector<2x64xbf16>, vector<64x128xbf16>, vector<2x128xf32> -> vector<2x128xf32>
    %69 = arith.addf %63, %68 : vector<2x128xf32>
    %70 = vector.extract_strided_slice %14 {offsets = [18, 0], sizes = [2, 64], strides = [1, 1]} : vector<98x64xf32> to vector<2x64xf32>
    %71 = arith.truncf %70 : vector<2x64xf32> to vector<2x64xbf16>
    %c9 = arith.constant 9 : index
    %c0_35 = arith.constant 0 : index
    %c0_36 = arith.constant 0 : index
    %72 = vector.load %arg3[%c9, %c0_35, %c0_36] : memref<49x64x128xbf16, #tpu.memory_space<vmem>>, vector<1x64x128xbf16>
    %73 = vector.shape_cast %72 : vector<1x64x128xbf16> to vector<64x128xbf16>
    %cst_37 = arith.constant dense<0.000000e+00> : vector<2x128xf32>
    %74 = tpu.matmul %71, %73, %cst_37 {dimension_numbers = #tpu.dot_dimension_numbers<[1], [0], [0], [1], [0, 0, 1, 1], [], []>} : vector<2x64xbf16>, vector<64x128xbf16>, vector<2x128xf32> -> vector<2x128xf32>
    %75 = arith.addf %69, %74 : vector<2x128xf32>
    %76 = vector.extract_strided_slice %14 {offsets = [20, 0], sizes = [2, 64], strides = [1, 1]} : vector<98x64xf32> to vector<2x64xf32>
    %77 = arith.truncf %76 : vector<2x64xf32> to vector<2x64xbf16>
    %c10 = arith.constant 10 : index
    %c0_38 = arith.constant 0 : index
    %c0_39 = arith.constant 0 : index
    %78 = vector.load %arg3[%c10, %c0_38, %c0_39] : memref<49x64x128xbf16, #tpu.memory_space<vmem>>, vector<1x64x128xbf16>
    %79 = vector.shape_cast %78 : vector<1x64x128xbf16> to vector<64x128xbf16>
    %cst_40 = arith.constant dense<0.000000e+00> : vector<2x128xf32>
    %80 = tpu.matmul %77, %79, %cst_40 {dimension_numbers = #tpu.dot_dimension_numbers<[1], [0], [0], [1], [0, 0, 1, 1], [], []>} : vector<2x64xbf16>, vector<64x128xbf16>, vector<2x128xf32> -> vector<2x128xf32>
    %81 = arith.addf %75, %80 : vector<2x128xf32>
    %82 = vector.extract_strided_slice %14 {offsets = [22, 0], sizes = [2, 64], strides = [1, 1]} : vector<98x64xf32> to vector<2x64xf32>
    %83 = arith.truncf %82 : vector<2x64xf32> to vector<2x64xbf16>
    %c11 = arith.constant 11 : index
    %c0_41 = arith.constant 0 : index
    %c0_42 = arith.constant 0 : index
    %84 = vector.load %arg3[%c11, %c0_41, %c0_42] : memref<49x64x128xbf16, #tpu.memory_space<vmem>>, vector<1x64x128xbf16>
    %85 = vector.shape_cast %84 : vector<1x64x128xbf16> to vector<64x128xbf16>
    %cst_43 = arith.constant dense<0.000000e+00> : vector<2x128xf32>
    %86 = tpu.matmul %83, %85, %cst_43 {dimension_numbers = #tpu.dot_dimension_numbers<[1], [0], [0], [1], [0, 0, 1, 1], [], []>} : vector<2x64xbf16>, vector<64x128xbf16>, vector<2x128xf32> -> vector<2x128xf32>
    %87 = arith.addf %81, %86 : vector<2x128xf32>
    %88 = vector.extract_strided_slice %14 {offsets = [24, 0], sizes = [2, 64], strides = [1, 1]} : vector<98x64xf32> to vector<2x64xf32>
    %89 = arith.truncf %88 : vector<2x64xf32> to vector<2x64xbf16>
    %c12 = arith.constant 12 : index
    %c0_44 = arith.constant 0 : index
    %c0_45 = arith.constant 0 : index
    %90 = vector.load %arg3[%c12, %c0_44, %c0_45] : memref<49x64x128xbf16, #tpu.memory_space<vmem>>, vector<1x64x128xbf16>
    %91 = vector.shape_cast %90 : vector<1x64x128xbf16> to vector<64x128xbf16>
    %cst_46 = arith.constant dense<0.000000e+00> : vector<2x128xf32>
    %92 = tpu.matmul %89, %91, %cst_46 {dimension_numbers = #tpu.dot_dimension_numbers<[1], [0], [0], [1], [0, 0, 1, 1], [], []>} : vector<2x64xbf16>, vector<64x128xbf16>, vector<2x128xf32> -> vector<2x128xf32>
    %93 = arith.addf %87, %92 : vector<2x128xf32>
    %94 = vector.extract_strided_slice %14 {offsets = [26, 0], sizes = [2, 64], strides = [1, 1]} : vector<98x64xf32> to vector<2x64xf32>
    %95 = arith.truncf %94 : vector<2x64xf32> to vector<2x64xbf16>
    %c13 = arith.constant 13 : index
    %c0_47 = arith.constant 0 : index
    %c0_48 = arith.constant 0 : index
    %96 = vector.load %arg3[%c13, %c0_47, %c0_48] : memref<49x64x128xbf16, #tpu.memory_space<vmem>>, vector<1x64x128xbf16>
    %97 = vector.shape_cast %96 : vector<1x64x128xbf16> to vector<64x128xbf16>
    %cst_49 = arith.constant dense<0.000000e+00> : vector<2x128xf32>
    %98 = tpu.matmul %95, %97, %cst_49 {dimension_numbers = #tpu.dot_dimension_numbers<[1], [0], [0], [1], [0, 0, 1, 1], [], []>} : vector<2x64xbf16>, vector<64x128xbf16>, vector<2x128xf32> -> vector<2x128xf32>
    %99 = arith.addf %93, %98 : vector<2x128xf32>
    %100 = vector.extract_strided_slice %14 {offsets = [28, 0], sizes = [2, 64], strides = [1, 1]} : vector<98x64xf32> to vector<2x64xf32>
    %101 = arith.truncf %100 : vector<2x64xf32> to vector<2x64xbf16>
    %c14 = arith.constant 14 : index
    %c0_50 = arith.constant 0 : index
    %c0_51 = arith.constant 0 : index
    %102 = vector.load %arg3[%c14, %c0_50, %c0_51] : memref<49x64x128xbf16, #tpu.memory_space<vmem>>, vector<1x64x128xbf16>
    %103 = vector.shape_cast %102 : vector<1x64x128xbf16> to vector<64x128xbf16>
    %cst_52 = arith.constant dense<0.000000e+00> : vector<2x128xf32>
    %104 = tpu.matmul %101, %103, %cst_52 {dimension_numbers = #tpu.dot_dimension_numbers<[1], [0], [0], [1], [0, 0, 1, 1], [], []>} : vector<2x64xbf16>, vector<64x128xbf16>, vector<2x128xf32> -> vector<2x128xf32>
    %105 = arith.addf %99, %104 : vector<2x128xf32>
    %106 = vector.extract_strided_slice %14 {offsets = [30, 0], sizes = [2, 64], strides = [1, 1]} : vector<98x64xf32> to vector<2x64xf32>
    %107 = arith.truncf %106 : vector<2x64xf32> to vector<2x64xbf16>
    %c15 = arith.constant 15 : index
    %c0_53 = arith.constant 0 : index
    %c0_54 = arith.constant 0 : index
    %108 = vector.load %arg3[%c15, %c0_53, %c0_54] : memref<49x64x128xbf16, #tpu.memory_space<vmem>>, vector<1x64x128xbf16>
    %109 = vector.shape_cast %108 : vector<1x64x128xbf16> to vector<64x128xbf16>
    %cst_55 = arith.constant dense<0.000000e+00> : vector<2x128xf32>
    %110 = tpu.matmul %107, %109, %cst_55 {dimension_numbers = #tpu.dot_dimension_numbers<[1], [0], [0], [1], [0, 0, 1, 1], [], []>} : vector<2x64xbf16>, vector<64x128xbf16>, vector<2x128xf32> -> vector<2x128xf32>
    %111 = arith.addf %105, %110 : vector<2x128xf32>
    %112 = vector.extract_strided_slice %14 {offsets = [32, 0], sizes = [2, 64], strides = [1, 1]} : vector<98x64xf32> to vector<2x64xf32>
    %113 = arith.truncf %112 : vector<2x64xf32> to vector<2x64xbf16>
    %c16 = arith.constant 16 : index
    %c0_56 = arith.constant 0 : index
    %c0_57 = arith.constant 0 : index
    %114 = vector.load %arg3[%c16, %c0_56, %c0_57] : memref<49x64x128xbf16, #tpu.memory_space<vmem>>, vector<1x64x128xbf16>
    %115 = vector.shape_cast %114 : vector<1x64x128xbf16> to vector<64x128xbf16>
    %cst_58 = arith.constant dense<0.000000e+00> : vector<2x128xf32>
    %116 = tpu.matmul %113, %115, %cst_58 {dimension_numbers = #tpu.dot_dimension_numbers<[1], [0], [0], [1], [0, 0, 1, 1], [], []>} : vector<2x64xbf16>, vector<64x128xbf16>, vector<2x128xf32> -> vector<2x128xf32>
    %117 = arith.addf %111, %116 : vector<2x128xf32>
    %118 = vector.extract_strided_slice %14 {offsets = [34, 0], sizes = [2, 64], strides = [1, 1]} : vector<98x64xf32> to vector<2x64xf32>
    %119 = arith.truncf %118 : vector<2x64xf32> to vector<2x64xbf16>
    %c17 = arith.constant 17 : index
    %c0_59 = arith.constant 0 : index
    %c0_60 = arith.constant 0 : index
    %120 = vector.load %arg3[%c17, %c0_59, %c0_60] : memref<49x64x128xbf16, #tpu.memory_space<vmem>>, vector<1x64x128xbf16>
    %121 = vector.shape_cast %120 : vector<1x64x128xbf16> to vector<64x128xbf16>
    %cst_61 = arith.constant dense<0.000000e+00> : vector<2x128xf32>
    %122 = tpu.matmul %119, %121, %cst_61 {dimension_numbers = #tpu.dot_dimension_numbers<[1], [0], [0], [1], [0, 0, 1, 1], [], []>} : vector<2x64xbf16>, vector<64x128xbf16>, vector<2x128xf32> -> vector<2x128xf32>
    %123 = arith.addf %117, %122 : vector<2x128xf32>
    %124 = vector.extract_strided_slice %14 {offsets = [36, 0], sizes = [2, 64], strides = [1, 1]} : vector<98x64xf32> to vector<2x64xf32>
    %125 = arith.truncf %124 : vector<2x64xf32> to vector<2x64xbf16>
    %c18 = arith.constant 18 : index
    %c0_62 = arith.constant 0 : index
    %c0_63 = arith.constant 0 : index
    %126 = vector.load %arg3[%c18, %c0_62, %c0_63] : memref<49x64x128xbf16, #tpu.memory_space<vmem>>, vector<1x64x128xbf16>
    %127 = vector.shape_cast %126 : vector<1x64x128xbf16> to vector<64x128xbf16>
    %cst_64 = arith.constant dense<0.000000e+00> : vector<2x128xf32>
    %128 = tpu.matmul %125, %127, %cst_64 {dimension_numbers = #tpu.dot_dimension_numbers<[1], [0], [0], [1], [0, 0, 1, 1], [], []>} : vector<2x64xbf16>, vector<64x128xbf16>, vector<2x128xf32> -> vector<2x128xf32>
    %129 = arith.addf %123, %128 : vector<2x128xf32>
    %130 = vector.extract_strided_slice %14 {offsets = [38, 0], sizes = [2, 64], strides = [1, 1]} : vector<98x64xf32> to vector<2x64xf32>
    %131 = arith.truncf %130 : vector<2x64xf32> to vector<2x64xbf16>
    %c19 = arith.constant 19 : index
    %c0_65 = arith.constant 0 : index
    %c0_66 = arith.constant 0 : index
    %132 = vector.load %arg3[%c19, %c0_65, %c0_66] : memref<49x64x128xbf16, #tpu.memory_space<vmem>>, vector<1x64x128xbf16>
    %133 = vector.shape_cast %132 : vector<1x64x128xbf16> to vector<64x128xbf16>
    %cst_67 = arith.constant dense<0.000000e+00> : vector<2x128xf32>
    %134 = tpu.matmul %131, %133, %cst_67 {dimension_numbers = #tpu.dot_dimension_numbers<[1], [0], [0], [1], [0, 0, 1, 1], [], []>} : vector<2x64xbf16>, vector<64x128xbf16>, vector<2x128xf32> -> vector<2x128xf32>
    %135 = arith.addf %129, %134 : vector<2x128xf32>
    %136 = vector.extract_strided_slice %14 {offsets = [40, 0], sizes = [2, 64], strides = [1, 1]} : vector<98x64xf32> to vector<2x64xf32>
    %137 = arith.truncf %136 : vector<2x64xf32> to vector<2x64xbf16>
    %c20 = arith.constant 20 : index
    %c0_68 = arith.constant 0 : index
    %c0_69 = arith.constant 0 : index
    %138 = vector.load %arg3[%c20, %c0_68, %c0_69] : memref<49x64x128xbf16, #tpu.memory_space<vmem>>, vector<1x64x128xbf16>
    %139 = vector.shape_cast %138 : vector<1x64x128xbf16> to vector<64x128xbf16>
    %cst_70 = arith.constant dense<0.000000e+00> : vector<2x128xf32>
    %140 = tpu.matmul %137, %139, %cst_70 {dimension_numbers = #tpu.dot_dimension_numbers<[1], [0], [0], [1], [0, 0, 1, 1], [], []>} : vector<2x64xbf16>, vector<64x128xbf16>, vector<2x128xf32> -> vector<2x128xf32>
    %141 = arith.addf %135, %140 : vector<2x128xf32>
    %142 = vector.extract_strided_slice %14 {offsets = [42, 0], sizes = [2, 64], strides = [1, 1]} : vector<98x64xf32> to vector<2x64xf32>
    %143 = arith.truncf %142 : vector<2x64xf32> to vector<2x64xbf16>
    %c21 = arith.constant 21 : index
    %c0_71 = arith.constant 0 : index
    %c0_72 = arith.constant 0 : index
    %144 = vector.load %arg3[%c21, %c0_71, %c0_72] : memref<49x64x128xbf16, #tpu.memory_space<vmem>>, vector<1x64x128xbf16>
    %145 = vector.shape_cast %144 : vector<1x64x128xbf16> to vector<64x128xbf16>
    %cst_73 = arith.constant dense<0.000000e+00> : vector<2x128xf32>
    %146 = tpu.matmul %143, %145, %cst_73 {dimension_numbers = #tpu.dot_dimension_numbers<[1], [0], [0], [1], [0, 0, 1, 1], [], []>} : vector<2x64xbf16>, vector<64x128xbf16>, vector<2x128xf32> -> vector<2x128xf32>
    %147 = arith.addf %141, %146 : vector<2x128xf32>
    %148 = vector.extract_strided_slice %14 {offsets = [44, 0], sizes = [2, 64], strides = [1, 1]} : vector<98x64xf32> to vector<2x64xf32>
    %149 = arith.truncf %148 : vector<2x64xf32> to vector<2x64xbf16>
    %c22 = arith.constant 22 : index
    %c0_74 = arith.constant 0 : index
    %c0_75 = arith.constant 0 : index
    %150 = vector.load %arg3[%c22, %c0_74, %c0_75] : memref<49x64x128xbf16, #tpu.memory_space<vmem>>, vector<1x64x128xbf16>
    %151 = vector.shape_cast %150 : vector<1x64x128xbf16> to vector<64x128xbf16>
    %cst_76 = arith.constant dense<0.000000e+00> : vector<2x128xf32>
    %152 = tpu.matmul %149, %151, %cst_76 {dimension_numbers = #tpu.dot_dimension_numbers<[1], [0], [0], [1], [0, 0, 1, 1], [], []>} : vector<2x64xbf16>, vector<64x128xbf16>, vector<2x128xf32> -> vector<2x128xf32>
    %153 = arith.addf %147, %152 : vector<2x128xf32>
    %154 = vector.extract_strided_slice %14 {offsets = [46, 0], sizes = [2, 64], strides = [1, 1]} : vector<98x64xf32> to vector<2x64xf32>
    %155 = arith.truncf %154 : vector<2x64xf32> to vector<2x64xbf16>
    %c23 = arith.constant 23 : index
    %c0_77 = arith.constant 0 : index
    %c0_78 = arith.constant 0 : index
    %156 = vector.load %arg3[%c23, %c0_77, %c0_78] : memref<49x64x128xbf16, #tpu.memory_space<vmem>>, vector<1x64x128xbf16>
    %157 = vector.shape_cast %156 : vector<1x64x128xbf16> to vector<64x128xbf16>
    %cst_79 = arith.constant dense<0.000000e+00> : vector<2x128xf32>
    %158 = tpu.matmul %155, %157, %cst_79 {dimension_numbers = #tpu.dot_dimension_numbers<[1], [0], [0], [1], [0, 0, 1, 1], [], []>} : vector<2x64xbf16>, vector<64x128xbf16>, vector<2x128xf32> -> vector<2x128xf32>
    %159 = arith.addf %153, %158 : vector<2x128xf32>
    %160 = vector.extract_strided_slice %14 {offsets = [48, 0], sizes = [2, 64], strides = [1, 1]} : vector<98x64xf32> to vector<2x64xf32>
    %161 = arith.truncf %160 : vector<2x64xf32> to vector<2x64xbf16>
    %c24 = arith.constant 24 : index
    %c0_80 = arith.constant 0 : index
    %c0_81 = arith.constant 0 : index
    %162 = vector.load %arg3[%c24, %c0_80, %c0_81] : memref<49x64x128xbf16, #tpu.memory_space<vmem>>, vector<1x64x128xbf16>
    %163 = vector.shape_cast %162 : vector<1x64x128xbf16> to vector<64x128xbf16>
    %cst_82 = arith.constant dense<0.000000e+00> : vector<2x128xf32>
    %164 = tpu.matmul %161, %163, %cst_82 {dimension_numbers = #tpu.dot_dimension_numbers<[1], [0], [0], [1], [0, 0, 1, 1], [], []>} : vector<2x64xbf16>, vector<64x128xbf16>, vector<2x128xf32> -> vector<2x128xf32>
    %165 = arith.addf %159, %164 : vector<2x128xf32>
    %166 = vector.extract_strided_slice %14 {offsets = [50, 0], sizes = [2, 64], strides = [1, 1]} : vector<98x64xf32> to vector<2x64xf32>
    %167 = arith.truncf %166 : vector<2x64xf32> to vector<2x64xbf16>
    %c25 = arith.constant 25 : index
    %c0_83 = arith.constant 0 : index
    %c0_84 = arith.constant 0 : index
    %168 = vector.load %arg3[%c25, %c0_83, %c0_84] : memref<49x64x128xbf16, #tpu.memory_space<vmem>>, vector<1x64x128xbf16>
    %169 = vector.shape_cast %168 : vector<1x64x128xbf16> to vector<64x128xbf16>
    %cst_85 = arith.constant dense<0.000000e+00> : vector<2x128xf32>
    %170 = tpu.matmul %167, %169, %cst_85 {dimension_numbers = #tpu.dot_dimension_numbers<[1], [0], [0], [1], [0, 0, 1, 1], [], []>} : vector<2x64xbf16>, vector<64x128xbf16>, vector<2x128xf32> -> vector<2x128xf32>
    %171 = arith.addf %165, %170 : vector<2x128xf32>
    %172 = vector.extract_strided_slice %14 {offsets = [52, 0], sizes = [2, 64], strides = [1, 1]} : vector<98x64xf32> to vector<2x64xf32>
    %173 = arith.truncf %172 : vector<2x64xf32> to vector<2x64xbf16>
    %c26 = arith.constant 26 : index
    %c0_86 = arith.constant 0 : index
    %c0_87 = arith.constant 0 : index
    %174 = vector.load %arg3[%c26, %c0_86, %c0_87] : memref<49x64x128xbf16, #tpu.memory_space<vmem>>, vector<1x64x128xbf16>
    %175 = vector.shape_cast %174 : vector<1x64x128xbf16> to vector<64x128xbf16>
    %cst_88 = arith.constant dense<0.000000e+00> : vector<2x128xf32>
    %176 = tpu.matmul %173, %175, %cst_88 {dimension_numbers = #tpu.dot_dimension_numbers<[1], [0], [0], [1], [0, 0, 1, 1], [], []>} : vector<2x64xbf16>, vector<64x128xbf16>, vector<2x128xf32> -> vector<2x128xf32>
    %177 = arith.addf %171, %176 : vector<2x128xf32>
    %178 = vector.extract_strided_slice %14 {offsets = [54, 0], sizes = [2, 64], strides = [1, 1]} : vector<98x64xf32> to vector<2x64xf32>
    %179 = arith.truncf %178 : vector<2x64xf32> to vector<2x64xbf16>
    %c27 = arith.constant 27 : index
    %c0_89 = arith.constant 0 : index
    %c0_90 = arith.constant 0 : index
    %180 = vector.load %arg3[%c27, %c0_89, %c0_90] : memref<49x64x128xbf16, #tpu.memory_space<vmem>>, vector<1x64x128xbf16>
    %181 = vector.shape_cast %180 : vector<1x64x128xbf16> to vector<64x128xbf16>
    %cst_91 = arith.constant dense<0.000000e+00> : vector<2x128xf32>
    %182 = tpu.matmul %179, %181, %cst_91 {dimension_numbers = #tpu.dot_dimension_numbers<[1], [0], [0], [1], [0, 0, 1, 1], [], []>} : vector<2x64xbf16>, vector<64x128xbf16>, vector<2x128xf32> -> vector<2x128xf32>
    %183 = arith.addf %177, %182 : vector<2x128xf32>
    %184 = vector.extract_strided_slice %14 {offsets = [56, 0], sizes = [2, 64], strides = [1, 1]} : vector<98x64xf32> to vector<2x64xf32>
    %185 = arith.truncf %184 : vector<2x64xf32> to vector<2x64xbf16>
    %c28 = arith.constant 28 : index
    %c0_92 = arith.constant 0 : index
    %c0_93 = arith.constant 0 : index
    %186 = vector.load %arg3[%c28, %c0_92, %c0_93] : memref<49x64x128xbf16, #tpu.memory_space<vmem>>, vector<1x64x128xbf16>
    %187 = vector.shape_cast %186 : vector<1x64x128xbf16> to vector<64x128xbf16>
    %cst_94 = arith.constant dense<0.000000e+00> : vector<2x128xf32>
    %188 = tpu.matmul %185, %187, %cst_94 {dimension_numbers = #tpu.dot_dimension_numbers<[1], [0], [0], [1], [0, 0, 1, 1], [], []>} : vector<2x64xbf16>, vector<64x128xbf16>, vector<2x128xf32> -> vector<2x128xf32>
    %189 = arith.addf %183, %188 : vector<2x128xf32>
    %190 = vector.extract_strided_slice %14 {offsets = [58, 0], sizes = [2, 64], strides = [1, 1]} : vector<98x64xf32> to vector<2x64xf32>
    %191 = arith.truncf %190 : vector<2x64xf32> to vector<2x64xbf16>
    %c29 = arith.constant 29 : index
    %c0_95 = arith.constant 0 : index
    %c0_96 = arith.constant 0 : index
    %192 = vector.load %arg3[%c29, %c0_95, %c0_96] : memref<49x64x128xbf16, #tpu.memory_space<vmem>>, vector<1x64x128xbf16>
    %193 = vector.shape_cast %192 : vector<1x64x128xbf16> to vector<64x128xbf16>
    %cst_97 = arith.constant dense<0.000000e+00> : vector<2x128xf32>
    %194 = tpu.matmul %191, %193, %cst_97 {dimension_numbers = #tpu.dot_dimension_numbers<[1], [0], [0], [1], [0, 0, 1, 1], [], []>} : vector<2x64xbf16>, vector<64x128xbf16>, vector<2x128xf32> -> vector<2x128xf32>
    %195 = arith.addf %189, %194 : vector<2x128xf32>
    %196 = vector.extract_strided_slice %14 {offsets = [60, 0], sizes = [2, 64], strides = [1, 1]} : vector<98x64xf32> to vector<2x64xf32>
    %197 = arith.truncf %196 : vector<2x64xf32> to vector<2x64xbf16>
    %c30 = arith.constant 30 : index
    %c0_98 = arith.constant 0 : index
    %c0_99 = arith.constant 0 : index
    %198 = vector.load %arg3[%c30, %c0_98, %c0_99] : memref<49x64x128xbf16, #tpu.memory_space<vmem>>, vector<1x64x128xbf16>
    %199 = vector.shape_cast %198 : vector<1x64x128xbf16> to vector<64x128xbf16>
    %cst_100 = arith.constant dense<0.000000e+00> : vector<2x128xf32>
    %200 = tpu.matmul %197, %199, %cst_100 {dimension_numbers = #tpu.dot_dimension_numbers<[1], [0], [0], [1], [0, 0, 1, 1], [], []>} : vector<2x64xbf16>, vector<64x128xbf16>, vector<2x128xf32> -> vector<2x128xf32>
    %201 = arith.addf %195, %200 : vector<2x128xf32>
    %202 = vector.extract_strided_slice %14 {offsets = [62, 0], sizes = [2, 64], strides = [1, 1]} : vector<98x64xf32> to vector<2x64xf32>
    %203 = arith.truncf %202 : vector<2x64xf32> to vector<2x64xbf16>
    %c31 = arith.constant 31 : index
    %c0_101 = arith.constant 0 : index
    %c0_102 = arith.constant 0 : index
    %204 = vector.load %arg3[%c31, %c0_101, %c0_102] : memref<49x64x128xbf16, #tpu.memory_space<vmem>>, vector<1x64x128xbf16>
    %205 = vector.shape_cast %204 : vector<1x64x128xbf16> to vector<64x128xbf16>
    %cst_103 = arith.constant dense<0.000000e+00> : vector<2x128xf32>
    %206 = tpu.matmul %203, %205, %cst_103 {dimension_numbers = #tpu.dot_dimension_numbers<[1], [0], [0], [1], [0, 0, 1, 1], [], []>} : vector<2x64xbf16>, vector<64x128xbf16>, vector<2x128xf32> -> vector<2x128xf32>
    %207 = arith.addf %201, %206 : vector<2x128xf32>
    %208 = vector.extract_strided_slice %14 {offsets = [64, 0], sizes = [2, 64], strides = [1, 1]} : vector<98x64xf32> to vector<2x64xf32>
    %209 = arith.truncf %208 : vector<2x64xf32> to vector<2x64xbf16>
    %c32 = arith.constant 32 : index
    %c0_104 = arith.constant 0 : index
    %c0_105 = arith.constant 0 : index
    %210 = vector.load %arg3[%c32, %c0_104, %c0_105] : memref<49x64x128xbf16, #tpu.memory_space<vmem>>, vector<1x64x128xbf16>
    %211 = vector.shape_cast %210 : vector<1x64x128xbf16> to vector<64x128xbf16>
    %cst_106 = arith.constant dense<0.000000e+00> : vector<2x128xf32>
    %212 = tpu.matmul %209, %211, %cst_106 {dimension_numbers = #tpu.dot_dimension_numbers<[1], [0], [0], [1], [0, 0, 1, 1], [], []>} : vector<2x64xbf16>, vector<64x128xbf16>, vector<2x128xf32> -> vector<2x128xf32>
    %213 = arith.addf %207, %212 : vector<2x128xf32>
    %214 = vector.extract_strided_slice %14 {offsets = [66, 0], sizes = [2, 64], strides = [1, 1]} : vector<98x64xf32> to vector<2x64xf32>
    %215 = arith.truncf %214 : vector<2x64xf32> to vector<2x64xbf16>
    %c33 = arith.constant 33 : index
    %c0_107 = arith.constant 0 : index
    %c0_108 = arith.constant 0 : index
    %216 = vector.load %arg3[%c33, %c0_107, %c0_108] : memref<49x64x128xbf16, #tpu.memory_space<vmem>>, vector<1x64x128xbf16>
    %217 = vector.shape_cast %216 : vector<1x64x128xbf16> to vector<64x128xbf16>
    %cst_109 = arith.constant dense<0.000000e+00> : vector<2x128xf32>
    %218 = tpu.matmul %215, %217, %cst_109 {dimension_numbers = #tpu.dot_dimension_numbers<[1], [0], [0], [1], [0, 0, 1, 1], [], []>} : vector<2x64xbf16>, vector<64x128xbf16>, vector<2x128xf32> -> vector<2x128xf32>
    %219 = arith.addf %213, %218 : vector<2x128xf32>
    %220 = vector.extract_strided_slice %14 {offsets = [68, 0], sizes = [2, 64], strides = [1, 1]} : vector<98x64xf32> to vector<2x64xf32>
    %221 = arith.truncf %220 : vector<2x64xf32> to vector<2x64xbf16>
    %c34 = arith.constant 34 : index
    %c0_110 = arith.constant 0 : index
    %c0_111 = arith.constant 0 : index
    %222 = vector.load %arg3[%c34, %c0_110, %c0_111] : memref<49x64x128xbf16, #tpu.memory_space<vmem>>, vector<1x64x128xbf16>
    %223 = vector.shape_cast %222 : vector<1x64x128xbf16> to vector<64x128xbf16>
    %cst_112 = arith.constant dense<0.000000e+00> : vector<2x128xf32>
    %224 = tpu.matmul %221, %223, %cst_112 {dimension_numbers = #tpu.dot_dimension_numbers<[1], [0], [0], [1], [0, 0, 1, 1], [], []>} : vector<2x64xbf16>, vector<64x128xbf16>, vector<2x128xf32> -> vector<2x128xf32>
    %225 = arith.addf %219, %224 : vector<2x128xf32>
    %226 = vector.extract_strided_slice %14 {offsets = [70, 0], sizes = [2, 64], strides = [1, 1]} : vector<98x64xf32> to vector<2x64xf32>
    %227 = arith.truncf %226 : vector<2x64xf32> to vector<2x64xbf16>
    %c35 = arith.constant 35 : index
    %c0_113 = arith.constant 0 : index
    %c0_114 = arith.constant 0 : index
    %228 = vector.load %arg3[%c35, %c0_113, %c0_114] : memref<49x64x128xbf16, #tpu.memory_space<vmem>>, vector<1x64x128xbf16>
    %229 = vector.shape_cast %228 : vector<1x64x128xbf16> to vector<64x128xbf16>
    %cst_115 = arith.constant dense<0.000000e+00> : vector<2x128xf32>
    %230 = tpu.matmul %227, %229, %cst_115 {dimension_numbers = #tpu.dot_dimension_numbers<[1], [0], [0], [1], [0, 0, 1, 1], [], []>} : vector<2x64xbf16>, vector<64x128xbf16>, vector<2x128xf32> -> vector<2x128xf32>
    %231 = arith.addf %225, %230 : vector<2x128xf32>
    %232 = vector.extract_strided_slice %14 {offsets = [72, 0], sizes = [2, 64], strides = [1, 1]} : vector<98x64xf32> to vector<2x64xf32>
    %233 = arith.truncf %232 : vector<2x64xf32> to vector<2x64xbf16>
    %c36 = arith.constant 36 : index
    %c0_116 = arith.constant 0 : index
    %c0_117 = arith.constant 0 : index
    %234 = vector.load %arg3[%c36, %c0_116, %c0_117] : memref<49x64x128xbf16, #tpu.memory_space<vmem>>, vector<1x64x128xbf16>
    %235 = vector.shape_cast %234 : vector<1x64x128xbf16> to vector<64x128xbf16>
    %cst_118 = arith.constant dense<0.000000e+00> : vector<2x128xf32>
    %236 = tpu.matmul %233, %235, %cst_118 {dimension_numbers = #tpu.dot_dimension_numbers<[1], [0], [0], [1], [0, 0, 1, 1], [], []>} : vector<2x64xbf16>, vector<64x128xbf16>, vector<2x128xf32> -> vector<2x128xf32>
    %237 = arith.addf %231, %236 : vector<2x128xf32>
    %238 = vector.extract_strided_slice %14 {offsets = [74, 0], sizes = [2, 64], strides = [1, 1]} : vector<98x64xf32> to vector<2x64xf32>
    %239 = arith.truncf %238 : vector<2x64xf32> to vector<2x64xbf16>
    %c37 = arith.constant 37 : index
    %c0_119 = arith.constant 0 : index
    %c0_120 = arith.constant 0 : index
    %240 = vector.load %arg3[%c37, %c0_119, %c0_120] : memref<49x64x128xbf16, #tpu.memory_space<vmem>>, vector<1x64x128xbf16>
    %241 = vector.shape_cast %240 : vector<1x64x128xbf16> to vector<64x128xbf16>
    %cst_121 = arith.constant dense<0.000000e+00> : vector<2x128xf32>
    %242 = tpu.matmul %239, %241, %cst_121 {dimension_numbers = #tpu.dot_dimension_numbers<[1], [0], [0], [1], [0, 0, 1, 1], [], []>} : vector<2x64xbf16>, vector<64x128xbf16>, vector<2x128xf32> -> vector<2x128xf32>
    %243 = arith.addf %237, %242 : vector<2x128xf32>
    %244 = vector.extract_strided_slice %14 {offsets = [76, 0], sizes = [2, 64], strides = [1, 1]} : vector<98x64xf32> to vector<2x64xf32>
    %245 = arith.truncf %244 : vector<2x64xf32> to vector<2x64xbf16>
    %c38 = arith.constant 38 : index
    %c0_122 = arith.constant 0 : index
    %c0_123 = arith.constant 0 : index
    %246 = vector.load %arg3[%c38, %c0_122, %c0_123] : memref<49x64x128xbf16, #tpu.memory_space<vmem>>, vector<1x64x128xbf16>
    %247 = vector.shape_cast %246 : vector<1x64x128xbf16> to vector<64x128xbf16>
    %cst_124 = arith.constant dense<0.000000e+00> : vector<2x128xf32>
    %248 = tpu.matmul %245, %247, %cst_124 {dimension_numbers = #tpu.dot_dimension_numbers<[1], [0], [0], [1], [0, 0, 1, 1], [], []>} : vector<2x64xbf16>, vector<64x128xbf16>, vector<2x128xf32> -> vector<2x128xf32>
    %249 = arith.addf %243, %248 : vector<2x128xf32>
    %250 = vector.extract_strided_slice %14 {offsets = [78, 0], sizes = [2, 64], strides = [1, 1]} : vector<98x64xf32> to vector<2x64xf32>
    %251 = arith.truncf %250 : vector<2x64xf32> to vector<2x64xbf16>
    %c39 = arith.constant 39 : index
    %c0_125 = arith.constant 0 : index
    %c0_126 = arith.constant 0 : index
    %252 = vector.load %arg3[%c39, %c0_125, %c0_126] : memref<49x64x128xbf16, #tpu.memory_space<vmem>>, vector<1x64x128xbf16>
    %253 = vector.shape_cast %252 : vector<1x64x128xbf16> to vector<64x128xbf16>
    %cst_127 = arith.constant dense<0.000000e+00> : vector<2x128xf32>
    %254 = tpu.matmul %251, %253, %cst_127 {dimension_numbers = #tpu.dot_dimension_numbers<[1], [0], [0], [1], [0, 0, 1, 1], [], []>} : vector<2x64xbf16>, vector<64x128xbf16>, vector<2x128xf32> -> vector<2x128xf32>
    %255 = arith.addf %249, %254 : vector<2x128xf32>
    %256 = vector.extract_strided_slice %14 {offsets = [80, 0], sizes = [2, 64], strides = [1, 1]} : vector<98x64xf32> to vector<2x64xf32>
    %257 = arith.truncf %256 : vector<2x64xf32> to vector<2x64xbf16>
    %c40 = arith.constant 40 : index
    %c0_128 = arith.constant 0 : index
    %c0_129 = arith.constant 0 : index
    %258 = vector.load %arg3[%c40, %c0_128, %c0_129] : memref<49x64x128xbf16, #tpu.memory_space<vmem>>, vector<1x64x128xbf16>
    %259 = vector.shape_cast %258 : vector<1x64x128xbf16> to vector<64x128xbf16>
    %cst_130 = arith.constant dense<0.000000e+00> : vector<2x128xf32>
    %260 = tpu.matmul %257, %259, %cst_130 {dimension_numbers = #tpu.dot_dimension_numbers<[1], [0], [0], [1], [0, 0, 1, 1], [], []>} : vector<2x64xbf16>, vector<64x128xbf16>, vector<2x128xf32> -> vector<2x128xf32>
    %261 = arith.addf %255, %260 : vector<2x128xf32>
    %262 = vector.extract_strided_slice %14 {offsets = [82, 0], sizes = [2, 64], strides = [1, 1]} : vector<98x64xf32> to vector<2x64xf32>
    %263 = arith.truncf %262 : vector<2x64xf32> to vector<2x64xbf16>
    %c41 = arith.constant 41 : index
    %c0_131 = arith.constant 0 : index
    %c0_132 = arith.constant 0 : index
    %264 = vector.load %arg3[%c41, %c0_131, %c0_132] : memref<49x64x128xbf16, #tpu.memory_space<vmem>>, vector<1x64x128xbf16>
    %265 = vector.shape_cast %264 : vector<1x64x128xbf16> to vector<64x128xbf16>
    %cst_133 = arith.constant dense<0.000000e+00> : vector<2x128xf32>
    %266 = tpu.matmul %263, %265, %cst_133 {dimension_numbers = #tpu.dot_dimension_numbers<[1], [0], [0], [1], [0, 0, 1, 1], [], []>} : vector<2x64xbf16>, vector<64x128xbf16>, vector<2x128xf32> -> vector<2x128xf32>
    %267 = arith.addf %261, %266 : vector<2x128xf32>
    %268 = vector.extract_strided_slice %14 {offsets = [84, 0], sizes = [2, 64], strides = [1, 1]} : vector<98x64xf32> to vector<2x64xf32>
    %269 = arith.truncf %268 : vector<2x64xf32> to vector<2x64xbf16>
    %c42 = arith.constant 42 : index
    %c0_134 = arith.constant 0 : index
    %c0_135 = arith.constant 0 : index
    %270 = vector.load %arg3[%c42, %c0_134, %c0_135] : memref<49x64x128xbf16, #tpu.memory_space<vmem>>, vector<1x64x128xbf16>
    %271 = vector.shape_cast %270 : vector<1x64x128xbf16> to vector<64x128xbf16>
    %cst_136 = arith.constant dense<0.000000e+00> : vector<2x128xf32>
    %272 = tpu.matmul %269, %271, %cst_136 {dimension_numbers = #tpu.dot_dimension_numbers<[1], [0], [0], [1], [0, 0, 1, 1], [], []>} : vector<2x64xbf16>, vector<64x128xbf16>, vector<2x128xf32> -> vector<2x128xf32>
    %273 = arith.addf %267, %272 : vector<2x128xf32>
    %274 = vector.extract_strided_slice %14 {offsets = [86, 0], sizes = [2, 64], strides = [1, 1]} : vector<98x64xf32> to vector<2x64xf32>
    %275 = arith.truncf %274 : vector<2x64xf32> to vector<2x64xbf16>
    %c43 = arith.constant 43 : index
    %c0_137 = arith.constant 0 : index
    %c0_138 = arith.constant 0 : index
    %276 = vector.load %arg3[%c43, %c0_137, %c0_138] : memref<49x64x128xbf16, #tpu.memory_space<vmem>>, vector<1x64x128xbf16>
    %277 = vector.shape_cast %276 : vector<1x64x128xbf16> to vector<64x128xbf16>
    %cst_139 = arith.constant dense<0.000000e+00> : vector<2x128xf32>
    %278 = tpu.matmul %275, %277, %cst_139 {dimension_numbers = #tpu.dot_dimension_numbers<[1], [0], [0], [1], [0, 0, 1, 1], [], []>} : vector<2x64xbf16>, vector<64x128xbf16>, vector<2x128xf32> -> vector<2x128xf32>
    %279 = arith.addf %273, %278 : vector<2x128xf32>
    %280 = vector.extract_strided_slice %14 {offsets = [88, 0], sizes = [2, 64], strides = [1, 1]} : vector<98x64xf32> to vector<2x64xf32>
    %281 = arith.truncf %280 : vector<2x64xf32> to vector<2x64xbf16>
    %c44 = arith.constant 44 : index
    %c0_140 = arith.constant 0 : index
    %c0_141 = arith.constant 0 : index
    %282 = vector.load %arg3[%c44, %c0_140, %c0_141] : memref<49x64x128xbf16, #tpu.memory_space<vmem>>, vector<1x64x128xbf16>
    %283 = vector.shape_cast %282 : vector<1x64x128xbf16> to vector<64x128xbf16>
    %cst_142 = arith.constant dense<0.000000e+00> : vector<2x128xf32>
    %284 = tpu.matmul %281, %283, %cst_142 {dimension_numbers = #tpu.dot_dimension_numbers<[1], [0], [0], [1], [0, 0, 1, 1], [], []>} : vector<2x64xbf16>, vector<64x128xbf16>, vector<2x128xf32> -> vector<2x128xf32>
    %285 = arith.addf %279, %284 : vector<2x128xf32>
    %286 = vector.extract_strided_slice %14 {offsets = [90, 0], sizes = [2, 64], strides = [1, 1]} : vector<98x64xf32> to vector<2x64xf32>
    %287 = arith.truncf %286 : vector<2x64xf32> to vector<2x64xbf16>
    %c45 = arith.constant 45 : index
    %c0_143 = arith.constant 0 : index
    %c0_144 = arith.constant 0 : index
    %288 = vector.load %arg3[%c45, %c0_143, %c0_144] : memref<49x64x128xbf16, #tpu.memory_space<vmem>>, vector<1x64x128xbf16>
    %289 = vector.shape_cast %288 : vector<1x64x128xbf16> to vector<64x128xbf16>
    %cst_145 = arith.constant dense<0.000000e+00> : vector<2x128xf32>
    %290 = tpu.matmul %287, %289, %cst_145 {dimension_numbers = #tpu.dot_dimension_numbers<[1], [0], [0], [1], [0, 0, 1, 1], [], []>} : vector<2x64xbf16>, vector<64x128xbf16>, vector<2x128xf32> -> vector<2x128xf32>
    %291 = arith.addf %285, %290 : vector<2x128xf32>
    %292 = vector.extract_strided_slice %14 {offsets = [92, 0], sizes = [2, 64], strides = [1, 1]} : vector<98x64xf32> to vector<2x64xf32>
    %293 = arith.truncf %292 : vector<2x64xf32> to vector<2x64xbf16>
    %c46 = arith.constant 46 : index
    %c0_146 = arith.constant 0 : index
    %c0_147 = arith.constant 0 : index
    %294 = vector.load %arg3[%c46, %c0_146, %c0_147] : memref<49x64x128xbf16, #tpu.memory_space<vmem>>, vector<1x64x128xbf16>
    %295 = vector.shape_cast %294 : vector<1x64x128xbf16> to vector<64x128xbf16>
    %cst_148 = arith.constant dense<0.000000e+00> : vector<2x128xf32>
    %296 = tpu.matmul %293, %295, %cst_148 {dimension_numbers = #tpu.dot_dimension_numbers<[1], [0], [0], [1], [0, 0, 1, 1], [], []>} : vector<2x64xbf16>, vector<64x128xbf16>, vector<2x128xf32> -> vector<2x128xf32>
    %297 = arith.addf %291, %296 : vector<2x128xf32>
    %298 = vector.extract_strided_slice %14 {offsets = [94, 0], sizes = [2, 64], strides = [1, 1]} : vector<98x64xf32> to vector<2x64xf32>
    %299 = arith.truncf %298 : vector<2x64xf32> to vector<2x64xbf16>
    %c47 = arith.constant 47 : index
    %c0_149 = arith.constant 0 : index
    %c0_150 = arith.constant 0 : index
    %300 = vector.load %arg3[%c47, %c0_149, %c0_150] : memref<49x64x128xbf16, #tpu.memory_space<vmem>>, vector<1x64x128xbf16>
    %301 = vector.shape_cast %300 : vector<1x64x128xbf16> to vector<64x128xbf16>
    %cst_151 = arith.constant dense<0.000000e+00> : vector<2x128xf32>
    %302 = tpu.matmul %299, %301, %cst_151 {dimension_numbers = #tpu.dot_dimension_numbers<[1], [0], [0], [1], [0, 0, 1, 1], [], []>} : vector<2x64xbf16>, vector<64x128xbf16>, vector<2x128xf32> -> vector<2x128xf32>
    %303 = arith.addf %297, %302 : vector<2x128xf32>
    %304 = vector.extract_strided_slice %14 {offsets = [96, 0], sizes = [2, 64], strides = [1, 1]} : vector<98x64xf32> to vector<2x64xf32>
    %305 = arith.truncf %304 : vector<2x64xf32> to vector<2x64xbf16>
    %c48 = arith.constant 48 : index
    %c0_152 = arith.constant 0 : index
    %c0_153 = arith.constant 0 : index
    %306 = vector.load %arg3[%c48, %c0_152, %c0_153] : memref<49x64x128xbf16, #tpu.memory_space<vmem>>, vector<1x64x128xbf16>
    %307 = vector.shape_cast %306 : vector<1x64x128xbf16> to vector<64x128xbf16>
    %cst_154 = arith.constant dense<0.000000e+00> : vector<2x128xf32>
    %308 = tpu.matmul %305, %307, %cst_154 {dimension_numbers = #tpu.dot_dimension_numbers<[1], [0], [0], [1], [0, 0, 1, 1], [], []>} : vector<2x64xbf16>, vector<64x128xbf16>, vector<2x128xf32> -> vector<2x128xf32>
    %309 = arith.addf %303, %308 : vector<2x128xf32>
    %c0_155 = arith.constant 0 : index
    %c0_156 = arith.constant 0 : index
    %310 = vector.load %arg4[%c0_155, %c0_156] : memref<1x128xf32, #tpu.memory_space<vmem>>, vector<1x128xf32>
    %311 = vector.broadcast %310 : vector<1x128xf32> to vector<2x128xf32>
    %312 = arith.addf %309, %311 : vector<2x128xf32>
    %cst_157 = arith.constant 0.000000e+00 : f32
    %313 = vector.broadcast %cst_157 : f32 to vector<2x128xf32>
    %314 = arith.maximumf %312, %313 : vector<2x128xf32>
    %315 = arith.truncf %314 : vector<2x128xf32> to vector<2x128xbf16>
    %c0_158 = arith.constant 0 : index
    %c0_159 = arith.constant 0 : index
    %316 = vector.load %arg5[%c0_158, %c0_159] : memref<128x128xbf16, #tpu.memory_space<vmem>>, vector<128x128xbf16>
    %cst_160 = arith.constant dense<0.000000e+00> : vector<2x128xf32>
    %317 = tpu.matmul %315, %316, %cst_160 {dimension_numbers = #tpu.dot_dimension_numbers<[1], [0], [0], [1], [0, 0, 1, 1], [], []>} : vector<2x128xbf16>, vector<128x128xbf16>, vector<2x128xf32> -> vector<2x128xf32>
    %c0_161 = arith.constant 0 : index
    %c0_162 = arith.constant 0 : index
    %318 = vector.load %arg6[%c0_161, %c0_162] : memref<1x128xf32, #tpu.memory_space<vmem>>, vector<1x128xf32>
    %319 = vector.broadcast %318 : vector<1x128xf32> to vector<2x128xf32>
    %320 = arith.addf %317, %319 : vector<2x128xf32>
    %cst_163 = arith.constant 0.000000e+00 : f32
    %321 = vector.broadcast %cst_163 : f32 to vector<2x128xf32>
    %322 = arith.maximumf %320, %321 : vector<2x128xf32>
    %323 = arith.truncf %322 : vector<2x128xf32> to vector<2x128xbf16>
    %c0_164 = arith.constant 0 : index
    %c0_165 = arith.constant 0 : index
    %324 = vector.load %arg7[%c0_164, %c0_165] : memref<128x128xbf16, #tpu.memory_space<vmem>>, vector<128x128xbf16>
    %cst_166 = arith.constant dense<0.000000e+00> : vector<2x128xf32>
    %325 = tpu.matmul %323, %324, %cst_166 {dimension_numbers = #tpu.dot_dimension_numbers<[1], [0], [0], [1], [0, 0, 1, 1], [], []>} : vector<2x128xbf16>, vector<128x128xbf16>, vector<2x128xf32> -> vector<2x128xf32>
    %326 = vector.extract_strided_slice %325 {offsets = [0, 0], sizes = [2, 1], strides = [1, 1]} : vector<2x128xf32> to vector<2x1xf32>
    %c0_167 = arith.constant 0 : index
    %c0_168 = arith.constant 0 : index
    %327 = vector.load %arg8[%c0_167, %c0_168] : memref<1x1xf32, #tpu.memory_space<vmem>>, vector<1x1xf32>
    %328 = vector.broadcast %327 : vector<1x1xf32> to vector<2x1xf32>
    %329 = arith.addf %326, %328 : vector<2x1xf32>
    %330 = arith.negf %329 : vector<2x1xf32>
    %331 = math.exp %330 : vector<2x1xf32>
    %cst_169 = arith.constant 1.000000e+00 : f32
    %332 = vector.broadcast %cst_169 : f32 to vector<2x1xf32>
    %333 = arith.addf %332, %331 : vector<2x1xf32>
    %334 = arith.divf %332, %333 : vector<2x1xf32>
    %c0_170 = arith.constant 0 : index
    %c0_171 = arith.constant 0 : index
    %335 = vector.load %arg9[%c0_170, %c0_171] : memref<2x1xf32, #tpu.memory_space<vmem>>, vector<2x1xf32>
    tpu.vector_store %arg9[%c0_170, %c0_171], %334 {strides = array<i32>} : memref<2x1xf32, #tpu.memory_space<vmem>>, vector<2x1xf32>,
    return
  }
}

</mosaic_0001>

<bundles_post_ra>
// kernel: domain_classifier_forward.2
= control target key start
LH: loop header
LB: loop body
LE: loop exit
PB: predicated region body
PF: predicated region fallthrough
CT: control target
= control target key end

     0   :  { %v12926_v0 = vmov 0.0   ;;  %vm7854_vm0 = vmmov 0   ;;  %vm891_vm1 = vcmask 523264   ;;  %s7855_s8 = smov 96   ;;  %s7856_s17 = smov 64   ;;  %vm6119_vm2 = vcmask 257024   ;;  %s12922_s1 = inlined_call_operand.vmem [shape: bf16[64,128], index: 1, kind: input, shape index: {}]   ;;  %s12923_s0 = inlined_call_operand.vmem [shape: bf16[1922,64], index: 0, kind: input, shape index: {}]   ;;  %s12924_s2 = inlined_call_operand.vmem [shape: f32[1,32], index: 2, kind: input, shape index: {}]   ;;  %s12925_s3 = inlined_call_operand.vmem [shape: bf16[1922,32], index: 3, kind: output, shape index: {}]  }
   0x1   :  { %7220 = vmatprep.subr.bf16.mxu0 %v12926_v0  ;;  %7712 = vmatprep.subr.bf16.mxu1 %v12926_v0  ;;  %v7724_v1 = vld [vmem:[%s12922_s1 + $0x18] sm:$0xff]   ;;  %v7725_v2 = vld [vmem:[%s12922_s1 + $0x10] sm:$0xff]   ;;  %v7726_v3 = vld [vmem:[%s12922_s1 + $0x8] sm:$0xff]   ;;  %vm6360_vm3 = vcmask 253952  }
   0x2   :  { %7228 = vmatprep.mubr.msk.bf16.mxu0 %vm7854_vm0, %v12926_v0  ;;  %7472 = vmatprep.mubr.msk.bf16.mxu1 %vm7854_vm0, %v12926_v0  ;;  %v7727_v4 = vld [vmem:[%s12922_s1] sm:$0xff]   ;;  %v7729_v6 = vld [vmem:[%s12923_s0 + $0x1e8] sm:$0xff]   ;;  %v7731_v8 = vld [vmem:[%s12923_s0 + $0x1f0] sm:$0xff]  }
   0x3   :  { %7221 = vmatpush3.bf16.msra.mxu0 %v7724_v1  ;;  %7716 = vmatpush3.bf16.msra.mxu1 %v7724_v1  ;;  %v7728_v5 = vld [vmem:[%s12923_s0] sm:$0xff]   ;;  %v7730_v7 = vld [vmem:[%s12923_s0 + $0x8] sm:$0xff]   ;;  %v7732_v9 = vld [vmem:[%s12923_s0 + $0x10] sm:$0xff]  }
   0x4   :  { %7222 = vmatprep.subr.bf16.mxu0 %v12926_v0  ;;  %7713 = vmatprep.subr.bf16.mxu1 %v12926_v0  ;;  %v7733_v10 = vld [vmem:[%s12923_s0 + $0x1f8] sm:$0xff]   ;;  %v7735_v12 = vld [vmem:[%s12923_s0 + $0x200] sm:$0xff]   ;;  %v7737_v14 = vld [vmem:[%s12923_s0 + $0x208] sm:$0xff]  }
   0x5   :  { %v7734_v11 = vld [vmem:[%s12923_s0 + $0x18] sm:$0xff]   ;;  %v7736_v13 = vld [vmem:[%s12923_s0 + $0x20] sm:$0xff]   ;;  %v7738_v15 = vld [vmem:[%s12923_s0 + $0x28] sm:$0xff]  }
   0x6   :  { %v7739_v16 = vld [vmem:[%s12923_s0 + $0x210] sm:$0xff]   ;;  %v7741_v18 = vld [vmem:[%s12923_s0 + $0x218] sm:$0xff]   ;;  %v7743_v20 = vld [vmem:[%s12923_s0 + $0x220] sm:$0xff]  }
   0x7   :  { %7223 = vmatpush3.bf16.msra.mxu0 %v7725_v2  ;;  %7717 = vmatpush3.bf16.msra.mxu1 %v7725_v2  ;;  %v7740_v17 = vld [vmem:[%s12923_s0 + $0x30] sm:$0xff]   ;;  %v7742_v19 = vld [vmem:[%s12923_s0 + $0x38] sm:$0xff]   ;;  %v7744_v21 = vld [vmem:[%s12923_s0 + $0x40] sm:$0xff]  }
   0x8   :  { %7224 = vmatprep.subr.bf16.mxu0 %v12926_v0  ;;  %7714 = vmatprep.subr.bf16.mxu1 %v12926_v0  ;;  %v7745_v22 = vld [vmem:[%s12923_s0 + $0x228] sm:$0xff]   ;;  %v7747_v24 = vld [vmem:[%s12923_s0 + $0x230] sm:$0xff]   ;;  %v7749_v26 = vld [vmem:[%s12923_s0 + $0x238] sm:$0xff]  }
   0x9   :  { %v7746_v23 = vld [vmem:[%s12923_s0 + $0x48] sm:$0xff]   ;;  %v7748_v25 = vld [vmem:[%s12923_s0 + $0x50] sm:$0xff]   ;;  %v7750_v27 = vld [vmem:[%s12923_s0 + $0x58] sm:$0xff]  }
   0xa   :  { %v7751_v28 = vld [vmem:[%s12923_s0 + $0x240] sm:$0xff]   ;;  %v7753_v30 = vld [vmem:[%s12923_s0 + $0x248] sm:$0xff]   ;;  %v7755_v32 = vld [vmem:[%s12923_s0 + $0x250] sm:$0xff]  }
   0xb   :  { %7225 = vmatpush3.bf16.msra.mxu0 %v7726_v3  ;;  %7718 = vmatpush3.bf16.msra.mxu1 %v7726_v3  ;;  %v7752_v29 = vld [vmem:[%s12923_s0 + $0x60] sm:$0xff]   ;;  %v7754_v31 = vld [vmem:[%s12923_s0 + $0x68] sm:$0xff]   ;;  %v7756_v33 = vld [vmem:[%s12923_s0 + $0x70] sm:$0xff]  }
   0xc   :  { %7226 = vmatprep.subr.bf16.mxu0 %v12926_v0  ;;  %7715 = vmatprep.subr.bf16.mxu1 %v12926_v0  ;;  %v7757_v34 = vld [vmem:[%s12923_s0 + $0x258] sm:$0xff]   ;;  %v7759_v36 = vld [vmem:[%s12923_s0 + $0x260] sm:$0xff]   ;;  %v7761_v38 = vld [vmem:[%s12923_s0 + $0x268] sm:$0xff]  }
   0xd   :  { %v7758_v35 = vld [vmem:[%s12923_s0 + $0x78] sm:$0xff]   ;;  %v7760_v37 = vld [vmem:[%s12923_s0 + $0x80] sm:$0xff]   ;;  %v7762_v39 = vld [vmem:[%s12923_s0 + $0x88] sm:$0xff]  }
   0xe   :  { %v7763_v40 = vld [vmem:[%s12923_s0 + $0x270] sm:$0xff]   ;;  %v7765_v42 = vld [vmem:[%s12923_s0 + $0x278] sm:$0xff]   ;;  %v7767_v44 = vld [vmem:[%s12923_s0 + $0x280] sm:$0xff]  }
   0xf   :  { %7227 = vmatpush3.bf16.msra.mxu0 %v7727_v4  ;;  %7719 = vmatpush3.bf16.msra.mxu1 %v7727_v4  ;;  %v7764_v41 = vld [vmem:[%s12923_s0 + $0x90] sm:$0xff]   ;;  %v7766_v43 = vld [vmem:[%s12923_s0 + $0x98] sm:$0xff]   ;;  %v7768_v45 = vld [vmem:[%s12923_s0 + $0xa0] sm:$0xff]  }
  0x10   :  { %v7769_v46 = vld [vmem:[%s12923_s0 + $0x288] sm:$0xff]   ;;  %v7771_v48 = vld [vmem:[%s12923_s0 + $0x290] sm:$0xff]   ;;  %v7773_v50 = vld [vmem:[%s12923_s0 + $0x298] sm:$0xff]  }
  0x11   :  { %v7770_v47 = vld [vmem:[%s12923_s0 + $0xa8] sm:$0xff]   ;;  %v7772_v49 = vld [vmem:[%s12923_s0 + $0xb0] sm:$0xff]   ;;  %v7774_v51 = vld [vmem:[%s12923_s0 + $0xb8] sm:$0xff]  }
  0x12   :  { %7229 = vmatmul.mubr.msk.bf16.vlgmr.msra.gmra.mxu0 %vm891_vm1, %v7728_v5  ;;  %7473 = vmatmul.mubr.msk.bf16.vlgmr.msra.gmra.mxu1 %vm891_vm1, %v7729_v6  ;;  %v7775_v52 = vld [vmem:[%s12923_s0 + $0x2a0] sm:$0xff]   ;;  %v7777_v54 = vld [vmem:[%s12923_s0 + $0x2a8] sm:$0xff]   ;;  %v7779_v62 = vld [vmem:[%s12923_s0 + $0x2b0] sm:$0xff]  }
  0x13   :  { %7232 = vmatprep.mubr.msk.bf16.mxu0 %vm7854_vm0, %v12926_v0  ;;  %7476 = vmatprep.mubr.msk.bf16.mxu1 %vm7854_vm0, %v12926_v0  ;;  %v7776_v53 = vld [vmem:[%s12923_s0 + $0xc0] sm:$0xff]   ;;  %v7778_v61 = vld [vmem:[%s12923_s0 + $0xc8] sm:$0xff]  }
  0x1a   :  { %7233 = vmatmul.mubr.msk.bf16.gmra.mxu0 %vm891_vm1, %v7730_v7  ;;  %7477 = vmatmul.mubr.msk.bf16.gmra.mxu1 %vm891_vm1, %v7731_v8  ;;  %v7780_v8 = vld [vmem:[%s12923_s0 + $0xd0] sm:$0xff]  }
  0x1b   :  { %7236 = vmatprep.mubr.msk.bf16.mxu0 %vm7854_vm0, %v12926_v0  ;;  %7480 = vmatprep.mubr.msk.bf16.mxu1 %vm7854_vm0, %v12926_v0 }
  0x22   :  { %7237 = vmatmul.mubr.msk.bf16.gmra.mxu0 %vm891_vm1, %v7732_v9  ;;  %7481 = vmatmul.mubr.msk.bf16.gmra.mxu1 %vm891_vm1, %v7733_v10  ;;  %v7781_v9 = vld [vmem:[%s12923_s0 + $0x2b8] sm:$0xff]  }
  0x23   :  { %7240 = vmatprep.mubr.msk.bf16.mxu0 %vm7854_vm0, %v12926_v0  ;;  %7484 = vmatprep.mubr.msk.bf16.mxu1 %vm7854_vm0, %v12926_v0 }
  0x2a   :  { %7241 = vmatmul.mubr.msk.bf16.gmra.mxu0 %vm891_vm1, %v7734_v11  ;;  %7485 = vmatmul.mubr.msk.bf16.gmra.mxu1 %vm891_vm1, %v7735_v12 }
  0x2b   :  { %7244 = vmatprep.mubr.msk.bf16.mxu0 %vm7854_vm0, %v12926_v0  ;;  %7488 = vmatprep.mubr.msk.bf16.mxu1 %vm7854_vm0, %v12926_v0 }
  0x32   :  { %7245 = vmatmul.mubr.msk.bf16.gmra.mxu0 %vm891_vm1, %v7736_v13  ;;  %7489 = vmatmul.mubr.msk.bf16.gmra.mxu1 %vm891_vm1, %v7737_v14 }
  0x33   :  { %7248 = vmatprep.mubr.msk.bf16.mxu0 %vm7854_vm0, %v12926_v0  ;;  %7492 = vmatprep.mubr.msk.bf16.mxu1 %vm7854_vm0, %v12926_v0 }
  0x3a   :  { %7249 = vmatmul.mubr.msk.bf16.gmra.mxu0 %vm891_vm1, %v7738_v15  ;;  %7493 = vmatmul.mubr.msk.bf16.gmra.mxu1 %vm891_vm1, %v7739_v16 }
  0x3b   :  { %7252 = vmatprep.mubr.msk.bf16.mxu0 %vm7854_vm0, %v12926_v0  ;;  %7496 = vmatprep.mubr.msk.bf16.mxu1 %vm7854_vm0, %v12926_v0 }
  0x42   :  { %7253 = vmatmul.mubr.msk.bf16.gmra.mxu0 %vm891_vm1, %v7740_v17  ;;  %7497 = vmatmul.mubr.msk.bf16.gmra.mxu1 %vm891_vm1, %v7741_v18  ;;  %v7782_v18 = vld [vmem:[%s12923_s0 + $0xd8] sm:$0xff]  }
  0x43   :  { %7256 = vmatprep.mubr.msk.bf16.mxu0 %vm7854_vm0, %v12926_v0  ;;  %7500 = vmatprep.mubr.msk.bf16.mxu1 %vm7854_vm0, %v12926_v0 }
  0x4a   :  { %7257 = vmatmul.mubr.msk.bf16.gmra.mxu0 %vm891_vm1, %v7742_v19  ;;  %7501 = vmatmul.mubr.msk.bf16.gmra.mxu1 %vm891_vm1, %v7743_v20  ;;  %v7783_v19 = vld [vmem:[%s12923_s0 + $0x2c0] sm:$0xff]  }
  0x4b   :  { %7260 = vmatprep.mubr.msk.bf16.mxu0 %vm7854_vm0, %v12926_v0  ;;  %7504 = vmatprep.mubr.msk.bf16.mxu1 %vm7854_vm0, %v12926_v0 }
  0x52   :  { %7261 = vmatmul.mubr.msk.bf16.gmra.mxu0 %vm891_vm1, %v7744_v21  ;;  %7505 = vmatmul.mubr.msk.bf16.gmra.mxu1 %vm891_vm1, %v7745_v22 }
  0x53   :  { %7264 = vmatprep.mubr.msk.bf16.mxu0 %vm7854_vm0, %v12926_v0  ;;  %7508 = vmatprep.mubr.msk.bf16.mxu1 %vm7854_vm0, %v12926_v0 }
  0x5a   :  { %7265 = vmatmul.mubr.msk.bf16.gmra.mxu0 %vm891_vm1, %v7746_v23  ;;  %7509 = vmatmul.mubr.msk.bf16.gmra.mxu1 %vm891_vm1, %v7747_v24 }
  0x5b   :  { %7268 = vmatprep.mubr.msk.bf16.mxu0 %vm7854_vm0, %v12926_v0  ;;  %7512 = vmatprep.mubr.msk.bf16.mxu1 %vm7854_vm0, %v12926_v0 }
  0x62   :  { %7269 = vmatmul.mubr.msk.bf16.gmra.mxu0 %vm891_vm1, %v7748_v25  ;;  %7513 = vmatmul.mubr.msk.bf16.gmra.mxu1 %vm891_vm1, %v7749_v26 }
  0x63   :  { %7272 = vmatprep.mubr.msk.bf16.mxu0 %vm7854_vm0, %v12926_v0  ;;  %7516 = vmatprep.mubr.msk.bf16.mxu1 %vm7854_vm0, %v12926_v0 }
  0x6a   :  { %7273 = vmatmul.mubr.msk.bf16.gmra.mxu0 %vm891_vm1, %v7750_v27  ;;  %7517 = vmatmul.mubr.msk.bf16.gmra.mxu1 %vm891_vm1, %v7751_v28  ;;  %v7784_v28 = vld [vmem:[%s12923_s0 + $0xe0] sm:$0xff]  }
  0x6b   :  { %7276 = vmatprep.mubr.msk.bf16.mxu0 %vm7854_vm0, %v12926_v0  ;;  %7520 = vmatprep.mubr.msk.bf16.mxu1 %vm7854_vm0, %v12926_v0 }
  0x72   :  { %7277 = vmatmul.mubr.msk.bf16.gmra.mxu0 %vm891_vm1, %v7752_v29  ;;  %7521 = vmatmul.mubr.msk.bf16.gmra.mxu1 %vm891_vm1, %v7753_v30  ;;  %v7785_v29 = vld [vmem:[%s12923_s0 + $0x2c8] sm:$0xff]  }
  0x73   :  { %7280 = vmatprep.mubr.msk.bf16.mxu0 %vm7854_vm0, %v12926_v0  ;;  %7524 = vmatprep.mubr.msk.bf16.mxu1 %vm7854_vm0, %v12926_v0 }
  0x7a   :  { %7281 = vmatmul.mubr.msk.bf16.gmra.mxu0 %vm891_vm1, %v7754_v31  ;;  %7525 = vmatmul.mubr.msk.bf16.gmra.mxu1 %vm891_vm1, %v7755_v32 }
  0x7b   :  { %7284 = vmatprep.mubr.msk.bf16.mxu0 %vm7854_vm0, %v12926_v0  ;;  %7528 = vmatprep.mubr.msk.bf16.mxu1 %vm7854_vm0, %v12926_v0 }
  0x82   :  { %7285 = vmatmul.mubr.msk.bf16.gmra.mxu0 %vm891_vm1, %v7756_v33  ;;  %7529 = vmatmul.mubr.msk.bf16.gmra.mxu1 %vm891_vm1, %v7757_v34 }
  0x83   :  { %7288 = vmatprep.mubr.msk.bf16.mxu0 %vm7854_vm0, %v12926_v0  ;;  %7532 = vmatprep.mubr.msk.bf16.mxu1 %vm7854_vm0, %v12926_v0 }
  0x8a   :  { %7289 = vmatmul.mubr.msk.bf16.gmra.mxu0 %vm891_vm1, %v7758_v35  ;;  %7533 = vmatmul.mubr.msk.bf16.gmra.mxu1 %vm891_vm1, %v7759_v36 }
  0x8b   :  { %7292 = vmatprep.mubr.msk.bf16.mxu0 %vm7854_vm0, %v12926_v0  ;;  %7536 = vmatprep.mubr.msk.bf16.mxu1 %vm7854_vm0, %v12926_v0 }
  0x92   :  { %7293 = vmatmul.mubr.msk.bf16.gmra.mxu0 %vm891_vm1, %v7760_v37  ;;  %7537 = vmatmul.mubr.msk.bf16.gmra.mxu1 %vm891_vm1, %v7761_v38  ;;  %v7786_v38 = vld [vmem:[%s12923_s0 + $0xe8] sm:$0xff]  }
  0x93   :  { %7296 = vmatprep.mubr.msk.bf16.mxu0 %vm7854_vm0, %v12926_v0  ;;  %7540 = vmatprep.mubr.msk.bf16.mxu1 %vm7854_vm0, %v12926_v0 }
  0x9a   :  { %7297 = vmatmul.mubr.msk.bf16.gmra.mxu0 %vm891_vm1, %v7762_v39  ;;  %7541 = vmatmul.mubr.msk.bf16.gmra.mxu1 %vm891_vm1, %v7763_v40  ;;  %v7787_v39 = vld [vmem:[%s12923_s0 + $0x2d0] sm:$0xff]  }
  0x9b   :  { %7300 = vmatprep.mubr.msk.bf16.mxu0 %vm7854_vm0, %v12926_v0  ;;  %7544 = vmatprep.mubr.msk.bf16.mxu1 %vm7854_vm0, %v12926_v0 }
  0xa2   :  { %7301 = vmatmul.mubr.msk.bf16.gmra.mxu0 %vm891_vm1, %v7764_v41  ;;  %7545 = vmatmul.mubr.msk.bf16.gmra.mxu1 %vm891_vm1, %v7765_v42 }
  0xa3   :  { %7304 = vmatprep.mubr.msk.bf16.mxu0 %vm7854_vm0, %v12926_v0  ;;  %7548 = vmatprep.mubr.msk.bf16.mxu1 %vm7854_vm0, %v12926_v0 }
  0xaa   :  { %7305 = vmatmul.mubr.msk.bf16.gmra.mxu0 %vm891_vm1, %v7766_v43  ;;  %7549 = vmatmul.mubr.msk.bf16.gmra.mxu1 %vm891_vm1, %v7767_v44 }
  0xab   :  { %7308 = vmatprep.mubr.msk.bf16.mxu0 %vm7854_vm0, %v12926_v0  ;;  %7552 = vmatprep.mubr.msk.bf16.mxu1 %vm7854_vm0, %v12926_v0 }
  0xb2   :  { %7309 = vmatmul.mubr.msk.bf16.gmra.mxu0 %vm891_vm1, %v7768_v45  ;;  %7553 = vmatmul.mubr.msk.bf16.gmra.mxu1 %vm891_vm1, %v7769_v46 }
  0xb3   :  { %7312 = vmatprep.mubr.msk.bf16.mxu0 %vm7854_vm0, %v12926_v0  ;;  %7556 = vmatprep.mubr.msk.bf16.mxu1 %vm7854_vm0, %v12926_v0 }
  0xba   :  { %7313 = vmatmul.mubr.msk.bf16.gmra.mxu0 %vm891_vm1, %v7770_v47  ;;  %7557 = vmatmul.mubr.msk.bf16.gmra.mxu1 %vm891_vm1, %v7771_v48  ;;  %v7788_v48 = vld [vmem:[%s12923_s0 + $0xf0] sm:$0xff]  }
  0xbb   :  { %7316 = vmatprep.mubr.msk.bf16.mxu0 %vm7854_vm0, %v12926_v0  ;;  %7560 = vmatprep.mubr.msk.bf16.mxu1 %vm7854_vm0, %v12926_v0 }
  0xc2   :  { %7317 = vmatmul.mubr.msk.bf16.gmra.mxu0 %vm891_vm1, %v7772_v49  ;;  %7561 = vmatmul.mubr.msk.bf16.gmra.mxu1 %vm891_vm1, %v7773_v50  ;;  %v7789_v49 = vld [vmem:[%s12923_s0 + $0x2d8] sm:$0xff]  }
  0xc3   :  { %7320 = vmatprep.mubr.msk.bf16.mxu0 %vm7854_vm0, %v12926_v0  ;;  %7564 = vmatprep.mubr.msk.bf16.mxu1 %vm7854_vm0, %v12926_v0 }
  0xca   :  { %7321 = vmatmul.mubr.msk.bf16.gmra.mxu0 %vm891_vm1, %v7774_v51  ;;  %7565 = vmatmul.mubr.msk.bf16.gmra.mxu1 %vm891_vm1, %v7775_v52 }
  0xcb   :  { %7324 = vmatprep.mubr.msk.bf16.mxu0 %vm7854_vm0, %v12926_v0  ;;  %7568 = vmatprep.mubr.msk.bf16.mxu1 %vm7854_vm0, %v12926_v0 }
  0xd2   :  { %v8195_v55 = vpop.f32.mrf.mxu0  ;;  %v8197_v56 = vpop.f32.mrf.mxu1  ;;  %7325 = vmatmul.mubr.msk.bf16.gmra.mxu0 %vm891_vm1, %v7776_v53  ;;  %7569 = vmatmul.mubr.msk.bf16.gmra.mxu1 %vm891_vm1, %v7777_v54 }
  0xd3   :  { %2496 = vrot.lane.b32.xlu0 %v8195_v55, %s7855_s8  ;;  %7328 = vmatprep.mubr.msk.bf16.mxu0 %vm7854_vm0, %v12926_v0 }
  0xd4   :  { %v7230_v57 = vpop.f32.mrf.mxu0  ;;  %v7474_v58 = vpop.f32.mrf.mxu1  ;;  %7572 = vmatprep.mubr.msk.bf16.mxu1 %vm7854_vm0, %v12926_v0 }
  0xd6   :  { %v8207_v59 = vpop.f32.mrf.mxu0  ;;  %v8209_v60 = vpop.f32.mrf.mxu1 }
  0xd7   :  { %2742 = vrot.lane.b32.xlu1 %v8209_v60, %s7855_s8  ;;  %2740 = vrot.lane.b32.xlu0 %v8197_v56, %s7855_s8 }
  0xd8   :  { %v7231_v63 = vpop.f32.mrf.mxu0  ;;  %v7475_v1 = vpop.f32.mrf.mxu1 }
  0xd9   :  { %v7791_v63 = vld [vmem:[%s12923_s0 + $0x2e0] sm:$0xff]  }
  0xda   :  { %v8221_v2 = vpop.f32.mrf.mxu0  ;;  %v8223_v3 = vpop.f32.mrf.mxu1  ;;  %7329 = vmatmul.mubr.msk.bf16.gmra.mxu0 %vm891_vm1, %v7778_v61  ;;  %7573 = vmatmul.mubr.msk.bf16.gmra.mxu1 %vm891_vm1, %v7779_v62  ;;  %v7790_v62 = vld [vmem:[%s12923_s0 + $0xf8] sm:$0xff]  }
  0xdb   :  { %2498 = vrot.lane.b32.xlu0 %v8207_v59, %s7855_s8  ;;  %2500 = vrot.lane.b32.xlu1 %v8221_v2, %s7855_s8 }
  0xdc   :  { %v7234_v4 = vpop.f32.mrf.mxu0  ;;  %v7478_v5 = vpop.f32.mrf.mxu1  ;;  %7332 = vmatprep.mubr.msk.bf16.mxu0 %vm7854_vm0, %v12926_v0  ;;  %7576 = vmatprep.mubr.msk.bf16.mxu1 %vm7854_vm0, %v12926_v0 }
  0xde   :  { %v8235_v6 = vpop.f32.mrf.mxu0  ;;  %v8237_v7 = vpop.f32.mrf.mxu1 }
  0xdf   :  { %2744 = vrot.lane.b32.xlu0 %v8223_v3, %s7855_s8  ;;  %2502 = vrot.lane.b32.xlu1 %v8235_v6, %s7855_s8 }
  0xe0   :  { %v7235_v10 = vpop.f32.mrf.mxu0  ;;  %v7479_v11 = vpop.f32.mrf.mxu1 }
  0xe2   :  { %v8249_v12 = vpop.f32.mrf.mxu0  ;;  %v8251_v13 = vpop.f32.mrf.mxu1  ;;  %7333 = vmatmul.mubr.msk.bf16.gmra.mxu0 %vm891_vm1, %v7780_v8  ;;  %7577 = vmatmul.mubr.msk.bf16.gmra.mxu1 %vm891_vm1, %v7781_v9 }
  0xe3   :  { %2746 = vrot.lane.b32.xlu1 %v8237_v7, %s7855_s8  ;;  %2504 = vrot.lane.b32.xlu0 %v8249_v12, %s7855_s8 }
  0xe4   :  { %v7238_v14 = vpop.f32.mrf.mxu0  ;;  %v7482_v15 = vpop.f32.mrf.mxu1  ;;  %7336 = vmatprep.mubr.msk.bf16.mxu0 %vm7854_vm0, %v12926_v0  ;;  %7580 = vmatprep.mubr.msk.bf16.mxu1 %vm7854_vm0, %v12926_v0 }
  0xe5   :  { %v7792_v15 = vld [vmem:[%s12923_s0 + $0x100] sm:$0xff]  }
  0xe6   :  { %v8263_v16 = vpop.f32.mrf.mxu0  ;;  %v8265_v17 = vpop.f32.mrf.mxu1 }
  0xe7   :  { %2748 = vrot.lane.b32.xlu0 %v8251_v13, %s7855_s8  ;;  %2506 = vrot.lane.b32.xlu1 %v8263_v16, %s7855_s8 }
  0xe8   :  { %v7239_v20 = vpop.f32.mrf.mxu0  ;;  %v7483_v21 = vpop.f32.mrf.mxu1 }
  0xea   :  { %v8277_v22 = vpop.f32.mrf.mxu0  ;;  %v8279_v23 = vpop.f32.mrf.mxu1  ;;  %7337 = vmatmul.mubr.msk.bf16.gmra.mxu0 %vm891_vm1, %v7782_v18  ;;  %7581 = vmatmul.mubr.msk.bf16.gmra.mxu1 %vm891_vm1, %v7783_v19  ;;  %v7793_v18 = vld [vmem:[%s12923_s0 + $0x2e8] sm:$0xff]  }
  0xeb   :  { %2750 = vrot.lane.b32.xlu1 %v8265_v17, %s7855_s8  ;;  %2508 = vrot.lane.b32.xlu0 %v8277_v22, %s7855_s8 }
  0xec   :  { %v7242_v24 = vpop.f32.mrf.mxu0  ;;  %v7486_v25 = vpop.f32.mrf.mxu1  ;;  %7340 = vmatprep.mubr.msk.bf16.mxu0 %vm7854_vm0, %v12926_v0  ;;  %7584 = vmatprep.mubr.msk.bf16.mxu1 %vm7854_vm0, %v12926_v0 }
  0xee   :  { %v8291_v26 = vpop.f32.mrf.mxu0  ;;  %v8293_v27 = vpop.f32.mrf.mxu1 }
  0xef   :  { %2752 = vrot.lane.b32.xlu0 %v8279_v23, %s7855_s8  ;;  %2510 = vrot.lane.b32.xlu1 %v8291_v26, %s7855_s8 }
  0xf0   :  { %v7243_v30 = vpop.f32.mrf.mxu0  ;;  %v7487_v31 = vpop.f32.mrf.mxu1 }
  0xf1   :  { %v7794_v31 = vld [vmem:[%s12923_s0 + $0x108] sm:$0xff]  }
  0xf2   :  { %v8305_v32 = vpop.f32.mrf.mxu0  ;;  %v8307_v33 = vpop.f32.mrf.mxu1  ;;  %7341 = vmatmul.mubr.msk.bf16.gmra.mxu0 %vm891_vm1, %v7784_v28  ;;  %7585 = vmatmul.mubr.msk.bf16.gmra.mxu1 %vm891_vm1, %v7785_v29 }
  0xf3   :  { %2754 = vrot.lane.b32.xlu1 %v8293_v27, %s7855_s8  ;;  %2512 = vrot.lane.b32.xlu0 %v8305_v32, %s7855_s8 }
  0xf4   :  { %v7246_v34 = vpop.f32.mrf.mxu0  ;;  %v7490_v35 = vpop.f32.mrf.mxu1  ;;  %7344 = vmatprep.mubr.msk.bf16.mxu0 %vm7854_vm0, %v12926_v0  ;;  %7588 = vmatprep.mubr.msk.bf16.mxu1 %vm7854_vm0, %v12926_v0 }
  0xf5   :  { %v7795_v34 = vld [vmem:[%s12923_s0 + $0x2f0] sm:$0xff]  }
  0xf6   :  { %v8319_v36 = vpop.f32.mrf.mxu0  ;;  %v8321_v37 = vpop.f32.mrf.mxu1 }
  0xf7   :  { %2756 = vrot.lane.b32.xlu0 %v8307_v33, %s7855_s8  ;;  %2514 = vrot.lane.b32.xlu1 %v8319_v36, %s7855_s8 }
  0xf8   :  { %v7247_v40 = vpop.f32.mrf.mxu0  ;;  %v7491_v41 = vpop.f32.mrf.mxu1 }
  0xfa   :  { %v8333_v42 = vpop.f32.mrf.mxu0  ;;  %v8335_v43 = vpop.f32.mrf.mxu1  ;;  %7345 = vmatmul.mubr.msk.bf16.gmra.mxu0 %vm891_vm1, %v7786_v38  ;;  %7589 = vmatmul.mubr.msk.bf16.gmra.mxu1 %vm891_vm1, %v7787_v39 }
  0xfb   :  { %2758 = vrot.lane.b32.xlu1 %v8321_v37, %s7855_s8  ;;  %2516 = vrot.lane.b32.xlu0 %v8333_v42, %s7855_s8 }
  0xfc   :  { %v7250_v44 = vpop.f32.mrf.mxu0  ;;  %v7494_v45 = vpop.f32.mrf.mxu1  ;;  %7348 = vmatprep.mubr.msk.bf16.mxu0 %vm7854_vm0, %v12926_v0  ;;  %7592 = vmatprep.mubr.msk.bf16.mxu1 %vm7854_vm0, %v12926_v0 }
  0xfe   :  { %v8347_v46 = vpop.f32.mrf.mxu0  ;;  %v8349_v47 = vpop.f32.mrf.mxu1 }
  0xff   :  { %2760 = vrot.lane.b32.xlu0 %v8335_v43, %s7855_s8  ;;  %2518 = vrot.lane.b32.xlu1 %v8347_v46, %s7855_s8 }
 0x100   :  { %v7251_v50 = vpop.f32.mrf.mxu0  ;;  %v7495_v51 = vpop.f32.mrf.mxu1 }
 0x101   :  { %v7797_v50 = vld [vmem:[%s12923_s0 + $0x2f8] sm:$0xff]  }
 0x102   :  { %v8361_v52 = vpop.f32.mrf.mxu0  ;;  %v8363_v53 = vpop.f32.mrf.mxu1  ;;  %7349 = vmatmul.mubr.msk.bf16.gmra.mxu0 %vm891_vm1, %v7788_v48  ;;  %7593 = vmatmul.mubr.msk.bf16.gmra.mxu1 %vm891_vm1, %v7789_v49  ;;  %v7796_v49 = vld [vmem:[%s12923_s0 + $0x110] sm:$0xff]  }
 0x103   :  { %2762 = vrot.lane.b32.xlu1 %v8349_v47, %s7855_s8  ;;  %2520 = vrot.lane.b32.xlu0 %v8361_v52, %s7855_s8 }
 0x104   :  { %v7254_v54 = vpop.f32.mrf.mxu0  ;;  %v7498_v57 = vpop.f32.mrf.mxu1  ;;  %7352 = vmatprep.mubr.msk.bf16.mxu0 %vm7854_vm0, %v12926_v0  ;;  %7596 = vmatprep.mubr.msk.bf16.mxu1 %vm7854_vm0, %v12926_v0 }
 0x106   :  { %v8375_v58 = vpop.f32.mrf.mxu0  ;;  %v8377_v61 = vpop.f32.mrf.mxu1 }
 0x107   :  { %2764 = vrot.lane.b32.xlu0 %v8363_v53, %s7855_s8  ;;  %2522 = vrot.lane.b32.xlu1 %v8375_v58, %s7855_s8 }
 0x108   :  { %v7255_v1 = vpop.f32.mrf.mxu0  ;;  %v7499_v4 = vpop.f32.mrf.mxu1 }
 0x10a   :  { %v8389_v5 = vpop.f32.mrf.mxu0  ;;  %v8391_v8 = vpop.f32.mrf.mxu1  ;;  %7353 = vmatmul.mubr.msk.bf16.gmra.mxu0 %vm891_vm1, %v7790_v62  ;;  %7597 = vmatmul.mubr.msk.bf16.gmra.mxu1 %vm891_vm1, %v7791_v63 }
 0x10b   :  { %2766 = vrot.lane.b32.xlu1 %v8377_v61, %s7855_s8  ;;  %2524 = vrot.lane.b32.xlu0 %v8389_v5, %s7855_s8 }
 0x10c   :  { %v7258_v9 = vpop.f32.mrf.mxu0  ;;  %v7502_v10 = vpop.f32.mrf.mxu1  ;;  %7356 = vmatprep.mubr.msk.bf16.mxu0 %vm7854_vm0, %v12926_v0  ;;  %7600 = vmatprep.mubr.msk.bf16.mxu1 %vm7854_vm0, %v12926_v0 }
 0x10d   :  { %v7798_v10 = vld [vmem:[%s12923_s0 + $0x118] sm:$0xff]  }
 0x10e   :  { %v8403_v11 = vpop.f32.mrf.mxu0  ;;  %v8405_v14 = vpop.f32.mrf.mxu1 }
 0x10f   :  { %13189 = vst [vmem:[#allocation2_spill] sm:$0xff] %v8405_v14  ;;  %2768 = vrot.lane.b32.xlu0 %v8391_v8, %s7855_s8  ;;  %2526 = vrot.lane.b32.xlu1 %v8403_v11, %s7855_s8 }
 0x110   :  { %v7259_v19 = vpop.f32.mrf.mxu0  ;;  %v7503_v20 = vpop.f32.mrf.mxu1 }
 0x112   :  { %v8417_v21 = vpop.f32.mrf.mxu0  ;;  %v8419_v24 = vpop.f32.mrf.mxu1  ;;  %7357 = vmatmul.mubr.msk.bf16.gmra.mxu0 %vm891_vm1, %v7792_v15  ;;  %7601 = vmatmul.mubr.msk.bf16.gmra.mxu1 %vm891_vm1, %v7793_v18  ;;  %v7799_v15 = vld [vmem:[%s12923_s0 + $0x300] sm:$0xff]  }
 0x113   :  { %13190 = vst [vmem:[#allocation3_spill] sm:$0xff] %v8419_v24  ;;  %2770 = vrot.lane.b32.xlu1 %v8405_v14, %s7855_s8  ;;  %2528 = vrot.lane.b32.xlu0 %v8417_v21, %s7855_s8 }
 0x114   :  { %v7262_v25 = vpop.f32.mrf.mxu0  ;;  %v7506_v28 = vpop.f32.mrf.mxu1  ;;  %7360 = vmatprep.mubr.msk.bf16.mxu0 %vm7854_vm0, %v12926_v0  ;;  %7604 = vmatprep.mubr.msk.bf16.mxu1 %vm7854_vm0, %v12926_v0 }
 0x116   :  { %v8431_v29 = vpop.f32.mrf.mxu0  ;;  %v8433_v30 = vpop.f32.mrf.mxu1 }
 0x117   :  { %13191 = vst [vmem:[#allocation4_spill] sm:$0xff] %v8431_v29  ;;  %13192 = vst [vmem:[#allocation5_spill] sm:$0xff] %v8433_v30  ;;  %2772 = vrot.lane.b32.xlu0 %v8419_v24, %s7855_s8  ;;  %2530 = vrot.lane.b32.xlu1 %v8431_v29, %s7855_s8 }
 0x118   :  { %v7263_v35 = vpop.f32.mrf.mxu0  ;;  %v7507_v38 = vpop.f32.mrf.mxu1 }
 0x119   :  { %v7800_v38 = vld [vmem:[%s12923_s0 + $0x120] sm:$0xff]  }
 0x11a   :  { %v8445_v39 = vpop.f32.mrf.mxu0  ;;  %v8447_v40 = vpop.f32.mrf.mxu1  ;;  %7361 = vmatmul.mubr.msk.bf16.gmra.mxu0 %vm891_vm1, %v7794_v31  ;;  %7605 = vmatmul.mubr.msk.bf16.gmra.mxu1 %vm891_vm1, %v7795_v34 }
 0x11b   :  { %13193 = vst [vmem:[#allocation6_spill] sm:$0xff] %v8445_v39  ;;  %13194 = vst [vmem:[#allocation7_spill] sm:$0xff] %v8447_v40  ;;  %2774 = vrot.lane.b32.xlu1 %v8433_v30, %s7855_s8  ;;  %2532 = vrot.lane.b32.xlu0 %v8445_v39, %s7855_s8 }
 0x11c   :  { %v7266_v41 = vpop.f32.mrf.mxu0  ;;  %v7510_v44 = vpop.f32.mrf.mxu1  ;;  %7364 = vmatprep.mubr.msk.bf16.mxu0 %vm7854_vm0, %v12926_v0  ;;  %7608 = vmatprep.mubr.msk.bf16.mxu1 %vm7854_vm0, %v12926_v0 }
 0x11d   :  { %v7801_v41 = vld [vmem:[%s12923_s0 + $0x308] sm:$0xff]  }
 0x11e   :  { %v8459_v45 = vpop.f32.mrf.mxu0  ;;  %v8461_v48 = vpop.f32.mrf.mxu1 }
 0x11f   :  { %13195 = vst [vmem:[#allocation8_spill] sm:$0xff] %v8459_v45  ;;  %13196 = vst [vmem:[#allocation9_spill] sm:$0xff] %v8461_v48  ;;  %2776 = vrot.lane.b32.xlu0 %v8447_v40, %s7855_s8  ;;  %2534 = vrot.lane.b32.xlu1 %v8459_v45, %s7855_s8 }
 0x120   :  { %v7267_v51 = vpop.f32.mrf.mxu0  ;;  %v7511_v54 = vpop.f32.mrf.mxu1 }
 0x122   :  { %v8473_v57 = vpop.f32.mrf.mxu0  ;;  %v8475_v62 = vpop.f32.mrf.mxu1  ;;  %7365 = vmatmul.mubr.msk.bf16.gmra.mxu0 %vm891_vm1, %v7796_v49  ;;  %7609 = vmatmul.mubr.msk.bf16.gmra.mxu1 %vm891_vm1, %v7797_v50 }
 0x123   :  { %13197 = vst [vmem:[#allocation10_spill] sm:$0xff] %v8473_v57  ;;  %13198 = vst [vmem:[#allocation11_spill] sm:$0xff] %v8475_v62  ;;  %2778 = vrot.lane.b32.xlu1 %v8461_v48, %s7855_s8  ;;  %2536 = vrot.lane.b32.xlu0 %v8473_v57, %s7855_s8 }
 0x124   :  { %v7270_v63 = vpop.f32.mrf.mxu0  ;;  %v7514_v1 = vpop.f32.mrf.mxu1  ;;  %7368 = vmatprep.mubr.msk.bf16.mxu0 %vm7854_vm0, %v12926_v0  ;;  %7612 = vmatprep.mubr.msk.bf16.mxu1 %vm7854_vm0, %v12926_v0 }
 0x126   :  { %v8487_v4 = vpop.f32.mrf.mxu0  ;;  %v8489_v9 = vpop.f32.mrf.mxu1 }
 0x127   :  { %13199 = vst [vmem:[#allocation12_spill] sm:$0xff] %v8487_v4  ;;  %13200 = vst [vmem:[#allocation13_spill] sm:$0xff] %v8489_v9  ;;  %2780 = vrot.lane.b32.xlu0 %v8475_v62, %s7855_s8  ;;  %2538 = vrot.lane.b32.xlu1 %v8487_v4, %s7855_s8  ;;  %v7813_v4 = vld [vmem:[%s12923_s0 + $0x338] sm:$0xff]  }
 0x128   :  { %v7271_v18 = vpop.f32.mrf.mxu0  ;;  %v7515_v19 = vpop.f32.mrf.mxu1 }
 0x129   :  { %v7803_v18 = vld [vmem:[%s12923_s0 + $0x310] sm:$0xff]  }
 0x12a   :  { %v8501_v20 = vpop.f32.mrf.mxu0  ;;  %v8503_v25 = vpop.f32.mrf.mxu1  ;;  %7369 = vmatmul.mubr.msk.bf16.gmra.mxu0 %vm891_vm1, %v7798_v10  ;;  %7613 = vmatmul.mubr.msk.bf16.gmra.mxu1 %vm891_vm1, %v7799_v15  ;;  %v7802_v15 = vld [vmem:[%s12923_s0 + $0x128] sm:$0xff]  }
 0x12b   :  { %13201 = vst [vmem:[#allocation14_spill] sm:$0xff] %v8501_v20  ;;  %13202 = vst [vmem:[#allocation15_spill] sm:$0xff] %v8503_v25  ;;  %2782 = vrot.lane.b32.xlu1 %v8489_v9, %s7855_s8  ;;  %2540 = vrot.lane.b32.xlu0 %v8501_v20, %s7855_s8 }
 0x12c   :  { %v7274_v28 = vpop.f32.mrf.mxu0  ;;  %v7518_v31 = vpop.f32.mrf.mxu1  ;;  %7372 = vmatprep.mubr.msk.bf16.mxu0 %vm7854_vm0, %v12926_v0  ;;  %7616 = vmatprep.mubr.msk.bf16.mxu1 %vm7854_vm0, %v12926_v0 }
 0x12e   :  { %v8515_v34 = vpop.f32.mrf.mxu0  ;;  %v8517_v35 = vpop.f32.mrf.mxu1 }
 0x12f   :  { %13203 = vst [vmem:[#allocation16_spill] sm:$0xff] %v8515_v34  ;;  %13204 = vst [vmem:[#allocation17_spill] sm:$0xff] %v8517_v35  ;;  %2784 = vrot.lane.b32.xlu0 %v8503_v25, %s7855_s8  ;;  %2542 = vrot.lane.b32.xlu1 %v8515_v34, %s7855_s8 }
 0x130   :  { %v7275_v44 = vpop.f32.mrf.mxu0  ;;  %v7519_v49 = vpop.f32.mrf.mxu1 }
 0x132   :  { %v8529_v50 = vpop.f32.mrf.mxu0  ;;  %v8531_v51 = vpop.f32.mrf.mxu1  ;;  %7373 = vmatmul.mubr.msk.bf16.gmra.mxu0 %vm891_vm1, %v7800_v38  ;;  %7617 = vmatmul.mubr.msk.bf16.gmra.mxu1 %vm891_vm1, %v7801_v41 }
 0x133   :  { %13205 = vst [vmem:[#allocation18_spill] sm:$0xff] %v8529_v50  ;;  %13206 = vst [vmem:[#allocation19_spill] sm:$0xff] %v8531_v51  ;;  %2786 = vrot.lane.b32.xlu1 %v8517_v35, %s7855_s8  ;;  %2544 = vrot.lane.b32.xlu0 %v8529_v50, %s7855_s8  ;;  %v7812_v50 = vld [vmem:[%s12923_s0 + $0x150] sm:$0xff]  }
 0x134   :  { %v7278_v54 = vpop.f32.mrf.mxu0  ;;  %v7522_v63 = vpop.f32.mrf.mxu1  ;;  %7376 = vmatprep.mubr.msk.bf16.mxu0 %vm7854_vm0, %v12926_v0  ;;  %7620 = vmatprep.mubr.msk.bf16.mxu1 %vm7854_vm0, %v12926_v0 }
 0x135   :  { %v7804_v63 = vld [vmem:[%s12923_s0 + $0x130] sm:$0xff]  }
 0x136   :  { %v8543_v1 = vpop.f32.mrf.mxu0  ;;  %v8545_v10 = vpop.f32.mrf.mxu1 }
 0x137   :  { %13207 = vst [vmem:[#allocation20_spill] sm:$0xff] %v8543_v1  ;;  %13208 = vst [vmem:[#allocation21_spill] sm:$0xff] %v8545_v10  ;;  %2788 = vrot.lane.b32.xlu0 %v8531_v51, %s7855_s8  ;;  %2546 = vrot.lane.b32.xlu1 %v8543_v1, %s7855_s8 }
 0x138   :  { %v7279_v19 = vpop.f32.mrf.mxu0  ;;  %v7523_v28 = vpop.f32.mrf.mxu1 }
 0x13a   :  { %v8557_v31 = vpop.f32.mrf.mxu0  ;;  %v8559_v38 = vpop.f32.mrf.mxu1  ;;  %7377 = vmatmul.mubr.msk.bf16.gmra.mxu0 %vm891_vm1, %v7802_v15  ;;  %7621 = vmatmul.mubr.msk.bf16.gmra.mxu1 %vm891_vm1, %v7803_v18  ;;  %v7805_v15 = vld [vmem:[%s12923_s0 + $0x318] sm:$0xff]  }
 0x13b   :  { %13209 = vst [vmem:[#allocation22_spill] sm:$0xff] %v8557_v31  ;;  %13210 = vst [vmem:[#allocation23_spill] sm:$0xff] %v8559_v38  ;;  %2790 = vrot.lane.b32.xlu1 %v8545_v10, %s7855_s8  ;;  %2548 = vrot.lane.b32.xlu0 %v8557_v31, %s7855_s8 }
 0x13c   :  { %v7282_v41 = vpop.f32.mrf.mxu0  ;;  %v7526_v44 = vpop.f32.mrf.mxu1  ;;  %7380 = vmatprep.mubr.msk.bf16.mxu0 %vm7854_vm0, %v12926_v0  ;;  %7624 = vmatprep.mubr.msk.bf16.mxu1 %vm7854_vm0, %v12926_v0 }
 0x13e   :  { %v8571_v49 = vpop.f32.mrf.mxu0  ;;  %v8573_v54 = vpop.f32.mrf.mxu1 }
 0x13f   :  { %13211 = vst [vmem:[#allocation24_spill] sm:$0xff] %v8571_v49  ;;  %13212 = vst [vmem:[#allocation25_spill] sm:$0xff] %v8573_v54  ;;  %2792 = vrot.lane.b32.xlu0 %v8559_v38, %s7855_s8  ;;  %2550 = vrot.lane.b32.xlu1 %v8571_v49, %s7855_s8  ;;  %v13215_v38 = vmov 0.0  }
 0x140   :  { %v7283_v18 = vpop.f32.mrf.mxu0  ;;  %v7527_v19 = vpop.f32.mrf.mxu1 }
 0x142   :  { %v8585_v28 = vpop.f32.mrf.mxu0  ;;  %v8587_v41 = vpop.f32.mrf.mxu1  ;;  %7381 = vmatmul.mubr.msk.bf16.gmra.mxu0 %vm891_vm1, %v7804_v63  ;;  %7625 = vmatmul.mubr.msk.bf16.gmra.mxu1 %vm891_vm1, %v7805_v15  ;;  %v7806_v15 = vld [vmem:[%s12923_s0 + $0x138] sm:$0xff]  }
 0x143   :  { %13213 = vst [vmem:[#allocation26_spill] sm:$0xff] %v8585_v28  ;;  %13214 = vst [vmem:[#allocation27_spill] sm:$0xff] %v8587_v41  ;;  %2794 = vrot.lane.b32.xlu1 %v8573_v54, %s7855_s8  ;;  %2552 = vrot.lane.b32.xlu0 %v8585_v28, %s7855_s8 }
 0x144   :  { %v7286_v44 = vpop.f32.mrf.mxu0  ;;  %v7530_v0 = vpop.f32.mrf.mxu1  ;;  %7384 = vmatprep.mubr.msk.bf16.mxu0 %vm7854_vm0, %v13215_v38  ;;  %7628 = vmatprep.mubr.msk.bf16.mxu1 %vm7854_vm0, %v13215_v38 }
 0x145   :  { %v2497_v18 = vpop.permute.xlu0 %2496  ;;  %v7807_v44 = vld [vmem:[%s12923_s0 + $0x320] sm:$0xff]  }
 0x146   :  { %v8599_v19 = vpop.f32.mrf.mxu0  ;;  %v8601_v63 = vpop.f32.mrf.mxu1 }
 0x147   :  { %13216 = vst [vmem:[#allocation28_spill] sm:$0xff] %v8599_v19  ;;  %13217 = vst [vmem:[#allocation29_spill] sm:$0xff] %v8601_v63  ;;  %2796 = vrot.lane.b32.xlu0 %v8587_v41, %s7855_s8  ;;  %2554 = vrot.lane.b32.xlu1 %v8599_v19, %s7855_s8 }
 0x148   :  { %v7287_v0 = vpop.f32.mrf.mxu0  ;;  %v7531_v54 = vpop.f32.mrf.mxu1 }
 0x149   :  { %v2743_v10 = vpop.permute.xlu1 %2742  ;;  %v2741_v51 = vpop.permute.xlu0 %2740  ;;  %v8628_v54 = vmax.f32 %v8195_v55, %v2497_v18 }
 0x14a   :  { %v8613_v35 = vpop.f32.mrf.mxu0  ;;  %v8615_v25 = vpop.f32.mrf.mxu1  ;;  %7385 = vmatmul.mubr.msk.bf16.gmra.mxu0 %vm891_vm1, %v7806_v15  ;;  %7629 = vmatmul.mubr.msk.bf16.gmra.mxu1 %vm891_vm1, %v7807_v44  ;;  %v8642_v18 = vmax.f32 %v8197_v56, %v2741_v51  ;;  %v8663_v51 = vmax.f32 %v8209_v60, %v2743_v10 }
 0x14b   :  { %13218 = vst [vmem:[#allocation30_spill] sm:$0xff] %v8613_v35  ;;  %13219 = vst [vmem:[#allocation31_spill] sm:$0xff] %v8615_v25  ;;  %2798 = vrot.lane.b32.xlu1 %v8601_v63, %s7855_s8  ;;  %2556 = vrot.lane.b32.xlu0 %v8613_v35, %s7855_s8  ;;  %v7810_v35 = vld [vmem:[%s12923_s0 + $0x148] sm:$0xff]  }
 0x14c   :  { %v7290_v41 = vpop.f32.mrf.mxu0  ;;  %v7534_v9 = vpop.f32.mrf.mxu1  ;;  %7388 = vmatprep.mubr.msk.bf16.mxu0 %vm7854_vm0, %v13215_v38  ;;  %7632 = vmatprep.mubr.msk.bf16.mxu1 %vm7854_vm0, %v13215_v38 }
 0x14d   :  { %v2499_v15 = vpop.permute.xlu0 %2498  ;;  %v2501_v0 = vpop.permute.xlu1 %2500  ;;  %v7808_v41 = vld [vmem:[%s12923_s0 + $0x140] sm:$0xff]  }
 0x14e   :  { %v8630_v44 = vpop.f32.mrf.mxu0  ;;  %v8632_v62 = vpop.f32.mrf.mxu1  ;;  %v8645_v63 = vmax.f32 %v8207_v59, %v2499_v15 }
 0x14f   :  { %13220 = vst [vmem:[#allocation32_spill] sm:$0xff] %v8630_v44  ;;  %13221 = vst [vmem:[#allocation33_spill] sm:$0xff] %v8632_v62  ;;  %3701 = vrot.lane.b32.xlu1 %v8628_v54, %s7856_s17  ;;  %2800 = vrot.lane.b32.xlu0 %v8615_v25, %s7855_s8  ;;  %v7809_v25 = vld [vmem:[%s12923_s0 + $0x328] sm:$0xff]  }
 0x150   :  { %v7291_v9 = vpop.f32.mrf.mxu0  ;;  %v7535_v55 = vpop.f32.mrf.mxu1 }
 0x151   :  { %v2745_v48 = vpop.permute.xlu0 %2744  ;;  %v2503_v40 = vpop.permute.xlu1 %2502 }
 0x152   :  { %v8647_v30 = vpop.f32.mrf.mxu0  ;;  %v8649_v24 = vpop.f32.mrf.mxu1  ;;  %7389 = vmatmul.mubr.msk.bf16.gmra.mxu0 %vm891_vm1, %v7808_v41  ;;  %7633 = vmatmul.mubr.msk.bf16.gmra.mxu1 %vm891_vm1, %v7809_v25 }
 0x153   :  { %13222 = vst [vmem:[#allocation34_spill] sm:$0xff] %v8647_v30  ;;  %13223 = vst [vmem:[#allocation35_spill] sm:$0xff] %v8649_v24  ;;  %3945 = vrot.lane.b32.xlu1 %v8642_v18, %s7856_s17  ;;  %3703 = vrot.lane.b32.xlu0 %v8645_v63, %s7856_s17 }
 0x154   :  { %v7294_v56 = vpop.f32.mrf.mxu0  ;;  %v7538_v59 = vpop.f32.mrf.mxu1  ;;  %7392 = vmatprep.mubr.msk.bf16.mxu0 %vm7854_vm0, %v13215_v38  ;;  %7636 = vmatprep.mubr.msk.bf16.mxu1 %vm7854_vm0, %v13215_v38 }
 0x155   :  { %v2747_v15 = vpop.permute.xlu1 %2746  ;;  %v8665_v41 = vpop.permute.xlu0 %2504 }
 0x156   :  { %v8669_v9 = vpop.f32.mrf.mxu0  ;;  %v8671_v55 = vpop.f32.mrf.mxu1 }
 0x157   :  { %13224 = vst [vmem:[#allocation36_spill] sm:$0xff] %v8669_v9  ;;  %13225 = vst [vmem:[#allocation37_spill] sm:$0xff] %v8671_v55  ;;  %3947 = vrot.lane.b32.xlu0 %v8663_v51, %s7856_s17  ;;  %2558 = vrot.lane.b32.xlu1 %v8630_v44, %s7855_s8  ;;  %v8694_v44 = vmax.f32 %v8221_v2, %v2501_v0  ;;  %v8715_v0 = vmax.f32 %v8223_v3, %v2745_v48 }
 0x158   :  { %v7295_v25 = vpop.f32.mrf.mxu0  ;;  %v7539_v56 = vpop.f32.mrf.mxu1 }
 0x159   :  { %v8677_v60 = vpop.permute.xlu0 %2748  ;;  %v8679_v10 = vpop.permute.xlu1 %2506  ;;  %13228 = vst [vmem:[#allocation40_spill] sm:$0xff] %v8694_v44  ;;  %13231 = vst [vmem:[#allocation43_spill] sm:$0xff] %v8715_v0 }
 0x15a   :  { %v8681_v59 = vpop.f32.mrf.mxu0  ;;  %v8683_v14 = vpop.f32.mrf.mxu1  ;;  %7393 = vmatmul.mubr.msk.bf16.gmra.mxu0 %vm891_vm1, %v7810_v35 }
 0x15b   :  { %13226 = vst [vmem:[#allocation38_spill] sm:$0xff] %v8681_v59  ;;  %13227 = vst [vmem:[#allocation39_spill] sm:$0xff] %v8683_v14  ;;  %2802 = vrot.lane.b32.xlu1 %v8632_v62, %s7855_s8  ;;  %2560 = vrot.lane.b32.xlu0 %v8647_v30, %s7855_s8 }
 0x15c   :  { %v7298_v25 = vpop.f32.mrf.mxu0  ;;  %v7542_v56 = vpop.f32.mrf.mxu1  ;;  %7396 = vmatprep.mubr.msk.bf16.mxu0 %vm7854_vm0, %v13215_v38 }
 0x15d   :  { %v8696_v19 = vpop.permute.xlu1 %2750  ;;  %v8698_v28 = vpop.permute.xlu0 %2508  ;;  %v7811_v25 = vld [vmem:[%s12923_s0 + $0x330] sm:$0xff]   ;;  %v8718_v56 = vmax.f32 %v8235_v6, %v2503_v40  ;;  %v8735_v40 = vmax.f32 %v8237_v7, %v2747_v15 }
 0x15e   :  { %v8702_v49 = vpop.f32.mrf.mxu0  ;;  %v8704_v62 = vpop.f32.mrf.mxu1  ;;  %7637 = vmatmul.mubr.msk.bf16.gmra.mxu1 %vm891_vm1, %v7811_v25 }
 0x15f   :  { %13229 = vst [vmem:[#allocation41_spill] sm:$0xff] %v8702_v49  ;;  %13230 = vst [vmem:[#allocation42_spill] sm:$0xff] %v8704_v62  ;;  %3705 = vrot.lane.b32.xlu1 %v8694_v44, %s7856_s17  ;;  %2804 = vrot.lane.b32.xlu0 %v8649_v24, %s7855_s8 }
 0x160   :  { %v7299_v2 = vpop.f32.mrf.mxu0  ;;  %v7543_v35 = vpop.f32.mrf.mxu1  ;;  %13232 = vst [vmem:[#allocation44_spill] sm:$0xff] %v8718_v56  ;;  %7640 = vmatprep.mubr.msk.bf16.mxu1 %vm7854_vm0, %v13215_v38  ;;  %13235 = vst [vmem:[#allocation47_spill] sm:$0xff] %v8735_v40 }
 0x161   :  { %v8720_v30 = vpop.permute.xlu0 %2752  ;;  %v8722_v31 = vpop.permute.xlu1 %2510 }
 0x162   :  { %v8726_v1 = vpop.f32.mrf.mxu0  ;;  %v8728_v24 = vpop.f32.mrf.mxu1  ;;  %7397 = vmatmul.mubr.msk.bf16.gmra.mxu0 %vm891_vm1, %v7812_v50 }
 0x163   :  { %13233 = vst [vmem:[#allocation45_spill] sm:$0xff] %v8726_v1  ;;  %13234 = vst [vmem:[#allocation46_spill] sm:$0xff] %v8728_v24  ;;  %3949 = vrot.lane.b32.xlu1 %v8715_v0, %s7856_s17  ;;  %3707 = vrot.lane.b32.xlu0 %v8718_v56, %s7856_s17 }
 0x164   :  { %v7302_v3 = vpop.f32.mrf.mxu0  ;;  %v7546_v6 = vpop.f32.mrf.mxu1  ;;  %7400 = vmatprep.mubr.msk.bf16.mxu0 %vm7854_vm0, %v13215_v38 }
 0x165   :  { %v8737_v48 = vpop.permute.xlu1 %2754  ;;  %v8739_v25 = vpop.permute.xlu0 %2512 }
 0x166   :  { %v8741_v2 = vpop.f32.mrf.mxu0  ;;  %v8743_v35 = vpop.f32.mrf.mxu1  ;;  %7641 = vmatmul.mubr.msk.bf16.gmra.mxu1 %vm891_vm1, %v7813_v4 }
 0x167   :  { %13236 = vst [vmem:[#allocation48_spill] sm:$0xff] %v8741_v2  ;;  %13237 = vst [vmem:[#allocation49_spill] sm:$0xff] %v8743_v35  ;;  %3951 = vrot.lane.b32.xlu0 %v8735_v40, %s7856_s17  ;;  %2562 = vrot.lane.b32.xlu1 %v8669_v9, %s7855_s8 }
 0x168   :  { %v7303_v7 = vpop.f32.mrf.mxu0  ;;  %v7547_v15 = vpop.f32.mrf.mxu1  ;;  %7644 = vmatprep.mubr.msk.bf16.mxu1 %vm7854_vm0, %v13215_v38 }
 0x169   :  { %v8753_v3 = vpop.permute.xlu0 %2756  ;;  %v8755_v6 = vpop.permute.xlu1 %2514  ;;  %v8773_v15 = vmax.f32 %v8249_v12, %v8665_v41  ;;  %v8791_v41 = vmax.f32 %v8251_v13, %v8677_v60  ;;  %v8815_v60 = vmax.f32 %v8265_v17, %v8696_v19 }
 0x16a   :  { %v8759_v34 = vpop.f32.mrf.mxu0  ;;  %v8761_v20 = vpop.f32.mrf.mxu1 }
 0x16b   :  { %13238 = vst [vmem:[#allocation50_spill] sm:$0xff] %v8759_v34  ;;  %13239 = vst [vmem:[#allocation51_spill] sm:$0xff] %v8761_v20  ;;  %2806 = vrot.lane.b32.xlu1 %v8671_v55, %s7855_s8  ;;  %2564 = vrot.lane.b32.xlu0 %v8681_v59, %s7855_s8 }
 0x16c   :  { %v7306_v50 = vpop.f32.mrf.mxu0  ;;  %v7550_v7 = vpop.f32.mrf.mxu1  ;;  %13240 = vst [vmem:[#allocation52_spill] sm:$0xff] %v8773_v15  ;;  %13243 = vst [vmem:[#allocation55_spill] sm:$0xff] %v8791_v41 }
 0x16d   :  { %v8775_v9 = vpop.permute.xlu1 %2758  ;;  %v8777_v57 = vpop.permute.xlu0 %2516  ;;  %v8795_v50 = vmax.f32 %v8263_v16, %v8679_v10  ;;  %13247 = vst [vmem:[#allocation59_spill] sm:$0xff] %v8815_v60 }
 0x16e   :  { %v8781_v40 = vpop.f32.mrf.mxu0  ;;  %v8783_v55 = vpop.f32.mrf.mxu1 }
 0x16f   :  { %13241 = vst [vmem:[#allocation53_spill] sm:$0xff] %v8781_v40  ;;  %13242 = vst [vmem:[#allocation54_spill] sm:$0xff] %v8783_v55  ;;  %3709 = vrot.lane.b32.xlu1 %v8773_v15, %s7856_s17  ;;  %2808 = vrot.lane.b32.xlu0 %v8683_v14, %s7855_s8 }
 0x170   :  { %v7307_v4 = vpop.f32.mrf.mxu0  ;;  %v7551_v12 = vpop.f32.mrf.mxu1  ;;  %13244 = vst [vmem:[#allocation56_spill] sm:$0xff] %v8795_v50 }
 0x171   :  { %v8797_v7 = vpop.permute.xlu0 %2760  ;;  %v8799_v59 = vpop.permute.xlu1 %2518  ;;  %v7814_v4 = vld [vmem:[%s12923_s0 + $0x158] sm:$0xff]  }
 0x172   :  { %v8801_v45 = vpop.f32.mrf.mxu0  ;;  %v8803_v15 = vpop.f32.mrf.mxu1  ;;  %7401 = vmatmul.mubr.msk.bf16.gmra.mxu0 %vm891_vm1, %v7814_v4 }
 0x173   :  { %13245 = vst [vmem:[#allocation57_spill] sm:$0xff] %v8801_v45  ;;  %13246 = vst [vmem:[#allocation58_spill] sm:$0xff] %v8803_v15  ;;  %3953 = vrot.lane.b32.xlu1 %v8791_v41, %s7856_s17  ;;  %3711 = vrot.lane.b32.xlu0 %v8795_v50, %s7856_s17 }
 0x174   :  { %v7310_v13 = vpop.f32.mrf.mxu0  ;;  %v7554_v16 = vpop.f32.mrf.mxu1  ;;  %7404 = vmatprep.mubr.msk.bf16.mxu0 %vm7854_vm0, %v13215_v38 }
 0x175   :  { %v8817_v10 = vpop.permute.xlu1 %2762  ;;  %v8819_v12 = vpop.permute.xlu0 %2520  ;;  %v7815_v13 = vld [vmem:[%s12923_s0 + $0x340] sm:$0xff]  }
 0x176   :  { %v8823_v14 = vpop.f32.mrf.mxu0  ;;  %v8825_v41 = vpop.f32.mrf.mxu1  ;;  %7645 = vmatmul.mubr.msk.bf16.gmra.mxu1 %vm891_vm1, %v7815_v13  ;;  %v8851_v13 = vmax.f32 %v8277_v22, %v8698_v28 }
 0x177   :  { %13248 = vst [vmem:[#allocation60_spill] sm:$0xff] %v8823_v14  ;;  %13249 = vst [vmem:[#allocation61_spill] sm:$0xff] %v8825_v41  ;;  %3955 = vrot.lane.b32.xlu0 %v8815_v60, %s7856_s17  ;;  %2566 = vrot.lane.b32.xlu1 %v8702_v49, %s7855_s8 }
 0x178   :  { %v7311_v17 = vpop.f32.mrf.mxu0  ;;  %v7555_v19 = vpop.f32.mrf.mxu1  ;;  %7648 = vmatprep.mubr.msk.bf16.mxu1 %vm7854_vm0, %v13215_v38  ;;  %13252 = vst [vmem:[#allocation64_spill] sm:$0xff] %v8851_v13 }
 0x179   :  { %v8835_v4 = vpop.permute.xlu0 %2764  ;;  %v8837_v16 = vpop.permute.xlu1 %2522 }
 0x17a   :  { %v8841_v50 = vpop.f32.mrf.mxu0  ;;  %v8843_v39 = vpop.f32.mrf.mxu1 }
 0x17b   :  { %13250 = vst [vmem:[#allocation62_spill] sm:$0xff] %v8841_v50  ;;  %13251 = vst [vmem:[#allocation63_spill] sm:$0xff] %v8843_v39  ;;  %2810 = vrot.lane.b32.xlu1 %v8704_v62, %s7855_s8  ;;  %2568 = vrot.lane.b32.xlu0 %v8726_v1, %s7855_s8  ;;  %v7816_v62 = vld [vmem:[%s12923_s0 + $0x160] sm:$0xff]  }
 0x17c   :  { %v7314_v17 = vpop.f32.mrf.mxu0  ;;  %v7558_v19 = vpop.f32.mrf.mxu1  ;;  %7405 = vmatmul.mubr.msk.bf16.gmra.mxu0 %vm891_vm1, %v7816_v62  ;;  %v8897_v62 = vmax.f32 %v8293_v27, %v8737_v48 }
 0x17d   :  { %v8853_v49 = vpop.permute.xlu1 %2766  ;;  %v8855_v60 = vpop.permute.xlu0 %2524  ;;  %v8871_v17 = vmax.f32 %v8279_v23, %v8720_v30  ;;  %v8875_v19 = vmax.f32 %v8291_v26, %v8722_v31  ;;  %7408 = vmatprep.mubr.msk.bf16.mxu0 %vm7854_vm0, %v13215_v38  ;;  %v7817_v23 = vld [vmem:[%s12923_s0 + $0x348] sm:$0xff]  }
 0x17e   :  { %v8857_v56 = vpop.f32.mrf.mxu0  ;;  %v8859_v0 = vpop.f32.mrf.mxu1  ;;  %7649 = vmatmul.mubr.msk.bf16.gmra.mxu1 %vm891_vm1, %v7817_v23  ;;  %13259 = vst [vmem:[#allocation71_spill] sm:$0xff] %v8897_v62 }
 0x17f   :  { %13253 = vst [vmem:[#allocation65_spill] sm:$0xff] %v8857_v56  ;;  %13254 = vst [vmem:[#allocation66_spill] sm:$0xff] %v8859_v0  ;;  %3713 = vrot.lane.b32.xlu1 %v8851_v13, %s7856_s17  ;;  %2812 = vrot.lane.b32.xlu0 %v8728_v24, %s7855_s8 }
 0x180   :  { %v7315_v22 = vpop.f32.mrf.mxu0  ;;  %v7559_v28 = vpop.f32.mrf.mxu1  ;;  %13255 = vst [vmem:[#allocation67_spill] sm:$0xff] %v8871_v17  ;;  %13256 = vst [vmem:[#allocation68_spill] sm:$0xff] %v8875_v19  ;;  %7652 = vmatprep.mubr.msk.bf16.mxu1 %vm7854_vm0, %v13215_v38 }
 0x181   :  { %v8877_v1 = vpop.permute.xlu0 %2768  ;;  %v8879_v44 = vpop.permute.xlu1 %2526 }
 0x182   :  { %v8883_v24 = vpop.f32.mrf.mxu0  ;;  %v8885_v22 = vpop.f32.mrf.mxu1 }
 0x183   :  { %13257 = vst [vmem:[#allocation69_spill] sm:$0xff] %v8883_v24  ;;  %13258 = vst [vmem:[#allocation70_spill] sm:$0xff] %v8885_v22  ;;  %3957 = vrot.lane.b32.xlu1 %v8871_v17, %s7856_s17  ;;  %3715 = vrot.lane.b32.xlu0 %v8875_v19, %s7856_s17  ;;  %v7818_v19 = vld [vmem:[%s12923_s0 + $0x168] sm:$0xff]  }
 0x184   :  { %v7318_v26 = vpop.f32.mrf.mxu0  ;;  %v7562_v30 = vpop.f32.mrf.mxu1  ;;  %7409 = vmatmul.mubr.msk.bf16.gmra.mxu0 %vm891_vm1, %v7818_v19  ;;  %v8953_v19 = vmax.f32 %v8307_v33, %v8753_v3  ;;  %v8975_v3 = vmax.f32 %v8321_v37, %v8775_v9 }
 0x185   :  { %v8899_v31 = vpop.permute.xlu1 %2770  ;;  %v8901_v28 = vpop.permute.xlu0 %2528  ;;  %7412 = vmatprep.mubr.msk.bf16.mxu0 %vm7854_vm0, %v13215_v38 }
 0x186   :  { %13260 = vst [vmem:[#allocation72_spill] sm:$0xff] %v8899_v31  ;;  %v8905_v13 = vpop.f32.mrf.mxu0  ;;  %v8907_v17 = vpop.f32.mrf.mxu1  ;;  %13270 = vst [vmem:[#allocation82_spill] sm:$0xff] %v8953_v19 }
 0x187   :  { %13261 = vst [vmem:[#allocation73_spill] sm:$0xff] %v8905_v13  ;;  %13262 = vst [vmem:[#allocation74_spill] sm:$0xff] %v8907_v17  ;;  %3959 = vrot.lane.b32.xlu0 %v8897_v62, %s7856_s17  ;;  %2570 = vrot.lane.b32.xlu1 %v8741_v2, %s7855_s8 }
 0x188   :  { %v7319_v23 = vpop.f32.mrf.mxu0  ;;  %v7563_v27 = vpop.f32.mrf.mxu1  ;;  %13275 = vst [vmem:[#allocation87_spill] sm:$0xff] %v8975_v3 }
 0x189   :  { %v8913_v48 = vpop.permute.xlu0 %2772  ;;  %v8915_v26 = vpop.permute.xlu1 %2530 }
 0x18a   :  { %13263 = vst [vmem:[#allocation75_spill] sm:$0xff] %v8913_v48  ;;  %v8917_v30 = vpop.f32.mrf.mxu0  ;;  %v8919_v31 = vpop.f32.mrf.mxu1  ;;  %v8931_v48 = vmax.f32 %v8305_v32, %v8739_v25 }
 0x18b   :  { %13264 = vst [vmem:[#allocation76_spill] sm:$0xff] %v8917_v30  ;;  %13265 = vst [vmem:[#allocation77_spill] sm:$0xff] %v8919_v31  ;;  %2814 = vrot.lane.b32.xlu1 %v8743_v35, %s7855_s8  ;;  %2572 = vrot.lane.b32.xlu0 %v8759_v34, %s7855_s8 }
 0x18c   :  { %v7322_v23 = vpop.f32.mrf.mxu0  ;;  %v7566_v27 = vpop.f32.mrf.mxu1  ;;  %13266 = vst [vmem:[#allocation78_spill] sm:$0xff] %v8931_v48 }
 0x18d   :  { %v8933_v2 = vpop.permute.xlu1 %2774  ;;  %v8935_v62 = vpop.permute.xlu0 %2532  ;;  %v7819_v23 = vld [vmem:[%s12923_s0 + $0x350] sm:$0xff]   ;;  %v8957_v27 = vmax.f32 %v8319_v36, %v8755_v6 }
 0x18e   :  { %13267 = vst [vmem:[#allocation79_spill] sm:$0xff] %v8933_v2  ;;  %v8939_v29 = vpop.f32.mrf.mxu0  ;;  %v8941_v35 = vpop.f32.mrf.mxu1  ;;  %7653 = vmatmul.mubr.msk.bf16.gmra.mxu1 %vm891_vm1, %v7819_v23 }
 0x18f   :  { %13268 = vst [vmem:[#allocation80_spill] sm:$0xff] %v8939_v29  ;;  %13269 = vst [vmem:[#allocation81_spill] sm:$0xff] %v8941_v35  ;;  %3717 = vrot.lane.b32.xlu1 %v8931_v48, %s7856_s17  ;;  %2816 = vrot.lane.b32.xlu0 %v8761_v20, %s7855_s8 }
 0x190   :  { %v7323_v32 = vpop.f32.mrf.mxu0  ;;  %v7567_v25 = vpop.f32.mrf.mxu1  ;;  %13271 = vst [vmem:[#allocation83_spill] sm:$0xff] %v8957_v27  ;;  %7656 = vmatprep.mubr.msk.bf16.mxu1 %vm7854_vm0, %v13215_v38 }
 0x191   :  { %v8959_v2 = vpop.permute.xlu0 %2776  ;;  %v8961_v34 = vpop.permute.xlu1 %2534 }
 0x192   :  { %13272 = vst [vmem:[#allocation84_spill] sm:$0xff] %v8959_v2  ;;  %v8965_v20 = vpop.f32.mrf.mxu0  ;;  %v8967_v32 = vpop.f32.mrf.mxu1 }
 0x193   :  { %13273 = vst [vmem:[#allocation85_spill] sm:$0xff] %v8965_v20  ;;  %13274 = vst [vmem:[#allocation86_spill] sm:$0xff] %v8967_v32  ;;  %3961 = vrot.lane.b32.xlu1 %v8953_v19, %s7856_s17  ;;  %3719 = vrot.lane.b32.xlu0 %v8957_v27, %s7856_s17  ;;  %v7820_v19 = vld [vmem:[%s12923_s0 + $0x170] sm:$0xff]  }
 0x194   :  { %v7326_v33 = vpop.f32.mrf.mxu0  ;;  %v7570_v36 = vpop.f32.mrf.mxu1  ;;  %7413 = vmatmul.mubr.msk.bf16.gmra.mxu0 %vm891_vm1, %v7820_v19 }
 0x195   :  { %v8977_v6 = vpop.permute.xlu1 %2778  ;;  %v8979_v23 = vpop.permute.xlu0 %2536  ;;  %7416 = vmatprep.mubr.msk.bf16.mxu0 %vm7854_vm0, %v13215_v38 }
 0x196   :  { %13276 = vst [vmem:[#allocation88_spill] sm:$0xff] %v8977_v6  ;;  %v8981_v25 = vpop.f32.mrf.mxu0  ;;  %v8983_v2 = vpop.f32.mrf.mxu1 }
 0x197   :  { %13277 = vst [vmem:[#allocation89_spill] sm:$0xff] %v8981_v25  ;;  %13278 = vst [vmem:[#allocation90_spill] sm:$0xff] %v8983_v2  ;;  %3963 = vrot.lane.b32.xlu0 %v8975_v3, %s7856_s17  ;;  %2574 = vrot.lane.b32.xlu1 %v8781_v40, %s7855_s8  ;;  %v7821_v3 = vld [vmem:[%s12923_s0 + $0x358] sm:$0xff]  }
 0x198   :  { %v7327_v37 = vpop.f32.mrf.mxu0  ;;  %v7571_v9 = vpop.f32.mrf.mxu1  ;;  %7657 = vmatmul.mubr.msk.bf16.gmra.mxu1 %vm891_vm1, %v7821_v3 }
 0x199   :  { %v8993_v33 = vpop.permute.xlu0 %2780  ;;  %v8995_v36 = vpop.permute.xlu1 %2538  ;;  %v9013_v9 = vmax.f32 %v8333_v42, %v8777_v57  ;;  %7660 = vmatprep.mubr.msk.bf16.mxu1 %vm7854_vm0, %v13215_v38  ;;  %v9031_v57 = vmax.f32 %v8335_v43, %v8797_v7 }
 0x19a   :  { %13279 = vst [vmem:[#allocation91_spill] sm:$0xff] %v8993_v33  ;;  %v8999_v6 = vpop.f32.mrf.mxu0  ;;  %v9001_v27 = vpop.f32.mrf.mxu1 }
 0x19b   :  { %13280 = vst [vmem:[#allocation92_spill] sm:$0xff] %v8999_v6  ;;  %13281 = vst [vmem:[#allocation93_spill] sm:$0xff] %v9001_v27  ;;  %2818 = vrot.lane.b32.xlu1 %v8783_v55, %s7855_s8  ;;  %2576 = vrot.lane.b32.xlu0 %v8801_v45, %s7855_s8 }
 0x19c   :  { %v7330_v19 = vpop.f32.mrf.mxu0  ;;  %v7574_v37 = vpop.f32.mrf.mxu1  ;;  %13282 = vst [vmem:[#allocation94_spill] sm:$0xff] %v9013_v9  ;;  %13286 = vst [vmem:[#allocation98_spill] sm:$0xff] %v9031_v57 }
 0x19d   :  { %v9015_v33 = vpop.permute.xlu1 %2782  ;;  %v9017_v40 = vpop.permute.xlu0 %2540  ;;  %v9035_v19 = vmax.f32 %v8347_v46, %v8799_v59  ;;  %v9055_v59 = vmax.f32 %v8349_v47, %v8817_v10 }
 0x19e   :  { %13283 = vst [vmem:[#allocation95_spill] sm:$0xff] %v9015_v33  ;;  %v9021_v48 = vpop.f32.mrf.mxu0  ;;  %v9023_v55 = vpop.f32.mrf.mxu1 }
 0x19f   :  { %13284 = vst [vmem:[#allocation96_spill] sm:$0xff] %v9021_v48  ;;  %13285 = vst [vmem:[#allocation97_spill] sm:$0xff] %v9023_v55  ;;  %3721 = vrot.lane.b32.xlu1 %v9013_v9, %s7856_s17  ;;  %2820 = vrot.lane.b32.xlu0 %v8803_v15, %s7855_s8 }
 0x1a0   :  { %v7331_v3 = vpop.f32.mrf.mxu0  ;;  %v7575_v42 = vpop.f32.mrf.mxu1  ;;  %13287 = vst [vmem:[#allocation99_spill] sm:$0xff] %v9035_v19  ;;  %13291 = vst [vmem:[#allocation103_spill] sm:$0xff] %v9055_v59 }
 0x1a1   :  { %v9037_v37 = vpop.permute.xlu0 %2784  ;;  %v9039_v33 = vpop.permute.xlu1 %2542  ;;  %v7822_v3 = vld [vmem:[%s12923_s0 + $0x178] sm:$0xff]  }
 0x1a2   :  { %13288 = vst [vmem:[#allocation100_spill] sm:$0xff] %v9037_v37  ;;  %v9041_v45 = vpop.f32.mrf.mxu0  ;;  %v9043_v9 = vpop.f32.mrf.mxu1  ;;  %7417 = vmatmul.mubr.msk.bf16.gmra.mxu0 %vm891_vm1, %v7822_v3 }
 0x1a3   :  { %13289 = vst [vmem:[#allocation101_spill] sm:$0xff] %v9041_v45  ;;  %13290 = vst [vmem:[#allocation102_spill] sm:$0xff] %v9043_v9  ;;  %3965 = vrot.lane.b32.xlu1 %v9031_v57, %s7856_s17  ;;  %3723 = vrot.lane.b32.xlu0 %v9035_v19, %s7856_s17 }
 0x1a4   :  { %v7334_v43 = vpop.f32.mrf.mxu0  ;;  %v7578_v46 = vpop.f32.mrf.mxu1  ;;  %7420 = vmatprep.mubr.msk.bf16.mxu0 %vm7854_vm0, %v13215_v38 }
 0x1a5   :  { %v9057_v7 = vpop.permute.xlu1 %2786  ;;  %v9059_v42 = vpop.permute.xlu0 %2544  ;;  %v7823_v43 = vld [vmem:[%s12923_s0 + $0x360] sm:$0xff]  }
 0x1a6   :  { %13292 = vst [vmem:[#allocation104_spill] sm:$0xff] %v9057_v7  ;;  %v9063_v15 = vpop.f32.mrf.mxu0  ;;  %v9065_v37 = vpop.f32.mrf.mxu1  ;;  %7661 = vmatmul.mubr.msk.bf16.gmra.mxu1 %vm891_vm1, %v7823_v43  ;;  %v9091_v43 = vmax.f32 %v8361_v52, %v8819_v12 }
 0x1a7   :  { %13293 = vst [vmem:[#allocation105_spill] sm:$0xff] %v9063_v15  ;;  %13294 = vst [vmem:[#allocation106_spill] sm:$0xff] %v9065_v37  ;;  %3967 = vrot.lane.b32.xlu0 %v9055_v59, %s7856_s17  ;;  %2578 = vrot.lane.b32.xlu1 %v8823_v14, %s7855_s8 }
 0x1a8   :  { %v7335_v47 = vpop.f32.mrf.mxu0  ;;  %v7579_v10 = vpop.f32.mrf.mxu1  ;;  %7664 = vmatprep.mubr.msk.bf16.mxu1 %vm7854_vm0, %v13215_v38  ;;  %13298 = vst [vmem:[#allocation110_spill] sm:$0xff] %v9091_v43 }
 0x1a9   :  { %v9075_v3 = vpop.permute.xlu0 %2788  ;;  %v9077_v46 = vpop.permute.xlu1 %2546 }
 0x1aa   :  { %13295 = vst [vmem:[#allocation107_spill] sm:$0xff] %v9075_v3  ;;  %v9081_v7 = vpop.f32.mrf.mxu0  ;;  %v9083_v19 = vpop.f32.mrf.mxu1 }
 0x1ab   :  { %13296 = vst [vmem:[#allocation108_spill] sm:$0xff] %v9081_v7  ;;  %13297 = vst [vmem:[#allocation109_spill] sm:$0xff] %v9083_v19  ;;  %2822 = vrot.lane.b32.xlu1 %v8825_v41, %s7855_s8  ;;  %2580 = vrot.lane.b32.xlu0 %v8841_v50, %s7855_s8  ;;  %v7824_v41 = vld [vmem:[%s12923_s0 + $0x180] sm:$0xff]  }
 0x1ac   :  { %v7338_v47 = vpop.f32.mrf.mxu0  ;;  %v7582_v10 = vpop.f32.mrf.mxu1  ;;  %7421 = vmatmul.mubr.msk.bf16.gmra.mxu0 %vm891_vm1, %v7824_v41 }
 0x1ad   :  { %v9093_v3 = vpop.permute.xlu1 %2790  ;;  %v9095_v14 = vpop.permute.xlu0 %2548  ;;  %v9111_v47 = vmax.f32 %v8363_v53, %v8835_v4  ;;  %v9115_v10 = vmax.f32 %v8375_v58, %v8837_v16  ;;  %7424 = vmatprep.mubr.msk.bf16.mxu0 %vm7854_vm0, %v13215_v38  ;;  %v7825_v53 = vld [vmem:[%s12923_s0 + $0x368] sm:$0xff]   ;;  %v9137_v4 = vmax.f32 %v8377_v61, %v8853_v49 }
 0x1ae   :  { %13299 = vst [vmem:[#allocation111_spill] sm:$0xff] %v9093_v3  ;;  %v9097_v59 = vpop.f32.mrf.mxu0  ;;  %v9099_v57 = vpop.f32.mrf.mxu1  ;;  %7665 = vmatmul.mubr.msk.bf16.gmra.mxu1 %vm891_vm1, %v7825_v53 }
 0x1af   :  { %13300 = vst [vmem:[#allocation112_spill] sm:$0xff] %v9097_v59  ;;  %13301 = vst [vmem:[#allocation113_spill] sm:$0xff] %v9099_v57  ;;  %3725 = vrot.lane.b32.xlu1 %v9091_v43, %s7856_s17  ;;  %2824 = vrot.lane.b32.xlu0 %v8843_v39, %s7855_s8 }
 0x1b0   :  { %v7339_v52 = vpop.f32.mrf.mxu0  ;;  %v7583_v12 = vpop.f32.mrf.mxu1  ;;  %13302 = vst [vmem:[#allocation114_spill] sm:$0xff] %v9111_v47  ;;  %13303 = vst [vmem:[#allocation115_spill] sm:$0xff] %v9115_v10  ;;  %7668 = vmatprep.mubr.msk.bf16.mxu1 %vm7854_vm0, %v13215_v38 }
 0x1b1   :  { %v9117_v3 = vpop.permute.xlu0 %2792  ;;  %v9119_v50 = vpop.permute.xlu1 %2550  ;;  %13307 = vst [vmem:[#allocation119_spill] sm:$0xff] %v9137_v4 }
 0x1b2   :  { %13304 = vst [vmem:[#allocation116_spill] sm:$0xff] %v9117_v3  ;;  %v9123_v39 = vpop.f32.mrf.mxu0  ;;  %v9125_v52 = vpop.f32.mrf.mxu1 }
 0x1b3   :  { %13305 = vst [vmem:[#allocation117_spill] sm:$0xff] %v9123_v39  ;;  %13306 = vst [vmem:[#allocation118_spill] sm:$0xff] %v9125_v52  ;;  %3969 = vrot.lane.b32.xlu1 %v9111_v47, %s7856_s17  ;;  %3727 = vrot.lane.b32.xlu0 %v9115_v10, %s7856_s17  ;;  %v7826_v10 = vld [vmem:[%s12923_s0 + $0x188] sm:$0xff]  }
 0x1b4   :  { %v7342_v58 = vpop.f32.mrf.mxu0  ;;  %v7586_v41 = vpop.f32.mrf.mxu1  ;;  %7425 = vmatmul.mubr.msk.bf16.gmra.mxu0 %vm891_vm1, %v7826_v10  ;;  %v9193_v10 = vmax.f32 %v8391_v8, %v8877_v1 }
 0x1b5   :  { %v9139_v16 = vpop.permute.xlu1 %2794  ;;  %v9141_v12 = vpop.permute.xlu0 %2552  ;;  %7428 = vmatprep.mubr.msk.bf16.mxu0 %vm7854_vm0, %v13215_v38 }
 0x1b6   :  { %13308 = vst [vmem:[#allocation120_spill] sm:$0xff] %v9139_v16  ;;  %v9145_v3 = vpop.f32.mrf.mxu0  ;;  %v9147_v47 = vpop.f32.mrf.mxu1  ;;  %13319 = vst [vmem:[#allocation131_spill] sm:$0xff] %v9193_v10 }
 0x1b7   :  { %13309 = vst [vmem:[#allocation121_spill] sm:$0xff] %v9145_v3  ;;  %13310 = vst [vmem:[#allocation122_spill] sm:$0xff] %v9147_v47  ;;  %3971 = vrot.lane.b32.xlu0 %v9137_v4, %s7856_s17  ;;  %2582 = vrot.lane.b32.xlu1 %v8857_v56, %s7855_s8 }
 0x1b8   :  { %v7343_v53 = vpop.f32.mrf.mxu0  ;;  %v7587_v61 = vpop.f32.mrf.mxu1 }
 0x1b9   :  { %v9153_v49 = vpop.permute.xlu0 %2796  ;;  %v9155_v58 = vpop.permute.xlu1 %2554 }
 0x1ba   :  { %13311 = vst [vmem:[#allocation123_spill] sm:$0xff] %v9153_v49  ;;  %v9157_v41 = vpop.f32.mrf.mxu0  ;;  %v9159_v16 = vpop.f32.mrf.mxu1  ;;  %v9171_v49 = vmax.f32 %v8389_v5, %v8855_v60 }
 0x1bb   :  { %13312 = vst [vmem:[#allocation124_spill] sm:$0xff] %v9157_v41  ;;  %13313 = vst [vmem:[#allocation125_spill] sm:$0xff] %v9159_v16  ;;  %2826 = vrot.lane.b32.xlu1 %v8859_v0, %s7855_s8  ;;  %2584 = vrot.lane.b32.xlu0 %v8883_v24, %s7855_s8 }
 0x1bc   :  { %v7346_v53 = vpop.f32.mrf.mxu0  ;;  %v7590_v61 = vpop.f32.mrf.mxu1  ;;  %13314 = vst [vmem:[#allocation126_spill] sm:$0xff] %v9171_v49 }
 0x1bd   :  { %v9173_v56 = vpop.permute.xlu1 %2798  ;;  %v9175_v4 = vpop.permute.xlu0 %2556  ;;  %v7827_v53 = vld [vmem:[%s12923_s0 + $0x370] sm:$0xff]   ;;  %v9197_v61 = vmax.f32 %v8403_v11, %v8879_v44 }
 0x1be   :  { %13315 = vst [vmem:[#allocation127_spill] sm:$0xff] %v9173_v56  ;;  %13316 = vst [vmem:[#allocation128_spill] sm:$0xff] %v9175_v4  ;;  %v9179_v43 = vpop.f32.mrf.mxu0  ;;  %v9181_v0 = vpop.f32.mrf.mxu1  ;;  %7669 = vmatmul.mubr.msk.bf16.gmra.mxu1 %vm891_vm1, %v7827_v53  ;;  %v9202_v56 = vld [vmem:[%s12924_s2] ss:$0 sm:$0xff] }
 0x1bf   :  { %13317 = vst [vmem:[#allocation129_spill] sm:$0xff] %v9179_v43  ;;  %13318 = vst [vmem:[#allocation130_spill] sm:$0xff] %v9181_v0  ;;  %3729 = vrot.lane.b32.xlu1 %v9171_v49, %s7856_s17  ;;  %2828 = vrot.lane.b32.xlu0 %v8885_v22, %s7855_s8 }
 0x1c0   :  { %v7347_v5 = vpop.f32.mrf.mxu0  ;;  %v7591_v60 = vpop.f32.mrf.mxu1  ;;  %13320 = vst [vmem:[#allocation132_spill] sm:$0xff] %v9197_v61  ;;  %7672 = vmatprep.mubr.msk.bf16.mxu1 %vm7854_vm0, %v13215_v38 }
 0x1c1   :  { %v3702_v24 = vpop.permute.xlu1 %3701  ;;  %v9204_v49 = vpop.permute.xlu0 %2800 }
 0x1c2   :  { %13321 = vst [vmem:[#allocation133_spill] sm:$0xff] %v9204_v49  ;;  %v4424_v53 = vmax.f32 %v8628_v54, %v3702_v24  ;;  %v9209_v5 = vpop.f32.mrf.mxu0  ;;  %v9211_v8 = vpop.f32.mrf.mxu1 }
 0x1c3   :  { %13322 = vst [vmem:[#allocation134_spill] sm:$0xff] %v9209_v5  ;;  %13323 = vst [vmem:[#allocation135_spill] sm:$0xff] %v9211_v8  ;;  %3973 = vrot.lane.b32.xlu1 %v9193_v10, %s7856_s17  ;;  %3731 = vrot.lane.b32.xlu0 %v9197_v61, %s7856_s17  ;;  %v7828_v10 = vld [vmem:[%s12923_s0 + $0x190] sm:$0xff]  }
 0x1c4   :  { %v4672_v11 = vadd.f32 %v9202_v56, %v4424_v53  ;;  %v7350_v1 = vpop.f32.mrf.mxu0  ;;  %v7594_v44 = vpop.f32.mrf.mxu1  ;;  %7429 = vmatmul.mubr.msk.bf16.gmra.mxu0 %vm891_vm1, %v7828_v10  ;;  %v7829_v10 = vld [vmem:[%s12923_s0 + $0x378] sm:$0xff]  }
 0x1c5   :  { %v3946_v60 = vpop.permute.xlu1 %3945  ;;  %v3704_v22 = vpop.permute.xlu0 %3703  ;;  %7432 = vmatprep.mubr.msk.bf16.mxu0 %vm7854_vm0, %v13215_v38 }
 0x1c6   :  { %v4913_v49 = vmax.f32 %v4672_v11, 0.0  ;;  %v4546_v4 = vmax.f32 %v8642_v18, %v3946_v60  ;;  %v4425_v24 = vmax.f32 %v8645_v63, %v3704_v22  ;;  %v9220_v54 = vpop.f32.mrf.mxu0  ;;  %v9222_v8 = vpop.f32.mrf.mxu1  ;;  %7673 = vmatmul.mubr.msk.bf16.gmra.mxu1 %vm891_vm1, %v7829_v10 }
 0x1c7   :  { %13324 = vst [vmem:[#allocation136_spill] sm:$0xff] %v9220_v54  ;;  %13325 = vst [vmem:[#allocation137_spill] sm:$0xff] %v9222_v8  ;;  %2586 = vrot.lane.b32.xlu1 %v8905_v13, %s7855_s8  ;;  %2588 = vrot.lane.b32.xlu0 %v8917_v30, %s7855_s8  ;;  %v13329_v30 = vld [vmem:[#allocation4_spill] sm:$0xff] }
 0x1c8   :  { %v6854_v53 = vpack.c.bf16 %v4913_v49, %v4913_v49  ;;  %v4794_v18 = vadd.f32 %v9202_v56, %v4546_v4  ;;  %v4673_v63 = vadd.f32 %v9202_v56, %v4425_v24  ;;  %v7351_v22 = vpop.f32.mrf.mxu0  ;;  %v7595_v11 = vpop.f32.mrf.mxu1  ;;  %v9262_v13 = vmax.f32 %v13329_v30, %v8915_v26  ;;  %7676 = vmatprep.mubr.msk.bf16.mxu1 %vm7854_vm0, %v13215_v38 }
 0x1c9   :  { %v3948_v1 = vpop.permute.xlu0 %3947  ;;  %v9234_v44 = vpop.permute.xlu1 %2558 }
 0x1ca   :  { %6120 = vst.msk [vmem:[%s12925_s3] sm:$0xf] %vm6119_vm2, %v6854_v53  ;;  %v5035_v49 = vmax.f32 %v4794_v18, 0.0  ;;  %v4914_v60 = vmax.f32 %v4673_v63, 0.0  ;;  %v4547_v4 = vmax.f32 %v8663_v51, %v3948_v1  ;;  %v9243_v24 = vpop.f32.mrf.mxu0  ;;  %v9245_v22 = vpop.f32.mrf.mxu1  ;;  %v9258_v1 = vmax.f32 %v8417_v21, %v8901_v28  ;;  %13330 = vst [vmem:[#allocation4_spill] sm:$0xff] %v9262_v13 }
 0x1cb   :  { %13326 = vst [vmem:[#allocation138_spill] sm:$0xff] %v9243_v24  ;;  %13327 = vst [vmem:[#allocation139_spill] sm:$0xff] %v9245_v22  ;;  %2830 = vrot.lane.b32.xlu1 %v8907_v17, %s7855_s8  ;;  %2832 = vrot.lane.b32.xlu0 %v8919_v31, %s7855_s8  ;;  %v13338_v31 = vld [vmem:[#allocation43_spill] sm:$0xff] }
 0x1cc   :  { %v6976_v11 = vpack.c.bf16 %v5035_v49, %v5035_v49  ;;  %v6855_v53 = vpack.c.bf16 %v4914_v60, %v4914_v60  ;;  %v4795_v18 = vadd.f32 %v9202_v56, %v4547_v4  ;;  %v7354_v63 = vpop.f32.mrf.mxu0  ;;  %v7598_v51 = vpop.f32.mrf.mxu1  ;;  %13328 = vst [vmem:[#allocation140_spill] sm:$0xff] %v9258_v1 }
 0x1cd   :  { %v9264_v17 = vpop.permute.xlu1 %2802  ;;  %v9266_v61 = vpop.permute.xlu0 %2560  ;;  %v7830_v51 = vld [vmem:[%s12923_s0 + $0x198] sm:$0xff]  }
 0x1ce   :  { %13331 = vst [vmem:[#allocation141_spill] sm:$0xff] %v9264_v17  ;;  %6242 = vst.msk [vmem:[%s12925_s3 + $0x1e8] sm:$0xf] %vm6119_vm2, %v6976_v11  ;;  %v5036_v21 = vmax.f32 %v4795_v18, 0.0  ;;  %v9278_v28 = vpop.f32.mrf.mxu0  ;;  %v9280_v26 = vpop.f32.mrf.mxu1  ;;  %v13335_v11 = vld [vmem:[#allocation40_spill] sm:$0xff]  ;;  %7433 = vmatmul.mubr.msk.bf16.gmra.mxu0 %vm891_vm1, %v7830_v51 }
 0x1cf   :  { %6121 = vst.msk [vmem:[%s12925_s3 + $0x4] sm:$0xf] %vm6119_vm2, %v6855_v53  ;;  %13332 = vst [vmem:[#allocation142_spill] sm:$0xff] %v9278_v28  ;;  %3733 = vrot.lane.b32.xlu1 %v9258_v1, %s7856_s17  ;;  %3735 = vrot.lane.b32.xlu0 %v9262_v13, %s7856_s17  ;;  %v13339_v17 = vld [vmem:[#allocation44_spill] sm:$0xff] }
 0x1d0   :  { %13333 = vst [vmem:[#allocation143_spill] sm:$0xff] %v9280_v26  ;;  %v6977_v30 = vpack.c.bf16 %v5036_v21, %v5036_v21  ;;  %v7355_v49 = vpop.f32.mrf.mxu0  ;;  %v7599_v60 = vpop.f32.mrf.mxu1  ;;  %7436 = vmatprep.mubr.msk.bf16.mxu0 %vm7854_vm0, %v13215_v38 }
 0x1d1   :  { %v3706_v4 = vpop.permute.xlu1 %3705  ;;  %v9286_v10 = vpop.permute.xlu0 %2804 }
 0x1d2   :  { %13334 = vst [vmem:[#allocation144_spill] sm:$0xff] %v9286_v10  ;;  %6243 = vst.msk [vmem:[%s12925_s3 + $0x1ec] sm:$0xf] %vm6119_vm2, %v6977_v30  ;;  %v4426_v53 = vmax.f32 %v13335_v11, %v3706_v4  ;;  %v9293_v18 = vpop.f32.mrf.mxu0  ;;  %v9295_v63 = vpop.f32.mrf.mxu1 }
 0x1d3   :  { %13336 = vst [vmem:[#allocation40_spill] sm:$0xff] %v9293_v18  ;;  %13337 = vst [vmem:[#allocation145_spill] sm:$0xff] %v9295_v63  ;;  %2590 = vrot.lane.b32.xlu1 %v8939_v29, %s7855_s8  ;;  %2592 = vrot.lane.b32.xlu0 %v8965_v20, %s7855_s8 }
 0x1d4   :  { %v4674_v21 = vadd.f32 %v9202_v56, %v4426_v53  ;;  %v7358_v49 = vpop.f32.mrf.mxu0  ;;  %v7602_v30 = vpop.f32.mrf.mxu1  ;;  %v7831_v53 = vld [vmem:[%s12923_s0 + $0x380] sm:$0xff]  }
 0x1d5   :  { %v3950_v60 = vpop.permute.xlu1 %3949  ;;  %v3708_v4 = vpop.permute.xlu0 %3707  ;;  %7677 = vmatmul.mubr.msk.bf16.gmra.mxu1 %vm891_vm1, %v7831_v53  ;;  %v13342_v30 = vld [vmem:[#allocation6_spill] sm:$0xff] }
 0x1d6   :  { %v4915_v11 = vmax.f32 %v4674_v21, 0.0  ;;  %v4548_v10 = vmax.f32 %v13338_v31, %v3950_v60  ;;  %v4427_v13 = vmax.f32 %v13339_v17, %v3708_v4  ;;  %v9310_v29 = vpop.f32.mrf.mxu0  ;;  %v9312_v1 = vpop.f32.mrf.mxu1  ;;  %v9326_v60 = vmax.f32 %v13342_v30, %v8935_v62  ;;  %v13343_v4 = vld [vmem:[#allocation8_spill] sm:$0xff]  ;;  %7680 = vmatprep.mubr.msk.bf16.mxu1 %vm7854_vm0, %v13215_v38 }
 0x1d7   :  { %13340 = vst [vmem:[#allocation43_spill] sm:$0xff] %v9310_v29  ;;  %13341 = vst [vmem:[#allocation44_spill] sm:$0xff] %v9312_v1  ;;  %2834 = vrot.lane.b32.xlu1 %v8941_v35, %s7855_s8  ;;  %2836 = vrot.lane.b32.xlu0 %v8967_v32, %s7855_s8  ;;  %v9330_v20 = vmax.f32 %v13343_v4, %v8961_v34 }
 0x1d8   :  { %v6856_v51 = vpack.c.bf16 %v4915_v11, %v4915_v11  ;;  %v4796_v21 = vadd.f32 %v9202_v56, %v4548_v10  ;;  %v4675_v31 = vadd.f32 %v9202_v56, %v4427_v13  ;;  %v7359_v17 = vpop.f32.mrf.mxu0  ;;  %v7603_v49 = vpop.f32.mrf.mxu1  ;;  %v13344_v11 = vld [vmem:[#allocation47_spill] sm:$0xff] }
 0x1d9   :  { %v3952_v35 = vpop.permute.xlu0 %3951  ;;  %v9332_v1 = vpop.permute.xlu1 %2562 }
 0x1da   :  { %6122 = vst.msk [vmem:[%s12925_s3 + $0x8] sm:$0xf] %vm6119_vm2, %v6856_v51  ;;  %v5037_v13 = vmax.f32 %v4796_v21, 0.0  ;;  %v4916_v10 = vmax.f32 %v4675_v31, 0.0  ;;  %v4549_v62 = vmax.f32 %v13344_v11, %v3952_v35  ;;  %v9341_v53 = vpop.f32.mrf.mxu0  ;;  %v9343_v17 = vpop.f32.mrf.mxu1  ;;  %v7832_v11 = vld [vmem:[%s12923_s0 + $0x1a0] sm:$0xff]  }
 0x1db   :  { %13345 = vst [vmem:[#allocation6_spill] sm:$0xff] %v9341_v53  ;;  %13346 = vst [vmem:[#allocation8_spill] sm:$0xff] %v9343_v17  ;;  %3737 = vrot.lane.b32.xlu1 %v9326_v60, %s7856_s17  ;;  %3739 = vrot.lane.b32.xlu0 %v9330_v20, %s7856_s17 }
 0x1dc   :  { %v6978_v34 = vpack.c.bf16 %v5037_v13, %v5037_v13  ;;  %v6857_v49 = vpack.c.bf16 %v4916_v10, %v4916_v10  ;;  %v4797_v30 = vadd.f32 %v9202_v56, %v4549_v62  ;;  %v7362_v4 = vpop.f32.mrf.mxu0  ;;  %v7606_v51 = vpop.f32.mrf.mxu1  ;;  %7437 = vmatmul.mubr.msk.bf16.gmra.mxu0 %vm891_vm1, %v7832_v11  ;;  %v7833_v11 = vld [vmem:[%s12923_s0 + $0x388] sm:$0xff]  }
 0x1dd   :  { %v9350_v21 = vpop.permute.xlu1 %2806  ;;  %v9352_v31 = vpop.permute.xlu0 %2564  ;;  %7440 = vmatprep.mubr.msk.bf16.mxu0 %vm7854_vm0, %v13215_v38  ;;  %v13351_v51 = vld [vmem:[#allocation52_spill] sm:$0xff]  ;;  %7681 = vmatmul.mubr.msk.bf16.gmra.mxu1 %vm891_vm1, %v7833_v11 }
 0x1de   :  { %13347 = vst [vmem:[#allocation47_spill] sm:$0xff] %v9350_v21  ;;  %6244 = vst.msk [vmem:[%s12925_s3 + $0x1f0] sm:$0xf] %vm6119_vm2, %v6978_v34  ;;  %v5038_v35 = vmax.f32 %v4797_v30, 0.0  ;;  %v9362_v13 = vpop.f32.mrf.mxu0  ;;  %v9364_v10 = vpop.f32.mrf.mxu1  ;;  %7684 = vmatprep.mubr.msk.bf16.mxu1 %vm7854_vm0, %v13215_v38 }
 0x1df   :  { %6123 = vst.msk [vmem:[%s12925_s3 + $0xc] sm:$0xf] %vm6119_vm2, %v6857_v49  ;;  %13348 = vst [vmem:[#allocation146_spill] sm:$0xff] %v9362_v13  ;;  %2594 = vrot.lane.b32.xlu1 %v8981_v25, %s7855_s8  ;;  %2596 = vrot.lane.b32.xlu0 %v8999_v6, %s7855_s8 }
 0x1e0   :  { %13349 = vst [vmem:[#allocation147_spill] sm:$0xff] %v9364_v10  ;;  %v6979_v62 = vpack.c.bf16 %v5038_v35, %v5038_v35  ;;  %v7363_v34 = vpop.f32.mrf.mxu0  ;;  %v7607_v4 = vpop.f32.mrf.mxu1 }
 0x1e1   :  { %v3710_v49 = vpop.permute.xlu1 %3709  ;;  %v9374_v30 = vpop.permute.xlu0 %2808 }
 0x1e2   :  { %13350 = vst [vmem:[#allocation148_spill] sm:$0xff] %v9374_v30  ;;  %6245 = vst.msk [vmem:[%s12925_s3 + $0x1f4] sm:$0xf] %vm6119_vm2, %v6979_v62  ;;  %v4428_v32 = vmax.f32 %v13351_v51, %v3710_v49  ;;  %v9383_v21 = vpop.f32.mrf.mxu0  ;;  %v9385_v35 = vpop.f32.mrf.mxu1  ;;  %v13354_v49 = vld [vmem:[#allocation10_spill] sm:$0xff]  ;;  %v13356_v30 = vld [vmem:[#allocation12_spill] sm:$0xff] }
 0x1e3   :  { %13352 = vst [vmem:[#allocation52_spill] sm:$0xff] %v9383_v21  ;;  %13353 = vst [vmem:[#allocation149_spill] sm:$0xff] %v9385_v35  ;;  %2838 = vrot.lane.b32.xlu1 %v8983_v2, %s7855_s8  ;;  %2840 = vrot.lane.b32.xlu0 %v9001_v27, %s7855_s8  ;;  %v9398_v51 = vmax.f32 %v13354_v49, %v8979_v23  ;;  %v9402_v6 = vmax.f32 %v13356_v30, %v8995_v36  ;;  %v13358_v2 = vld [vmem:[#allocation55_spill] sm:$0xff] }
 0x1e4   :  { %v4676_v34 = vadd.f32 %v9202_v56, %v4428_v32  ;;  %v7366_v4 = vpop.f32.mrf.mxu0  ;;  %v7610_v62 = vpop.f32.mrf.mxu1 }
 0x1e5   :  { %13355 = vst [vmem:[#allocation10_spill] sm:$0xff] %v9398_v51  ;;  %13357 = vst [vmem:[#allocation12_spill] sm:$0xff] %v9402_v6  ;;  %v3954_v25 = vpop.permute.xlu1 %3953  ;;  %v3712_v35 = vpop.permute.xlu0 %3711  ;;  %v13359_v4 = vld [vmem:[#allocation56_spill] sm:$0xff] }
 0x1e6   :  { %v4917_v27 = vmax.f32 %v4676_v34, 0.0  ;;  %v4550_v32 = vmax.f32 %v13358_v2, %v3954_v25  ;;  %v4429_v62 = vmax.f32 %v13359_v4, %v3712_v35  ;;  %v9408_v10 = vpop.f32.mrf.mxu0  ;;  %v9410_v11 = vpop.f32.mrf.mxu1 }
 0x1e7   :  { %13360 = vst [vmem:[#allocation55_spill] sm:$0xff] %v9408_v10  ;;  %13361 = vst [vmem:[#allocation56_spill] sm:$0xff] %v9410_v11  ;;  %3741 = vrot.lane.b32.xlu1 %v9398_v51, %s7856_s17  ;;  %3743 = vrot.lane.b32.xlu0 %v9402_v6, %s7856_s17  ;;  %v13362_v11 = vld [vmem:[#allocation59_spill] sm:$0xff] }
 0x1e8   :  { %v6858_v23 = vpack.c.bf16 %v4917_v27, %v4917_v27  ;;  %v4798_v36 = vadd.f32 %v9202_v56, %v4550_v32  ;;  %v4677_v30 = vadd.f32 %v9202_v56, %v4429_v62  ;;  %v7367_v34 = vpop.f32.mrf.mxu0  ;;  %v7611_v49 = vpop.f32.mrf.mxu1  ;;  %v7834_v32 = vld [vmem:[%s12923_s0 + $0x1a8] sm:$0xff]  }
 0x1e9   :  { %v3956_v2 = vpop.permute.xlu0 %3955  ;;  %v9418_v25 = vpop.permute.xlu1 %2566  ;;  %7441 = vmatmul.mubr.msk.bf16.gmra.mxu0 %vm891_vm1, %v7834_v32 }
 0x1ea   :  { %6124 = vst.msk [vmem:[%s12925_s3 + $0x10] sm:$0xf] %vm6119_vm2, %v6858_v23  ;;  %v5039_v35 = vmax.f32 %v4798_v36, 0.0  ;;  %v4918_v4 = vmax.f32 %v4677_v30, 0.0  ;;  %v4551_v51 = vmax.f32 %v13362_v11, %v3956_v2  ;;  %v9425_v6 = vpop.f32.mrf.mxu0  ;;  %v9427_v27 = vpop.f32.mrf.mxu1  ;;  %7444 = vmatprep.mubr.msk.bf16.mxu0 %vm7854_vm0, %v13215_v38 }
 0x1eb   :  { %13363 = vst [vmem:[#allocation59_spill] sm:$0xff] %v9425_v6  ;;  %13364 = vst [vmem:[#allocation150_spill] sm:$0xff] %v9427_v27  ;;  %2598 = vrot.lane.b32.xlu1 %v9021_v48, %s7855_s8  ;;  %2600 = vrot.lane.b32.xlu0 %v9041_v45, %s7855_s8 }
 0x1ec   :  { %v6980_v62 = vpack.c.bf16 %v5039_v35, %v5039_v35  ;;  %v6859_v23 = vpack.c.bf16 %v4918_v4, %v4918_v4  ;;  %v4799_v36 = vadd.f32 %v9202_v56, %v4551_v51  ;;  %v7370_v30 = vpop.f32.mrf.mxu0  ;;  %v7614_v11 = vpop.f32.mrf.mxu1  ;;  %v7835_v4 = vld [vmem:[%s12923_s0 + $0x390] sm:$0xff]  }
 0x1ed   :  { %v9438_v34 = vpop.permute.xlu1 %2810  ;;  %v9440_v49 = vpop.permute.xlu0 %2568  ;;  %7685 = vmatmul.mubr.msk.bf16.gmra.mxu1 %vm891_vm1, %v7835_v4  ;;  %v13370_v11 = vld [vmem:[#allocation16_spill] sm:$0xff] }
 0x1ee   :  { %13365 = vst [vmem:[#allocation151_spill] sm:$0xff] %v9438_v34  ;;  %6246 = vst.msk [vmem:[%s12925_s3 + $0x1f8] sm:$0xf] %vm6119_vm2, %v6980_v62  ;;  %v5040_v51 = vmax.f32 %v4799_v36, 0.0  ;;  %v9452_v2 = vpop.f32.mrf.mxu0  ;;  %v9454_v35 = vpop.f32.mrf.mxu1  ;;  %v9470_v34 = vmax.f32 %v13370_v11, %v9039_v33  ;;  %7688 = vmatprep.mubr.msk.bf16.mxu1 %vm7854_vm0, %v13215_v38 }
 0x1ef   :  { %6125 = vst.msk [vmem:[%s12925_s3 + $0x14] sm:$0xf] %vm6119_vm2, %v6859_v23  ;;  %13366 = vst [vmem:[#allocation152_spill] sm:$0xff] %v9452_v2  ;;  %2842 = vrot.lane.b32.xlu1 %v9023_v55, %s7855_s8  ;;  %2844 = vrot.lane.b32.xlu0 %v9043_v9, %s7855_s8  ;;  %v13368_v23 = vld [vmem:[#allocation14_spill] sm:$0xff] }
 0x1f0   :  { %13367 = vst [vmem:[#allocation153_spill] sm:$0xff] %v9454_v35  ;;  %v6981_v32 = vpack.c.bf16 %v5040_v51, %v5040_v51  ;;  %v7371_v62 = vpop.f32.mrf.mxu0  ;;  %v7615_v30 = vpop.f32.mrf.mxu1  ;;  %v9466_v36 = vmax.f32 %v13368_v23, %v9017_v40  ;;  %v13372_v51 = vld [vmem:[#allocation64_spill] sm:$0xff] }
 0x1f1   :  { %v3714_v45 = vpop.permute.xlu1 %3713  ;;  %v9472_v48 = vpop.permute.xlu0 %2812 }
 0x1f2   :  { %13369 = vst [vmem:[#allocation14_spill] sm:$0xff] %v9466_v36  ;;  %13371 = vst [vmem:[#allocation16_spill] sm:$0xff] %v9472_v48  ;;  %v4430_v4 = vmax.f32 %v13372_v51, %v3714_v45  ;;  %v9481_v62 = vpop.f32.mrf.mxu0  ;;  %v9483_v40 = vpop.f32.mrf.mxu1  ;;  %v13376_v45 = vld [vmem:[#allocation68_spill] sm:$0xff] }
 0x1f3   :  { %6247 = vst.msk [vmem:[%s12925_s3 + $0x1fc] sm:$0xf] %vm6119_vm2, %v6981_v32  ;;  %13373 = vst [vmem:[#allocation64_spill] sm:$0xff] %v9481_v62  ;;  %3745 = vrot.lane.b32.xlu1 %v9466_v36, %s7856_s17  ;;  %3747 = vrot.lane.b32.xlu0 %v9470_v34, %s7856_s17  ;;  %v13375_v32 = vld [vmem:[#allocation67_spill] sm:$0xff]  ;;  %v7836_v36 = vld [vmem:[%s12923_s0 + $0x1b0] sm:$0xff]  }
 0x1f4   :  { %13374 = vst [vmem:[#allocation154_spill] sm:$0xff] %v9483_v40  ;;  %v4678_v33 = vadd.f32 %v9202_v56, %v4430_v4  ;;  %v7374_v30 = vpop.f32.mrf.mxu0  ;;  %v7618_v23 = vpop.f32.mrf.mxu1  ;;  %7445 = vmatmul.mubr.msk.bf16.gmra.mxu0 %vm891_vm1, %v7836_v36  ;;  %v7837_v36 = vld [vmem:[%s12923_s0 + $0x398] sm:$0xff]  }
 0x1f5   :  { %v3958_v11 = vpop.permute.xlu1 %3957  ;;  %v3716_v9 = vpop.permute.xlu0 %3715  ;;  %7448 = vmatprep.mubr.msk.bf16.mxu0 %vm7854_vm0, %v13215_v38  ;;  %7689 = vmatmul.mubr.msk.bf16.gmra.mxu1 %vm891_vm1, %v7837_v36 }
 0x1f6   :  { %v4919_v55 = vmax.f32 %v4678_v33, 0.0  ;;  %v4552_v48 = vmax.f32 %v13375_v32, %v3958_v11  ;;  %v4431_v51 = vmax.f32 %v13376_v45, %v3716_v9  ;;  %v9492_v35 = vpop.f32.mrf.mxu0  ;;  %v9494_v40 = vpop.f32.mrf.mxu1  ;;  %7692 = vmatprep.mubr.msk.bf16.mxu1 %vm7854_vm0, %v13215_v38 }
 0x1f7   :  { %13377 = vst [vmem:[#allocation67_spill] sm:$0xff] %v9492_v35  ;;  %13378 = vst [vmem:[#allocation68_spill] sm:$0xff] %v9494_v40  ;;  %2602 = vrot.lane.b32.xlu1 %v9063_v15, %s7855_s8  ;;  %2604 = vrot.lane.b32.xlu0 %v9081_v7, %s7855_s8 }
 0x1f8   :  { %v6860_v4 = vpack.c.bf16 %v4919_v55, %v4919_v55  ;;  %v4800_v33 = vadd.f32 %v9202_v56, %v4552_v48  ;;  %v4679_v30 = vadd.f32 %v9202_v56, %v4431_v51  ;;  %v7375_v9 = vpop.f32.mrf.mxu0  ;;  %v7619_v23 = vpop.f32.mrf.mxu1  ;;  %v13379_v48 = vld [vmem:[#allocation71_spill] sm:$0xff] }
 0x1f9   :  { %v3960_v11 = vpop.permute.xlu0 %3959  ;;  %v9506_v32 = vpop.permute.xlu1 %2570 }
 0x1fa   :  { %6126 = vst.msk [vmem:[%s12925_s3 + $0x18] sm:$0xf] %vm6119_vm2, %v6860_v4  ;;  %v5041_v55 = vmax.f32 %v4800_v33, 0.0  ;;  %v4920_v45 = vmax.f32 %v4679_v30, 0.0  ;;  %v4553_v7 = vmax.f32 %v13379_v48, %v3960_v11  ;;  %v9515_v51 = vpop.f32.mrf.mxu0  ;;  %v9517_v9 = vpop.f32.mrf.mxu1  ;;  %v13382_v48 = vld [vmem:[#allocation18_spill] sm:$0xff] }
 0x1fb   :  { %13380 = vst [vmem:[#allocation71_spill] sm:$0xff] %v9515_v51  ;;  %13381 = vst [vmem:[#allocation155_spill] sm:$0xff] %v9517_v9  ;;  %2846 = vrot.lane.b32.xlu1 %v9065_v37, %s7855_s8  ;;  %2848 = vrot.lane.b32.xlu0 %v9083_v19, %s7855_s8  ;;  %v9530_v15 = vmax.f32 %v13382_v48, %v9059_v42  ;;  %v13383_v9 = vld [vmem:[#allocation20_spill] sm:$0xff]  ;;  %v7838_v48 = vld [vmem:[%s12923_s0 + $0x1b8] sm:$0xff]  }
 0x1fc   :  { %v6982_v23 = vpack.c.bf16 %v5041_v55, %v5041_v55  ;;  %v6861_v4 = vpack.c.bf16 %v4920_v45, %v4920_v45  ;;  %v4801_v33 = vadd.f32 %v9202_v56, %v4553_v7  ;;  %v7378_v30 = vpop.f32.mrf.mxu0  ;;  %v7622_v11 = vpop.f32.mrf.mxu1  ;;  %v9534_v40 = vmax.f32 %v13383_v9, %v9077_v46  ;;  %7449 = vmatmul.mubr.msk.bf16.gmra.mxu0 %vm891_vm1, %v7838_v48  ;;  %v13391_v19 = vld [vmem:[#allocation82_spill] sm:$0xff] }
 0x1fd   :  { %v9536_v37 = vpop.permute.xlu1 %2814  ;;  %v9538_v51 = vpop.permute.xlu0 %2572  ;;  %7452 = vmatprep.mubr.msk.bf16.mxu0 %vm7854_vm0, %v13215_v38 }
 0x1fe   :  { %13384 = vst [vmem:[#allocation18_spill] sm:$0xff] %v9536_v37  ;;  %6248 = vst.msk [vmem:[%s12925_s3 + $0x200] sm:$0xf] %vm6119_vm2, %v6982_v23  ;;  %v5042_v7 = vmax.f32 %v4801_v33, 0.0  ;;  %v9550_v42 = vpop.f32.mrf.mxu0  ;;  %v9552_v46 = vpop.f32.mrf.mxu1  ;;  %v13392_v37 = vld [vmem:[#allocation83_spill] sm:$0xff] }
 0x1ff   :  { %6127 = vst.msk [vmem:[%s12925_s3 + $0x1c] sm:$0xf] %vm6119_vm2, %v6861_v4  ;;  %13385 = vst [vmem:[#allocation20_spill] sm:$0xff] %v9550_v42  ;;  %3749 = vrot.lane.b32.xlu1 %v9530_v15, %s7856_s17  ;;  %3751 = vrot.lane.b32.xlu0 %v9534_v40, %s7856_s17  ;;  %v13388_v4 = vld [vmem:[#allocation78_spill] sm:$0xff] }
 0x200   :  { %13386 = vst [vmem:[#allocation156_spill] sm:$0xff] %v9552_v46  ;;  %v6983_v55 = vpack.c.bf16 %v5042_v7, %v5042_v7  ;;  %v7379_v45 = vpop.f32.mrf.mxu0  ;;  %v7623_v9 = vpop.f32.mrf.mxu1 }
 0x201   :  { %v3718_v36 = vpop.permute.xlu1 %3717  ;;  %v9558_v23 = vpop.permute.xlu0 %2816 }
 0x202   :  { %13387 = vst [vmem:[#allocation157_spill] sm:$0xff] %v9558_v23  ;;  %6249 = vst.msk [vmem:[%s12925_s3 + $0x204] sm:$0xf] %vm6119_vm2, %v6983_v55  ;;  %v4432_v33 = vmax.f32 %v13388_v4, %v3718_v36  ;;  %v9565_v30 = vpop.f32.mrf.mxu0  ;;  %v9567_v11 = vpop.f32.mrf.mxu1 }
 0x203   :  { %13389 = vst [vmem:[#allocation78_spill] sm:$0xff] %v9565_v30  ;;  %13390 = vst [vmem:[#allocation158_spill] sm:$0xff] %v9567_v11  ;;  %2606 = vrot.lane.b32.xlu1 %v9097_v59, %s7855_s8  ;;  %2608 = vrot.lane.b32.xlu0 %v9123_v39, %s7855_s8 }
 0x204   :  { %v4680_v7 = vadd.f32 %v9202_v56, %v4432_v33  ;;  %v7382_v45 = vpop.f32.mrf.mxu0  ;;  %v7626_v55 = vpop.f32.mrf.mxu1  ;;  %v7839_v33 = vld [vmem:[%s12923_s0 + $0x3a0] sm:$0xff]  }
 0x205   :  { %v3962_v9 = vpop.permute.xlu1 %3961  ;;  %v3720_v36 = vpop.permute.xlu0 %3719  ;;  %7693 = vmatmul.mubr.msk.bf16.gmra.mxu1 %vm891_vm1, %v7839_v33  ;;  %v13395_v55 = vld [vmem:[#allocation22_spill] sm:$0xff] }
 0x206   :  { %v4921_v4 = vmax.f32 %v4680_v7, 0.0  ;;  %v4554_v23 = vmax.f32 %v13391_v19, %v3962_v9  ;;  %v4433_v11 = vmax.f32 %v13392_v37, %v3720_v36  ;;  %v9582_v59 = vpop.f32.mrf.mxu0  ;;  %v9584_v46 = vpop.f32.mrf.mxu1  ;;  %v9598_v9 = vmax.f32 %v13395_v55, %v9095_v14  ;;  %v13396_v36 = vld [vmem:[#allocation24_spill] sm:$0xff]  ;;  %7696 = vmatprep.mubr.msk.bf16.mxu1 %vm7854_vm0, %v13215_v38 }
 0x207   :  { %13393 = vst [vmem:[#allocation82_spill] sm:$0xff] %v9582_v59  ;;  %13394 = vst [vmem:[#allocation83_spill] sm:$0xff] %v9584_v46  ;;  %2850 = vrot.lane.b32.xlu1 %v9099_v57, %s7855_s8  ;;  %2852 = vrot.lane.b32.xlu0 %v9125_v52, %s7855_s8  ;;  %v9602_v39 = vmax.f32 %v13396_v36, %v9119_v50 }
 0x208   :  { %v6862_v48 = vpack.c.bf16 %v4921_v4, %v4921_v4  ;;  %v4802_v7 = vadd.f32 %v9202_v56, %v4554_v23  ;;  %v4681_v19 = vadd.f32 %v9202_v56, %v4433_v11  ;;  %v7383_v37 = vpop.f32.mrf.mxu0  ;;  %v7627_v45 = vpop.f32.mrf.mxu1  ;;  %v13397_v4 = vld [vmem:[#allocation87_spill] sm:$0xff] }
 0x209   :  { %v3964_v57 = vpop.permute.xlu0 %3963  ;;  %v9604_v46 = vpop.permute.xlu1 %2574 }
 0x20a   :  { %6128 = vst.msk [vmem:[%s12925_s3 + $0x20] sm:$0xf] %vm6119_vm2, %v6862_v48  ;;  %v5043_v23 = vmax.f32 %v4802_v7, 0.0  ;;  %v4922_v11 = vmax.f32 %v4681_v19, 0.0  ;;  %v4555_v14 = vmax.f32 %v13397_v4, %v3964_v57  ;;  %v9613_v33 = vpop.f32.mrf.mxu0  ;;  %v9615_v37 = vpop.f32.mrf.mxu1  ;;  %v7840_v4 = vld [vmem:[%s12923_s0 + $0x1c0] sm:$0xff]  }
 0x20b   :  { %13398 = vst [vmem:[#allocation22_spill] sm:$0xff] %v9613_v33  ;;  %13399 = vst [vmem:[#allocation24_spill] sm:$0xff] %v9615_v37  ;;  %3753 = vrot.lane.b32.xlu1 %v9598_v9, %s7856_s17  ;;  %3755 = vrot.lane.b32.xlu0 %v9602_v39, %s7856_s17 }
 0x20c   :  { %v6984_v50 = vpack.c.bf16 %v5043_v23, %v5043_v23  ;;  %v6863_v45 = vpack.c.bf16 %v4922_v11, %v4922_v11  ;;  %v4803_v55 = vadd.f32 %v9202_v56, %v4555_v14  ;;  %v7386_v36 = vpop.f32.mrf.mxu0  ;;  %v7630_v48 = vpop.f32.mrf.mxu1  ;;  %7453 = vmatmul.mubr.msk.bf16.gmra.mxu0 %vm891_vm1, %v7840_v4 }
 0x20d   :  { %v9622_v7 = vpop.permute.xlu1 %2818  ;;  %v9624_v19 = vpop.permute.xlu0 %2576  ;;  %7456 = vmatprep.mubr.msk.bf16.mxu0 %vm7854_vm0, %v13215_v38  ;;  %v13404_v48 = vld [vmem:[#allocation94_spill] sm:$0xff] }
 0x20e   :  { %13400 = vst [vmem:[#allocation87_spill] sm:$0xff] %v9622_v7  ;;  %6250 = vst.msk [vmem:[%s12925_s3 + $0x208] sm:$0xf] %vm6119_vm2, %v6984_v50  ;;  %v5044_v57 = vmax.f32 %v4803_v55, 0.0  ;;  %v9634_v23 = vpop.f32.mrf.mxu0  ;;  %v9636_v11 = vpop.f32.mrf.mxu1 }
 0x20f   :  { %6129 = vst.msk [vmem:[%s12925_s3 + $0x24] sm:$0xf] %vm6119_vm2, %v6863_v45  ;;  %13401 = vst [vmem:[#allocation159_spill] sm:$0xff] %v9634_v23  ;;  %2610 = vrot.lane.b32.xlu1 %v9145_v3, %s7855_s8  ;;  %2612 = vrot.lane.b32.xlu0 %v9157_v41, %s7855_s8  ;;  %v13410_v3 = vld [vmem:[#allocation99_spill] sm:$0xff] }
 0x210   :  { %13402 = vst [vmem:[#allocation160_spill] sm:$0xff] %v9636_v11  ;;  %v6985_v14 = vpack.c.bf16 %v5044_v57, %v5044_v57  ;;  %v7387_v50 = vpop.f32.mrf.mxu0  ;;  %v7631_v36 = vpop.f32.mrf.mxu1  ;;  %v7841_v57 = vld [vmem:[%s12923_s0 + $0x3a8] sm:$0xff]  }
 0x211   :  { %v3722_v45 = vpop.permute.xlu1 %3721  ;;  %v9646_v55 = vpop.permute.xlu0 %2820  ;;  %7697 = vmatmul.mubr.msk.bf16.gmra.mxu1 %vm891_vm1, %v7841_v57 }
 0x212   :  { %13403 = vst [vmem:[#allocation161_spill] sm:$0xff] %v9646_v55  ;;  %6251 = vst.msk [vmem:[%s12925_s3 + $0x20c] sm:$0xf] %vm6119_vm2, %v6985_v14  ;;  %v4434_v52 = vmax.f32 %v13404_v48, %v3722_v45  ;;  %v9655_v7 = vpop.f32.mrf.mxu0  ;;  %v9665_v36 = vpop.f32.mrf.mxu1  ;;  %v13407_v14 = vld [vmem:[#allocation26_spill] sm:$0xff]  ;;  %v13408_v48 = vld [vmem:[#allocation28_spill] sm:$0xff]  ;;  %7700 = vmatprep.mubr.msk.bf16.mxu1 %vm7854_vm0, %v13215_v38 }
 0x213   :  { %13405 = vst [vmem:[#allocation94_spill] sm:$0xff] %v9655_v7  ;;  %2854 = vrot.lane.b32.xlu1 %v9147_v47, %s7855_s8  ;;  %2856 = vrot.lane.b32.xlu0 %v9159_v16, %s7855_s8  ;;  %13406 = vst [vmem:[#allocation162_spill] sm:$0xff] %v9665_v36  ;;  %v9670_v45 = vmax.f32 %v13407_v14, %v9141_v12  ;;  %v9674_v55 = vmax.f32 %v13408_v48, %v9155_v58 }
 0x214   :  { %v4682_v4 = vadd.f32 %v9202_v56, %v4434_v52  ;;  %v7390_v50 = vpop.f32.mrf.mxu0  ;;  %v13409_v52 = vld [vmem:[#allocation98_spill] sm:$0xff]  ;;  %v7634_v57 = vpop.f32.mrf.mxu1 }
 0x215   :  { %v3966_v41 = vpop.permute.xlu1 %3965  ;;  %v3724_v47 = vpop.permute.xlu0 %3723  ;;  %v13413_v57 = vld [vmem:[#allocation103_spill] sm:$0xff] }
 0x216   :  { %v4923_v16 = vmax.f32 %v4682_v4, 0.0  ;;  %v4556_v50 = vmax.f32 %v13409_v52, %v3966_v41  ;;  %v4435_v36 = vmax.f32 %v13410_v3, %v3724_v47  ;;  %v9680_v11 = vpop.f32.mrf.mxu0  ;;  %v9688_v4 = vpop.f32.mrf.mxu1 }
 0x217   :  { %13411 = vst [vmem:[#allocation26_spill] sm:$0xff] %v9680_v11  ;;  %3757 = vrot.lane.b32.xlu1 %v9670_v45, %s7856_s17  ;;  %3759 = vrot.lane.b32.xlu0 %v9674_v55, %s7856_s17  ;;  %13412 = vst [vmem:[#allocation28_spill] sm:$0xff] %v9688_v4 }
 0x218   :  { %v6864_v12 = vpack.c.bf16 %v4923_v16, %v4923_v16  ;;  %v4804_v58 = vadd.f32 %v9202_v56, %v4556_v50  ;;  %v4683_v14 = vadd.f32 %v9202_v56, %v4435_v36  ;;  %v7391_v48 = vpop.f32.mrf.mxu0  ;;  %v7635_v16 = vpop.f32.mrf.mxu1  ;;  %v7842_v36 = vld [vmem:[%s12923_s0 + $0x1c8] sm:$0xff]  }
 0x219   :  { %v3968_v41 = vpop.permute.xlu0 %3967  ;;  %v9690_v52 = vpop.permute.xlu1 %2578  ;;  %7457 = vmatmul.mubr.msk.bf16.gmra.mxu0 %vm891_vm1, %v7842_v36 }
 0x21a   :  { %6130 = vst.msk [vmem:[%s12925_s3 + $0x28] sm:$0xf] %vm6119_vm2, %v6864_v12  ;;  %v5045_v3 = vmax.f32 %v4804_v58, 0.0  ;;  %v4924_v47 = vmax.f32 %v4683_v14, 0.0  ;;  %v4557_v11 = vmax.f32 %v13413_v57, %v3968_v41  ;;  %v9705_v12 = vpop.f32.mrf.mxu0  ;;  %7460 = vmatprep.mubr.msk.bf16.mxu0 %vm7854_vm0, %v13215_v38 }
 0x21b   :  { %2614 = vrot.lane.b32.xlu1 %v9179_v43, %s7855_s8  ;;  %2616 = vrot.lane.b32.xlu0 %v9209_v5, %s7855_s8  ;;  %13414 = vst [vmem:[#allocation98_spill] sm:$0xff] %v9705_v12 }
 0x21c   :  { %v6986_v50 = vpack.c.bf16 %v5045_v3, %v5045_v3  ;;  %v6865_v48 = vpack.c.bf16 %v4924_v47, %v4924_v47  ;;  %v4805_v4 = vadd.f32 %v9202_v56, %v4557_v11  ;;  %v7394_v41 = vpop.f32.mrf.mxu0  ;;  %v7843_v3 = vld [vmem:[%s12923_s0 + $0x3b0] sm:$0xff]   ;;  %v13416_v47 = vld [vmem:[#allocation135_spill] sm:$0xff] }
 0x21d   :  { %v9708_v58 = vpop.permute.xlu1 %2822  ;;  %v9710_v14 = vpop.permute.xlu0 %2580  ;;  %7701 = vmatmul.mubr.msk.bf16.gmra.mxu1 %vm891_vm1, %v7843_v3  ;;  %v13421_v41 = vld [vmem:[#allocation32_spill] sm:$0xff] }
 0x21e   :  { %13415 = vst [vmem:[#allocation99_spill] sm:$0xff] %v9708_v58  ;;  %6252 = vst.msk [vmem:[%s12925_s3 + $0x210] sm:$0xf] %vm6119_vm2, %v6986_v50  ;;  %v5046_v11 = vmax.f32 %v4805_v4, 0.0  ;;  %v9729_v16 = vpop.f32.mrf.mxu0  ;;  %v9731_v36 = vpop.f32.mrf.mxu1  ;;  %v13419_v50 = vld [vmem:[#allocation128_spill] sm:$0xff]  ;;  %v13420_v4 = vld [vmem:[#allocation30_spill] sm:$0xff]  ;;  %v9740_v58 = vmax.f32 %v13421_v41, %v9234_v44  ;;  %7704 = vmatprep.mubr.msk.bf16.mxu1 %vm7854_vm0, %v13215_v38 }
 0x21f   :  { %6131 = vst.msk [vmem:[%s12925_s3 + $0x2c] sm:$0xf] %vm6119_vm2, %v6865_v48  ;;  %2858 = vrot.lane.b32.xlu1 %v9181_v0, %s7855_s8  ;;  %2860 = vrot.lane.b32.xlu0 %v13416_v47, %s7855_s8  ;;  %13417 = vst [vmem:[#allocation103_spill] sm:$0xff] %v9729_v16  ;;  %v9736_v48 = vmax.f32 %v13420_v4, %v13419_v50  ;;  %v13425_v16 = vld [vmem:[#allocation114_spill] sm:$0xff] }
 0x220   :  { %v6987_v57 = vpack.c.bf16 %v5046_v11, %v5046_v11  ;;  %13418 = vst [vmem:[#allocation163_spill] sm:$0xff] %v9731_v36  ;;  %v13423_v11 = vld [vmem:[#allocation110_spill] sm:$0xff]  ;;  %v7395_v47 = vpop.f32.mrf.mxu0  ;;  %v7638_v50 = vpop.f32.mrf.mxu1 }
 0x221   :  { %v3726_v5 = vpop.permute.xlu1 %3725  ;;  %v9742_v0 = vpop.permute.xlu0 %2824  ;;  %v7844_v47 = vld [vmem:[%s12923_s0 + $0x1d0] sm:$0xff]  }
 0x222   :  { %13422 = vst [vmem:[#allocation128_spill] sm:$0xff] %v9742_v0  ;;  %6253 = vst.msk [vmem:[%s12925_s3 + $0x214] sm:$0xf] %vm6119_vm2, %v6987_v57  ;;  %v4436_v3 = vmax.f32 %v13423_v11, %v3726_v5  ;;  %v9756_v4 = vpop.f32.mrf.mxu1  ;;  %v13426_v57 = vld [vmem:[#allocation115_spill] sm:$0xff]  ;;  %7461 = vmatmul.mubr.msk.bf16.gmra.mxu0 %vm891_vm1, %v7844_v47 }
 0x223   :  { %3761 = vrot.lane.b32.xlu1 %v9736_v48, %s7856_s17  ;;  %3763 = vrot.lane.b32.xlu0 %v9740_v58, %s7856_s17  ;;  %13424 = vst [vmem:[#allocation30_spill] sm:$0xff] %v9756_v4 }
 0x224   :  { %v4684_v44 = vadd.f32 %v9202_v56, %v4436_v3  ;;  %v7639_v5 = vpop.f32.mrf.mxu1  ;;  %7464 = vmatprep.mubr.msk.bf16.mxu0 %vm7854_vm0, %v13215_v38 }
 0x225   :  { %v3970_v41 = vpop.permute.xlu1 %3969  ;;  %v3728_v0 = vpop.permute.xlu0 %3727  ;;  %v7845_v5 = vld [vmem:[%s12923_s0 + $0x3b8] sm:$0xff]  }
 0x226   :  { %v4925_v43 = vmax.f32 %v4684_v44, 0.0  ;;  %v4558_v36 = vmax.f32 %v13425_v16, %v3970_v41  ;;  %v4437_v12 = vmax.f32 %v13426_v57, %v3728_v0  ;;  %v9769_v44 = vpop.f32.mrf.mxu0  ;;  %7705 = vmatmul.mubr.msk.bf16.gmra.mxu1 %vm891_vm1, %v7845_v5 }
 0x227   :  { %2618 = vrot.lane.b32.xlu1 %v9220_v54, %s7855_s8  ;;  %2620 = vrot.lane.b32.xlu0 %v9243_v24, %s7855_s8  ;;  %13427 = vst [vmem:[#allocation32_spill] sm:$0xff] %v9769_v44 }
 0x228   :  { %v6866_v11 = vpack.c.bf16 %v4925_v43, %v4925_v43  ;;  %v4806_v3 = vadd.f32 %v9202_v56, %v4558_v36  ;;  %v4685_v50 = vadd.f32 %v9202_v56, %v4437_v12  ;;  %v13428_v36 = vld [vmem:[#allocation119_spill] sm:$0xff]  ;;  %v7398_v12 = vpop.f32.mrf.mxu0  ;;  %7708 = vmatprep.mubr.msk.bf16.mxu1 %vm7854_vm0, %v13215_v38 }
 0x229   :  { %v3972_v0 = vpop.permute.xlu0 %3971  ;;  %v9772_v16 = vpop.permute.xlu1 %2582 }
 0x22a   :  { %6132 = vst.msk [vmem:[%s12925_s3 + $0x30] sm:$0xf] %vm6119_vm2, %v6866_v11  ;;  %v5047_v43 = vmax.f32 %v4806_v3, 0.0  ;;  %v4926_v41 = vmax.f32 %v4685_v50, 0.0  ;;  %v4559_v57 = vmax.f32 %v13428_v36, %v3972_v0  ;;  %v9789_v11 = vpop.f32.mrf.mxu0  ;;  %v9791_v3 = vpop.f32.mrf.mxu1  ;;  %v13431_v50 = vld [vmem:[#allocation34_spill] sm:$0xff]  ;;  %v13432_v36 = vld [vmem:[#allocation36_spill] sm:$0xff] }
 0x22b   :  { %2862 = vrot.lane.b32.xlu1 %v9222_v8, %s7855_s8  ;;  %2864 = vrot.lane.b32.xlu0 %v9245_v22, %s7855_s8  ;;  %13429 = vst [vmem:[#allocation110_spill] sm:$0xff] %v9789_v11  ;;  %13430 = vst [vmem:[#allocation114_spill] sm:$0xff] %v9791_v3  ;;  %v9796_v0 = vmax.f32 %v13431_v50, %v9266_v61  ;;  %v9800_v12 = vmax.f32 %v13432_v36, %v9332_v1 }
 0x22c   :  { %v6988_v47 = vpack.c.bf16 %v5047_v43, %v5047_v43  ;;  %v6867_v24 = vpack.c.bf16 %v4926_v41, %v4926_v41  ;;  %v4807_v54 = vadd.f32 %v9202_v56, %v4559_v57  ;;  %v7399_v1 = vpop.f32.mrf.mxu0  ;;  %v7642_v41 = vpop.f32.mrf.mxu1 }
 0x22d   :  { %v9802_v8 = vpop.permute.xlu1 %2826  ;;  %v9804_v43 = vpop.permute.xlu0 %2584  ;;  %v7846_v1 = vld [vmem:[%s12923_s0 + $0x1d8] sm:$0xff]  }
 0x22e   :  { %13433 = vst [vmem:[#allocation115_spill] sm:$0xff] %v9802_v8  ;;  %6254 = vst.msk [vmem:[%s12925_s3 + $0x218] sm:$0xf] %vm6119_vm2, %v6988_v47  ;;  %v5048_v61 = vmax.f32 %v4807_v54, 0.0  ;;  %v9820_v5 = vpop.f32.mrf.mxu1  ;;  %v13436_v54 = vld [vmem:[#allocation126_spill] sm:$0xff]  ;;  %7465 = vmatmul.mubr.msk.bf16.gmra.mxu0 %vm891_vm1, %v7846_v1 }
 0x22f   :  { %6133 = vst.msk [vmem:[%s12925_s3 + $0x34] sm:$0xf] %vm6119_vm2, %v6867_v24  ;;  %3765 = vrot.lane.b32.xlu1 %v9796_v0, %s7856_s17  ;;  %3767 = vrot.lane.b32.xlu0 %v9800_v12, %s7856_s17  ;;  %13434 = vst [vmem:[#allocation119_spill] sm:$0xff] %v9820_v5 }
 0x230   :  { %v6989_v57 = vpack.c.bf16 %v5048_v61, %v5048_v61  ;;  %v7643_v47 = vpop.f32.mrf.mxu1  ;;  %7468 = vmatprep.mubr.msk.bf16.mxu0 %vm7854_vm0, %v13215_v38 }
 0x231   :  { %v3730_v50 = vpop.permute.xlu1 %3729  ;;  %v9822_v36 = vpop.permute.xlu0 %2828 }
 0x232   :  { %13435 = vst [vmem:[#allocation34_spill] sm:$0xff] %v9822_v36  ;;  %6255 = vst.msk [vmem:[%s12925_s3 + $0x21c] sm:$0xf] %vm6119_vm2, %v6989_v57  ;;  %v4438_v24 = vmax.f32 %v13436_v54, %v3730_v50  ;;  %v9837_v41 = vpop.f32.mrf.mxu0  ;;  %v13438_v54 = vld [vmem:[#allocation131_spill] sm:$0xff]  ;;  %v13439_v36 = vld [vmem:[#allocation132_spill] sm:$0xff] }
 0x233   :  { %2622 = vrot.lane.b32.xlu1 %v9278_v28, %s7855_s8  ;;  %2624 = vrot.lane.b32.xlu0 %v9293_v18, %s7855_s8  ;;  %13437 = vst [vmem:[#allocation36_spill] sm:$0xff] %v9837_v41  ;;  %v7847_v18 = vld [vmem:[%s12923_s0 + $0x3c0] ss:$0 sps:$4 sm:$0x11]  }
 0x234   :  { %v4686_v61 = vadd.f32 %v9202_v56, %v4438_v24  ;;  %v7402_v28 = vpop.f32.mrf.mxu0  ;;  %7709 = vmatmul.mubr.msk.bf16.gmra.mxu1 %vm891_vm1, %v7847_v18 }
 0x235   :  { %v3974_v57 = vpop.permute.xlu1 %3973  ;;  %v3732_v22 = vpop.permute.xlu0 %3731 }
 0x236   :  { %v4927_v50 = vmax.f32 %v4686_v61, 0.0  ;;  %v4560_v47 = vmax.f32 %v13438_v54, %v3974_v57  ;;  %v4439_v8 = vmax.f32 %v13439_v36, %v3732_v22  ;;  %v9853_v61 = vpop.f32.mrf.mxu0  ;;  %v9855_v57 = vpop.f32.mrf.mxu1  ;;  %v13442_v22 = vld [vmem:[#allocation38_spill] sm:$0xff]  ;;  %v13443_v36 = vld [vmem:[#allocation41_spill] sm:$0xff] }
 0x237   :  { %2866 = vrot.lane.b32.xlu1 %v9280_v26, %s7855_s8  ;;  %2868 = vrot.lane.b32.xlu0 %v9295_v63, %s7855_s8  ;;  %13440 = vst [vmem:[#allocation126_spill] sm:$0xff] %v9853_v61  ;;  %13441 = vst [vmem:[#allocation131_spill] sm:$0xff] %v9855_v57  ;;  %v9860_v28 = vmax.f32 %v13442_v22, %v9352_v31  ;;  %v9864_v54 = vmax.f32 %v13443_v36, %v9418_v25 }
 0x238   :  { %v6868_v24 = vpack.c.bf16 %v4927_v50, %v4927_v50  ;;  %v4808_v1 = vadd.f32 %v9202_v56, %v4560_v47  ;;  %v4687_v38 = vadd.f32 %v9202_v56, %v4439_v8  ;;  %v7403_v18 = vpop.f32.mrf.mxu0  ;;  %v7646_v26 = vpop.f32.mrf.mxu1 }
 0x239   :  { %v9866_v63 = vpop.permute.xlu1 %2586  ;;  %v9868_v50 = vpop.permute.xlu0 %2588 }
 0x23a   :  { %6134 = vst.msk [vmem:[%s12925_s3 + $0x38] sm:$0xf] %vm6119_vm2, %v6868_v24  ;;  %v5049_v8 = vmax.f32 %v4808_v1, 0.0  ;;  %v4928_v47 = vmax.f32 %v4687_v38, 0.0  ;;  %v9878_v22 = vpop.f32.mrf.mxu1  ;;  %v7848_v24 = vld [vmem:[%s12923_s0 + $0x1e0] sm:$0xff]  }
 0x23b   :  { %3769 = vrot.lane.b32.xlu1 %v9860_v28, %s7856_s17  ;;  %3771 = vrot.lane.b32.xlu0 %v9864_v54, %s7856_s17  ;;  %13444 = vst [vmem:[#allocation132_spill] sm:$0xff] %v9878_v22  ;;  %v13453_v22 = vld [vmem:[#allocation45_spill] sm:$0xff] }
 0x23c   :  { %v6990_v31 = vpack.c.bf16 %v5049_v8, %v5049_v8  ;;  %v6869_v25 = vpack.c.bf16 %v4928_v47, %v4928_v47  ;;  %v7647_v26 = vpop.f32.mrf.mxu1  ;;  %v9899_v1 = vpop.f32.mrf.mxu0  ;;  %7469 = vmatmul.mubr.msk.bf16.gmra.mxu0 %vm891_vm1, %v7848_v24  ;;  %v13448_v47 = vld [vmem:[#allocation140_spill] sm:$0xff] }
 0x23d   :  { %v9880_v36 = vpop.permute.xlu1 %2830  ;;  %v9882_v61 = vpop.permute.xlu0 %2832  ;;  %13447 = vst [vmem:[#allocation164_spill] sm:$0xff] %v9899_v1 }
 0x23e   :  { %13445 = vst [vmem:[#allocation38_spill] sm:$0xff] %v9880_v36  ;;  %13446 = vst [vmem:[#allocation41_spill] sm:$0xff] %v9882_v61  ;;  %v7406_v26 = vpop.f32.mrf.mxu0  ;;  %v13450_v61 = vld [vmem:[#allocation44_spill] sm:$0xff]  ;;  %v9912_v24 = vpop.f32.mrf.mxu1 }
 0x23f   :  { %6256 = vst.msk [vmem:[%s12925_s3 + $0x220] sm:$0xf] %vm6119_vm2, %v6990_v31  ;;  %6135 = vst.msk [vmem:[%s12925_s3 + $0x3c] sm:$0xf] %vm6119_vm2, %v6869_v25  ;;  %2626 = vrot.lane.b32.xlu1 %v9310_v29, %s7855_s8  ;;  %2628 = vrot.lane.b32.xlu0 %v9341_v53, %s7855_s8  ;;  %v13449_v31 = vld [vmem:[#allocation4_spill] sm:$0xff] }
 0x240   :  { %v9910_v29 = vpop.f32.mrf.mxu0  ;;  %13452 = vst [vmem:[#allocation4_spill] sm:$0xff] %v9912_v24 }
 0x241   :  { %v3734_v38 = vpop.permute.xlu1 %3733  ;;  %v3736_v8 = vpop.permute.xlu0 %3735  ;;  %13451 = vst [vmem:[#allocation140_spill] sm:$0xff] %v9910_v29 }
 0x242   :  { %v4440_v18 = vmax.f32 %v13448_v47, %v3734_v38  ;;  %v4441_v25 = vmax.f32 %v13449_v31, %v3736_v8  ;;  %v9916_v38 = vmax.f32 %v13453_v22, %v9440_v49  ;;  %v13454_v8 = vld [vmem:[#allocation48_spill] sm:$0xff] }
 0x243   :  { %2870 = vrot.lane.b32.xlu1 %v13450_v61, %s7855_s8  ;;  %2872 = vrot.lane.b32.xlu0 %v9343_v17, %s7855_s8  ;;  %v9920_v47 = vmax.f32 %v13454_v8, %v9506_v32  ;;  %v7407_v61 = vpop.f32.mrf.mxu0 }
 0x244   :  { %v4688_v36 = vadd.f32 %v9202_v56, %v4440_v18  ;;  %v4689_v53 = vadd.f32 %v9202_v56, %v4441_v25  ;;  %v7650_v56 = vpop.f32.mrf.mxu1 }
 0x245   :  { %v9922_v31 = vpop.permute.xlu1 %2590  ;;  %v9924_v26 = vpop.permute.xlu0 %2592 }
 0x246   :  { %v4929_v17 = vmax.f32 %v4688_v36, 0.0  ;;  %v4930_v18 = vmax.f32 %v4689_v53, 0.0  ;;  %v9930_v25 = vpop.f32.mrf.mxu1 }
 0x247   :  { %3773 = vrot.lane.b32.xlu1 %v9916_v38, %s7856_s17  ;;  %3775 = vrot.lane.b32.xlu0 %v9920_v47, %s7856_s17  ;;  %13455 = vst [vmem:[#allocation45_spill] sm:$0xff] %v9930_v25 }
 0x248   :  { %v6870_v49 = vpack.c.bf16 %v4929_v17, %v4929_v17  ;;  %v6871_v22 = vpack.c.bf16 %v4930_v18, %v4930_v18  ;;  %v7651_v53 = vpop.f32.mrf.mxu1  ;;  %v9948_v17 = vpop.f32.mrf.mxu0 }
 0x249   :  { %v9932_v32 = vpop.permute.xlu1 %2834  ;;  %v9934_v8 = vpop.permute.xlu0 %2836  ;;  %13458 = vst [vmem:[#allocation166_spill] sm:$0xff] %v9948_v17  ;;  %v9959_v53 = vld [vmem:[%s12924_s2] ss:$0 sm:$0xff] }
 0x24a   :  { %13456 = vst [vmem:[#allocation48_spill] sm:$0xff] %v9932_v32  ;;  %13457 = vst [vmem:[#allocation165_spill] sm:$0xff] %v9934_v8  ;;  %v13459_v8 = vld [vmem:[#allocation147_spill] sm:$0xff] }
 0x24b   :  { %6136 = vst.msk [vmem:[%s12925_s3 + $0x40] sm:$0xf] %vm6119_vm2, %v6870_v49  ;;  %6137 = vst.msk [vmem:[%s12925_s3 + $0x44] sm:$0xf] %vm6119_vm2, %v6871_v22  ;;  %2630 = vrot.lane.b32.xlu1 %v9362_v13, %s7855_s8  ;;  %2632 = vrot.lane.b32.xlu0 %v9383_v21, %s7855_s8  ;;  %v7410_v49 = vpop.f32.mrf.mxu0  ;;  %v13460_v22 = vld [vmem:[#allocation149_spill] sm:$0xff] }
 0x24d   :  { %v3738_v61 = vpop.permute.xlu1 %3737  ;;  %v3740_v36 = vpop.permute.xlu0 %3739 }
 0x24e   :  { %v4442_v18 = vmax.f32 %v9326_v60, %v3738_v61  ;;  %v4443_v56 = vmax.f32 %v9330_v20, %v3740_v36  ;;  %v9963_v13 = vpop.f32.mrf.mxu0  ;;  %v9965_v60 = vpop.f32.mrf.mxu1  ;;  %v13463_v20 = vld [vmem:[#allocation50_spill] sm:$0xff]  ;;  %v13464_v36 = vld [vmem:[#allocation53_spill] sm:$0xff] }
 0x24f   :  { %2874 = vrot.lane.b32.xlu1 %v13459_v8, %s7855_s8  ;;  %2876 = vrot.lane.b32.xlu0 %v13460_v22, %s7855_s8  ;;  %13461 = vst [vmem:[#allocation167_spill] sm:$0xff] %v9963_v13  ;;  %13462 = vst [vmem:[#allocation168_spill] sm:$0xff] %v9965_v60  ;;  %v9969_v61 = vmax.f32 %v13463_v20, %v9538_v51  ;;  %v9973_v49 = vmax.f32 %v13464_v36, %v9604_v46 }
 0x250   :  { %v4690_v32 = vadd.f32 %v9959_v53, %v4442_v18  ;;  %v4691_v21 = vadd.f32 %v9959_v53, %v4443_v56  ;;  %v7411_v17 = vpop.f32.mrf.mxu0  ;;  %v7654_v56 = vpop.f32.mrf.mxu1 }
 0x251   :  { %v9975_v22 = vpop.permute.xlu1 %2594  ;;  %v9977_v8 = vpop.permute.xlu0 %2596 }
 0x252   :  { %v4931_v25 = vmax.f32 %v4690_v32, 0.0  ;;  %v4932_v18 = vmax.f32 %v4691_v21, 0.0  ;;  %v9983_v13 = vpop.f32.mrf.mxu1 }
 0x253   :  { %3777 = vrot.lane.b32.xlu1 %v9969_v61, %s7856_s17  ;;  %3779 = vrot.lane.b32.xlu0 %v9973_v49, %s7856_s17  ;;  %13465 = vst [vmem:[#allocation50_spill] sm:$0xff] %v9983_v13  ;;  %v13471_v13 = vld [vmem:[#allocation56_spill] sm:$0xff] }
 0x254   :  { %v6872_v51 = vpack.c.bf16 %v4931_v25, %v4931_v25  ;;  %v6873_v20 = vpack.c.bf16 %v4932_v18, %v4932_v18  ;;  %v7655_v21 = vpop.f32.mrf.mxu1  ;;  %v10001_v25 = vpop.f32.mrf.mxu0  ;;  %v13469_v18 = vld [vmem:[#allocation10_spill] sm:$0xff] }
 0x255   :  { %v9985_v46 = vpop.permute.xlu1 %2838  ;;  %v9987_v36 = vpop.permute.xlu0 %2840  ;;  %13468 = vst [vmem:[#allocation170_spill] sm:$0xff] %v10001_v25  ;;  %v13474_v25 = vld [vmem:[#allocation57_spill] sm:$0xff] }
 0x256   :  { %13466 = vst [vmem:[#allocation53_spill] sm:$0xff] %v9985_v46  ;;  %13467 = vst [vmem:[#allocation169_spill] sm:$0xff] %v9987_v36  ;;  %v13470_v36 = vld [vmem:[#allocation12_spill] sm:$0xff]  ;;  %v7414_v46 = vpop.f32.mrf.mxu0 }
 0x257   :  { %6138 = vst.msk [vmem:[%s12925_s3 + $0x48] sm:$0xf] %vm6119_vm2, %v6872_v51  ;;  %6139 = vst.msk [vmem:[%s12925_s3 + $0x4c] sm:$0xf] %vm6119_vm2, %v6873_v20  ;;  %2634 = vrot.lane.b32.xlu1 %v9408_v10, %s7855_s8  ;;  %2636 = vrot.lane.b32.xlu0 %v9425_v6, %s7855_s8  ;;  %v13475_v46 = vld [vmem:[#allocation60_spill] sm:$0xff] }
 0x258   :  { %v10011_v6 = vpop.f32.mrf.mxu0  ;;  %v10013_v10 = vpop.f32.mrf.mxu1 }
 0x259   :  { %v3742_v32 = vpop.permute.xlu1 %3741  ;;  %v3744_v17 = vpop.permute.xlu0 %3743  ;;  %13472 = vst [vmem:[#allocation10_spill] sm:$0xff] %v10011_v6  ;;  %13473 = vst [vmem:[#allocation12_spill] sm:$0xff] %v10013_v10 }
 0x25a   :  { %v4444_v56 = vmax.f32 %v13469_v18, %v3742_v32  ;;  %v4445_v51 = vmax.f32 %v13470_v36, %v3744_v17  ;;  %v10017_v32 = vmax.f32 %v13474_v25, %v9624_v19  ;;  %v10021_v36 = vmax.f32 %v13475_v46, %v9690_v52 }
 0x25b   :  { %2878 = vrot.lane.b32.xlu1 %v13471_v13, %s7855_s8  ;;  %2880 = vrot.lane.b32.xlu0 %v9427_v27, %s7855_s8  ;;  %v7415_v13 = vpop.f32.mrf.mxu0 }
 0x25c   :  { %v4692_v20 = vadd.f32 %v9959_v53, %v4444_v56  ;;  %v4693_v21 = vadd.f32 %v9959_v53, %v4445_v51  ;;  %v7658_v51 = vpop.f32.mrf.mxu1 }
 0x25d   :  { %v10023_v17 = vpop.permute.xlu1 %2598  ;;  %v10025_v18 = vpop.permute.xlu0 %2600 }
 0x25e   :  { %v4933_v27 = vmax.f32 %v4692_v20, 0.0  ;;  %v4934_v56 = vmax.f32 %v4693_v21, 0.0  ;;  %v10031_v6 = vpop.f32.mrf.mxu1 }
 0x25f   :  { %3781 = vrot.lane.b32.xlu1 %v10017_v32, %s7856_s17  ;;  %3783 = vrot.lane.b32.xlu0 %v10021_v36, %s7856_s17  ;;  %13476 = vst [vmem:[#allocation57_spill] sm:$0xff] %v10031_v6 }
 0x260   :  { %v6874_v19 = vpack.c.bf16 %v4933_v27, %v4933_v27  ;;  %v6875_v25 = vpack.c.bf16 %v4934_v56, %v4934_v56  ;;  %v7659_v13 = vpop.f32.mrf.mxu1  ;;  %v13480_v56 = vld [vmem:[#allocation14_spill] sm:$0xff] }
 0x261   :  { %v10033_v52 = vpop.permute.xlu1 %2842  ;;  %v10035_v46 = vpop.permute.xlu0 %2844 }
 0x262   :  { %13477 = vst [vmem:[#allocation60_spill] sm:$0xff] %v10033_v52  ;;  %13478 = vst [vmem:[#allocation171_spill] sm:$0xff] %v10035_v46  ;;  %v10049_v27 = vpop.f32.mrf.mxu0  ;;  %v13481_v52 = vld [vmem:[#allocation153_spill] sm:$0xff] }
 0x263   :  { %6140 = vst.msk [vmem:[%s12925_s3 + $0x50] sm:$0xf] %vm6119_vm2, %v6874_v19  ;;  %6141 = vst.msk [vmem:[%s12925_s3 + $0x54] sm:$0xf] %vm6119_vm2, %v6875_v25  ;;  %2638 = vrot.lane.b32.xlu1 %v9452_v2, %s7855_s8  ;;  %2640 = vrot.lane.b32.xlu0 %v9481_v62, %s7855_s8  ;;  %v13482_v25 = vld [vmem:[#allocation154_spill] sm:$0xff] }
 0x264   :  { %13479 = vst [vmem:[#allocation172_spill] sm:$0xff] %v10049_v27  ;;  %v7418_v46 = vpop.f32.mrf.mxu0  ;;  %v13485_v27 = vld [vmem:[#allocation62_spill] sm:$0xff] }
 0x265   :  { %v3746_v20 = vpop.permute.xlu1 %3745  ;;  %v3748_v21 = vpop.permute.xlu0 %3747 }
 0x266   :  { %v4446_v51 = vmax.f32 %v13480_v56, %v3746_v20  ;;  %v4447_v19 = vmax.f32 %v9470_v34, %v3748_v21  ;;  %v10059_v62 = vpop.f32.mrf.mxu0  ;;  %v10061_v6 = vpop.f32.mrf.mxu1  ;;  %v10065_v20 = vmax.f32 %v13485_v27, %v9710_v14  ;;  %v13486_v34 = vld [vmem:[#allocation65_spill] sm:$0xff] }
 0x267   :  { %2882 = vrot.lane.b32.xlu1 %v13481_v52, %s7855_s8  ;;  %2884 = vrot.lane.b32.xlu0 %v13482_v25, %s7855_s8  ;;  %13483 = vst [vmem:[#allocation14_spill] sm:$0xff] %v10059_v62  ;;  %13484 = vst [vmem:[#allocation173_spill] sm:$0xff] %v10061_v6  ;;  %v10069_v46 = vmax.f32 %v13486_v34, %v9772_v16 }
 0x268   :  { %v4694_v13 = vadd.f32 %v9959_v53, %v4446_v51  ;;  %v4695_v2 = vadd.f32 %v9959_v53, %v4447_v19  ;;  %v7419_v52 = vpop.f32.mrf.mxu0  ;;  %v7662_v19 = vpop.f32.mrf.mxu1 }
 0x269   :  { %v10071_v21 = vpop.permute.xlu1 %2602  ;;  %v10073_v56 = vpop.permute.xlu0 %2604  ;;  %v13490_v52 = vld [vmem:[#allocation71_spill] sm:$0xff] }
 0x26a   :  { %v4935_v25 = vmax.f32 %v4694_v13, 0.0  ;;  %v4936_v51 = vmax.f32 %v4695_v2, 0.0  ;;  %v10079_v62 = vpop.f32.mrf.mxu1 }
 0x26b   :  { %3785 = vrot.lane.b32.xlu1 %v10065_v20, %s7856_s17  ;;  %3787 = vrot.lane.b32.xlu0 %v10069_v46, %s7856_s17  ;;  %13487 = vst [vmem:[#allocation62_spill] sm:$0xff] %v10079_v62 }
 0x26c   :  { %v6876_v14 = vpack.c.bf16 %v4935_v25, %v4935_v25  ;;  %v6877_v27 = vpack.c.bf16 %v4936_v51, %v4936_v51  ;;  %v7663_v2 = vpop.f32.mrf.mxu1  ;;  %v10097_v25 = vpop.f32.mrf.mxu0 }
 0x26d   :  { %v10081_v16 = vpop.permute.xlu1 %2846  ;;  %v10083_v34 = vpop.permute.xlu0 %2848  ;;  %13491 = vst [vmem:[#allocation175_spill] sm:$0xff] %v10097_v25  ;;  %v13496_v25 = vld [vmem:[#allocation69_spill] sm:$0xff] }
 0x26e   :  { %13488 = vst [vmem:[#allocation65_spill] sm:$0xff] %v10081_v16  ;;  %13489 = vst [vmem:[#allocation174_spill] sm:$0xff] %v10083_v34  ;;  %v7422_v34 = vpop.f32.mrf.mxu0  ;;  %v13492_v16 = vld [vmem:[#allocation68_spill] sm:$0xff]  ;;  %v10109_v62 = vpop.f32.mrf.mxu1 }
 0x26f   :  { %6142 = vst.msk [vmem:[%s12925_s3 + $0x58] sm:$0xf] %vm6119_vm2, %v6876_v14  ;;  %6143 = vst.msk [vmem:[%s12925_s3 + $0x5c] sm:$0xf] %vm6119_vm2, %v6877_v27  ;;  %2642 = vrot.lane.b32.xlu1 %v9492_v35, %s7855_s8  ;;  %2644 = vrot.lane.b32.xlu0 %v13490_v52, %s7855_s8  ;;  %v13493_v27 = vld [vmem:[#allocation155_spill] sm:$0xff] }
 0x270   :  { %v10107_v52 = vpop.f32.mrf.mxu0  ;;  %13495 = vst [vmem:[#allocation177_spill] sm:$0xff] %v10109_v62 }
 0x271   :  { %v3750_v13 = vpop.permute.xlu1 %3749  ;;  %v3752_v51 = vpop.permute.xlu0 %3751  ;;  %13494 = vst [vmem:[#allocation176_spill] sm:$0xff] %v10107_v52 }
 0x272   :  { %v4448_v19 = vmax.f32 %v9530_v15, %v3750_v13  ;;  %v4449_v14 = vmax.f32 %v9534_v40, %v3752_v51  ;;  %v10113_v15 = vmax.f32 %v13496_v25, %v9804_v43  ;;  %v13497_v40 = vld [vmem:[#allocation73_spill] sm:$0xff] }
 0x273   :  { %2886 = vrot.lane.b32.xlu1 %v13492_v16, %s7855_s8  ;;  %2888 = vrot.lane.b32.xlu0 %v13493_v27, %s7855_s8  ;;  %v10117_v34 = vmax.f32 %v13497_v40, %v9866_v63  ;;  %v7423_v16 = vpop.f32.mrf.mxu0 }
 0x274   :  { %v4696_v2 = vadd.f32 %v9959_v53, %v4448_v19  ;;  %v4697_v35 = vadd.f32 %v9959_v53, %v4449_v14  ;;  %v7666_v14 = vpop.f32.mrf.mxu1 }
 0x275   :  { %v10119_v13 = vpop.permute.xlu1 %2606  ;;  %v10121_v51 = vpop.permute.xlu0 %2608 }
 0x276   :  { %v4937_v27 = vmax.f32 %v4696_v2, 0.0  ;;  %v4938_v19 = vmax.f32 %v4697_v35, 0.0  ;;  %v10127_v52 = vpop.f32.mrf.mxu1  ;;  %v10145_v16 = vpop.f32.mrf.mxu0 }
 0x277   :  { %3789 = vrot.lane.b32.xlu1 %v10113_v15, %s7856_s17  ;;  %3791 = vrot.lane.b32.xlu0 %v10117_v34, %s7856_s17  ;;  %13498 = vst [vmem:[#allocation69_spill] sm:$0xff] %v10127_v52  ;;  %13501 = vst [vmem:[#allocation179_spill] sm:$0xff] %v10145_v16  ;;  %v13506_v52 = vld [vmem:[#allocation76_spill] sm:$0xff] }
 0x278   :  { %v6878_v43 = vpack.c.bf16 %v4937_v27, %v4937_v27  ;;  %v6879_v25 = vpack.c.bf16 %v4938_v19, %v4938_v19  ;;  %v7667_v35 = vpop.f32.mrf.mxu1 }
 0x279   :  { %v10129_v63 = vpop.permute.xlu1 %2850  ;;  %v10131_v40 = vpop.permute.xlu0 %2852 }
 0x27a   :  { %13499 = vst [vmem:[#allocation73_spill] sm:$0xff] %v10129_v63  ;;  %13500 = vst [vmem:[#allocation178_spill] sm:$0xff] %v10131_v40  ;;  %v13502_v40 = vld [vmem:[#allocation156_spill] sm:$0xff] }
 0x27b   :  { %6144 = vst.msk [vmem:[%s12925_s3 + $0x60] sm:$0xf] %vm6119_vm2, %v6878_v43  ;;  %6145 = vst.msk [vmem:[%s12925_s3 + $0x64] sm:$0xf] %vm6119_vm2, %v6879_v25  ;;  %2646 = vrot.lane.b32.xlu1 %v9550_v42, %s7855_s8  ;;  %2648 = vrot.lane.b32.xlu0 %v9565_v30, %s7855_s8  ;;  %v7426_v43 = vpop.f32.mrf.mxu0  ;;  %v13503_v25 = vld [vmem:[#allocation158_spill] sm:$0xff] }
 0x27d   :  { %v3754_v27 = vpop.permute.xlu1 %3753  ;;  %v3756_v2 = vpop.permute.xlu0 %3755 }
 0x27e   :  { %v4450_v19 = vmax.f32 %v9598_v9, %v3754_v27  ;;  %v4451_v14 = vmax.f32 %v9602_v39, %v3756_v2  ;;  %v10155_v30 = vpop.f32.mrf.mxu0  ;;  %v10157_v42 = vpop.f32.mrf.mxu1  ;;  %v10161_v9 = vmax.f32 %v13506_v52, %v9868_v50  ;;  %v13507_v39 = vld [vmem:[#allocation80_spill] sm:$0xff] }
 0x27f   :  { %2890 = vrot.lane.b32.xlu1 %v13502_v40, %s7855_s8  ;;  %2892 = vrot.lane.b32.xlu0 %v13503_v25, %s7855_s8  ;;  %13504 = vst [vmem:[#allocation180_spill] sm:$0xff] %v10155_v30  ;;  %13505 = vst [vmem:[#allocation181_spill] sm:$0xff] %v10157_v42  ;;  %v10165_v27 = vmax.f32 %v13507_v39, %v9922_v31 }
 0x280   :  { %v4698_v35 = vadd.f32 %v9959_v53, %v4450_v19  ;;  %v4699_v63 = vadd.f32 %v9959_v53, %v4451_v14  ;;  %v7427_v40 = vpop.f32.mrf.mxu0  ;;  %v7670_v14 = vpop.f32.mrf.mxu1 }
 0x281   :  { %v10167_v2 = vpop.permute.xlu1 %2610  ;;  %v10169_v43 = vpop.permute.xlu0 %2612 }
 0x282   :  { %v4939_v25 = vmax.f32 %v4698_v35, 0.0  ;;  %v4940_v19 = vmax.f32 %v4699_v63, 0.0  ;;  %v10175_v30 = vpop.f32.mrf.mxu1 }
 0x283   :  { %3793 = vrot.lane.b32.xlu1 %v10161_v9, %s7856_s17  ;;  %3795 = vrot.lane.b32.xlu0 %v10165_v27, %s7856_s17  ;;  %13508 = vst [vmem:[#allocation76_spill] sm:$0xff] %v10175_v30 }
 0x284   :  { %v6880_v50 = vpack.c.bf16 %v4939_v25, %v4939_v25  ;;  %v6881_v52 = vpack.c.bf16 %v4940_v19, %v4940_v19  ;;  %v7671_v63 = vpop.f32.mrf.mxu1  ;;  %v10193_v40 = vpop.f32.mrf.mxu0 }
 0x285   :  { %v10177_v31 = vpop.permute.xlu1 %2854  ;;  %v10179_v39 = vpop.permute.xlu0 %2856 }
 0x286   :  { %13509 = vst [vmem:[#allocation80_spill] sm:$0xff] %v10177_v31  ;;  %13510 = vst [vmem:[#allocation182_spill] sm:$0xff] %v10179_v39  ;;  %v13511_v39 = vld [vmem:[#allocation83_spill] sm:$0xff] }
 0x287   :  { %6146 = vst.msk [vmem:[%s12925_s3 + $0x68] sm:$0xf] %vm6119_vm2, %v6880_v50  ;;  %6147 = vst.msk [vmem:[%s12925_s3 + $0x6c] sm:$0xf] %vm6119_vm2, %v6881_v52  ;;  %2650 = vrot.lane.b32.xlu1 %v9582_v59, %s7855_s8  ;;  %2652 = vrot.lane.b32.xlu0 %v9613_v33, %s7855_s8  ;;  %v7430_v50 = vpop.f32.mrf.mxu0  ;;  %v10205_v33 = vpop.f32.mrf.mxu1  ;;  %v13514_v59 = vld [vmem:[#allocation85_spill] sm:$0xff] }
 0x288   :  { %13513 = vst [vmem:[#allocation184_spill] sm:$0xff] %v10205_v33 }
 0x289   :  { %v3758_v25 = vpop.permute.xlu1 %3757  ;;  %v3760_v35 = vpop.permute.xlu0 %3759 }
 0x28a   :  { %v4452_v19 = vmax.f32 %v9670_v45, %v3758_v25  ;;  %v4453_v14 = vmax.f32 %v9674_v55, %v3760_v35  ;;  %v10203_v31 = vpop.f32.mrf.mxu0  ;;  %v10209_v45 = vmax.f32 %v13514_v59, %v9924_v26  ;;  %v13515_v55 = vld [vmem:[#allocation89_spill] sm:$0xff] }
 0x28b   :  { %2894 = vrot.lane.b32.xlu1 %v13511_v39, %s7855_s8  ;;  %2896 = vrot.lane.b32.xlu0 %v9615_v37, %s7855_s8  ;;  %13512 = vst [vmem:[#allocation183_spill] sm:$0xff] %v10203_v31  ;;  %v10213_v25 = vmax.f32 %v13515_v55, %v9975_v22 }
 0x28c   :  { %v4700_v52 = vadd.f32 %v9959_v53, %v4452_v19  ;;  %v4701_v63 = vadd.f32 %v9959_v53, %v4453_v14  ;;  %v7431_v39 = vpop.f32.mrf.mxu0  ;;  %v7674_v14 = vpop.f32.mrf.mxu1 }
 0x28d   :  { %v10215_v35 = vpop.permute.xlu1 %2614  ;;  %v10217_v50 = vpop.permute.xlu0 %2616 }
 0x28e   :  { %v4941_v37 = vmax.f32 %v4700_v52, 0.0  ;;  %v4942_v19 = vmax.f32 %v4701_v63, 0.0  ;;  %v10223_v31 = vpop.f32.mrf.mxu1 }
 0x28f   :  { %3797 = vrot.lane.b32.xlu1 %v10209_v45, %s7856_s17  ;;  %3799 = vrot.lane.b32.xlu0 %v10213_v25, %s7856_s17  ;;  %13516 = vst [vmem:[#allocation85_spill] sm:$0xff] %v10223_v31  ;;  %v13523_v31 = vld [vmem:[#allocation92_spill] sm:$0xff] }
 0x290   :  { %v6882_v59 = vpack.c.bf16 %v4941_v37, %v4941_v37  ;;  %v6883_v26 = vpack.c.bf16 %v4942_v19, %v4942_v19  ;;  %v7675_v39 = vpop.f32.mrf.mxu1  ;;  %v10241_v37 = vpop.f32.mrf.mxu0 }
 0x291   :  { %v10225_v22 = vpop.permute.xlu1 %2858  ;;  %v10227_v55 = vpop.permute.xlu0 %2860 }
 0x292   :  { %13517 = vst [vmem:[#allocation89_spill] sm:$0xff] %v10225_v22  ;;  %13518 = vst [vmem:[#allocation185_spill] sm:$0xff] %v10227_v55  ;;  %v13519_v55 = vld [vmem:[#allocation160_spill] sm:$0xff] }
 0x293   :  { %6148 = vst.msk [vmem:[%s12925_s3 + $0x70] sm:$0xf] %vm6119_vm2, %v6882_v59  ;;  %6149 = vst.msk [vmem:[%s12925_s3 + $0x74] sm:$0xf] %vm6119_vm2, %v6883_v26  ;;  %2654 = vrot.lane.b32.xlu1 %v9634_v23, %s7855_s8  ;;  %2656 = vrot.lane.b32.xlu0 %v9655_v7, %s7855_s8  ;;  %v7434_v59 = vpop.f32.mrf.mxu0  ;;  %v13520_v26 = vld [vmem:[#allocation162_spill] sm:$0xff] }
 0x295   :  { %v3762_v52 = vpop.permute.xlu1 %3761  ;;  %v3764_v63 = vpop.permute.xlu0 %3763 }
 0x296   :  { %v4454_v19 = vmax.f32 %v9736_v48, %v3762_v52  ;;  %v4455_v14 = vmax.f32 %v9740_v58, %v3764_v63  ;;  %v10251_v7 = vpop.f32.mrf.mxu0  ;;  %v10253_v23 = vpop.f32.mrf.mxu1  ;;  %v10257_v48 = vmax.f32 %v13523_v31, %v9977_v8  ;;  %v13524_v58 = vld [vmem:[#allocation96_spill] sm:$0xff] }
 0x297   :  { %2898 = vrot.lane.b32.xlu1 %v13519_v55, %s7855_s8  ;;  %2900 = vrot.lane.b32.xlu0 %v13520_v26, %s7855_s8  ;;  %13521 = vst [vmem:[#allocation186_spill] sm:$0xff] %v10251_v7  ;;  %13522 = vst [vmem:[#allocation187_spill] sm:$0xff] %v10253_v23  ;;  %v10261_v52 = vmax.f32 %v13524_v58, %v10023_v17  ;;  %v13535_v23 = vld [vmem:[#allocation101_spill] sm:$0xff] }
 0x298   :  { %v4702_v39 = vadd.f32 %v9959_v53, %v4454_v19  ;;  %v4703_v22 = vadd.f32 %v9959_v53, %v4455_v14  ;;  %v7435_v55 = vpop.f32.mrf.mxu0  ;;  %v7678_v14 = vpop.f32.mrf.mxu1 }
 0x299   :  { %v10263_v63 = vpop.permute.xlu1 %2618  ;;  %v10265_v59 = vpop.permute.xlu0 %2620  ;;  %v13528_v55 = vld [vmem:[#allocation26_spill] sm:$0xff] }
 0x29a   :  { %v4943_v26 = vmax.f32 %v4702_v39, 0.0  ;;  %v4944_v19 = vmax.f32 %v4703_v22, 0.0  ;;  %v10271_v7 = vpop.f32.mrf.mxu1 }
 0x29b   :  { %3801 = vrot.lane.b32.xlu1 %v10257_v48, %s7856_s17  ;;  %3803 = vrot.lane.b32.xlu0 %v10261_v52, %s7856_s17  ;;  %13525 = vst [vmem:[#allocation92_spill] sm:$0xff] %v10271_v7  ;;  %v13531_v7 = vld [vmem:[#allocation28_spill] sm:$0xff] }
 0x29c   :  { %v6884_v8 = vpack.c.bf16 %v4943_v26, %v4943_v26  ;;  %v6885_v31 = vpack.c.bf16 %v4944_v19, %v4944_v19  ;;  %v7679_v22 = vpop.f32.mrf.mxu1  ;;  %v13529_v26 = vld [vmem:[#allocation98_spill] sm:$0xff]  ;;  %v10289_v39 = vpop.f32.mrf.mxu0 }
 0x29d   :  { %v10273_v17 = vpop.permute.xlu1 %2862  ;;  %v10275_v58 = vpop.permute.xlu0 %2864  ;;  %13530 = vst [vmem:[#allocation189_spill] sm:$0xff] %v10289_v39 }
 0x29e   :  { %13526 = vst [vmem:[#allocation96_spill] sm:$0xff] %v10273_v17  ;;  %13527 = vst [vmem:[#allocation188_spill] sm:$0xff] %v10275_v58  ;;  %v7438_v17 = vpop.f32.mrf.mxu0  ;;  %v10301_v39 = vpop.f32.mrf.mxu1 }
 0x29f   :  { %6150 = vst.msk [vmem:[%s12925_s3 + $0x78] sm:$0xf] %vm6119_vm2, %v6884_v8  ;;  %6151 = vst.msk [vmem:[%s12925_s3 + $0x7c] sm:$0xf] %vm6119_vm2, %v6885_v31  ;;  %2658 = vrot.lane.b32.xlu1 %v13528_v55, %s7855_s8  ;;  %2660 = vrot.lane.b32.xlu0 %v13529_v26, %s7855_s8  ;;  %v13532_v31 = vld [vmem:[#allocation163_spill] sm:$0xff] }
 0x2a0   :  { %v10299_v26 = vpop.f32.mrf.mxu0  ;;  %13534 = vst [vmem:[#allocation191_spill] sm:$0xff] %v10301_v39 }
 0x2a1   :  { %v3766_v19 = vpop.permute.xlu1 %3765  ;;  %v3768_v14 = vpop.permute.xlu0 %3767  ;;  %13533 = vst [vmem:[#allocation190_spill] sm:$0xff] %v10299_v26 }
 0x2a2   :  { %v4456_v58 = vmax.f32 %v9796_v0, %v3766_v19  ;;  %v4457_v8 = vmax.f32 %v9800_v12, %v3768_v14  ;;  %v10305_v0 = vmax.f32 %v13535_v23, %v10025_v18  ;;  %v13536_v12 = vld [vmem:[#allocation105_spill] sm:$0xff] }
 0x2a3   :  { %2902 = vrot.lane.b32.xlu1 %v13531_v7, %s7855_s8  ;;  %2904 = vrot.lane.b32.xlu0 %v13532_v31, %s7855_s8  ;;  %v10309_v17 = vmax.f32 %v13536_v12, %v10071_v21  ;;  %v7439_v7 = vpop.f32.mrf.mxu0 }
 0x2a4   :  { %v4704_v22 = vadd.f32 %v9959_v53, %v4456_v58  ;;  %v4705_v55 = vadd.f32 %v9959_v53, %v4457_v8  ;;  %v7682_v8 = vpop.f32.mrf.mxu1 }
 0x2a5   :  { %v10311_v19 = vpop.permute.xlu1 %2622  ;;  %v10313_v14 = vpop.permute.xlu0 %2624 }
 0x2a6   :  { %v4945_v31 = vmax.f32 %v4704_v22, 0.0  ;;  %v4946_v58 = vmax.f32 %v4705_v55, 0.0  ;;  %v10319_v26 = vpop.f32.mrf.mxu1  ;;  %v13540_v55 = vld [vmem:[#allocation103_spill] sm:$0xff] }
 0x2a7   :  { %3805 = vrot.lane.b32.xlu1 %v10305_v0, %s7856_s17  ;;  %3807 = vrot.lane.b32.xlu0 %v10309_v17, %s7856_s17  ;;  %13537 = vst [vmem:[#allocation101_spill] sm:$0xff] %v10319_v26 }
 0x2a8   :  { %v6886_v23 = vpack.c.bf16 %v4945_v31, %v4945_v31  ;;  %v6887_v18 = vpack.c.bf16 %v4946_v58, %v4946_v58  ;;  %v7683_v7 = vpop.f32.mrf.mxu1 }
 0x2a9   :  { %v10321_v21 = vpop.permute.xlu1 %2866  ;;  %v10323_v12 = vpop.permute.xlu0 %2868 }
 0x2aa   :  { %13538 = vst [vmem:[#allocation105_spill] sm:$0xff] %v10321_v21  ;;  %13539 = vst [vmem:[#allocation192_spill] sm:$0xff] %v10323_v12  ;;  %v10337_v31 = vpop.f32.mrf.mxu0 }
 0x2ab   :  { %6152 = vst.msk [vmem:[%s12925_s3 + $0x80] sm:$0xf] %vm6119_vm2, %v6886_v23  ;;  %6153 = vst.msk [vmem:[%s12925_s3 + $0x84] sm:$0xf] %vm6119_vm2, %v6887_v18  ;;  %2662 = vrot.lane.b32.xlu1 %v13540_v55, %s7855_s8  ;;  %2664 = vrot.lane.b32.xlu0 %v9769_v44, %s7855_s8  ;;  %v13543_v55 = vld [vmem:[#allocation108_spill] sm:$0xff] }
 0x2ac   :  { %v7442_v12 = vpop.f32.mrf.mxu0 }
 0x2ad   :  { %v3770_v22 = vpop.permute.xlu1 %3769  ;;  %v3772_v58 = vpop.permute.xlu0 %3771 }
 0x2ae   :  { %v4458_v8 = vmax.f32 %v9860_v28, %v3770_v22  ;;  %v4459_v23 = vmax.f32 %v9864_v54, %v3772_v58  ;;  %v10347_v21 = vpop.f32.mrf.mxu0  ;;  %v10349_v44 = vpop.f32.mrf.mxu1  ;;  %v10353_v28 = vmax.f32 %v13543_v55, %v10073_v56  ;;  %v13544_v54 = vld [vmem:[#allocation112_spill] sm:$0xff] }
 0x2af   :  { %2906 = vrot.lane.b32.xlu1 %v9756_v4, %s7855_s8  ;;  %2908 = vrot.lane.b32.xlu0 %v9791_v3, %s7855_s8  ;;  %13541 = vst [vmem:[#allocation193_spill] sm:$0xff] %v10347_v21  ;;  %13542 = vst [vmem:[#allocation194_spill] sm:$0xff] %v10349_v44  ;;  %v10357_v12 = vmax.f32 %v13544_v54, %v10119_v13 }
 0x2b0   :  { %v4706_v18 = vadd.f32 %v9959_v53, %v4458_v8  ;;  %v4707_v7 = vadd.f32 %v9959_v53, %v4459_v23  ;;  %v7443_v4 = vpop.f32.mrf.mxu0  ;;  %v7686_v23 = vpop.f32.mrf.mxu1 }
 0x2b1   :  { %v10359_v22 = vpop.permute.xlu1 %2626  ;;  %v10361_v58 = vpop.permute.xlu0 %2628 }
 0x2b2   :  { %v4947_v3 = vmax.f32 %v4706_v18, 0.0  ;;  %v4948_v8 = vmax.f32 %v4707_v7, 0.0  ;;  %v10367_v21 = vpop.f32.mrf.mxu1 }
 0x2b3   :  { %3809 = vrot.lane.b32.xlu1 %v10353_v28, %s7856_s17  ;;  %3811 = vrot.lane.b32.xlu0 %v10357_v12, %s7856_s17  ;;  %13545 = vst [vmem:[#allocation108_spill] sm:$0xff] %v10367_v21 }
 0x2b4   :  { %v6888_v56 = vpack.c.bf16 %v4947_v3, %v4947_v3  ;;  %v6889_v55 = vpack.c.bf16 %v4948_v8, %v4948_v8  ;;  %v7687_v4 = vpop.f32.mrf.mxu1  ;;  %v10385_v3 = vpop.f32.mrf.mxu0 }
 0x2b5   :  { %v10369_v13 = vpop.permute.xlu1 %2870  ;;  %v10371_v54 = vpop.permute.xlu0 %2872 }
 0x2b6   :  { %13546 = vst [vmem:[#allocation112_spill] sm:$0xff] %v10369_v13  ;;  %13547 = vst [vmem:[#allocation195_spill] sm:$0xff] %v10371_v54  ;;  %v10397_v13 = vpop.f32.mrf.mxu1 }
 0x2b7   :  { %6154 = vst.msk [vmem:[%s12925_s3 + $0x88] sm:$0xf] %vm6119_vm2, %v6888_v56  ;;  %6155 = vst.msk [vmem:[%s12925_s3 + $0x8c] sm:$0xf] %vm6119_vm2, %v6889_v55  ;;  %2666 = vrot.lane.b32.xlu1 %v9789_v11, %s7855_s8  ;;  %2668 = vrot.lane.b32.xlu0 %v9837_v41, %s7855_s8  ;;  %v7446_v56 = vpop.f32.mrf.mxu0  ;;  %v13549_v41 = vld [vmem:[#allocation117_spill] sm:$0xff] }
 0x2b8   :  { %13548 = vst [vmem:[#allocation196_spill] sm:$0xff] %v10397_v13 }
 0x2b9   :  { %v3774_v18 = vpop.permute.xlu1 %3773  ;;  %v3776_v7 = vpop.permute.xlu0 %3775 }
 0x2ba   :  { %v4460_v8 = vmax.f32 %v9916_v38, %v3774_v18  ;;  %v4461_v23 = vmax.f32 %v9920_v47, %v3776_v7  ;;  %v10395_v54 = vpop.f32.mrf.mxu0  ;;  %v10401_v38 = vmax.f32 %v13549_v41, %v10121_v51  ;;  %v13550_v47 = vld [vmem:[#allocation121_spill] sm:$0xff] }
 0x2bb   :  { %2910 = vrot.lane.b32.xlu1 %v9820_v5, %s7855_s8  ;;  %2912 = vrot.lane.b32.xlu0 %v9855_v57, %s7855_s8  ;;  %v10405_v18 = vmax.f32 %v13550_v47, %v10167_v2 }
 0x2bc   :  { %v4708_v55 = vadd.f32 %v9959_v53, %v4460_v8  ;;  %v4709_v4 = vadd.f32 %v9959_v53, %v4461_v23  ;;  %v7447_v5 = vpop.f32.mrf.mxu0  ;;  %v7690_v23 = vpop.f32.mrf.mxu1 }
 0x2bd   :  { %v10407_v7 = vpop.permute.xlu1 %2630  ;;  %v10409_v56 = vpop.permute.xlu0 %2632 }
 0x2be   :  { %v4949_v57 = vmax.f32 %v4708_v55, 0.0  ;;  %v4950_v8 = vmax.f32 %v4709_v4, 0.0  ;;  %v10415_v11 = vpop.f32.mrf.mxu1  ;;  %v10433_v55 = vpop.f32.mrf.mxu0 }
 0x2bf   :  { %3813 = vrot.lane.b32.xlu1 %v10401_v38, %s7856_s17  ;;  %3815 = vrot.lane.b32.xlu0 %v10405_v18, %s7856_s17  ;;  %13551 = vst [vmem:[#allocation117_spill] sm:$0xff] %v10415_v11  ;;  %v13558_v11 = vld [vmem:[#allocation124_spill] sm:$0xff] }
 0x2c0   :  { %v6890_v41 = vpack.c.bf16 %v4949_v57, %v4949_v57  ;;  %v6891_v51 = vpack.c.bf16 %v4950_v8, %v4950_v8  ;;  %v7691_v5 = vpop.f32.mrf.mxu1  ;;  %v13554_v57 = vld [vmem:[#allocation126_spill] sm:$0xff] }
 0x2c1   :  { %v10417_v2 = vpop.permute.xlu1 %2874  ;;  %v10419_v47 = vpop.permute.xlu0 %2876 }
 0x2c2   :  { %13552 = vst [vmem:[#allocation121_spill] sm:$0xff] %v10417_v2  ;;  %13553 = vst [vmem:[#allocation197_spill] sm:$0xff] %v10419_v47  ;;  %v7450_v47 = vpop.f32.mrf.mxu0  ;;  %v13555_v2 = vld [vmem:[#allocation132_spill] sm:$0xff] }
 0x2c3   :  { %6156 = vst.msk [vmem:[%s12925_s3 + $0x90] sm:$0xf] %vm6119_vm2, %v6890_v41  ;;  %6157 = vst.msk [vmem:[%s12925_s3 + $0x94] sm:$0xf] %vm6119_vm2, %v6891_v51  ;;  %2670 = vrot.lane.b32.xlu1 %v13554_v57, %s7855_s8  ;;  %2672 = vrot.lane.b32.xlu0 %v9899_v1, %s7855_s8 }
 0x2c4   :  { %v10443_v1 = vpop.f32.mrf.mxu0 }
 0x2c5   :  { %v3778_v4 = vpop.permute.xlu1 %3777  ;;  %v3780_v8 = vpop.permute.xlu0 %3779  ;;  %13556 = vst [vmem:[#allocation198_spill] sm:$0xff] %v10443_v1 }
 0x2c6   :  { %v4462_v23 = vmax.f32 %v9969_v61, %v3778_v4  ;;  %v4463_v41 = vmax.f32 %v9973_v49, %v3780_v8  ;;  %v10445_v57 = vpop.f32.mrf.mxu1  ;;  %v10449_v61 = vmax.f32 %v13558_v11, %v10169_v43  ;;  %v13559_v49 = vld [vmem:[#allocation129_spill] sm:$0xff] }
 0x2c7   :  { %2914 = vrot.lane.b32.xlu1 %v13555_v2, %s7855_s8  ;;  %2916 = vrot.lane.b32.xlu0 %v9912_v24, %s7855_s8  ;;  %13557 = vst [vmem:[#allocation199_spill] sm:$0xff] %v10445_v57  ;;  %v10453_v47 = vmax.f32 %v13559_v49, %v10215_v35  ;;  %v7451_v2 = vpop.f32.mrf.mxu0 }
 0x2c8   :  { %v4710_v51 = vadd.f32 %v9959_v53, %v4462_v23  ;;  %v4711_v5 = vadd.f32 %v9959_v53, %v4463_v41  ;;  %v7694_v41 = vpop.f32.mrf.mxu1 }
 0x2c9   :  { %v10455_v4 = vpop.permute.xlu1 %2634  ;;  %v10457_v8 = vpop.permute.xlu0 %2636 }
 0x2ca   :  { %v4951_v24 = vmax.f32 %v4710_v51, 0.0  ;;  %v4952_v23 = vmax.f32 %v4711_v5, 0.0  ;;  %v10463_v1 = vpop.f32.mrf.mxu1 }
 0x2cb   :  { %3817 = vrot.lane.b32.xlu1 %v10449_v61, %s7856_s17  ;;  %3819 = vrot.lane.b32.xlu0 %v10453_v47, %s7856_s17  ;;  %13560 = vst [vmem:[#allocation124_spill] sm:$0xff] %v10463_v1  ;;  %v13567_v1 = vld [vmem:[#allocation134_spill] sm:$0xff] }
 0x2cc   :  { %v6892_v11 = vpack.c.bf16 %v4951_v24, %v4951_v24  ;;  %v6893_v43 = vpack.c.bf16 %v4952_v23, %v4952_v23  ;;  %v7695_v2 = vpop.f32.mrf.mxu1  ;;  %v13563_v24 = vld [vmem:[#allocation166_spill] sm:$0xff]  ;;  %v10481_v51 = vpop.f32.mrf.mxu0 }
 0x2cd   :  { %v10465_v35 = vpop.permute.xlu1 %2878  ;;  %v10467_v49 = vpop.permute.xlu0 %2880 }
 0x2ce   :  { %13561 = vst [vmem:[#allocation129_spill] sm:$0xff] %v10465_v35  ;;  %13562 = vst [vmem:[#allocation200_spill] sm:$0xff] %v10467_v49  ;;  %v7454_v49 = vpop.f32.mrf.mxu0  ;;  %v13564_v35 = vld [vmem:[#allocation45_spill] sm:$0xff] }
 0x2cf   :  { %6158 = vst.msk [vmem:[%s12925_s3 + $0x98] sm:$0xf] %vm6119_vm2, %v6892_v11  ;;  %6159 = vst.msk [vmem:[%s12925_s3 + $0x9c] sm:$0xf] %vm6119_vm2, %v6893_v43  ;;  %2674 = vrot.lane.b32.xlu1 %v9910_v29, %s7855_s8  ;;  %2676 = vrot.lane.b32.xlu0 %v13563_v24, %s7855_s8 }
 0x2d0   :  { %v10491_v24 = vpop.f32.mrf.mxu0 }
 0x2d1   :  { %v3782_v5 = vpop.permute.xlu1 %3781  ;;  %v3784_v23 = vpop.permute.xlu0 %3783  ;;  %13565 = vst [vmem:[#allocation201_spill] sm:$0xff] %v10491_v24 }
 0x2d2   :  { %v4464_v41 = vmax.f32 %v10017_v32, %v3782_v5  ;;  %v4465_v11 = vmax.f32 %v10021_v36, %v3784_v23  ;;  %v10493_v29 = vpop.f32.mrf.mxu1  ;;  %v10497_v32 = vmax.f32 %v13567_v1, %v10217_v50  ;;  %v13568_v36 = vld [vmem:[#allocation136_spill] sm:$0xff] }
 0x2d3   :  { %2918 = vrot.lane.b32.xlu1 %v13564_v35, %s7855_s8  ;;  %2920 = vrot.lane.b32.xlu0 %v9965_v60, %s7855_s8  ;;  %13566 = vst [vmem:[#allocation202_spill] sm:$0xff] %v10493_v29  ;;  %v10501_v49 = vmax.f32 %v13568_v36, %v10263_v63  ;;  %v7455_v35 = vpop.f32.mrf.mxu0 }
 0x2d4   :  { %v4712_v43 = vadd.f32 %v9959_v53, %v4464_v41  ;;  %v4713_v2 = vadd.f32 %v9959_v53, %v4465_v11  ;;  %v7698_v11 = vpop.f32.mrf.mxu1 }
 0x2d5   :  { %v10503_v5 = vpop.permute.xlu1 %2638  ;;  %v10505_v23 = vpop.permute.xlu0 %2640 }
 0x2d6   :  { %v4953_v60 = vmax.f32 %v4712_v43, 0.0  ;;  %v4954_v41 = vmax.f32 %v4713_v2, 0.0  ;;  %v10511_v24 = vpop.f32.mrf.mxu1  ;;  %v13573_v43 = vld [vmem:[#allocation170_spill] sm:$0xff] }
 0x2d7   :  { %3821 = vrot.lane.b32.xlu1 %v10497_v32, %s7856_s17  ;;  %3823 = vrot.lane.b32.xlu0 %v10501_v49, %s7856_s17  ;;  %13569 = vst [vmem:[#allocation134_spill] sm:$0xff] %v10511_v24  ;;  %v13575_v24 = vld [vmem:[#allocation50_spill] sm:$0xff] }
 0x2d8   :  { %v6894_v1 = vpack.c.bf16 %v4953_v60, %v4953_v60  ;;  %v6895_v50 = vpack.c.bf16 %v4954_v41, %v4954_v41  ;;  %v7699_v35 = vpop.f32.mrf.mxu1  ;;  %v13572_v60 = vld [vmem:[#allocation167_spill] sm:$0xff] }
 0x2d9   :  { %v10513_v63 = vpop.permute.xlu1 %2882  ;;  %v10515_v36 = vpop.permute.xlu0 %2884 }
 0x2da   :  { %13570 = vst [vmem:[#allocation136_spill] sm:$0xff] %v10513_v63  ;;  %13571 = vst [vmem:[#allocation203_spill] sm:$0xff] %v10515_v36  ;;  %v10529_v2 = vpop.f32.mrf.mxu0 }
 0x2db   :  { %6160 = vst.msk [vmem:[%s12925_s3 + $0xa0] sm:$0xf] %vm6119_vm2, %v6894_v1  ;;  %6161 = vst.msk [vmem:[%s12925_s3 + $0xa4] sm:$0xf] %vm6119_vm2, %v6895_v50  ;;  %2678 = vrot.lane.b32.xlu1 %v13572_v60, %s7855_s8  ;;  %2680 = vrot.lane.b32.xlu0 %v13573_v43, %s7855_s8 }
 0x2dc   :  { %13574 = vst [vmem:[#allocation204_spill] sm:$0xff] %v10529_v2  ;;  %v7458_v63 = vpop.f32.mrf.mxu0  ;;  %v13578_v2 = vld [vmem:[#allocation138_spill] sm:$0xff] }
 0x2dd   :  { %v3786_v41 = vpop.permute.xlu1 %3785  ;;  %v3788_v11 = vpop.permute.xlu0 %3787 }
 0x2de   :  { %v4466_v36 = vmax.f32 %v10065_v20, %v3786_v41  ;;  %v4467_v1 = vmax.f32 %v10069_v46, %v3788_v11  ;;  %v10539_v43 = vpop.f32.mrf.mxu0  ;;  %v10541_v60 = vpop.f32.mrf.mxu1  ;;  %v10545_v20 = vmax.f32 %v13578_v2, %v10265_v59  ;;  %v13579_v46 = vld [vmem:[#allocation142_spill] sm:$0xff] }
 0x2df   :  { %2922 = vrot.lane.b32.xlu1 %v13575_v24, %s7855_s8  ;;  %2924 = vrot.lane.b32.xlu0 %v10013_v10, %s7855_s8  ;;  %13576 = vst [vmem:[#allocation205_spill] sm:$0xff] %v10539_v43  ;;  %13577 = vst [vmem:[#allocation206_spill] sm:$0xff] %v10541_v60  ;;  %v10549_v63 = vmax.f32 %v13579_v46, %v10311_v19 }
 0x2e0   :  { %v4714_v50 = vadd.f32 %v9959_v53, %v4466_v36  ;;  %v4715_v35 = vadd.f32 %v9959_v53, %v4467_v1  ;;  %v7459_v24 = vpop.f32.mrf.mxu0  ;;  %v7702_v1 = vpop.f32.mrf.mxu1 }
 0x2e1   :  { %v10551_v41 = vpop.permute.xlu1 %2642  ;;  %v10553_v11 = vpop.permute.xlu0 %2644 }
 0x2e2   :  { %v4955_v10 = vmax.f32 %v4714_v50, 0.0  ;;  %v4956_v36 = vmax.f32 %v4715_v35, 0.0  ;;  %v10559_v43 = vpop.f32.mrf.mxu1  ;;  %v13584_v50 = vld [vmem:[#allocation172_spill] sm:$0xff]  ;;  %v10577_v35 = vpop.f32.mrf.mxu0 }
 0x2e3   :  { %3825 = vrot.lane.b32.xlu1 %v10545_v20, %s7856_s17  ;;  %3827 = vrot.lane.b32.xlu0 %v10549_v63, %s7856_s17  ;;  %13580 = vst [vmem:[#allocation138_spill] sm:$0xff] %v10559_v43  ;;  %13585 = vst [vmem:[#allocation208_spill] sm:$0xff] %v10577_v35  ;;  %v13586_v43 = vld [vmem:[#allocation57_spill] sm:$0xff]  ;;  %v13589_v35 = vld [vmem:[#allocation40_spill] sm:$0xff] }
 0x2e4   :  { %v6896_v59 = vpack.c.bf16 %v4955_v10, %v4955_v10  ;;  %v6897_v2 = vpack.c.bf16 %v4956_v36, %v4956_v36  ;;  %v7703_v24 = vpop.f32.mrf.mxu1  ;;  %v13583_v10 = vld [vmem:[#allocation10_spill] sm:$0xff] }
 0x2e5   :  { %v10561_v19 = vpop.permute.xlu1 %2886  ;;  %v10563_v46 = vpop.permute.xlu0 %2888 }
 0x2e6   :  { %13581 = vst [vmem:[#allocation142_spill] sm:$0xff] %v10561_v19  ;;  %13582 = vst [vmem:[#allocation207_spill] sm:$0xff] %v10563_v46  ;;  %v7462_v19 = vpop.f32.mrf.mxu0 }
 0x2e7   :  { %6162 = vst.msk [vmem:[%s12925_s3 + $0xa8] sm:$0xf] %vm6119_vm2, %v6896_v59  ;;  %6163 = vst.msk [vmem:[%s12925_s3 + $0xac] sm:$0xf] %vm6119_vm2, %v6897_v2  ;;  %2682 = vrot.lane.b32.xlu1 %v13583_v10, %s7855_s8  ;;  %2684 = vrot.lane.b32.xlu0 %v13584_v50, %s7855_s8  ;;  %v10589_v10 = vpop.f32.mrf.mxu1 }
 0x2e8   :  { %v10587_v50 = vpop.f32.mrf.mxu0  ;;  %13588 = vst [vmem:[#allocation210_spill] sm:$0xff] %v10589_v10 }
 0x2e9   :  { %v3790_v36 = vpop.permute.xlu1 %3789  ;;  %v3792_v1 = vpop.permute.xlu0 %3791  ;;  %13587 = vst [vmem:[#allocation209_spill] sm:$0xff] %v10587_v50 }
 0x2ea   :  { %v4468_v46 = vmax.f32 %v10113_v15, %v3790_v36  ;;  %v4469_v59 = vmax.f32 %v10117_v34, %v3792_v1  ;;  %v10593_v15 = vmax.f32 %v13589_v35, %v10313_v14  ;;  %v13590_v34 = vld [vmem:[#allocation43_spill] sm:$0xff] }
 0x2eb   :  { %2926 = vrot.lane.b32.xlu1 %v13586_v43, %s7855_s8  ;;  %2928 = vrot.lane.b32.xlu0 %v10061_v6, %s7855_s8  ;;  %v10597_v19 = vmax.f32 %v13590_v34, %v10359_v22  ;;  %v7463_v43 = vpop.f32.mrf.mxu0 }
 0x2ec   :  { %v4716_v2 = vadd.f32 %v9959_v53, %v4468_v46  ;;  %v4717_v24 = vadd.f32 %v9959_v53, %v4469_v59  ;;  %v7706_v59 = vpop.f32.mrf.mxu1 }
 0x2ed   :  { %v10599_v36 = vpop.permute.xlu1 %2646  ;;  %v10601_v1 = vpop.permute.xlu0 %2648 }
 0x2ee   :  { %v4957_v6 = vmax.f32 %v4716_v2, 0.0  ;;  %v4958_v46 = vmax.f32 %v4717_v24, 0.0  ;;  %v10607_v50 = vpop.f32.mrf.mxu1  ;;  %v13595_v2 = vld [vmem:[#allocation175_spill] sm:$0xff]  ;;  %v10625_v24 = vpop.f32.mrf.mxu0 }
 0x2ef   :  { %3829 = vrot.lane.b32.xlu1 %v10593_v15, %s7856_s17  ;;  %3831 = vrot.lane.b32.xlu0 %v10597_v19, %s7856_s17  ;;  %13591 = vst [vmem:[#allocation40_spill] sm:$0xff] %v10607_v50  ;;  %13596 = vst [vmem:[#allocation212_spill] sm:$0xff] %v10625_v24  ;;  %v13597_v50 = vld [vmem:[#allocation62_spill] sm:$0xff] }
 0x2f0   :  { %v6898_v14 = vpack.c.bf16 %v4957_v6, %v4957_v6  ;;  %v6899_v35 = vpack.c.bf16 %v4958_v46, %v4958_v46  ;;  %v7707_v43 = vpop.f32.mrf.mxu1  ;;  %v13594_v6 = vld [vmem:[#allocation14_spill] sm:$0xff] }
 0x2f1   :  { %v10609_v22 = vpop.permute.xlu1 %2890  ;;  %v10611_v34 = vpop.permute.xlu0 %2892  ;;  %v13600_v24 = vld [vmem:[#allocation6_spill] sm:$0xff] }
 0x2f2   :  { %13592 = vst [vmem:[#allocation43_spill] sm:$0xff] %v10609_v22  ;;  %13593 = vst [vmem:[#allocation211_spill] sm:$0xff] %v10611_v34  ;;  %v7466_v22 = vpop.f32.mrf.mxu0 }
 0x2f3   :  { %6164 = vst.msk [vmem:[%s12925_s3 + $0xb0] sm:$0xf] %vm6119_vm2, %v6898_v14  ;;  %6165 = vst.msk [vmem:[%s12925_s3 + $0xb4] sm:$0xf] %vm6119_vm2, %v6899_v35  ;;  %2686 = vrot.lane.b32.xlu1 %v13594_v6, %s7855_s8  ;;  %2688 = vrot.lane.b32.xlu0 %v13595_v2, %s7855_s8 }
 0x2f4   :  { %v10635_v2 = vpop.f32.mrf.mxu0  ;;  %v10637_v6 = vpop.f32.mrf.mxu1 }
 0x2f5   :  { %v3794_v46 = vpop.permute.xlu1 %3793  ;;  %v3796_v59 = vpop.permute.xlu0 %3795  ;;  %13598 = vst [vmem:[#allocation213_spill] sm:$0xff] %v10635_v2  ;;  %13599 = vst [vmem:[#allocation214_spill] sm:$0xff] %v10637_v6 }
 0x2f6   :  { %v4470_v34 = vmax.f32 %v10161_v9, %v3794_v46  ;;  %v4471_v14 = vmax.f32 %v10165_v27, %v3796_v59  ;;  %v10641_v9 = vmax.f32 %v13600_v24, %v10361_v58  ;;  %v13601_v27 = vld [vmem:[#allocation146_spill] sm:$0xff] }
 0x2f7   :  { %2930 = vrot.lane.b32.xlu1 %v13597_v50, %s7855_s8  ;;  %2932 = vrot.lane.b32.xlu0 %v10109_v62, %s7855_s8  ;;  %v10645_v22 = vmax.f32 %v13601_v27, %v10407_v7  ;;  %v7467_v50 = vpop.f32.mrf.mxu0 }
 0x2f8   :  { %v4718_v35 = vadd.f32 %v9959_v53, %v4470_v34  ;;  %v4719_v43 = vadd.f32 %v9959_v53, %v4471_v14  ;;  %v7710_v14 = vpop.f32.mrf.mxu1 }
 0x2f9   :  { %v10647_v46 = vpop.permute.xlu1 %2650  ;;  %v10649_v59 = vpop.permute.xlu0 %2652 }
 0x2fa   :  { %v4959_v62 = vmax.f32 %v4718_v35, 0.0  ;;  %v4960_v34 = vmax.f32 %v4719_v43, 0.0  ;;  %v2252_v2 = vpop.f32.mrf.mxu1  ;;  %v13604_v35 = vld [vmem:[#allocation176_spill] sm:$0xff] }
 0x2fb   :  { %3833 = vrot.lane.b32.xlu1 %v10641_v9, %s7856_s17  ;;  %3835 = vrot.lane.b32.xlu0 %v10645_v22, %s7856_s17 }
 0x2fc   :  { %v6900_v58 = vpack.c.bf16 %v4959_v62, %v4959_v62  ;;  %v6901_v24 = vpack.c.bf16 %v4960_v34, %v4960_v34  ;;  %v7711_v50 = vpop.f32.mrf.mxu1  ;;  %v10671_v62 = vpop.f32.mrf.mxu0 }
 0x2fd   :  { %v10655_v6 = vpop.permute.xlu1 %2894  ;;  %v10657_v7 = vpop.permute.xlu0 %2896  ;;  %13605 = vst [vmem:[#allocation176_spill] sm:$0xff] %v10671_v62 }
 0x2fe   :  { %13602 = vst [vmem:[#allocation6_spill] sm:$0xff] %v10655_v6  ;;  %13603 = vst [vmem:[#allocation146_spill] sm:$0xff] %v10657_v7  ;;  %v7470_v14 = vpop.f32.mrf.mxu0  ;;  %v13607_v6 = vld [vmem:[#allocation52_spill] sm:$0xff] }
 0x2ff   :  { %6166 = vst.msk [vmem:[%s12925_s3 + $0xb8] sm:$0xf] %vm6119_vm2, %v6900_v58  ;;  %6167 = vst.msk [vmem:[%s12925_s3 + $0xbc] sm:$0xf] %vm6119_vm2, %v6901_v24  ;;  %2690 = vrot.lane.b32.xlu1 %v13604_v35, %s7855_s8  ;;  %2692 = vrot.lane.b32.xlu0 %v10145_v16, %s7855_s8  ;;  %v13606_v58 = vld [vmem:[#allocation69_spill] sm:$0xff]  ;;  %v10685_v16 = vmax.f32 %v13607_v6, %v10409_v56 }
 0x300   :  { %v10681_v7 = vpop.f32.mrf.mxu0 }
 0x301   :  { %v3798_v2 = vpop.permute.xlu1 %3797  ;;  %v3800_v43 = vpop.permute.xlu0 %3799 }
 0x302   :  { %v4472_v27 = vmax.f32 %v10209_v45, %v3798_v2  ;;  %v4473_v34 = vmax.f32 %v10213_v25, %v3800_v43  ;;  %v13608_v45 = vld [vmem:[#allocation55_spill] sm:$0xff] }
 0x303   :  { %2934 = vrot.lane.b32.xlu1 %v13606_v58, %s7855_s8  ;;  %2936 = vrot.lane.b32.xlu0 %v10157_v42, %s7855_s8  ;;  %v10689_v25 = vmax.f32 %v13608_v45, %v10455_v4  ;;  %v7471_v58 = vpop.f32.mrf.mxu0  ;;  %v13611_v4 = vld [vmem:[#allocation180_spill] sm:$0xff] }
 0x304   :  { %v4720_v24 = vadd.f32 %v9959_v53, %v4472_v27  ;;  %v4721_v50 = vadd.f32 %v9959_v53, %v4473_v34 }
 0x305   :  { %v10691_v2 = vpop.permute.xlu1 %2654  ;;  %v10693_v43 = vpop.permute.xlu0 %2656 }
 0x306   :  { %v4961_v14 = vmax.f32 %v4720_v24, 0.0  ;;  %v4962_v42 = vmax.f32 %v4721_v50, 0.0 }
 0x307   :  { %3837 = vrot.lane.b32.xlu1 %v10685_v16, %s7856_s17  ;;  %3839 = vrot.lane.b32.xlu0 %v10689_v25, %s7856_s17 }
 0x308   :  { %v6902_v27 = vpack.c.bf16 %v4961_v14, %v4961_v14  ;;  %v6903_v56 = vpack.c.bf16 %v4962_v42, %v4962_v42 }
 0x309   :  { %v10699_v6 = vpop.permute.xlu1 %2898  ;;  %v10701_v34 = vpop.permute.xlu0 %2900 }
 0x30a   :  { %13609 = vst [vmem:[#allocation52_spill] sm:$0xff] %v10699_v6  ;;  %13610 = vst [vmem:[#allocation55_spill] sm:$0xff] %v10701_v34  ;;  %v13613_v34 = vld [vmem:[#allocation152_spill] sm:$0xff] }
 0x30b   :  { %6168 = vst.msk [vmem:[%s12925_s3 + $0xc0] sm:$0xf] %vm6119_vm2, %v6902_v27  ;;  %6169 = vst.msk [vmem:[%s12925_s3 + $0xc4] sm:$0xf] %vm6119_vm2, %v6903_v56  ;;  %2694 = vrot.lane.b32.xlu1 %v13611_v4, %s7855_s8  ;;  %2696 = vrot.lane.b32.xlu0 %v10193_v40, %s7855_s8  ;;  %v13612_v27 = vld [vmem:[#allocation59_spill] sm:$0xff]  ;;  %v10729_v6 = vmax.f32 %v13613_v34, %v10503_v5 }
 0x30c   :  { %v10725_v56 = vmax.f32 %v13612_v27, %v10457_v8  ;;  %v13616_v5 = vld [vmem:[#allocation183_spill] sm:$0xff] }
 0x30d   :  { %v3802_v42 = vpop.permute.xlu1 %3801  ;;  %v3804_v58 = vpop.permute.xlu0 %3803 }
 0x30e   :  { %v4474_v24 = vmax.f32 %v10257_v48, %v3802_v42  ;;  %v4475_v50 = vmax.f32 %v10261_v52, %v3804_v58 }
 0x30f   :  { %2938 = vrot.lane.b32.xlu1 %v10175_v30, %s7855_s8  ;;  %2940 = vrot.lane.b32.xlu0 %v10205_v33, %s7855_s8  ;;  %v13619_v30 = vld [vmem:[#allocation64_spill] sm:$0xff] }
 0x310   :  { %v4722_v45 = vadd.f32 %v9959_v53, %v4474_v24  ;;  %v4723_v14 = vadd.f32 %v9959_v53, %v4475_v50 }
 0x311   :  { %v10731_v48 = vpop.permute.xlu1 %2658  ;;  %v10733_v52 = vpop.permute.xlu0 %2660 }
 0x312   :  { %v4963_v42 = vmax.f32 %v4722_v45, 0.0  ;;  %v4964_v58 = vmax.f32 %v4723_v14, 0.0 }
 0x313   :  { %3841 = vrot.lane.b32.xlu1 %v10725_v56, %s7856_s17  ;;  %3843 = vrot.lane.b32.xlu0 %v10729_v6, %s7856_s17 }
 0x314   :  { %v6904_v53 = vpack.c.bf16 %v4963_v42, %v4963_v42  ;;  %v6905_v24 = vpack.c.bf16 %v4964_v58, %v4964_v58  ;;  %v13617_v42 = vld [vmem:[#allocation85_spill] sm:$0xff]  ;;  %v13618_v58 = vld [vmem:[#allocation187_spill] sm:$0xff] }
 0x315   :  { %v10739_v8 = vpop.permute.xlu1 %2902  ;;  %v10741_v50 = vpop.permute.xlu0 %2904 }
 0x316   :  { %13614 = vst [vmem:[#allocation180_spill] sm:$0xff] %v10739_v8  ;;  %13615 = vst [vmem:[#allocation59_spill] sm:$0xff] %v10741_v50 }
 0x317   :  { %6170 = vst.msk [vmem:[%s12925_s3 + $0xc8] sm:$0xf] %vm6119_vm2, %v6904_v53  ;;  %6171 = vst.msk [vmem:[%s12925_s3 + $0xcc] sm:$0xf] %vm6119_vm2, %v6905_v24  ;;  %2698 = vrot.lane.b32.xlu1 %v13616_v5, %s7855_s8  ;;  %2700 = vrot.lane.b32.xlu0 %v10241_v37, %s7855_s8 }
 0x318   :  { %v10764_v53 = vld [vmem:[%s12924_s2] ss:$0 sm:$0xff] }
 0x319   :  { %v3806_v34 = vpop.permute.xlu1 %3805  ;;  %v3808_v45 = vpop.permute.xlu0 %3807 }
 0x31a   :  { %v4476_v14 = vmax.f32 %v10305_v0, %v3806_v34  ;;  %v4477_v27 = vmax.f32 %v10309_v17, %v3808_v45  ;;  %v10770_v0 = vmax.f32 %v13619_v30, %v10505_v23  ;;  %v13620_v17 = vld [vmem:[#allocation67_spill] sm:$0xff] }
 0x31b   :  { %2942 = vrot.lane.b32.xlu1 %v13617_v42, %s7855_s8  ;;  %2944 = vrot.lane.b32.xlu0 %v13618_v58, %s7855_s8  ;;  %v10774_v34 = vmax.f32 %v13620_v17, %v10551_v41  ;;  %v13624_v41 = vld [vmem:[#allocation189_spill] sm:$0xff] }
 0x31c   :  { %v4724_v24 = vadd.f32 %v10764_v53, %v4476_v14  ;;  %v4725_v33 = vadd.f32 %v10764_v53, %v4477_v27 }
 0x31d   :  { %v10776_v45 = vpop.permute.xlu1 %2662  ;;  %v10778_v58 = vpop.permute.xlu0 %2664 }
 0x31e   :  { %v4965_v42 = vmax.f32 %v4724_v24, 0.0  ;;  %v4966_v50 = vmax.f32 %v4725_v33, 0.0  ;;  %v13623_v33 = vld [vmem:[#allocation186_spill] sm:$0xff] }
 0x31f   :  { %3845 = vrot.lane.b32.xlu1 %v10770_v0, %s7856_s17  ;;  %3847 = vrot.lane.b32.xlu0 %v10774_v34, %s7856_s17 }
 0x320   :  { %v6906_v14 = vpack.c.bf16 %v4965_v42, %v4965_v42  ;;  %v6907_v27 = vpack.c.bf16 %v4966_v50, %v4966_v50 }
 0x321   :  { %v10784_v30 = vpop.permute.xlu1 %2906  ;;  %v10786_v23 = vpop.permute.xlu0 %2908 }
 0x322   :  { %13621 = vst [vmem:[#allocation152_spill] sm:$0xff] %v10784_v30  ;;  %13622 = vst [vmem:[#allocation183_spill] sm:$0xff] %v10786_v23  ;;  %v13625_v23 = vld [vmem:[#allocation92_spill] sm:$0xff]  ;;  %v13626_v30 = vld [vmem:[#allocation71_spill] sm:$0xff] }
 0x323   :  { %6172 = vst.msk [vmem:[%s12925_s3 + $0xd0] sm:$0xf] %vm6119_vm2, %v6906_v14  ;;  %6173 = vst.msk [vmem:[%s12925_s3 + $0xd4] sm:$0xf] %vm6119_vm2, %v6907_v27  ;;  %2702 = vrot.lane.b32.xlu1 %v13623_v33, %s7855_s8  ;;  %2704 = vrot.lane.b32.xlu0 %v13624_v41, %s7855_s8  ;;  %v10810_v8 = vmax.f32 %v13626_v30, %v10553_v11  ;;  %v13627_v41 = vld [vmem:[#allocation20_spill] sm:$0xff] }
 0x324   :  { %v10814_v33 = vmax.f32 %v13627_v41, %v10599_v36  ;;  %v13630_v36 = vld [vmem:[#allocation190_spill] sm:$0xff] }
 0x325   :  { %v3810_v50 = vpop.permute.xlu1 %3809  ;;  %v3812_v42 = vpop.permute.xlu0 %3811 }
 0x326   :  { %v4478_v24 = vmax.f32 %v10353_v28, %v3810_v50  ;;  %v4479_v17 = vmax.f32 %v10357_v12, %v3812_v42 }
 0x327   :  { %2946 = vrot.lane.b32.xlu1 %v13625_v23, %s7855_s8  ;;  %2948 = vrot.lane.b32.xlu0 %v10301_v39, %s7855_s8  ;;  %v13632_v23 = vld [vmem:[#allocation82_spill] sm:$0xff] }
 0x328   :  { %v4726_v14 = vadd.f32 %v10764_v53, %v4478_v24  ;;  %v4727_v27 = vadd.f32 %v10764_v53, %v4479_v17 }
 0x329   :  { %v10816_v28 = vpop.permute.xlu1 %2666  ;;  %v10818_v12 = vpop.permute.xlu0 %2668 }
 0x32a   :  { %v4967_v50 = vmax.f32 %v4726_v14, 0.0  ;;  %v4968_v42 = vmax.f32 %v4727_v27, 0.0 }
 0x32b   :  { %3849 = vrot.lane.b32.xlu1 %v10810_v8, %s7856_s17  ;;  %3851 = vrot.lane.b32.xlu0 %v10814_v33, %s7856_s17 }
 0x32c   :  { %v6908_v24 = vpack.c.bf16 %v4967_v50, %v4967_v50  ;;  %v6909_v17 = vpack.c.bf16 %v4968_v42, %v4968_v42 }
 0x32d   :  { %v10824_v11 = vpop.permute.xlu1 %2910  ;;  %v10826_v30 = vpop.permute.xlu0 %2912 }
 0x32e   :  { %13628 = vst [vmem:[#allocation64_spill] sm:$0xff] %v10824_v11  ;;  %13629 = vst [vmem:[#allocation67_spill] sm:$0xff] %v10826_v30  ;;  %v10854_v30 = vmax.f32 %v13632_v23, %v10647_v46  ;;  %v13635_v46 = vld [vmem:[#allocation193_spill] sm:$0xff]  ;;  %v13670_v11 = vld [vmem:[#allocation140_spill] sm:$0xff] }
 0x32f   :  { %6174 = vst.msk [vmem:[%s12925_s3 + $0xd8] sm:$0xf] %vm6119_vm2, %v6908_v24  ;;  %6175 = vst.msk [vmem:[%s12925_s3 + $0xdc] sm:$0xf] %vm6119_vm2, %v6909_v17  ;;  %2706 = vrot.lane.b32.xlu1 %v13630_v36, %s7855_s8  ;;  %2708 = vrot.lane.b32.xlu0 %v10337_v31, %s7855_s8  ;;  %v13631_v17 = vld [vmem:[#allocation78_spill] sm:$0xff] }
 0x330   :  { %v10850_v39 = vmax.f32 %v13631_v17, %v10601_v1 }
 0x331   :  { %v3814_v41 = vpop.permute.xlu1 %3813  ;;  %v3816_v14 = vpop.permute.xlu0 %3815 }
 0x332   :  { %v4480_v27 = vmax.f32 %v10401_v38, %v3814_v41  ;;  %v4481_v50 = vmax.f32 %v10405_v18, %v3816_v14 }
 0x333   :  { %2950 = vrot.lane.b32.xlu1 %v10319_v26, %s7855_s8  ;;  %2952 = vrot.lane.b32.xlu0 %v10349_v44, %s7855_s8  ;;  %v13637_v26 = vld [vmem:[#allocation159_spill] sm:$0xff] }
 0x334   :  { %v4728_v42 = vadd.f32 %v10764_v53, %v4480_v27  ;;  %v4729_v24 = vadd.f32 %v10764_v53, %v4481_v50 }
 0x335   :  { %v10856_v38 = vpop.permute.xlu1 %2670  ;;  %v10858_v18 = vpop.permute.xlu0 %2672 }
 0x336   :  { %v4969_v41 = vmax.f32 %v4728_v42, 0.0  ;;  %v4970_v14 = vmax.f32 %v4729_v24, 0.0 }
 0x337   :  { %3853 = vrot.lane.b32.xlu1 %v10850_v39, %s7856_s17  ;;  %3855 = vrot.lane.b32.xlu0 %v10854_v30, %s7856_s17 }
 0x338   :  { %v6910_v27 = vpack.c.bf16 %v4969_v41, %v4969_v41  ;;  %v6911_v50 = vpack.c.bf16 %v4970_v14, %v4970_v14 }
 0x339   :  { %v10864_v1 = vpop.permute.xlu1 %2914  ;;  %v10866_v17 = vpop.permute.xlu0 %2916 }
 0x33a   :  { %13633 = vst [vmem:[#allocation71_spill] sm:$0xff] %v10864_v1  ;;  %13634 = vst [vmem:[#allocation20_spill] sm:$0xff] %v10866_v17  ;;  %v10894_v17 = vmax.f32 %v13637_v26, %v10691_v2 }
 0x33b   :  { %6176 = vst.msk [vmem:[%s12925_s3 + $0xe0] sm:$0xf] %vm6119_vm2, %v6910_v27  ;;  %6177 = vst.msk [vmem:[%s12925_s3 + $0xe4] sm:$0xf] %vm6119_vm2, %v6911_v50  ;;  %2710 = vrot.lane.b32.xlu1 %v13635_v46, %s7855_s8  ;;  %2712 = vrot.lane.b32.xlu0 %v10385_v3, %s7855_s8  ;;  %v13636_v50 = vld [vmem:[#allocation22_spill] sm:$0xff] }
 0x33c   :  { %v10890_v44 = vmax.f32 %v13636_v50, %v10649_v59 }
 0x33d   :  { %v3818_v23 = vpop.permute.xlu1 %3817  ;;  %v3820_v42 = vpop.permute.xlu0 %3819 }
 0x33e   :  { %v4482_v24 = vmax.f32 %v10449_v61, %v3818_v23  ;;  %v4483_v41 = vmax.f32 %v10453_v47, %v3820_v42 }
 0x33f   :  { %2954 = vrot.lane.b32.xlu1 %v10367_v21, %s7855_s8  ;;  %2956 = vrot.lane.b32.xlu0 %v10397_v13, %s7855_s8  ;;  %v13642_v21 = vld [vmem:[#allocation26_spill] sm:$0xff] }
 0x340   :  { %v4730_v14 = vadd.f32 %v10764_v53, %v4482_v24  ;;  %v4731_v27 = vadd.f32 %v10764_v53, %v4483_v41 }
 0x341   :  { %v10896_v61 = vpop.permute.xlu1 %2674  ;;  %v10898_v47 = vpop.permute.xlu0 %2676 }
 0x342   :  { %v4971_v23 = vmax.f32 %v4730_v14, 0.0  ;;  %v4972_v42 = vmax.f32 %v4731_v27, 0.0 }
 0x343   :  { %3857 = vrot.lane.b32.xlu1 %v10890_v44, %s7856_s17  ;;  %3859 = vrot.lane.b32.xlu0 %v10894_v17, %s7856_s17 }
 0x344   :  { %v6912_v24 = vpack.c.bf16 %v4971_v23, %v4971_v23  ;;  %v6913_v41 = vpack.c.bf16 %v4972_v42, %v4972_v42  ;;  %v13640_v23 = vld [vmem:[#allocation117_spill] sm:$0xff] }
 0x345   :  { %v10904_v59 = vpop.permute.xlu1 %2918  ;;  %v10906_v50 = vpop.permute.xlu0 %2920 }
 0x346   :  { %13638 = vst [vmem:[#allocation190_spill] sm:$0xff] %v10904_v59  ;;  %13639 = vst [vmem:[#allocation78_spill] sm:$0xff] %v10906_v50  ;;  %v10934_v50 = vmax.f32 %v13642_v21, %v10731_v48  ;;  %v13645_v21 = vld [vmem:[#allocation198_spill] sm:$0xff] }
 0x347   :  { %6178 = vst.msk [vmem:[%s12925_s3 + $0xe8] sm:$0xf] %vm6119_vm2, %v6912_v24  ;;  %6179 = vst.msk [vmem:[%s12925_s3 + $0xec] sm:$0xf] %vm6119_vm2, %v6913_v41  ;;  %2714 = vrot.lane.b32.xlu1 %v10395_v54, %s7855_s8  ;;  %2716 = vrot.lane.b32.xlu0 %v10433_v55, %s7855_s8  ;;  %v13641_v41 = vld [vmem:[#allocation94_spill] sm:$0xff] }
 0x348   :  { %v10930_v13 = vmax.f32 %v13641_v41, %v10693_v43 }
 0x349   :  { %v3822_v26 = vpop.permute.xlu1 %3821  ;;  %v3824_v2 = vpop.permute.xlu0 %3823 }
 0x34a   :  { %v4484_v14 = vmax.f32 %v10497_v32, %v3822_v26  ;;  %v4485_v27 = vmax.f32 %v10501_v49, %v3824_v2 }
 0x34b   :  { %2958 = vrot.lane.b32.xlu1 %v13640_v23, %s7855_s8  ;;  %2960 = vrot.lane.b32.xlu0 %v10445_v57, %s7855_s8  ;;  %v13647_v57 = vld [vmem:[#allocation98_spill] sm:$0xff] }
 0x34c   :  { %v4732_v42 = vadd.f32 %v10764_v53, %v4484_v14  ;;  %v4733_v24 = vadd.f32 %v10764_v53, %v4485_v27  ;;  %v10970_v23 = vmax.f32 %v13647_v57, %v10733_v52 }
 0x34d   :  { %v10936_v32 = vpop.permute.xlu1 %2678  ;;  %v10938_v49 = vpop.permute.xlu0 %2680 }
 0x34e   :  { %v4973_v26 = vmax.f32 %v4732_v42, 0.0  ;;  %v4974_v2 = vmax.f32 %v4733_v24, 0.0 }
 0x34f   :  { %3861 = vrot.lane.b32.xlu1 %v10930_v13, %s7856_s17  ;;  %3863 = vrot.lane.b32.xlu0 %v10934_v50, %s7856_s17 }
 0x350   :  { %v6914_v14 = vpack.c.bf16 %v4973_v26, %v4973_v26  ;;  %v6915_v27 = vpack.c.bf16 %v4974_v2, %v4974_v2  ;;  %v13646_v2 = vld [vmem:[#allocation124_spill] sm:$0xff] }
 0x351   :  { %v10944_v43 = vpop.permute.xlu1 %2922  ;;  %v10946_v41 = vpop.permute.xlu0 %2924 }
 0x352   :  { %13643 = vst [vmem:[#allocation82_spill] sm:$0xff] %v10944_v43  ;;  %13644 = vst [vmem:[#allocation193_spill] sm:$0xff] %v10946_v41  ;;  %v13648_v41 = vld [vmem:[#allocation103_spill] sm:$0xff] }
 0x353   :  { %6180 = vst.msk [vmem:[%s12925_s3 + $0xf0] sm:$0xf] %vm6119_vm2, %v6914_v14  ;;  %6181 = vst.msk [vmem:[%s12925_s3 + $0xf4] sm:$0xf] %vm6119_vm2, %v6915_v27  ;;  %2718 = vrot.lane.b32.xlu1 %v13645_v21, %s7855_s8  ;;  %2720 = vrot.lane.b32.xlu0 %v10481_v51, %s7855_s8  ;;  %v10974_v43 = vmax.f32 %v13648_v41, %v10776_v45  ;;  %v13651_v45 = vld [vmem:[#allocation201_spill] sm:$0xff]  ;;  %v13652_v41 = vld [vmem:[#allocation204_spill] sm:$0xff] }
 0x355   :  { %v3826_v48 = vpop.permute.xlu1 %3825  ;;  %v3828_v42 = vpop.permute.xlu0 %3827 }
 0x356   :  { %v4486_v24 = vmax.f32 %v10545_v20, %v3826_v48  ;;  %v4487_v26 = vmax.f32 %v10549_v63, %v3828_v42 }
 0x357   :  { %2962 = vrot.lane.b32.xlu1 %v13646_v2, %s7855_s8  ;;  %2964 = vrot.lane.b32.xlu0 %v10493_v29, %s7855_s8  ;;  %v13653_v29 = vld [vmem:[#allocation134_spill] sm:$0xff]  ;;  %v13654_v2 = vld [vmem:[#allocation32_spill] sm:$0xff] }
 0x358   :  { %v4734_v14 = vadd.f32 %v10764_v53, %v4486_v24  ;;  %v4735_v27 = vadd.f32 %v10764_v53, %v4487_v26 }
 0x359   :  { %v10976_v20 = vpop.permute.xlu1 %2682  ;;  %v10978_v63 = vpop.permute.xlu0 %2684 }
 0x35a   :  { %v4975_v48 = vmax.f32 %v4734_v14, 0.0  ;;  %v4976_v42 = vmax.f32 %v4735_v27, 0.0 }
 0x35b   :  { %3865 = vrot.lane.b32.xlu1 %v10970_v23, %s7856_s17  ;;  %3867 = vrot.lane.b32.xlu0 %v10974_v43, %s7856_s17 }
 0x35c   :  { %v6916_v24 = vpack.c.bf16 %v4975_v48, %v4975_v48  ;;  %v6917_v26 = vpack.c.bf16 %v4976_v42, %v4976_v42 }
 0x35d   :  { %v10984_v57 = vpop.permute.xlu1 %2926  ;;  %v10986_v52 = vpop.permute.xlu0 %2928 }
 0x35e   :  { %13649 = vst [vmem:[#allocation22_spill] sm:$0xff] %v10984_v57  ;;  %13650 = vst [vmem:[#allocation159_spill] sm:$0xff] %v10986_v52  ;;  %v11010_v52 = vmax.f32 %v13654_v2, %v10778_v58  ;;  %v13655_v57 = vld [vmem:[#allocation110_spill] sm:$0xff] }
 0x35f   :  { %6182 = vst.msk [vmem:[%s12925_s3 + $0xf8] sm:$0xf] %vm6119_vm2, %v6916_v24  ;;  %6183 = vst.msk [vmem:[%s12925_s3 + $0xfc] sm:$0xf] %vm6119_vm2, %v6917_v26  ;;  %2722 = vrot.lane.b32.xlu1 %v13651_v45, %s7855_s8  ;;  %2724 = vrot.lane.b32.xlu0 %v13652_v41, %s7855_s8  ;;  %v11014_v59 = vmax.f32 %v13655_v57, %v10816_v28  ;;  %v13658_v28 = vld [vmem:[#allocation205_spill] sm:$0xff]  ;;  %v13659_v57 = vld [vmem:[#allocation208_spill] sm:$0xff] }
 0x361   :  { %v3830_v14 = vpop.permute.xlu1 %3829  ;;  %v3832_v27 = vpop.permute.xlu0 %3831 }
 0x362   :  { %v4488_v48 = vmax.f32 %v10593_v15, %v3830_v14  ;;  %v4489_v42 = vmax.f32 %v10597_v19, %v3832_v27 }
 0x363   :  { %2966 = vrot.lane.b32.xlu1 %v13653_v29, %s7855_s8  ;;  %2968 = vrot.lane.b32.xlu0 %v10541_v60, %s7855_s8  ;;  %v13660_v60 = vld [vmem:[#allocation138_spill] sm:$0xff]  ;;  %v13661_v29 = vld [vmem:[#allocation36_spill] sm:$0xff] }
 0x364   :  { %v4736_v24 = vadd.f32 %v10764_v53, %v4488_v48  ;;  %v4737_v26 = vadd.f32 %v10764_v53, %v4489_v42 }
 0x365   :  { %v11016_v15 = vpop.permute.xlu1 %2686  ;;  %v11018_v19 = vpop.permute.xlu0 %2688 }
 0x366   :  { %v4977_v14 = vmax.f32 %v4736_v24, 0.0  ;;  %v4978_v27 = vmax.f32 %v4737_v26, 0.0 }
 0x367   :  { %3869 = vrot.lane.b32.xlu1 %v11010_v52, %s7856_s17  ;;  %3871 = vrot.lane.b32.xlu0 %v11014_v59, %s7856_s17 }
 0x368   :  { %v6918_v48 = vpack.c.bf16 %v4977_v14, %v4977_v14  ;;  %v6919_v42 = vpack.c.bf16 %v4978_v27, %v4978_v27 }
 0x369   :  { %v11024_v58 = vpop.permute.xlu1 %2930  ;;  %v11026_v2 = vpop.permute.xlu0 %2932 }
 0x36a   :  { %13656 = vst [vmem:[#allocation94_spill] sm:$0xff] %v11024_v58  ;;  %13657 = vst [vmem:[#allocation26_spill] sm:$0xff] %v11026_v2  ;;  %v11050_v2 = vmax.f32 %v13661_v29, %v10818_v12  ;;  %v13662_v58 = vld [vmem:[#allocation126_spill] sm:$0xff] }
 0x36b   :  { %6184 = vst.msk [vmem:[%s12925_s3 + $0x100] sm:$0xf] %vm6119_vm2, %v6918_v48  ;;  %6185 = vst.msk [vmem:[%s12925_s3 + $0x104] sm:$0xf] %vm6119_vm2, %v6919_v42  ;;  %2726 = vrot.lane.b32.xlu1 %v13658_v28, %s7855_s8  ;;  %2728 = vrot.lane.b32.xlu0 %v13659_v57, %s7855_s8  ;;  %v11054_v1 = vmax.f32 %v13662_v58, %v10856_v38  ;;  %v13665_v38 = vld [vmem:[#allocation209_spill] sm:$0xff]  ;;  %v13666_v58 = vld [vmem:[#allocation212_spill] sm:$0xff] }
 0x36d   :  { %v3834_v24 = vpop.permute.xlu1 %3833  ;;  %v3836_v26 = vpop.permute.xlu0 %3835 }
 0x36e   :  { %v4490_v14 = vmax.f32 %v10641_v9, %v3834_v24  ;;  %v4491_v27 = vmax.f32 %v10645_v22, %v3836_v26 }
 0x36f   :  { %2970 = vrot.lane.b32.xlu1 %v13660_v60, %s7855_s8  ;;  %2972 = vrot.lane.b32.xlu0 %v10589_v10, %s7855_s8  ;;  %v13667_v10 = vld [vmem:[#allocation40_spill] sm:$0xff] }
 0x370   :  { %v4738_v48 = vadd.f32 %v10764_v53, %v4490_v14  ;;  %v4739_v42 = vadd.f32 %v10764_v53, %v4491_v27 }
 0x371   :  { %v11056_v9 = vpop.permute.xlu1 %2690  ;;  %v11058_v22 = vpop.permute.xlu0 %2692 }
 0x372   :  { %v4979_v24 = vmax.f32 %v4738_v48, 0.0  ;;  %v4980_v26 = vmax.f32 %v4739_v42, 0.0 }
 0x373   :  { %3873 = vrot.lane.b32.xlu1 %v11050_v2, %s7856_s17  ;;  %3875 = vrot.lane.b32.xlu0 %v11054_v1, %s7856_s17 }
 0x374   :  { %v6920_v14 = vpack.c.bf16 %v4979_v24, %v4979_v24  ;;  %v6921_v27 = vpack.c.bf16 %v4980_v26, %v4980_v26 }
 0x375   :  { %v11064_v29 = vpop.permute.xlu1 %2934  ;;  %v11066_v12 = vpop.permute.xlu0 %2936 }
 0x376   :  { %13663 = vst [vmem:[#allocation198_spill] sm:$0xff] %v11064_v29  ;;  %13664 = vst [vmem:[#allocation98_spill] sm:$0xff] %v11066_v12  ;;  %v13669_v12 = vld [vmem:[#allocation164_spill] sm:$0xff] }
 0x377   :  { %6186 = vst.msk [vmem:[%s12925_s3 + $0x108] sm:$0xf] %vm6119_vm2, %v6920_v14  ;;  %6187 = vst.msk [vmem:[%s12925_s3 + $0x10c] sm:$0xf] %vm6119_vm2, %v6921_v27  ;;  %2730 = vrot.lane.b32.xlu1 %v13665_v38, %s7855_s8  ;;  %2732 = vrot.lane.b32.xlu0 %v13666_v58, %s7855_s8  ;;  %v13668_v14 = vld [vmem:[#allocation214_spill] sm:$0xff]  ;;  %v11090_v29 = vmax.f32 %v13669_v12, %v10858_v18  ;;  %v11094_v58 = vmax.f32 %v13670_v11, %v10896_v61 }
 0x378   :  { %v13674_v11 = vld [vmem:[#allocation166_spill] sm:$0xff] }
 0x379   :  { %v3838_v48 = vpop.permute.xlu1 %3837  ;;  %v3840_v42 = vpop.permute.xlu0 %3839  ;;  %v11122_v61 = vmax.f32 %v13674_v11, %v10898_v47  ;;  %v13676_v11 = vld [vmem:[#allocation72_spill] sm:$0xff] }
 0x37a   :  { %v4492_v24 = vmax.f32 %v10685_v16, %v3838_v48  ;;  %v4493_v26 = vmax.f32 %v10689_v25, %v3840_v42 }
 0x37b   :  { %2974 = vrot.lane.b32.xlu1 %v13667_v10, %s7855_s8  ;;  %2976 = vrot.lane.b32.xlu0 %v13668_v14, %s7855_s8 }
 0x37c   :  { %v4740_v27 = vadd.f32 %v10764_v53, %v4492_v24  ;;  %v4741_v60 = vadd.f32 %v10764_v53, %v4493_v26 }
 0x37d   :  { %v11096_v16 = vpop.permute.xlu1 %2694  ;;  %v11098_v25 = vpop.permute.xlu0 %2696 }
 0x37e   :  { %v4981_v48 = vmax.f32 %v4740_v27, 0.0  ;;  %v4982_v42 = vmax.f32 %v4741_v60, 0.0  ;;  %v13673_v60 = vld [vmem:[#allocation213_spill] sm:$0xff]  ;;  %v13675_v27 = vld [vmem:[#allocation167_spill] sm:$0xff] }
 0x37f   :  { %3877 = vrot.lane.b32.xlu1 %v11090_v29, %s7856_s17  ;;  %3879 = vrot.lane.b32.xlu0 %v11094_v58, %s7856_s17 }
 0x380   :  { %v6922_v24 = vpack.c.bf16 %v4981_v48, %v4981_v48  ;;  %v6923_v26 = vpack.c.bf16 %v4982_v42, %v4982_v42  ;;  %v11126_v48 = vmax.f32 %v13675_v27, %v10936_v32 }
 0x381   :  { %v11104_v18 = vpop.permute.xlu1 %2938  ;;  %v11106_v12 = vpop.permute.xlu0 %2940 }
 0x382   :  { %13671 = vst [vmem:[#allocation103_spill] sm:$0xff] %v11104_v18  ;;  %13672 = vst [vmem:[#allocation201_spill] sm:$0xff] %v11106_v12  ;;  %v13677_v12 = vld [vmem:[#allocation2_spill] sm:$0xff] }
 0x383   :  { %6188 = vst.msk [vmem:[%s12925_s3 + $0x110] sm:$0xf] %vm6119_vm2, %v6922_v24  ;;  %6189 = vst.msk [vmem:[%s12925_s3 + $0x114] sm:$0xf] %vm6119_vm2, %v6923_v26  ;;  %2734 = vrot.lane.b32.xlu1 %v13673_v60, %s7855_s8  ;;  %2736 = vrot.lane.b32.xlu0 %v10671_v62, %s7855_s8  ;;  %v11138_v32 = vmax.f32 %v13677_v12, %v13676_v11  ;;  %v13680_v12 = vld [vmem:[#allocation10_spill] sm:$0xff] }
 0x384   :  { %v11154_v11 = vmax.f32 %v13680_v12, %v10976_v20  ;;  %v13685_v20 = vld [vmem:[#allocation3_spill] sm:$0xff] }
 0x385   :  { %v3842_v42 = vpop.permute.xlu1 %3841  ;;  %v3844_v24 = vpop.permute.xlu0 %3843 }
 0x386   :  { %v4494_v14 = vmax.f32 %v10725_v56, %v3842_v42  ;;  %v4495_v26 = vmax.f32 %v10729_v6, %v3844_v24  ;;  %v13678_v24 = vld [vmem:[#allocation170_spill] sm:$0xff]  ;;  %13681 = vst [vmem:[#allocation32_spill] sm:$0xff] %v11154_v11 }
 0x387   :  { %3881 = vrot.lane.b32.xlu1 %v11122_v61, %s7856_s17  ;;  %3883 = vrot.lane.b32.xlu0 %v11126_v48, %s7856_s17 }
 0x388   :  { %v4742_v10 = vadd.f32 %v10764_v53, %v4494_v14  ;;  %v4743_v47 = vadd.f32 %v10764_v53, %v4495_v26  ;;  %v11150_v26 = vmax.f32 %v13678_v24, %v10938_v49  ;;  %v13684_v49 = vld [vmem:[#allocation75_spill] sm:$0xff] }
 0x389   :  { %v11140_v27 = vpop.permute.xlu1 %2698  ;;  %v11142_v18 = vpop.permute.xlu0 %2700 }
 0x38a   :  { %v4983_v56 = vmax.f32 %v4742_v10, 0.0  ;;  %v4984_v6 = vmax.f32 %v4743_v47, 0.0  ;;  %13679 = vst [vmem:[#allocation204_spill] sm:$0xff] %v11150_v26  ;;  %v11174_v47 = vmax.f32 %v13685_v20, %v13684_v49  ;;  %v13690_v20 = vld [vmem:[#allocation172_spill] sm:$0xff] }
 0x38b   :  { %3975 = vrot.lane.b32.xlu0 %v11138_v32, %s7856_s17  ;;  %2738 = vrot.lane.b32.xlu1 %v10681_v7, %s7855_s8 }
 0x38c   :  { %v6924_v42 = vpack.c.bf16 %v4983_v56, %v4983_v56  ;;  %v6925_v14 = vpack.c.bf16 %v4984_v6, %v4984_v6  ;;  %13686 = vst [vmem:[#allocation208_spill] sm:$0xff] %v11174_v47  ;;  %v13687_v56 = vld [vmem:[#allocation79_spill] sm:$0xff]  ;;  %v13688_v6 = vld [vmem:[#allocation5_spill] sm:$0xff] }
 0x38d   :  { %v11156_v62 = vpop.permute.xlu1 %2942  ;;  %v11158_v10 = vpop.permute.xlu0 %2944  ;;  %v11178_v24 = vmax.f32 %v13688_v6, %v13687_v56  ;;  %v11190_v56 = vmax.f32 %v13690_v20, %v10978_v63  ;;  %v13691_v6 = vld [vmem:[#allocation14_spill] sm:$0xff]  ;;  %v13692_v63 = vld [vmem:[#allocation84_spill] sm:$0xff]  ;;  %v13693_v20 = vld [vmem:[#allocation7_spill] sm:$0xff] }
 0x38e   :  { %13682 = vst [vmem:[#allocation110_spill] sm:$0xff] %v11156_v62  ;;  %13683 = vst [vmem:[#allocation205_spill] sm:$0xff] %v11158_v10 }
 0x38f   :  { %6190 = vst.msk [vmem:[%s12925_s3 + $0x118] sm:$0xf] %vm6119_vm2, %v6924_v42  ;;  %6191 = vst.msk [vmem:[%s12925_s3 + $0x11c] sm:$0xf] %vm6119_vm2, %v6925_v14  ;;  %3887 = vrot.lane.b32.xlu0 %v11154_v11, %s7856_s17  ;;  %3885 = vrot.lane.b32.xlu1 %v11150_v26, %s7856_s17  ;;  %v11194_v26 = vmax.f32 %v13691_v6, %v11016_v15  ;;  %v13694_v15 = vld [vmem:[#allocation88_spill] sm:$0xff]  ;;  %v13695_v6 = vld [vmem:[#allocation9_spill] sm:$0xff] }
 0x390   :  { %13689 = vst [vmem:[#allocation36_spill] sm:$0xff] %v11178_v24 }
 0x391   :  { %v3846_v42 = vpop.permute.xlu1 %3845  ;;  %v3848_v12 = vpop.permute.xlu0 %3847 }
 0x392   :  { %v4496_v10 = vmax.f32 %v10770_v0, %v3846_v42  ;;  %v4497_v14 = vmax.f32 %v10774_v34, %v3848_v12 }
 0x393   :  { %3979 = vrot.lane.b32.xlu0 %v11178_v24, %s7856_s17  ;;  %3977 = vrot.lane.b32.xlu1 %v11174_v47, %s7856_s17  ;;  %v11206_v47 = vmax.f32 %v13693_v20, %v13692_v63  ;;  %v11210_v24 = vmax.f32 %v13695_v6, %v13694_v15  ;;  %v13699_v6 = vld [vmem:[#allocation91_spill] sm:$0xff] }
 0x394   :  { %v4744_v62 = vadd.f32 %v10764_v53, %v4496_v10  ;;  %v4745_v49 = vadd.f32 %v10764_v53, %v4497_v14 }
 0x395   :  { %v11196_v0 = vpop.permute.xlu1 %2702  ;;  %v11198_v34 = vpop.permute.xlu0 %2704 }
 0x396   :  { %v4985_v42 = vmax.f32 %v4744_v62, 0.0  ;;  %v4986_v12 = vmax.f32 %v4745_v49, 0.0  ;;  %v13698_v49 = vld [vmem:[#allocation175_spill] sm:$0xff] }
 0x397   :  { %3891 = vrot.lane.b32.xlu0 %v11194_v26, %s7856_s17  ;;  %3889 = vrot.lane.b32.xlu1 %v11190_v56, %s7856_s17 }
 0x398   :  { %v6926_v10 = vpack.c.bf16 %v4985_v42, %v4985_v42  ;;  %v6927_v14 = vpack.c.bf16 %v4986_v12, %v4986_v12  ;;  %v11230_v42 = vmax.f32 %v13698_v49, %v11018_v19  ;;  %v11234_v12 = vmax.f32 %v13604_v35, %v11056_v9  ;;  %v13700_v49 = vld [vmem:[#allocation11_spill] sm:$0xff] }
 0x399   :  { %v11212_v11 = vpop.permute.xlu1 %2946  ;;  %v11214_v62 = vpop.permute.xlu0 %2948  ;;  %v11246_v35 = vmax.f32 %v13700_v49, %v13699_v6  ;;  %v13701_v9 = vld [vmem:[#allocation95_spill] sm:$0xff] }
 0x39a   :  { %13696 = vst [vmem:[#allocation126_spill] sm:$0xff] %v11212_v11  ;;  %13697 = vst [vmem:[#allocation209_spill] sm:$0xff] %v11214_v62  ;;  %v13702_v62 = vld [vmem:[#allocation13_spill] sm:$0xff]  ;;  %v13703_v6 = vld [vmem:[#allocation179_spill] sm:$0xff] }
 0x39b   :  { %6192 = vst.msk [vmem:[%s12925_s3 + $0x120] sm:$0xf] %vm6119_vm2, %v6926_v10  ;;  %6193 = vst.msk [vmem:[%s12925_s3 + $0x124] sm:$0xf] %vm6119_vm2, %v6927_v14  ;;  %3983 = vrot.lane.b32.xlu0 %v11210_v24, %s7856_s17  ;;  %3981 = vrot.lane.b32.xlu1 %v11206_v47, %s7856_s17  ;;  %v11250_v11 = vmax.f32 %v13702_v62, %v13701_v9  ;;  %v11262_v49 = vmax.f32 %v13703_v6, %v11058_v22  ;;  %v13707_v22 = vld [vmem:[#allocation15_spill] sm:$0xff] }
 0x39c   :  { %v11266_v62 = vmax.f32 %v13611_v4, %v11096_v16  ;;  %v13706_v4 = vld [vmem:[#allocation100_spill] sm:$0xff] }
 0x39d   :  { %v3850_v10 = vpop.permute.xlu1 %3849  ;;  %v3852_v63 = vpop.permute.xlu0 %3851  ;;  %v11286_v16 = vmax.f32 %v13707_v22, %v13706_v4  ;;  %v11302_v22 = vmax.f32 %v10193_v40, %v11098_v25  ;;  %v13713_v40 = vld [vmem:[#allocation19_spill] sm:$0xff] }
 0x39e   :  { %v4498_v20 = vmax.f32 %v10810_v8, %v3850_v10  ;;  %v4499_v14 = vmax.f32 %v10814_v33, %v3852_v63 }
 0x39f   :  { %3895 = vrot.lane.b32.xlu0 %v11234_v12, %s7856_s17  ;;  %3893 = vrot.lane.b32.xlu1 %v11230_v42, %s7856_s17  ;;  %13708 = vst [vmem:[#allocation213_spill] sm:$0xff] %v11286_v16 }
 0x3a0   :  { %v4746_v15 = vadd.f32 %v10764_v53, %v4498_v20  ;;  %v4747_v19 = vadd.f32 %v10764_v53, %v4499_v14 }
 0x3a1   :  { %v11252_v8 = vpop.permute.xlu1 %2706  ;;  %v11254_v33 = vpop.permute.xlu0 %2708 }
 0x3a2   :  { %v4987_v10 = vmax.f32 %v4746_v15, 0.0  ;;  %v4988_v63 = vmax.f32 %v4747_v19, 0.0  ;;  %v13709_v19 = vld [vmem:[#allocation104_spill] sm:$0xff] }
 0x3a3   :  { %3987 = vrot.lane.b32.xlu0 %v11250_v11, %s7856_s17  ;;  %3985 = vrot.lane.b32.xlu1 %v11246_v35, %s7856_s17 }
 0x3a4   :  { %v6928_v20 = vpack.c.bf16 %v4987_v10, %v4987_v10  ;;  %v6929_v14 = vpack.c.bf16 %v4988_v63, %v4988_v63  ;;  %v13710_v10 = vld [vmem:[#allocation17_spill] sm:$0xff] }
 0x3a5   :  { %v11268_v9 = vpop.permute.xlu1 %2950  ;;  %v11270_v15 = vpop.permute.xlu0 %2952  ;;  %v11290_v63 = vmax.f32 %v13710_v10, %v13709_v19  ;;  %v11306_v19 = vmax.f32 %v13616_v5, %v11140_v27  ;;  %v13715_v5 = vld [vmem:[#allocation21_spill] sm:$0xff] }
 0x3a6   :  { %13704 = vst [vmem:[#allocation164_spill] sm:$0xff] %v11268_v9  ;;  %13705 = vst [vmem:[#allocation140_spill] sm:$0xff] %v11270_v15 }
 0x3a7   :  { %6194 = vst.msk [vmem:[%s12925_s3 + $0x128] sm:$0xf] %vm6119_vm2, %v6928_v20  ;;  %6195 = vst.msk [vmem:[%s12925_s3 + $0x12c] sm:$0xf] %vm6119_vm2, %v6929_v14  ;;  %3899 = vrot.lane.b32.xlu0 %v11266_v62, %s7856_s17  ;;  %3897 = vrot.lane.b32.xlu1 %v11262_v49, %s7856_s17 }
 0x3a8   :  { %13711 = vst [vmem:[#allocation166_spill] sm:$0xff] %v11290_v63 }
 0x3a9   :  { %v3854_v20 = vpop.permute.xlu1 %3853  ;;  %v3856_v6 = vpop.permute.xlu0 %3855 }
 0x3aa   :  { %v4500_v15 = vmax.f32 %v10850_v39, %v3854_v20  ;;  %v4501_v14 = vmax.f32 %v10854_v30, %v3856_v6 }
 0x3ab   :  { %3991 = vrot.lane.b32.xlu0 %v11290_v63, %s7856_s17  ;;  %3989 = vrot.lane.b32.xlu1 %v11286_v16, %s7856_s17  ;;  %v13714_v16 = vld [vmem:[#allocation111_spill] sm:$0xff] }
 0x3ac   :  { %v4748_v9 = vadd.f32 %v10764_v53, %v4500_v15  ;;  %v4749_v4 = vadd.f32 %v10764_v53, %v4501_v14  ;;  %v13712_v14 = vld [vmem:[#allocation107_spill] sm:$0xff]  ;;  %v11320_v27 = vmax.f32 %v13715_v5, %v13714_v16  ;;  %v11340_v16 = vmax.f32 %v10241_v37, %v11142_v18  ;;  %v13719_v18 = vld [vmem:[#allocation116_spill] sm:$0xff] }
 0x3ad   :  { %v2711_v39 = vpop.permute.xlu1 %2710  ;;  %v11308_v30 = vpop.permute.xlu0 %2712  ;;  %v11316_v25 = vmax.f32 %v13713_v40, %v13712_v14  ;;  %v13720_v5 = vld [vmem:[#allocation23_spill] sm:$0xff] }
 0x3ae   :  { %v4989_v10 = vmax.f32 %v4748_v9, 0.0  ;;  %v4990_v20 = vmax.f32 %v4749_v4, 0.0  ;;  %v13718_v4 = vld [vmem:[#allocation186_spill] sm:$0xff] }
 0x3af   :  { %3903 = vrot.lane.b32.xlu0 %v11306_v19, %s7856_s17  ;;  %3901 = vrot.lane.b32.xlu1 %v11302_v22, %s7856_s17 }
 0x3b0   :  { %v6930_v15 = vpack.c.bf16 %v4989_v10, %v4989_v10  ;;  %v6931_v6 = vpack.c.bf16 %v4990_v20, %v4990_v20  ;;  %v11344_v10 = vmax.f32 %v13718_v4, %v11196_v0  ;;  %v11356_v0 = vmax.f32 %v13720_v5, %v13719_v18  ;;  %v13721_v4 = vld [vmem:[#allocation120_spill] sm:$0xff]  ;;  %v13723_v18 = vld [vmem:[#allocation189_spill] sm:$0xff] }
 0x3b1   :  { %v11322_v63 = vpop.permute.xlu1 %2954  ;;  %v11324_v9 = vpop.permute.xlu0 %2956  ;;  %v11370_v5 = vmax.f32 %v13723_v18, %v11198_v34  ;;  %v13727_v34 = vld [vmem:[#allocation27_spill] sm:$0xff] }
 0x3b2   :  { %13716 = vst [vmem:[#allocation167_spill] sm:$0xff] %v11322_v63  ;;  %13717 = vst [vmem:[#allocation72_spill] sm:$0xff] %v11324_v9  ;;  %v13722_v9 = vld [vmem:[#allocation25_spill] sm:$0xff] }
 0x3b3   :  { %6196 = vst.msk [vmem:[%s12925_s3 + $0x130] sm:$0xf] %vm6119_vm2, %v6930_v15  ;;  %6197 = vst.msk [vmem:[%s12925_s3 + $0x134] sm:$0xf] %vm6119_vm2, %v6931_v6  ;;  %3995 = vrot.lane.b32.xlu0 %v11320_v27, %s7856_s17  ;;  %3993 = vrot.lane.b32.xlu1 %v11316_v25, %s7856_s17  ;;  %v11360_v63 = vmax.f32 %v13722_v9, %v13721_v4  ;;  %v11374_v9 = vmax.f32 %v13630_v36, %v11252_v8  ;;  %v13726_v36 = vld [vmem:[#allocation123_spill] sm:$0xff] }
 0x3b4   :  { %v11394_v8 = vmax.f32 %v13727_v34, %v13726_v36  ;;  %v11410_v34 = vmax.f32 %v10337_v31, %v11254_v33  ;;  %v13734_v31 = vld [vmem:[#allocation141_spill] sm:$0xff] }
 0x3b5   :  { %v3858_v20 = vpop.permute.xlu1 %3857  ;;  %v3860_v15 = vpop.permute.xlu0 %3859  ;;  %v13735_v33 = vld [vmem:[#allocation33_spill] sm:$0xff] }
 0x3b6   :  { %v4502_v14 = vmax.f32 %v10890_v44, %v3858_v20  ;;  %v4503_v6 = vmax.f32 %v10894_v17, %v3860_v15  ;;  %13728 = vst [vmem:[#allocation10_spill] sm:$0xff] %v11394_v8 }
 0x3b7   :  { %3907 = vrot.lane.b32.xlu0 %v11344_v10, %s7856_s17  ;;  %3905 = vrot.lane.b32.xlu1 %v11340_v16, %s7856_s17 }
 0x3b8   :  { %v4750_v40 = vadd.f32 %v10764_v53, %v4502_v14  ;;  %v4751_v37 = vadd.f32 %v10764_v53, %v4503_v6 }
 0x3b9   :  { %v2715_v44 = vpop.permute.xlu1 %2714  ;;  %v11362_v17 = vpop.permute.xlu0 %2716 }
 0x3ba   :  { %v4991_v20 = vmax.f32 %v4750_v40, 0.0  ;;  %v4992_v15 = vmax.f32 %v4751_v37, 0.0  ;;  %v13729_v37 = vld [vmem:[#allocation127_spill] sm:$0xff] }
 0x3bb   :  { %3999 = vrot.lane.b32.xlu0 %v11360_v63, %s7856_s17  ;;  %3997 = vrot.lane.b32.xlu1 %v11356_v0, %s7856_s17 }
 0x3bc   :  { %v6932_v14 = vpack.c.bf16 %v4991_v20, %v4991_v20  ;;  %v6933_v6 = vpack.c.bf16 %v4992_v15, %v4992_v15  ;;  %v13730_v20 = vld [vmem:[#allocation29_spill] sm:$0xff] }
 0x3bd   :  { %v11376_v4 = vpop.permute.xlu1 %2958  ;;  %v11378_v40 = vpop.permute.xlu0 %2960  ;;  %v11398_v15 = vmax.f32 %v13730_v20, %v13729_v37  ;;  %v11413_v37 = vmax.f32 %v13635_v46, %v2711_v39  ;;  %v11425_v46 = vmax.f32 %v13735_v33, %v13734_v31  ;;  %v13739_v31 = vld [vmem:[#allocation35_spill] sm:$0xff]  ;;  %v13741_v33 = vld [vmem:[#allocation37_spill] sm:$0xff] }
 0x3be   :  { %13724 = vst [vmem:[#allocation2_spill] sm:$0xff] %v11376_v4  ;;  %13725 = vst [vmem:[#allocation170_spill] sm:$0xff] %v11378_v40 }
 0x3bf   :  { %6198 = vst.msk [vmem:[%s12925_s3 + $0x138] sm:$0xf] %vm6119_vm2, %v6932_v14  ;;  %6199 = vst.msk [vmem:[%s12925_s3 + $0x13c] sm:$0xf] %vm6119_vm2, %v6933_v6  ;;  %3911 = vrot.lane.b32.xlu0 %v11374_v9, %s7856_s17  ;;  %3909 = vrot.lane.b32.xlu1 %v11370_v5, %s7856_s17 }
 0x3c0   :  { %13731 = vst [vmem:[#allocation75_spill] sm:$0xff] %v11398_v15 }
 0x3c1   :  { %v3862_v14 = vpop.permute.xlu1 %3861  ;;  %v3864_v18 = vpop.permute.xlu0 %3863 }
 0x3c2   :  { %v4504_v40 = vmax.f32 %v10930_v13, %v3862_v14  ;;  %v4505_v6 = vmax.f32 %v10934_v50, %v3864_v18 }
 0x3c3   :  { %4003 = vrot.lane.b32.xlu0 %v11398_v15, %s7856_s17  ;;  %4001 = vrot.lane.b32.xlu1 %v11394_v8, %s7856_s17  ;;  %v13733_v8 = vld [vmem:[#allocation31_spill] sm:$0xff] }
 0x3c4   :  { %v4752_v4 = vadd.f32 %v10764_v53, %v4504_v40  ;;  %v4753_v36 = vadd.f32 %v10764_v53, %v4505_v6  ;;  %v13732_v6 = vld [vmem:[#allocation133_spill] sm:$0xff] }
 0x3c5   :  { %v2719_v13 = vpop.permute.xlu1 %2718  ;;  %v2721_v20 = vpop.permute.xlu0 %2720  ;;  %v11421_v15 = vmax.f32 %v13733_v8, %v13732_v6  ;;  %v11445_v8 = vmax.f32 %v10385_v3, %v11308_v30  ;;  %v13738_v30 = vld [vmem:[#allocation144_spill] sm:$0xff] }
 0x3c6   :  { %v4993_v50 = vmax.f32 %v4752_v4, 0.0  ;;  %v4994_v14 = vmax.f32 %v4753_v36, 0.0  ;;  %v11448_v36 = vmax.f32 %v10395_v54, %v2715_v44  ;;  %v11460_v54 = vmax.f32 %v13739_v31, %v13738_v30  ;;  %v13740_v44 = vld [vmem:[#allocation47_spill] sm:$0xff] }
 0x3c7   :  { %3915 = vrot.lane.b32.xlu0 %v11413_v37, %s7856_s17  ;;  %3913 = vrot.lane.b32.xlu1 %v11410_v34, %s7856_s17  ;;  %v11472_v30 = vmax.f32 %v10433_v55, %v11362_v17  ;;  %v11475_v31 = vmax.f32 %v13645_v21, %v2719_v13  ;;  %v13744_v55 = vld [vmem:[#allocation148_spill] sm:$0xff]  ;;  %v13745_v21 = vld [vmem:[#allocation39_spill] sm:$0xff] }
 0x3c8   :  { %v6934_v40 = vpack.c.bf16 %v4993_v50, %v4993_v50  ;;  %v6935_v18 = vpack.c.bf16 %v4994_v14, %v4994_v14  ;;  %v11495_v17 = vmax.f32 %v13745_v21, %v13744_v55  ;;  %v13746_v13 = vld [vmem:[#allocation151_spill] sm:$0xff]  ;;  %v11510_v21 = vmax.f32 %v10481_v51, %v2721_v20  ;;  %v13750_v51 = vld [vmem:[#allocation18_spill] sm:$0xff]  ;;  %v13751_v20 = vld [vmem:[#allocation49_spill] sm:$0xff] }
 0x3c9   :  { %v11427_v39 = vpop.permute.xlu1 %2962  ;;  %v11429_v4 = vpop.permute.xlu0 %2964 }
 0x3ca   :  { %13736 = vst [vmem:[#allocation3_spill] sm:$0xff] %v11427_v39  ;;  %13737 = vst [vmem:[#allocation79_spill] sm:$0xff] %v11429_v4  ;;  %v11464_v4 = vmax.f32 %v13741_v33, %v13740_v44 }
 0x3cb   :  { %6200 = vst.msk [vmem:[%s12925_s3 + $0x140] sm:$0xf] %vm6119_vm2, %v6934_v40  ;;  %6201 = vst.msk [vmem:[%s12925_s3 + $0x144] sm:$0xf] %vm6119_vm2, %v6935_v18  ;;  %4007 = vrot.lane.b32.xlu0 %v11425_v46, %s7856_s17  ;;  %4005 = vrot.lane.b32.xlu1 %v11421_v15, %s7856_s17 }
 0x3cd   :  { %v3866_v50 = vpop.permute.xlu1 %3865  ;;  %v3868_v14 = vpop.permute.xlu0 %3867 }
 0x3ce   :  { %v4506_v40 = vmax.f32 %v10970_v23, %v3866_v50  ;;  %v4507_v6 = vmax.f32 %v10974_v43, %v3868_v14 }
 0x3cf   :  { %3919 = vrot.lane.b32.xlu0 %v11448_v36, %s7856_s17  ;;  %3917 = vrot.lane.b32.xlu1 %v11445_v8, %s7856_s17 }
 0x3d0   :  { %v4754_v18 = vadd.f32 %v10764_v53, %v4506_v40  ;;  %v4755_v3 = vadd.f32 %v10764_v53, %v4507_v6 }
 0x3d1   :  { %v2723_v23 = vpop.permute.xlu1 %2722  ;;  %v2725_v43 = vpop.permute.xlu0 %2724 }
 0x3d2   :  { %v4995_v50 = vmax.f32 %v4754_v18, 0.0  ;;  %v4996_v14 = vmax.f32 %v4755_v3, 0.0  ;;  %v13747_v18 = vld [vmem:[#allocation42_spill] sm:$0xff] }
 0x3d3   :  { %4011 = vrot.lane.b32.xlu0 %v11464_v4, %s7856_s17  ;;  %4009 = vrot.lane.b32.xlu1 %v11460_v54, %s7856_s17  ;;  %v11499_v3 = vmax.f32 %v13747_v18, %v13746_v13  ;;  %v11513_v13 = vmax.f32 %v13651_v45, %v2723_v23  ;;  %v11525_v45 = vmax.f32 %v13751_v20, %v13750_v51  ;;  %v13755_v51 = vld [vmem:[#allocation51_spill] sm:$0xff]  ;;  %v13757_v20 = vld [vmem:[#allocation54_spill] sm:$0xff] }
 0x3d4   :  { %v6936_v40 = vpack.c.bf16 %v4995_v50, %v4995_v50  ;;  %v6937_v6 = vpack.c.bf16 %v4996_v14, %v4996_v14 }
 0x3d5   :  { %v11477_v44 = vpop.permute.xlu1 %2966  ;;  %v11479_v33 = vpop.permute.xlu0 %2968 }
 0x3d6   :  { %13742 = vst [vmem:[#allocation5_spill] sm:$0xff] %v11477_v44  ;;  %13743 = vst [vmem:[#allocation172_spill] sm:$0xff] %v11479_v33  ;;  %v13748_v44 = vld [vmem:[#allocation16_spill] sm:$0xff] }
 0x3d7   :  { %6202 = vst.msk [vmem:[%s12925_s3 + $0x148] sm:$0xf] %vm6119_vm2, %v6936_v40  ;;  %6203 = vst.msk [vmem:[%s12925_s3 + $0x14c] sm:$0xf] %vm6119_vm2, %v6937_v6  ;;  %3923 = vrot.lane.b32.xlu0 %v11475_v31, %s7856_s17  ;;  %3921 = vrot.lane.b32.xlu1 %v11472_v30, %s7856_s17 }
 0x3d9   :  { %v3870_v50 = vpop.permute.xlu1 %3869  ;;  %v3872_v14 = vpop.permute.xlu0 %3871 }
 0x3da   :  { %v4508_v40 = vmax.f32 %v11010_v52, %v3870_v50  ;;  %v4509_v6 = vmax.f32 %v11014_v59, %v3872_v14 }
 0x3db   :  { %4015 = vrot.lane.b32.xlu0 %v11499_v3, %s7856_s17  ;;  %4013 = vrot.lane.b32.xlu1 %v11495_v17, %s7856_s17 }
 0x3dc   :  { %v4756_v33 = vadd.f32 %v10764_v53, %v4508_v40  ;;  %v4757_v55 = vadd.f32 %v10764_v53, %v4509_v6  ;;  %v13749_v6 = vld [vmem:[#allocation46_spill] sm:$0xff] }
 0x3dd   :  { %v2727_v18 = vpop.permute.xlu1 %2726  ;;  %v2729_v52 = vpop.permute.xlu0 %2728  ;;  %v11521_v39 = vmax.f32 %v13749_v6, %v13748_v44  ;;  %v11544_v44 = vmax.f32 %v13652_v41, %v2725_v43  ;;  %v13754_v43 = vld [vmem:[#allocation157_spill] sm:$0xff] }
 0x3de   :  { %v4997_v50 = vmax.f32 %v4756_v33, 0.0  ;;  %v4998_v59 = vmax.f32 %v4757_v55, 0.0  ;;  %v11547_v55 = vmax.f32 %v13658_v28, %v2727_v18  ;;  %v11559_v28 = vmax.f32 %v13755_v51, %v13754_v43  ;;  %v13756_v18 = vld [vmem:[#allocation87_spill] sm:$0xff] }
 0x3df   :  { %3927 = vrot.lane.b32.xlu0 %v11513_v13, %s7856_s17  ;;  %3925 = vrot.lane.b32.xlu1 %v11510_v21, %s7856_s17 }
 0x3e0   :  { %v6938_v14 = vpack.c.bf16 %v4997_v50, %v4997_v50  ;;  %v6939_v40 = vpack.c.bf16 %v4998_v59, %v4998_v59 }
 0x3e1   :  { %v11527_v23 = vpop.permute.xlu1 %2970  ;;  %v11529_v33 = vpop.permute.xlu0 %2972 }
 0x3e2   :  { %13752 = vst [vmem:[#allocation14_spill] sm:$0xff] %v11527_v23  ;;  %13753 = vst [vmem:[#allocation84_spill] sm:$0xff] %v11529_v33  ;;  %v11563_v33 = vmax.f32 %v13757_v20, %v13756_v18  ;;  %v11570_v23 = vmax.f32 %v13659_v57, %v2729_v52  ;;  %v13761_v57 = vld [vmem:[#allocation161_spill] sm:$0xff] }
 0x3e3   :  { %6204 = vst.msk [vmem:[%s12925_s3 + $0x150] sm:$0xf] %vm6119_vm2, %v6938_v14  ;;  %6205 = vst.msk [vmem:[%s12925_s3 + $0x154] sm:$0xf] %vm6119_vm2, %v6939_v40  ;;  %4019 = vrot.lane.b32.xlu0 %v11525_v45, %s7856_s17  ;;  %4017 = vrot.lane.b32.xlu1 %v11521_v39, %s7856_s17 }
 0x3e4   :  { %13758 = vst [vmem:[#allocation7_spill] sm:$0xff] %v11570_v23 }
 0x3e5   :  { %v3874_v50 = vpop.permute.xlu1 %3873  ;;  %v3876_v59 = vpop.permute.xlu0 %3875 }
 0x3e6   :  { %v4510_v14 = vmax.f32 %v11050_v2, %v3874_v50  ;;  %v4511_v6 = vmax.f32 %v11054_v1, %v3876_v59 }
 0x3e7   :  { %3931 = vrot.lane.b32.xlu0 %v11547_v55, %s7856_s17  ;;  %3929 = vrot.lane.b32.xlu1 %v11544_v44, %s7856_s17 }
 0x3e8   :  { %v4758_v40 = vadd.f32 %v10764_v53, %v4510_v14  ;;  %v4759_v41 = vadd.f32 %v10764_v53, %v4511_v6 }
 0x3e9   :  { %v2731_v2 = vpop.permute.xlu1 %2730  ;;  %v2733_v1 = vpop.permute.xlu0 %2732 }
 0x3ea   :  { %v4999_v50 = vmax.f32 %v4758_v40, 0.0  ;;  %v5000_v59 = vmax.f32 %v4759_v41, 0.0  ;;  %v11573_v43 = vmax.f32 %v13665_v38, %v2731_v2  ;;  %v13762_v38 = vld [vmem:[#allocation58_spill] sm:$0xff]  ;;  %v13764_v40 = vld [vmem:[#allocation99_spill] sm:$0xff]  ;;  %v13765_v41 = vld [vmem:[#allocation61_spill] sm:$0xff] }
 0x3eb   :  { %4023 = vrot.lane.b32.xlu0 %v11563_v33, %s7856_s17  ;;  %4021 = vrot.lane.b32.xlu1 %v11559_v28, %s7856_s17  ;;  %v11593_v52 = vmax.f32 %v13762_v38, %v13761_v57  ;;  %v11597_v20 = vmax.f32 %v13765_v41, %v13764_v40  ;;  %v13766_v38 = vld [vmem:[#allocation212_spill] sm:$0xff] }
 0x3ec   :  { %v6940_v14 = vpack.c.bf16 %v4999_v50, %v4999_v50  ;;  %v6941_v6 = vpack.c.bf16 %v5000_v59, %v5000_v59 }
 0x3ed   :  { %v11575_v51 = vpop.permute.xlu1 %2974  ;;  %v11577_v18 = vpop.permute.xlu0 %2976  ;;  %13763 = vst [vmem:[#allocation175_spill] sm:$0xff] %v11593_v52 }
 0x3ee   :  { %13759 = vst [vmem:[#allocation88_spill] sm:$0xff] %v11575_v51  ;;  %13760 = vst [vmem:[#allocation9_spill] sm:$0xff] %v11577_v18  ;;  %v11608_v18 = vmax.f32 %v13766_v38, %v2733_v1 }
 0x3ef   :  { %6206 = vst.msk [vmem:[%s12925_s3 + $0x158] sm:$0xf] %vm6119_vm2, %v6940_v14  ;;  %6207 = vst.msk [vmem:[%s12925_s3 + $0x15c] sm:$0xf] %vm6119_vm2, %v6941_v6  ;;  %3935 = vrot.lane.b32.xlu0 %v11573_v43, %s7856_s17  ;;  %3933 = vrot.lane.b32.xlu1 %v11570_v23, %s7856_s17 }
 0x3f1   :  { %v3878_v2 = vpop.permute.xlu1 %3877  ;;  %v3880_v50 = vpop.permute.xlu0 %3879 }
 0x3f2   :  { %v4512_v59 = vmax.f32 %v11090_v29, %v3878_v2  ;;  %v4513_v14 = vmax.f32 %v11094_v58, %v3880_v50  ;;  %v13767_v50 = vld [vmem:[#allocation128_spill] sm:$0xff] }
 0x3f3   :  { %4027 = vrot.lane.b32.xlu0 %v11597_v20, %s7856_s17  ;;  %4025 = vrot.lane.b32.xlu1 %v11593_v52, %s7856_s17  ;;  %v13769_v52 = vld [vmem:[#allocation115_spill] sm:$0xff] }
 0x3f4   :  { %v4760_v6 = vadd.f32 %v10764_v53, %v4512_v59  ;;  %v4761_v57 = vadd.f32 %v10764_v53, %v4513_v14  ;;  %v13768_v59 = vld [vmem:[#allocation63_spill] sm:$0xff] }
 0x3f5   :  { %v2735_v40 = vpop.permute.xlu1 %2734  ;;  %v2737_v41 = vpop.permute.xlu0 %2736  ;;  %v11619_v14 = vmax.f32 %v13768_v59, %v13767_v50 }
 0x3f6   :  { %v5001_v51 = vmax.f32 %v4760_v6, 0.0  ;;  %v5002_v23 = vmax.f32 %v4761_v57, 0.0  ;;  %v11611_v29 = vmax.f32 %v13673_v60, %v2735_v40  ;;  %v13770_v6 = vld [vmem:[#allocation66_spill] sm:$0xff]  ;;  %v13772_v40 = vld [vmem:[#allocation176_spill] sm:$0xff] }
 0x3f7   :  { %3937 = vrot.lane.b32.xlu1 %v11608_v18, %s7856_s17  ;;  %v11623_v57 = vmax.f32 %v13770_v6, %v13769_v52 }
 0x3f8   :  { %v6942_v58 = vpack.c.bf16 %v5001_v51, %v5001_v51  ;;  %v6943_v2 = vpack.c.bf16 %v5002_v23, %v5002_v23  ;;  %3939 = vrot.lane.b32.xlu0 %v11611_v29, %s7856_s17 }
 0x3f9   :  { %v3882_v1 = vpop.permute.xlu1 %3881  ;;  %v3884_v38 = vpop.permute.xlu0 %3883  ;;  %13771 = vst [vmem:[#allocation91_spill] sm:$0xff] %v11623_v57 }
 0x3fa   :  { %6208 = vst.msk [vmem:[%s12925_s3 + $0x160] sm:$0xf] %vm6119_vm2, %v6942_v58  ;;  %6209 = vst.msk [vmem:[%s12925_s3 + $0x164] sm:$0xf] %vm6119_vm2, %v6943_v2  ;;  %v4514_v60 = vmax.f32 %v11122_v61, %v3882_v1  ;;  %v4515_v23 = vmax.f32 %v11126_v48, %v3884_v38  ;;  %v11642_v58 = vmax.f32 %v13772_v40, %v2737_v41  ;;  %v13775_v41 = vld [vmem:[#allocation34_spill] sm:$0xff] }
 0x3fb   :  { %4029 = vrot.lane.b32.xlu1 %v11619_v14, %s7856_s17 }
 0x3fc   :  { %v4762_v51 = vadd.f32 %v10764_v53, %v4514_v60  ;;  %v4763_v52 = vadd.f32 %v10764_v53, %v4515_v23  ;;  %4031 = vrot.lane.b32.xlu0 %v11623_v57, %s7856_s17  ;;  %13773 = vst [vmem:[#allocation11_spill] sm:$0xff] %v11642_v58  ;;  %v13776_v23 = vld [vmem:[#allocation70_spill] sm:$0xff]  ;;  %v13789_v57 = vld [vmem:[#allocation165_spill] sm:$0xff] }
 0x3fd   :  { %v3976_v50 = vpop.permute.xlu0 %3975  ;;  %v2739_v59 = vpop.permute.xlu1 %2738  ;;  %v11655_v40 = vmax.f32 %v13776_v23, %v13775_v41  ;;  %v11676_v23 = vld [vmem:[%s12924_s2] ss:$0 sm:$0xff] }
 0x3fe   :  { %v5003_v2 = vmax.f32 %v4762_v51, 0.0  ;;  %v5004_v6 = vmax.f32 %v4763_v52, 0.0  ;;  %v4561_v61 = vmax.f32 %v11138_v32, %v3976_v50  ;;  %v11646_v48 = vmax.f32 %v10681_v7, %v2739_v59  ;;  %v13778_v32 = vld [vmem:[#allocation38_spill] sm:$0xff]  ;;  %v13781_v59 = vld [vmem:[#allocation32_spill] sm:$0xff] }
 0x3ff   :  { %3941 = vrot.lane.b32.xlu1 %v11642_v58, %s7856_s17  ;;  %13777 = vst [vmem:[#allocation13_spill] sm:$0xff] %v11655_v40  ;;  %v13779_v50 = vld [vmem:[#allocation74_spill] sm:$0xff] }
 0x400   :  { %13774 = vst [vmem:[#allocation95_spill] sm:$0xff] %v11646_v48  ;;  %v6944_v1 = vpack.c.bf16 %v5003_v2, %v5003_v2  ;;  %v6945_v38 = vpack.c.bf16 %v5004_v6, %v5004_v6  ;;  %v4809_v60 = vadd.f32 %v10764_v53, %v4561_v61  ;;  %3943 = vrot.lane.b32.xlu0 %v11646_v48, %s7856_s17  ;;  %v13782_v6 = vld [vmem:[#allocation204_spill] sm:$0xff] }
 0x401   :  { %v3888_v51 = vpop.permute.xlu0 %3887  ;;  %v3886_v52 = vpop.permute.xlu1 %3885  ;;  %v11659_v7 = vmax.f32 %v13779_v50, %v13778_v32  ;;  %v13786_v50 = vld [vmem:[#allocation81_spill] sm:$0xff] }
 0x402   :  { %6210 = vst.msk [vmem:[%s12925_s3 + $0x168] sm:$0xf] %vm6119_vm2, %v6944_v1  ;;  %6211 = vst.msk [vmem:[%s12925_s3 + $0x16c] sm:$0xf] %vm6119_vm2, %v6945_v38  ;;  %v5050_v53 = vmax.f32 %v4809_v60, 0.0  ;;  %v4517_v2 = vmax.f32 %v13781_v59, %v3888_v51  ;;  %v4516_v61 = vmax.f32 %v13782_v6, %v3886_v52  ;;  %v13783_v38 = vld [vmem:[#allocation41_spill] sm:$0xff] }
 0x403   :  { %13780 = vst [vmem:[#allocation179_spill] sm:$0xff] %v11659_v7  ;;  %4033 = vrot.lane.b32.xlu1 %v11655_v40, %s7856_s17  ;;  %v13784_v60 = vld [vmem:[#allocation77_spill] sm:$0xff]  ;;  %v13785_v52 = vld [vmem:[#allocation48_spill] sm:$0xff] }
 0x404   :  { %v6991_v41 = vpack.c.bf16 %v5050_v53, %v5050_v53  ;;  %v4765_v1 = vadd.f32 %v11676_v23, %v4517_v2  ;;  %v4764_v32 = vadd.f32 %v11676_v23, %v4516_v61  ;;  %4035 = vrot.lane.b32.xlu0 %v11659_v7, %s7856_s17  ;;  %v11684_v51 = vmax.f32 %v13784_v60, %v13783_v38  ;;  %v13787_v40 = vld [vmem:[#allocation36_spill] sm:$0xff] }
 0x405   :  { %v11688_v59 = vmax.f32 %v13786_v50, %v13785_v52  ;;  %v3980_v53 = vpop.permute.xlu0 %3979  ;;  %v3978_v6 = vpop.permute.xlu1 %3977  ;;  %v13788_v7 = vld [vmem:[#allocation208_spill] sm:$0xff] }
 0x406   :  { %6257 = vst.msk [vmem:[%s12925_s3 + $0x224] sm:$0xf] %vm6119_vm2, %v6991_v41  ;;  %v5006_v2 = vmax.f32 %v4765_v1, 0.0  ;;  %v5005_v61 = vmax.f32 %v4764_v32, 0.0  ;;  %v4563_v48 = vmax.f32 %v13787_v40, %v3980_v53  ;;  %v4562_v58 = vmax.f32 %v13788_v7, %v3978_v6  ;;  %v13790_v41 = vld [vmem:[#allocation86_spill] sm:$0xff]  ;;  %v13791_v32 = vld [vmem:[#allocation53_spill] sm:$0xff] }
 0x407   :  { %4037 = vrot.lane.b32.xlu1 %v11684_v51, %s7856_s17  ;;  %v11704_v1 = vmax.f32 %v13790_v41, %v13789_v57  ;;  %v13792_v40 = vld [vmem:[#allocation90_spill] sm:$0xff] }
 0x408   :  { %v6947_v38 = vpack.c.bf16 %v5006_v2, %v5006_v2  ;;  %v6946_v60 = vpack.c.bf16 %v5005_v61, %v5005_v61  ;;  %v4811_v52 = vadd.f32 %v11676_v23, %v4563_v48  ;;  %v4810_v50 = vadd.f32 %v11676_v23, %v4562_v58  ;;  %4039 = vrot.lane.b32.xlu0 %v11688_v59, %s7856_s17 }
 0x409   :  { %v11708_v53 = vmax.f32 %v13792_v40, %v13791_v32  ;;  %v3892_v7 = vpop.permute.xlu0 %3891  ;;  %v3890_v6 = vpop.permute.xlu1 %3889  ;;  %v13793_v40 = vld [vmem:[#allocation169_spill] sm:$0xff] }
 0x40a   :  { %6213 = vst.msk [vmem:[%s12925_s3 + $0x174] sm:$0xf] %vm6119_vm2, %v6947_v38  ;;  %6212 = vst.msk [vmem:[%s12925_s3 + $0x170] sm:$0xf] %vm6119_vm2, %v6946_v60  ;;  %v5052_v58 = vmax.f32 %v4811_v52, 0.0  ;;  %v5051_v48 = vmax.f32 %v4810_v50, 0.0  ;;  %v4519_v57 = vmax.f32 %v11194_v26, %v3892_v7  ;;  %v4518_v2 = vmax.f32 %v11190_v56, %v3890_v6 }
 0x40b   :  { %4041 = vrot.lane.b32.xlu1 %v11704_v1, %s7856_s17  ;;  %v13794_v60 = vld [vmem:[#allocation93_spill] sm:$0xff]  ;;  %v13795_v50 = vld [vmem:[#allocation60_spill] sm:$0xff] }
 0x40c   :  { %v6993_v61 = vpack.c.bf16 %v5052_v58, %v5052_v58  ;;  %v6992_v41 = vpack.c.bf16 %v5051_v48, %v5051_v48  ;;  %v4767_v32 = vadd.f32 %v11676_v23, %v4519_v57  ;;  %v4766_v38 = vadd.f32 %v11676_v23, %v4518_v2  ;;  %4043 = vrot.lane.b32.xlu0 %v11708_v53, %s7856_s17  ;;  %v13796_v26 = vld [vmem:[#allocation97_spill] sm:$0xff] }
 0x40d   :  { %v11728_v52 = vmax.f32 %v13794_v60, %v13793_v40  ;;  %v11732_v7 = vmax.f32 %v13796_v26, %v13795_v50  ;;  %v3984_v56 = vpop.permute.xlu0 %3983  ;;  %v3982_v6 = vpop.permute.xlu1 %3981  ;;  %v13797_v26 = vld [vmem:[#allocation171_spill] sm:$0xff] }
 0x40e   :  { %6259 = vst.msk [vmem:[%s12925_s3 + $0x22c] sm:$0xf] %vm6119_vm2, %v6993_v61  ;;  %6258 = vst.msk [vmem:[%s12925_s3 + $0x228] sm:$0xf] %vm6119_vm2, %v6992_v41  ;;  %v5008_v58 = vmax.f32 %v4767_v32, 0.0  ;;  %v5007_v48 = vmax.f32 %v4766_v38, 0.0  ;;  %v4565_v57 = vmax.f32 %v11210_v24, %v3984_v56  ;;  %v4564_v2 = vmax.f32 %v11206_v47, %v3982_v6 }
 0x40f   :  { %4045 = vrot.lane.b32.xlu1 %v11728_v52, %s7856_s17  ;;  %v13798_v41 = vld [vmem:[#allocation102_spill] sm:$0xff]  ;;  %v13799_v38 = vld [vmem:[#allocation65_spill] sm:$0xff] }
 0x410   :  { %v6949_v40 = vpack.c.bf16 %v5008_v58, %v5008_v58  ;;  %v6948_v60 = vpack.c.bf16 %v5007_v48, %v5007_v48  ;;  %v4813_v50 = vadd.f32 %v11676_v23, %v4565_v57  ;;  %v4812_v61 = vadd.f32 %v11676_v23, %v4564_v2  ;;  %4047 = vrot.lane.b32.xlu0 %v11732_v7, %s7856_s17  ;;  %v13800_v24 = vld [vmem:[#allocation106_spill] sm:$0xff] }
 0x411   :  { %v11752_v32 = vmax.f32 %v13798_v41, %v13797_v26  ;;  %v11756_v56 = vmax.f32 %v13800_v24, %v13799_v38  ;;  %v3896_v47 = vpop.permute.xlu0 %3895  ;;  %v3894_v6 = vpop.permute.xlu1 %3893  ;;  %v13801_v24 = vld [vmem:[#allocation174_spill] sm:$0xff] }
 0x412   :  { %6215 = vst.msk [vmem:[%s12925_s3 + $0x17c] sm:$0xf] %vm6119_vm2, %v6949_v40  ;;  %6214 = vst.msk [vmem:[%s12925_s3 + $0x178] sm:$0xf] %vm6119_vm2, %v6948_v60  ;;  %v5054_v58 = vmax.f32 %v4813_v50, 0.0  ;;  %v5053_v48 = vmax.f32 %v4812_v61, 0.0  ;;  %v4521_v57 = vmax.f32 %v11234_v12, %v3896_v47  ;;  %v4520_v2 = vmax.f32 %v11230_v42, %v3894_v6 }
 0x413   :  { %4049 = vrot.lane.b32.xlu1 %v11752_v32, %s7856_s17  ;;  %v13802_v60 = vld [vmem:[#allocation109_spill] sm:$0xff] }
 0x414   :  { %v6995_v26 = vpack.c.bf16 %v5054_v58, %v5054_v58  ;;  %v6994_v41 = vpack.c.bf16 %v5053_v48, %v5053_v48  ;;  %v4769_v38 = vadd.f32 %v11676_v23, %v4521_v57  ;;  %v4768_v40 = vadd.f32 %v11676_v23, %v4520_v2  ;;  %4051 = vrot.lane.b32.xlu0 %v11756_v56, %s7856_s17  ;;  %v13803_v61 = vld [vmem:[#allocation73_spill] sm:$0xff] }
 0x415   :  { %v11776_v50 = vmax.f32 %v13802_v60, %v13801_v24  ;;  %v13804_v12 = vld [vmem:[#allocation113_spill] sm:$0xff]  ;;  %v3988_v42 = vpop.permute.xlu0 %3987  ;;  %v3986_v6 = vpop.permute.xlu1 %3985 }
 0x416   :  { %v11780_v47 = vmax.f32 %v13804_v12, %v13803_v61  ;;  %6261 = vst.msk [vmem:[%s12925_s3 + $0x234] sm:$0xf] %vm6119_vm2, %v6995_v26  ;;  %6260 = vst.msk [vmem:[%s12925_s3 + $0x230] sm:$0xf] %vm6119_vm2, %v6994_v41  ;;  %v5010_v58 = vmax.f32 %v4769_v38, 0.0  ;;  %v5009_v48 = vmax.f32 %v4768_v40, 0.0  ;;  %v4567_v57 = vmax.f32 %v11250_v11, %v3988_v42 }
 0x417   :  { %v4566_v2 = vmax.f32 %v11246_v35, %v3986_v6  ;;  %4053 = vrot.lane.b32.xlu1 %v11776_v50, %s7856_s17  ;;  %v13805_v12 = vld [vmem:[#allocation178_spill] sm:$0xff]  ;;  %v13808_v40 = vld [vmem:[#allocation80_spill] sm:$0xff] }
 0x418   :  { %v6951_v24 = vpack.c.bf16 %v5010_v58, %v5010_v58  ;;  %v6950_v60 = vpack.c.bf16 %v5009_v48, %v5009_v48  ;;  %v4815_v61 = vadd.f32 %v11676_v23, %v4567_v57  ;;  %4055 = vrot.lane.b32.xlu0 %v11780_v47, %s7856_s17  ;;  %v13806_v41 = vld [vmem:[#allocation118_spill] sm:$0xff] }
 0x419   :  { %v4814_v26 = vadd.f32 %v11676_v23, %v4566_v2  ;;  %v11800_v38 = vmax.f32 %v13806_v41, %v13805_v12  ;;  %v13809_v11 = vld [vmem:[#allocation122_spill] sm:$0xff]  ;;  %v3900_v35 = vpop.permute.xlu0 %3899  ;;  %v3898_v6 = vpop.permute.xlu1 %3897 }
 0x41a   :  { %v11804_v42 = vmax.f32 %v13809_v11, %v13808_v40  ;;  %6217 = vst.msk [vmem:[%s12925_s3 + $0x184] sm:$0xf] %vm6119_vm2, %v6951_v24  ;;  %6216 = vst.msk [vmem:[%s12925_s3 + $0x180] sm:$0xf] %vm6119_vm2, %v6950_v60  ;;  %v5056_v58 = vmax.f32 %v4815_v61, 0.0  ;;  %v4523_v57 = vmax.f32 %v11266_v62, %v3900_v35  ;;  %v4522_v2 = vmax.f32 %v11262_v49, %v3898_v6  ;;  %v13811_v11 = vld [vmem:[#allocation182_spill] sm:$0xff] }
 0x41b   :  { %13807 = vst [vmem:[#allocation100_spill] sm:$0xff] %v11800_v38  ;;  %v5055_v48 = vmax.f32 %v4814_v26, 0.0  ;;  %4057 = vrot.lane.b32.xlu1 %v11800_v38, %s7856_s17  ;;  %v13812_v60 = vld [vmem:[#allocation125_spill] sm:$0xff]  ;;  %v13814_v62 = vld [vmem:[#allocation130_spill] sm:$0xff] }
 0x41c   :  { %13810 = vst [vmem:[#allocation15_spill] sm:$0xff] %v11804_v42  ;;  %v6997_v12 = vpack.c.bf16 %v5056_v58, %v5056_v58  ;;  %v4771_v40 = vadd.f32 %v11676_v23, %v4523_v57  ;;  %v4770_v24 = vadd.f32 %v11676_v23, %v4522_v2  ;;  %4059 = vrot.lane.b32.xlu0 %v11804_v42, %s7856_s17  ;;  %v13813_v26 = vld [vmem:[#allocation89_spill] sm:$0xff]  ;;  %v13815_v57 = vld [vmem:[#allocation166_spill] sm:$0xff] }
 0x41d   :  { %v6996_v41 = vpack.c.bf16 %v5055_v48, %v5055_v48  ;;  %v11824_v61 = vmax.f32 %v13812_v60, %v13811_v11  ;;  %v11828_v35 = vmax.f32 %v13814_v62, %v13813_v26  ;;  %v3992_v49 = vpop.permute.xlu0 %3991  ;;  %v3990_v6 = vpop.permute.xlu1 %3989  ;;  %v13816_v11 = vld [vmem:[#allocation213_spill] sm:$0xff] }
 0x41e   :  { %6263 = vst.msk [vmem:[%s12925_s3 + $0x23c] sm:$0xf] %vm6119_vm2, %v6997_v12  ;;  %v5012_v58 = vmax.f32 %v4771_v40, 0.0  ;;  %v5011_v48 = vmax.f32 %v4770_v24, 0.0  ;;  %v4569_v2 = vmax.f32 %v13815_v57, %v3992_v49  ;;  %v4568_v60 = vmax.f32 %v13816_v11, %v3990_v6  ;;  %v13817_v38 = vld [vmem:[#allocation185_spill] sm:$0xff]  ;;  %v13819_v24 = vld [vmem:[#allocation96_spill] sm:$0xff] }
 0x41f   :  { %6262 = vst.msk [vmem:[%s12925_s3 + $0x238] sm:$0xf] %vm6119_vm2, %v6996_v41  ;;  %4061 = vrot.lane.b32.xlu1 %v11824_v61, %s7856_s17  ;;  %v13818_v41 = vld [vmem:[#allocation135_spill] sm:$0xff]  ;;  %v13820_v49 = vld [vmem:[#allocation137_spill] sm:$0xff] }
 0x420   :  { %v6953_v26 = vpack.c.bf16 %v5012_v58, %v5012_v58  ;;  %v6952_v62 = vpack.c.bf16 %v5011_v48, %v5011_v48  ;;  %v4817_v42 = vadd.f32 %v11676_v23, %v4569_v2  ;;  %v4816_v12 = vadd.f32 %v11676_v23, %v4568_v60  ;;  %4063 = vrot.lane.b32.xlu0 %v11828_v35, %s7856_s17 }
 0x421   :  { %v11848_v40 = vmax.f32 %v13818_v41, %v13817_v38  ;;  %v11852_v57 = vmax.f32 %v13820_v49, %v13819_v24  ;;  %v3904_v6 = vpop.permute.xlu0 %3903  ;;  %v3902_v11 = vpop.permute.xlu1 %3901  ;;  %v13821_v49 = vld [vmem:[#allocation188_spill] sm:$0xff] }
 0x422   :  { %6219 = vst.msk [vmem:[%s12925_s3 + $0x18c] sm:$0xf] %vm6119_vm2, %v6953_v26  ;;  %6218 = vst.msk [vmem:[%s12925_s3 + $0x188] sm:$0xf] %vm6119_vm2, %v6952_v62  ;;  %v5058_v58 = vmax.f32 %v4817_v42, 0.0  ;;  %v5057_v48 = vmax.f32 %v4816_v12, 0.0  ;;  %v4525_v38 = vmax.f32 %v11306_v19, %v3904_v6  ;;  %v4524_v2 = vmax.f32 %v11302_v22, %v3902_v11 }
 0x423   :  { %4065 = vrot.lane.b32.xlu1 %v11848_v40, %s7856_s17  ;;  %v13822_v62 = vld [vmem:[#allocation139_spill] sm:$0xff]  ;;  %v13823_v12 = vld [vmem:[#allocation105_spill] sm:$0xff] }
 0x424   :  { %v6999_v60 = vpack.c.bf16 %v5058_v58, %v5058_v58  ;;  %v6998_v41 = vpack.c.bf16 %v5057_v48, %v5057_v48  ;;  %v4773_v24 = vadd.f32 %v11676_v23, %v4525_v38  ;;  %v4772_v26 = vadd.f32 %v11676_v23, %v4524_v2  ;;  %4067 = vrot.lane.b32.xlu0 %v11852_v57, %s7856_s17  ;;  %v13824_v19 = vld [vmem:[#allocation143_spill] sm:$0xff] }
 0x425   :  { %v11872_v42 = vmax.f32 %v13822_v62, %v13821_v49  ;;  %v11876_v6 = vmax.f32 %v13824_v19, %v13823_v12  ;;  %v3996_v22 = vpop.permute.xlu0 %3995  ;;  %v3994_v11 = vpop.permute.xlu1 %3993  ;;  %v13825_v19 = vld [vmem:[#allocation192_spill] sm:$0xff] }
 0x426   :  { %6265 = vst.msk [vmem:[%s12925_s3 + $0x244] sm:$0xf] %vm6119_vm2, %v6999_v60  ;;  %6264 = vst.msk [vmem:[%s12925_s3 + $0x240] sm:$0xf] %vm6119_vm2, %v6998_v41  ;;  %v5014_v58 = vmax.f32 %v4773_v24, 0.0  ;;  %v5013_v48 = vmax.f32 %v4772_v26, 0.0  ;;  %v4571_v38 = vmax.f32 %v11320_v27, %v3996_v22  ;;  %v4570_v2 = vmax.f32 %v11316_v25, %v3994_v11 }
 0x427   :  { %4069 = vrot.lane.b32.xlu1 %v11872_v42, %s7856_s17  ;;  %v13826_v41 = vld [vmem:[#allocation145_spill] sm:$0xff]  ;;  %v13827_v26 = vld [vmem:[#allocation112_spill] sm:$0xff] }
 0x428   :  { %v6955_v49 = vpack.c.bf16 %v5014_v58, %v5014_v58  ;;  %v6954_v62 = vpack.c.bf16 %v5013_v48, %v5013_v48  ;;  %v4819_v12 = vadd.f32 %v11676_v23, %v4571_v38  ;;  %v4818_v60 = vadd.f32 %v11676_v23, %v4570_v2  ;;  %4071 = vrot.lane.b32.xlu0 %v11876_v6, %s7856_s17  ;;  %v13828_v27 = vld [vmem:[#allocation44_spill] sm:$0xff] }
 0x429   :  { %v11896_v24 = vmax.f32 %v13826_v41, %v13825_v19  ;;  %v11900_v22 = vmax.f32 %v13828_v27, %v13827_v26  ;;  %v3908_v25 = vpop.permute.xlu0 %3907  ;;  %v3906_v11 = vpop.permute.xlu1 %3905  ;;  %v13829_v27 = vld [vmem:[#allocation195_spill] sm:$0xff] }
 0x42a   :  { %6221 = vst.msk [vmem:[%s12925_s3 + $0x194] sm:$0xf] %vm6119_vm2, %v6955_v49  ;;  %6220 = vst.msk [vmem:[%s12925_s3 + $0x190] sm:$0xf] %vm6119_vm2, %v6954_v62  ;;  %v5060_v58 = vmax.f32 %v4819_v12, 0.0  ;;  %v5059_v48 = vmax.f32 %v4818_v60, 0.0  ;;  %v4527_v38 = vmax.f32 %v11344_v10, %v3908_v25  ;;  %v4526_v2 = vmax.f32 %v11340_v16, %v3906_v11 }
 0x42b   :  { %4073 = vrot.lane.b32.xlu1 %v11896_v24, %s7856_s17  ;;  %v13830_v62 = vld [vmem:[#allocation8_spill] sm:$0xff]  ;;  %v13831_v60 = vld [vmem:[#allocation121_spill] sm:$0xff]  ;;  %v13832_v10 = vld [vmem:[#allocation147_spill] sm:$0xff] }
 0x42c   :  { %v7001_v19 = vpack.c.bf16 %v5060_v58, %v5060_v58  ;;  %v7000_v41 = vpack.c.bf16 %v5059_v48, %v5059_v48  ;;  %v4775_v26 = vadd.f32 %v11676_v23, %v4527_v38  ;;  %v4774_v49 = vadd.f32 %v11676_v23, %v4526_v2  ;;  %4075 = vrot.lane.b32.xlu0 %v11900_v22, %s7856_s17 }
 0x42d   :  { %v11920_v12 = vmax.f32 %v13830_v62, %v13829_v27  ;;  %v11924_v25 = vmax.f32 %v13832_v10, %v13831_v60  ;;  %v4000_v16 = vpop.permute.xlu0 %3999  ;;  %v3998_v11 = vpop.permute.xlu1 %3997  ;;  %v13833_v10 = vld [vmem:[#allocation197_spill] sm:$0xff] }
 0x42e   :  { %6267 = vst.msk [vmem:[%s12925_s3 + $0x24c] sm:$0xf] %vm6119_vm2, %v7001_v19  ;;  %6266 = vst.msk [vmem:[%s12925_s3 + $0x248] sm:$0xf] %vm6119_vm2, %v7000_v41  ;;  %v5016_v58 = vmax.f32 %v4775_v26, 0.0  ;;  %v5015_v48 = vmax.f32 %v4774_v49, 0.0  ;;  %v4573_v38 = vmax.f32 %v11360_v63, %v4000_v16  ;;  %v4572_v2 = vmax.f32 %v11356_v0, %v3998_v11 }
 0x42f   :  { %4077 = vrot.lane.b32.xlu1 %v11920_v12, %s7856_s17  ;;  %v13834_v41 = vld [vmem:[#allocation149_spill] sm:$0xff]  ;;  %v13837_v63 = vld [vmem:[#allocation56_spill] sm:$0xff] }
 0x430   :  { %v6957_v27 = vpack.c.bf16 %v5016_v58, %v5016_v58  ;;  %v6956_v62 = vpack.c.bf16 %v5015_v48, %v5015_v48  ;;  %v4821_v60 = vadd.f32 %v11676_v23, %v4573_v38  ;;  %v4820_v19 = vadd.f32 %v11676_v23, %v4572_v2  ;;  %4079 = vrot.lane.b32.xlu0 %v11924_v25, %s7856_s17  ;;  %v13836_v49 = vld [vmem:[#allocation129_spill] sm:$0xff] }
 0x431   :  { %v11944_v26 = vmax.f32 %v13834_v41, %v13833_v10  ;;  %v11948_v16 = vmax.f32 %v13837_v63, %v13836_v49  ;;  %v3912_v0 = vpop.permute.xlu0 %3911  ;;  %v3910_v11 = vpop.permute.xlu1 %3909  ;;  %v13839_v63 = vld [vmem:[#allocation200_spill] sm:$0xff] }
 0x432   :  { %6223 = vst.msk [vmem:[%s12925_s3 + $0x19c] sm:$0xf] %vm6119_vm2, %v6957_v27  ;;  %6222 = vst.msk [vmem:[%s12925_s3 + $0x198] sm:$0xf] %vm6119_vm2, %v6956_v62  ;;  %v5062_v58 = vmax.f32 %v4821_v60, 0.0  ;;  %v5061_v48 = vmax.f32 %v4820_v19, 0.0  ;;  %v4529_v38 = vmax.f32 %v11374_v9, %v3912_v0  ;;  %v4528_v2 = vmax.f32 %v11370_v5, %v3910_v11 }
 0x433   :  { %13835 = vst [vmem:[#allocation104_spill] sm:$0xff] %v11944_v26  ;;  %13838 = vst [vmem:[#allocation17_spill] sm:$0xff] %v11948_v16  ;;  %4081 = vrot.lane.b32.xlu1 %v11944_v26, %s7856_s17  ;;  %v13840_v62 = vld [vmem:[#allocation150_spill] sm:$0xff]  ;;  %v13841_v19 = vld [vmem:[#allocation136_spill] sm:$0xff] }
 0x434   :  { %v7003_v10 = vpack.c.bf16 %v5062_v58, %v5062_v58  ;;  %v7002_v41 = vpack.c.bf16 %v5061_v48, %v5061_v48  ;;  %v4777_v49 = vadd.f32 %v11676_v23, %v4529_v38  ;;  %v4776_v27 = vadd.f32 %v11676_v23, %v4528_v2  ;;  %4083 = vrot.lane.b32.xlu0 %v11948_v16, %s7856_s17  ;;  %v13842_v9 = vld [vmem:[#allocation153_spill] sm:$0xff]  ;;  %v13843_v38 = vld [vmem:[#allocation75_spill] sm:$0xff] }
 0x435   :  { %v11968_v60 = vmax.f32 %v13840_v62, %v13839_v63  ;;  %v11972_v0 = vmax.f32 %v13842_v9, %v13841_v19  ;;  %v4004_v5 = vpop.permute.xlu0 %4003  ;;  %v4002_v11 = vpop.permute.xlu1 %4001  ;;  %v13844_v63 = vld [vmem:[#allocation10_spill] sm:$0xff]  ;;  %v13845_v26 = vld [vmem:[#allocation203_spill] sm:$0xff] }
 0x436   :  { %6269 = vst.msk [vmem:[%s12925_s3 + $0x254] sm:$0xf] %vm6119_vm2, %v7003_v10  ;;  %6268 = vst.msk [vmem:[%s12925_s3 + $0x250] sm:$0xf] %vm6119_vm2, %v7002_v41  ;;  %v5018_v58 = vmax.f32 %v4777_v49, 0.0  ;;  %v5017_v48 = vmax.f32 %v4776_v27, 0.0  ;;  %v4575_v2 = vmax.f32 %v13843_v38, %v4004_v5  ;;  %v4574_v62 = vmax.f32 %v13844_v63, %v4002_v11 }
 0x437   :  { %4085 = vrot.lane.b32.xlu1 %v11968_v60, %s7856_s17  ;;  %v13846_v41 = vld [vmem:[#allocation154_spill] sm:$0xff]  ;;  %v13848_v5 = vld [vmem:[#allocation68_spill] sm:$0xff] }
 0x438   :  { %v6959_v19 = vpack.c.bf16 %v5018_v58, %v5018_v58  ;;  %v6958_v9 = vpack.c.bf16 %v5017_v48, %v5017_v48  ;;  %v4823_v16 = vadd.f32 %v11676_v23, %v4575_v2  ;;  %v4822_v10 = vadd.f32 %v11676_v23, %v4574_v62  ;;  %4087 = vrot.lane.b32.xlu0 %v11972_v0, %s7856_s17  ;;  %v13847_v27 = vld [vmem:[#allocation142_spill] sm:$0xff] }
 0x439   :  { %v11992_v49 = vmax.f32 %v13846_v41, %v13845_v26  ;;  %v11996_v38 = vmax.f32 %v13848_v5, %v13847_v27  ;;  %v3916_v11 = vpop.permute.xlu0 %3915  ;;  %v3914_v63 = vpop.permute.xlu1 %3913  ;;  %v13849_v5 = vld [vmem:[#allocation207_spill] sm:$0xff] }
 0x43a   :  { %6225 = vst.msk [vmem:[%s12925_s3 + $0x1a4] sm:$0xf] %vm6119_vm2, %v6959_v19  ;;  %6224 = vst.msk [vmem:[%s12925_s3 + $0x1a0] sm:$0xf] %vm6119_vm2, %v6958_v9  ;;  %v5064_v58 = vmax.f32 %v4823_v16, 0.0  ;;  %v5063_v48 = vmax.f32 %v4822_v10, 0.0  ;;  %v4531_v26 = vmax.f32 %v11413_v37, %v3916_v11  ;;  %v4530_v2 = vmax.f32 %v11410_v34, %v3914_v63 }
 0x43b   :  { %4089 = vrot.lane.b32.xlu1 %v11992_v49, %s7856_s17  ;;  %v13850_v9 = vld [vmem:[#allocation155_spill] sm:$0xff]  ;;  %v13852_v37 = vld [vmem:[#allocation156_spill] sm:$0xff] }
 0x43c   :  { %v7005_v62 = vpack.c.bf16 %v5064_v58, %v5064_v58  ;;  %v7004_v41 = vpack.c.bf16 %v5063_v48, %v5063_v48  ;;  %v4779_v27 = vadd.f32 %v11676_v23, %v4531_v26  ;;  %v4778_v19 = vadd.f32 %v11676_v23, %v4530_v2  ;;  %4091 = vrot.lane.b32.xlu0 %v11996_v38, %s7856_s17  ;;  %v13851_v10 = vld [vmem:[#allocation43_spill] sm:$0xff] }
 0x43d   :  { %v12016_v16 = vmax.f32 %v13850_v9, %v13849_v5  ;;  %v12020_v11 = vmax.f32 %v13852_v37, %v13851_v10  ;;  %v4008_v34 = vpop.permute.xlu0 %4007  ;;  %v4006_v63 = vpop.permute.xlu1 %4005  ;;  %v13853_v37 = vld [vmem:[#allocation211_spill] sm:$0xff] }
 0x43e   :  { %6271 = vst.msk [vmem:[%s12925_s3 + $0x25c] sm:$0xf] %vm6119_vm2, %v7005_v62  ;;  %6270 = vst.msk [vmem:[%s12925_s3 + $0x258] sm:$0xf] %vm6119_vm2, %v7004_v41  ;;  %v5020_v58 = vmax.f32 %v4779_v27, 0.0  ;;  %v5019_v48 = vmax.f32 %v4778_v19, 0.0  ;;  %v4577_v26 = vmax.f32 %v11425_v46, %v4008_v34  ;;  %v4576_v2 = vmax.f32 %v11421_v15, %v4006_v63 }
 0x43f   :  { %4093 = vrot.lane.b32.xlu1 %v12016_v16, %s7856_s17  ;;  %v13854_v41 = vld [vmem:[#allocation158_spill] sm:$0xff]  ;;  %v13856_v46 = vld [vmem:[#allocation83_spill] sm:$0xff] }
 0x440   :  { %v6961_v5 = vpack.c.bf16 %v5020_v58, %v5020_v58  ;;  %v6960_v9 = vpack.c.bf16 %v5019_v48, %v5019_v48  ;;  %v4825_v10 = vadd.f32 %v11676_v23, %v4577_v26  ;;  %v4824_v62 = vadd.f32 %v11676_v23, %v4576_v2  ;;  %4095 = vrot.lane.b32.xlu0 %v12020_v11, %s7856_s17  ;;  %v13855_v19 = vld [vmem:[#allocation6_spill] sm:$0xff] }
 0x441   :  { %v12040_v27 = vmax.f32 %v13854_v41, %v13853_v37  ;;  %v12044_v34 = vmax.f32 %v13856_v46, %v13855_v19  ;;  %v3920_v15 = vpop.permute.xlu0 %3919  ;;  %v3918_v63 = vpop.permute.xlu1 %3917  ;;  %v13857_v46 = vld [vmem:[#allocation146_spill] sm:$0xff] }
 0x442   :  { %6227 = vst.msk [vmem:[%s12925_s3 + $0x1ac] sm:$0xf] %vm6119_vm2, %v6961_v5  ;;  %6226 = vst.msk [vmem:[%s12925_s3 + $0x1a8] sm:$0xf] %vm6119_vm2, %v6960_v9  ;;  %v5066_v58 = vmax.f32 %v4825_v10, 0.0  ;;  %v5065_v48 = vmax.f32 %v4824_v62, 0.0  ;;  %v4533_v26 = vmax.f32 %v11448_v36, %v3920_v15  ;;  %v4532_v2 = vmax.f32 %v11445_v8, %v3918_v63 }
 0x443   :  { %4097 = vrot.lane.b32.xlu1 %v12040_v27, %s7856_s17  ;;  %v13858_v9 = vld [vmem:[#allocation24_spill] sm:$0xff] }
 0x444   :  { %v7007_v37 = vpack.c.bf16 %v5066_v58, %v5066_v58  ;;  %v7006_v41 = vpack.c.bf16 %v5065_v48, %v5065_v48  ;;  %v4781_v19 = vadd.f32 %v11676_v23, %v4533_v26  ;;  %v4780_v5 = vadd.f32 %v11676_v23, %v4532_v2  ;;  %4099 = vrot.lane.b32.xlu0 %v12044_v34, %s7856_s17  ;;  %v13859_v62 = vld [vmem:[#allocation52_spill] sm:$0xff] }
 0x445   :  { %v12064_v10 = vmax.f32 %v13858_v9, %v13857_v46  ;;  %v13860_v36 = vld [vmem:[#allocation160_spill] sm:$0xff]  ;;  %v4012_v8 = vpop.permute.xlu0 %4011  ;;  %v4010_v63 = vpop.permute.xlu1 %4009 }
 0x446   :  { %v12068_v15 = vmax.f32 %v13860_v36, %v13859_v62  ;;  %6273 = vst.msk [vmem:[%s12925_s3 + $0x264] sm:$0xf] %vm6119_vm2, %v7007_v37  ;;  %6272 = vst.msk [vmem:[%s12925_s3 + $0x260] sm:$0xf] %vm6119_vm2, %v7006_v41  ;;  %v5022_v58 = vmax.f32 %v4781_v19, 0.0  ;;  %v5021_v48 = vmax.f32 %v4780_v5, 0.0  ;;  %v4579_v26 = vmax.f32 %v11464_v4, %v4012_v8 }
 0x447   :  { %v4578_v2 = vmax.f32 %v11460_v54, %v4010_v63  ;;  %4101 = vrot.lane.b32.xlu1 %v12064_v10, %s7856_s17  ;;  %v13861_v36 = vld [vmem:[#allocation55_spill] sm:$0xff]  ;;  %v13862_v41 = vld [vmem:[#allocation162_spill] sm:$0xff]  ;;  %v13863_v5 = vld [vmem:[#allocation180_spill] sm:$0xff] }
 0x448   :  { %v6963_v46 = vpack.c.bf16 %v5022_v58, %v5022_v58  ;;  %v6962_v9 = vpack.c.bf16 %v5021_v48, %v5021_v48  ;;  %v4827_v62 = vadd.f32 %v11676_v23, %v4579_v26  ;;  %4103 = vrot.lane.b32.xlu0 %v12068_v15, %s7856_s17  ;;  %v12088_v19 = vmax.f32 %v13862_v41, %v13861_v36  ;;  %v13864_v4 = vld [vmem:[#allocation28_spill] sm:$0xff] }
 0x449   :  { %v4826_v37 = vadd.f32 %v11676_v23, %v4578_v2  ;;  %v12092_v8 = vmax.f32 %v13864_v4, %v13863_v5  ;;  %v3924_v54 = vpop.permute.xlu0 %3923  ;;  %v3922_v63 = vpop.permute.xlu1 %3921  ;;  %v13865_v4 = vld [vmem:[#allocation59_spill] sm:$0xff] }
 0x44a   :  { %6229 = vst.msk [vmem:[%s12925_s3 + $0x1b4] sm:$0xf] %vm6119_vm2, %v6963_v46  ;;  %6228 = vst.msk [vmem:[%s12925_s3 + $0x1b0] sm:$0xf] %vm6119_vm2, %v6962_v9  ;;  %v5068_v58 = vmax.f32 %v4827_v62, 0.0  ;;  %v4535_v26 = vmax.f32 %v11475_v31, %v3924_v54  ;;  %v4534_v2 = vmax.f32 %v11472_v30, %v3922_v63  ;;  %v13866_v9 = vld [vmem:[#allocation163_spill] sm:$0xff] }
 0x44b   :  { %v5067_v48 = vmax.f32 %v4826_v37, 0.0  ;;  %4105 = vrot.lane.b32.xlu1 %v12088_v19, %s7856_s17  ;;  %v12112_v62 = vmax.f32 %v13866_v9, %v13865_v4  ;;  %v13867_v37 = vld [vmem:[#allocation152_spill] sm:$0xff]  ;;  %v13868_v31 = vld [vmem:[#allocation30_spill] sm:$0xff] }
 0x44c   :  { %v7009_v36 = vpack.c.bf16 %v5068_v58, %v5068_v58  ;;  %v4783_v5 = vadd.f32 %v11676_v23, %v4535_v26  ;;  %v4782_v46 = vadd.f32 %v11676_v23, %v4534_v2  ;;  %4107 = vrot.lane.b32.xlu0 %v12092_v8, %s7856_s17  ;;  %v12116_v54 = vmax.f32 %v13868_v31, %v13867_v37  ;;  %v13869_v31 = vld [vmem:[#allocation183_spill] sm:$0xff] }
 0x44d   :  { %v7008_v41 = vpack.c.bf16 %v5067_v48, %v5067_v48  ;;  %v4016_v30 = vpop.permute.xlu0 %4015  ;;  %v4014_v63 = vpop.permute.xlu1 %4013 }
 0x44e   :  { %6275 = vst.msk [vmem:[%s12925_s3 + $0x26c] sm:$0xf] %vm6119_vm2, %v7009_v36  ;;  %v5024_v58 = vmax.f32 %v4783_v5, 0.0  ;;  %v5023_v48 = vmax.f32 %v4782_v46, 0.0  ;;  %v4581_v26 = vmax.f32 %v11499_v3, %v4016_v30  ;;  %v4580_v2 = vmax.f32 %v11495_v17, %v4014_v63  ;;  %v13871_v46 = vld [vmem:[#allocation64_spill] sm:$0xff]  ;;  %v13872_v3 = vld [vmem:[#allocation119_spill] sm:$0xff] }
 0x44f   :  { %6274 = vst.msk [vmem:[%s12925_s3 + $0x268] sm:$0xf] %vm6119_vm2, %v7008_v41  ;;  %4109 = vrot.lane.b32.xlu1 %v12112_v62, %s7856_s17  ;;  %v13870_v41 = vld [vmem:[#allocation114_spill] sm:$0xff]  ;;  %v12140_v30 = vmax.f32 %v13872_v3, %v13871_v46  ;;  %v13873_v3 = vld [vmem:[#allocation67_spill] sm:$0xff] }
 0x450   :  { %v6965_v4 = vpack.c.bf16 %v5024_v58, %v5024_v58  ;;  %v6964_v9 = vpack.c.bf16 %v5023_v48, %v5023_v48  ;;  %v4829_v37 = vadd.f32 %v11676_v23, %v4581_v26  ;;  %v4828_v36 = vadd.f32 %v11676_v23, %v4580_v2  ;;  %4111 = vrot.lane.b32.xlu0 %v12116_v54, %s7856_s17 }
 0x451   :  { %v12136_v5 = vmax.f32 %v13870_v41, %v13869_v31  ;;  %v3928_v17 = vpop.permute.xlu0 %3927  ;;  %v3926_v63 = vpop.permute.xlu1 %3925 }
 0x452   :  { %6231 = vst.msk [vmem:[%s12925_s3 + $0x1bc] sm:$0xf] %vm6119_vm2, %v6965_v4  ;;  %6230 = vst.msk [vmem:[%s12925_s3 + $0x1b8] sm:$0xf] %vm6119_vm2, %v6964_v9  ;;  %v5070_v58 = vmax.f32 %v4829_v37, 0.0  ;;  %v5069_v48 = vmax.f32 %v4828_v36, 0.0  ;;  %v4537_v26 = vmax.f32 %v11513_v13, %v3928_v17  ;;  %v4536_v2 = vmax.f32 %v11510_v21, %v3926_v63 }
 0x453   :  { %4113 = vrot.lane.b32.xlu1 %v12136_v5, %s7856_s17  ;;  %v13874_v9 = vld [vmem:[#allocation131_spill] sm:$0xff]  ;;  %v13876_v13 = vld [vmem:[#allocation132_spill] sm:$0xff] }
 0x454   :  { %v7011_v31 = vpack.c.bf16 %v5070_v58, %v5070_v58  ;;  %v7010_v41 = vpack.c.bf16 %v5069_v48, %v5069_v48  ;;  %v4785_v46 = vadd.f32 %v11676_v23, %v4537_v26  ;;  %v4784_v4 = vadd.f32 %v11676_v23, %v4536_v2  ;;  %4115 = vrot.lane.b32.xlu0 %v12140_v30, %s7856_s17  ;;  %v13875_v36 = vld [vmem:[#allocation71_spill] sm:$0xff] }
 0x455   :  { %v12160_v37 = vmax.f32 %v13874_v9, %v13873_v3  ;;  %v12164_v17 = vmax.f32 %v13876_v13, %v13875_v36  ;;  %v4020_v21 = vpop.permute.xlu0 %4019  ;;  %v4018_v63 = vpop.permute.xlu1 %4017  ;;  %v13877_v13 = vld [vmem:[#allocation20_spill] sm:$0xff] }
 0x456   :  { %6277 = vst.msk [vmem:[%s12925_s3 + $0x274] sm:$0xf] %vm6119_vm2, %v7011_v31  ;;  %6276 = vst.msk [vmem:[%s12925_s3 + $0x270] sm:$0xf] %vm6119_vm2, %v7010_v41  ;;  %v5026_v58 = vmax.f32 %v4785_v46, 0.0  ;;  %v5025_v48 = vmax.f32 %v4784_v4, 0.0  ;;  %v4583_v26 = vmax.f32 %v11525_v45, %v4020_v21  ;;  %v4582_v2 = vmax.f32 %v11521_v39, %v4018_v63 }
 0x457   :  { %4117 = vrot.lane.b32.xlu1 %v12160_v37, %s7856_s17  ;;  %v13878_v41 = vld [vmem:[#allocation4_spill] sm:$0xff]  ;;  %v13879_v4 = vld [vmem:[#allocation190_spill] sm:$0xff]  ;;  %v13880_v45 = vld [vmem:[#allocation45_spill] sm:$0xff] }
 0x458   :  { %v6967_v3 = vpack.c.bf16 %v5026_v58, %v5026_v58  ;;  %v6966_v9 = vpack.c.bf16 %v5025_v48, %v5025_v48  ;;  %v4831_v36 = vadd.f32 %v11676_v23, %v4583_v26  ;;  %v4830_v31 = vadd.f32 %v11676_v23, %v4582_v2  ;;  %4119 = vrot.lane.b32.xlu0 %v12164_v17, %s7856_s17 }
 0x459   :  { %v12184_v46 = vmax.f32 %v13878_v41, %v13877_v13  ;;  %v12188_v21 = vmax.f32 %v13880_v45, %v13879_v4  ;;  %v3932_v39 = vpop.permute.xlu0 %3931  ;;  %v3930_v63 = vpop.permute.xlu1 %3929  ;;  %v13881_v45 = vld [vmem:[#allocation78_spill] sm:$0xff] }
 0x45a   :  { %6233 = vst.msk [vmem:[%s12925_s3 + $0x1c4] sm:$0xf] %vm6119_vm2, %v6967_v3  ;;  %6232 = vst.msk [vmem:[%s12925_s3 + $0x1c0] sm:$0xf] %vm6119_vm2, %v6966_v9  ;;  %v5072_v58 = vmax.f32 %v4831_v36, 0.0  ;;  %v5071_v48 = vmax.f32 %v4830_v31, 0.0  ;;  %v4539_v26 = vmax.f32 %v11547_v55, %v3932_v39  ;;  %v4538_v2 = vmax.f32 %v11544_v44, %v3930_v63 }
 0x45b   :  { %4121 = vrot.lane.b32.xlu1 %v12184_v46, %s7856_s17  ;;  %v13882_v9 = vld [vmem:[#allocation168_spill] sm:$0xff]  ;;  %v13883_v31 = vld [vmem:[#allocation82_spill] sm:$0xff] }
 0x45c   :  { %v7013_v13 = vpack.c.bf16 %v5072_v58, %v5072_v58  ;;  %v7012_v41 = vpack.c.bf16 %v5071_v48, %v5071_v48  ;;  %v4787_v4 = vadd.f32 %v11676_v23, %v4539_v26  ;;  %v4786_v3 = vadd.f32 %v11676_v23, %v4538_v2  ;;  %4123 = vrot.lane.b32.xlu0 %v12188_v21, %s7856_s17  ;;  %v13884_v55 = vld [vmem:[#allocation50_spill] sm:$0xff] }
 0x45d   :  { %v12208_v36 = vmax.f32 %v13882_v9, %v13881_v45  ;;  %v12212_v39 = vmax.f32 %v13884_v55, %v13883_v31  ;;  %v4024_v44 = vpop.permute.xlu0 %4023  ;;  %v4022_v63 = vpop.permute.xlu1 %4021  ;;  %v13886_v55 = vld [vmem:[#allocation193_spill] sm:$0xff] }
 0x45e   :  { %6279 = vst.msk [vmem:[%s12925_s3 + $0x27c] sm:$0xf] %vm6119_vm2, %v7013_v13  ;;  %6278 = vst.msk [vmem:[%s12925_s3 + $0x278] sm:$0xf] %vm6119_vm2, %v7012_v41  ;;  %v5028_v58 = vmax.f32 %v4787_v4, 0.0  ;;  %v5027_v48 = vmax.f32 %v4786_v3, 0.0  ;;  %v4585_v26 = vmax.f32 %v11563_v33, %v4024_v44  ;;  %v4584_v2 = vmax.f32 %v11559_v28, %v4022_v63 }
 0x45f   :  { %13885 = vst [vmem:[#allocation107_spill] sm:$0xff] %v12212_v39  ;;  %4125 = vrot.lane.b32.xlu1 %v12208_v36, %s7856_s17  ;;  %v13887_v41 = vld [vmem:[#allocation12_spill] sm:$0xff]  ;;  %v13888_v3 = vld [vmem:[#allocation22_spill] sm:$0xff]  ;;  %v13889_v33 = vld [vmem:[#allocation57_spill] sm:$0xff] }
 0x460   :  { %v6969_v45 = vpack.c.bf16 %v5028_v58, %v5028_v58  ;;  %v6968_v9 = vpack.c.bf16 %v5027_v48, %v5027_v48  ;;  %v4833_v31 = vadd.f32 %v11676_v23, %v4585_v26  ;;  %v4832_v13 = vadd.f32 %v11676_v23, %v4584_v2  ;;  %4127 = vrot.lane.b32.xlu0 %v12212_v39, %s7856_s17  ;;  %v13891_v2 = vld [vmem:[#allocation7_spill] sm:$0xff] }
 0x461   :  { %v12232_v4 = vmax.f32 %v13887_v41, %v13886_v55  ;;  %v12236_v44 = vmax.f32 %v13889_v33, %v13888_v3  ;;  %v3936_v28 = vpop.permute.xlu0 %3935  ;;  %v3934_v63 = vpop.permute.xlu1 %3933  ;;  %v13892_v39 = vld [vmem:[#allocation159_spill] sm:$0xff] }
 0x462   :  { %6235 = vst.msk [vmem:[%s12925_s3 + $0x1cc] sm:$0xf] %vm6119_vm2, %v6969_v45  ;;  %6234 = vst.msk [vmem:[%s12925_s3 + $0x1c8] sm:$0xf] %vm6119_vm2, %v6968_v9  ;;  %v5074_v58 = vmax.f32 %v4833_v31, 0.0  ;;  %v5073_v48 = vmax.f32 %v4832_v13, 0.0  ;;  %v4541_v26 = vmax.f32 %v11573_v43, %v3936_v28  ;;  %v4540_v55 = vmax.f32 %v13891_v2, %v3934_v63 }
 0x463   :  { %13890 = vst [vmem:[#allocation19_spill] sm:$0xff] %v12236_v44  ;;  %4129 = vrot.lane.b32.xlu1 %v12232_v4, %s7856_s17  ;;  %v13893_v9 = vld [vmem:[#allocation173_spill] sm:$0xff]  ;;  %v13894_v13 = vld [vmem:[#allocation94_spill] sm:$0xff] }
 0x464   :  { %v7015_v41 = vpack.c.bf16 %v5074_v58, %v5074_v58  ;;  %v7014_v3 = vpack.c.bf16 %v5073_v48, %v5073_v48  ;;  %v4789_v33 = vadd.f32 %v11676_v23, %v4541_v26  ;;  %v4788_v45 = vadd.f32 %v11676_v23, %v4540_v55  ;;  %4131 = vrot.lane.b32.xlu0 %v12236_v44, %s7856_s17  ;;  %v13895_v43 = vld [vmem:[#allocation62_spill] sm:$0xff]  ;;  %v13896_v26 = vld [vmem:[#allocation175_spill] sm:$0xff] }
 0x465   :  { %v12256_v31 = vmax.f32 %v13893_v9, %v13892_v39  ;;  %v12260_v28 = vmax.f32 %v13895_v43, %v13894_v13  ;;  %v4028_v63 = vpop.permute.xlu0 %4027  ;;  %v4026_v2 = vpop.permute.xlu1 %4025  ;;  %v13897_v44 = vld [vmem:[#allocation26_spill] sm:$0xff] }
 0x466   :  { %6281 = vst.msk [vmem:[%s12925_s3 + $0x284] sm:$0xf] %vm6119_vm2, %v7015_v41  ;;  %6280 = vst.msk [vmem:[%s12925_s3 + $0x280] sm:$0xf] %vm6119_vm2, %v7014_v3  ;;  %v5030_v58 = vmax.f32 %v4789_v33, 0.0  ;;  %v5029_v48 = vmax.f32 %v4788_v45, 0.0  ;;  %v4587_v39 = vmax.f32 %v11597_v20, %v4028_v63  ;;  %v4586_v55 = vmax.f32 %v13896_v26, %v4026_v2 }
 0x467   :  { %4133 = vrot.lane.b32.xlu1 %v12256_v31, %s7856_s17  ;;  %v13898_v3 = vld [vmem:[#allocation177_spill] sm:$0xff]  ;;  %v13899_v20 = vld [vmem:[#allocation198_spill] sm:$0xff] }
 0x468   :  { %v6971_v9 = vpack.c.bf16 %v5030_v58, %v5030_v58  ;;  %v6970_v13 = vpack.c.bf16 %v5029_v48, %v5029_v48  ;;  %v4835_v43 = vadd.f32 %v11676_v23, %v4587_v39  ;;  %v4834_v41 = vadd.f32 %v11676_v23, %v4586_v55  ;;  %4135 = vrot.lane.b32.xlu0 %v12260_v28, %s7856_s17  ;;  %v13900_v63 = vld [vmem:[#allocation69_spill] sm:$0xff] }
 0x469   :  { %v12280_v33 = vmax.f32 %v13898_v3, %v13897_v44  ;;  %v3938_v45 = vpop.permute.xlu1 %3937  ;;  %v12284_v2 = vmax.f32 %v13900_v63, %v13899_v20  ;;  %v13903_v63 = vld [vmem:[#allocation181_spill] sm:$0xff] }
 0x46a   :  { %6237 = vst.msk [vmem:[%s12925_s3 + $0x1d4] sm:$0xf] %vm6119_vm2, %v6971_v9  ;;  %6236 = vst.msk [vmem:[%s12925_s3 + $0x1d0] sm:$0xf] %vm6119_vm2, %v6970_v13  ;;  %v5076_v58 = vmax.f32 %v4835_v43, 0.0  ;;  %v5075_v48 = vmax.f32 %v4834_v41, 0.0  ;;  %v4542_v44 = vmax.f32 %v11608_v18, %v3938_v45  ;;  %v3940_v39 = vpop.permute.xlu0 %3939 }
 0x46b   :  { %13901 = vst [vmem:[#allocation111_spill] sm:$0xff] %v12284_v2  ;;  %v4543_v26 = vmax.f32 %v11611_v29, %v3940_v39  ;;  %4137 = vrot.lane.b32.xlu1 %v12280_v33, %s7856_s17  ;;  %v13902_v9 = vld [vmem:[#allocation98_spill] sm:$0xff]  ;;  %v13905_v41 = vld [vmem:[#allocation103_spill] sm:$0xff]  ;;  %v13906_v45 = vld [vmem:[#allocation76_spill] sm:$0xff] }
 0x46c   :  { %v7017_v55 = vpack.c.bf16 %v5076_v58, %v5076_v58  ;;  %v7016_v3 = vpack.c.bf16 %v5075_v48, %v5075_v48  ;;  %v4790_v20 = vadd.f32 %v11676_v23, %v4542_v44  ;;  %4139 = vrot.lane.b32.xlu0 %v12284_v2, %s7856_s17  ;;  %v12303_v13 = vmax.f32 %v13903_v63, %v13902_v9 }
 0x46d   :  { %v4791_v43 = vadd.f32 %v11676_v23, %v4543_v26  ;;  %v4030_v18 = vpop.permute.xlu1 %4029  ;;  %v12308_v29 = vmax.f32 %v13906_v45, %v13905_v41  ;;  %v13908_v26 = vld [vmem:[#allocation91_spill] sm:$0xff]  ;;  %v13910_v45 = vld [vmem:[#allocation184_spill] sm:$0xff] }
 0x46e   :  { %13904 = vst [vmem:[#allocation21_spill] sm:$0xff] %v12303_v13  ;;  %6283 = vst.msk [vmem:[%s12925_s3 + $0x28c] sm:$0xf] %vm6119_vm2, %v7017_v55  ;;  %v5031_v58 = vmax.f32 %v4790_v20, 0.0  ;;  %v4588_v48 = vmax.f32 %v11619_v14, %v4030_v18  ;;  %v4032_v44 = vpop.permute.xlu0 %4031  ;;  %v13909_v55 = vld [vmem:[#allocation201_spill] sm:$0xff] }
 0x46f   :  { %13907 = vst [vmem:[#allocation186_spill] sm:$0xff] %v12308_v29  ;;  %6282 = vst.msk [vmem:[%s12925_s3 + $0x288] sm:$0xf] %vm6119_vm2, %v7016_v3  ;;  %v5032_v39 = vmax.f32 %v4791_v43, 0.0  ;;  %v4589_v9 = vmax.f32 %v13908_v26, %v4032_v44  ;;  %4141 = vrot.lane.b32.xlu1 %v12303_v13, %s7856_s17  ;;  %v12327_v2 = vmax.f32 %v13910_v45, %v13909_v55  ;;  %v13912_v43 = vld [vmem:[#allocation110_spill] sm:$0xff]  ;;  %v13913_v18 = vld [vmem:[#allocation85_spill] sm:$0xff] }
 0x470   :  { %v6972_v63 = vpack.c.bf16 %v5031_v58, %v5031_v58  ;;  %v4836_v41 = vadd.f32 %v11676_v23, %v4588_v48  ;;  %4143 = vrot.lane.b32.xlu0 %v12308_v29, %s7856_s17  ;;  %v12332_v44 = vmax.f32 %v13913_v18, %v13912_v43  ;;  %v13915_v48 = vld [vmem:[#allocation11_spill] sm:$0xff]  ;;  %v13920_v13 = vld [vmem:[#allocation92_spill] sm:$0xff] }
 0x471   :  { %13911 = vst [vmem:[#allocation116_spill] sm:$0xff] %v12327_v2  ;;  %v6973_v3 = vpack.c.bf16 %v5032_v39, %v5032_v39  ;;  %v4837_v14 = vadd.f32 %v11676_v23, %v4589_v9  ;;  %v3942_v20 = vpop.permute.xlu1 %3941  ;;  %v13916_v9 = vld [vmem:[#allocation95_spill] sm:$0xff] }
 0x472   :  { %13914 = vst [vmem:[#allocation23_spill] sm:$0xff] %v12332_v44  ;;  %6238 = vst.msk [vmem:[%s12925_s3 + $0x1d8] sm:$0xf] %vm6119_vm2, %v6972_v63  ;;  %v5077_v58 = vmax.f32 %v4836_v41, 0.0  ;;  %v4544_v26 = vmax.f32 %v13915_v48, %v3942_v20  ;;  %v3944_v29 = vpop.permute.xlu0 %3943  ;;  %v13917_v63 = vld [vmem:[#allocation205_spill] sm:$0xff]  ;;  %v13918_v41 = vld [vmem:[#allocation187_spill] sm:$0xff] }
 0x473   :  { %6239 = vst.msk [vmem:[%s12925_s3 + $0x1dc] sm:$0xf] %vm6119_vm2, %v6973_v3  ;;  %v5078_v39 = vmax.f32 %v4837_v14, 0.0  ;;  %v4545_v55 = vmax.f32 %v13916_v9, %v3944_v29  ;;  %4145 = vrot.lane.b32.xlu1 %v12327_v2, %s7856_s17  ;;  %v12351_v20 = vmax.f32 %v13918_v41, %v13917_v63  ;;  %v13919_v14 = vld [vmem:[#allocation126_spill] sm:$0xff]  ;;  %v13926_v2 = vld [vmem:[#allocation101_spill] sm:$0xff] }
 0x474   :  { %v7018_v45 = vpack.c.bf16 %v5077_v58, %v5077_v58  ;;  %v4792_v43 = vadd.f32 %v11676_v23, %v4544_v26  ;;  %4147 = vrot.lane.b32.xlu0 %v12332_v44, %s7856_s17  ;;  %v12356_v29 = vmax.f32 %v13920_v13, %v13919_v14  ;;  %v13921_v26 = vld [vmem:[#allocation13_spill] sm:$0xff] }
 0x475   :  { %v7019_v18 = vpack.c.bf16 %v5078_v39, %v5078_v39  ;;  %v4793_v48 = vadd.f32 %v11676_v23, %v4545_v55  ;;  %v4034_v3 = vpop.permute.xlu1 %4033  ;;  %v13922_v55 = vld [vmem:[#allocation179_spill] sm:$0xff] }
 0x476   :  { %6284 = vst.msk [vmem:[%s12925_s3 + $0x290] sm:$0xf] %vm6119_vm2, %v7018_v45  ;;  %v5033_v58 = vmax.f32 %v4792_v43, 0.0  ;;  %v4590_v9 = vmax.f32 %v13921_v26, %v4034_v3  ;;  %v4036_v44 = vpop.permute.xlu0 %4035  ;;  %v13923_v45 = vld [vmem:[#allocation209_spill] sm:$0xff]  ;;  %v13924_v43 = vld [vmem:[#allocation191_spill] sm:$0xff] }
 0x477   :  { %6285 = vst.msk [vmem:[%s12925_s3 + $0x294] sm:$0xf] %vm6119_vm2, %v7019_v18  ;;  %v5034_v39 = vmax.f32 %v4793_v48, 0.0  ;;  %v4591_v63 = vmax.f32 %v13922_v55, %v4036_v44  ;;  %4149 = vrot.lane.b32.xlu1 %v12351_v20, %s7856_s17  ;;  %v12375_v3 = vmax.f32 %v13924_v43, %v13923_v45  ;;  %v13925_v48 = vld [vmem:[#allocation164_spill] sm:$0xff] }
 0x478   :  { %v6974_v13 = vpack.c.bf16 %v5033_v58, %v5033_v58  ;;  %v4838_v41 = vadd.f32 %v11676_v23, %v4590_v9  ;;  %4151 = vrot.lane.b32.xlu0 %v12356_v29, %s7856_s17  ;;  %v12380_v44 = vmax.f32 %v13926_v2, %v13925_v48  ;;  %v13930_v48 = vld [vmem:[#allocation108_spill] sm:$0xff] }
 0x479   :  { %v6975_v14 = vpack.c.bf16 %v5034_v39, %v5034_v39  ;;  %v4839_v26 = vadd.f32 %v11676_v23, %v4591_v63  ;;  %v4038_v18 = vpop.permute.xlu1 %4037 }
 0x47a   :  { %6240 = vst.msk [vmem:[%s12925_s3 + $0x1e0] sm:$0xf] %vm6119_vm2, %v6974_v13  ;;  %v5079_v58 = vmax.f32 %v4838_v41, 0.0  ;;  %v4592_v9 = vmax.f32 %v11684_v51, %v4038_v18  ;;  %v4040_v55 = vpop.permute.xlu0 %4039  ;;  %v13927_v13 = vld [vmem:[#allocation140_spill] sm:$0xff]  ;;  %v13928_v51 = vld [vmem:[#allocation194_spill] sm:$0xff] }
 0x47b   :  { %6241 = vst.msk [vmem:[%s12925_s3 + $0x1e4] sm:$0xf] %vm6119_vm2, %v6975_v14  ;;  %v5080_v39 = vmax.f32 %v4839_v26, 0.0  ;;  %v4593_v63 = vmax.f32 %v11688_v59, %v4040_v55  ;;  %4153 = vrot.lane.b32.xlu1 %v12375_v3, %s7856_s17  ;;  %v12399_v41 = vmax.f32 %v13928_v51, %v13927_v13  ;;  %v13929_v26 = vld [vmem:[#allocation167_spill] sm:$0xff] }
 0x47c   :  { %v7020_v2 = vpack.c.bf16 %v5079_v58, %v5079_v58  ;;  %v4840_v45 = vadd.f32 %v11676_v23, %v4592_v9  ;;  %4155 = vrot.lane.b32.xlu0 %v12380_v44, %s7856_s17  ;;  %v12404_v59 = vmax.f32 %v13930_v48, %v13929_v26  ;;  %v13934_v48 = vld [vmem:[#allocation117_spill] sm:$0xff] }
 0x47d   :  { %v7021_v43 = vpack.c.bf16 %v5080_v39, %v5080_v39  ;;  %v4841_v18 = vadd.f32 %v11676_v23, %v4593_v63  ;;  %v4042_v14 = vpop.permute.xlu1 %4041 }
 0x47e   :  { %6286 = vst.msk [vmem:[%s12925_s3 + $0x298] sm:$0xf] %vm6119_vm2, %v7020_v2  ;;  %v5081_v58 = vmax.f32 %v4840_v45, 0.0  ;;  %v4594_v9 = vmax.f32 %v11704_v1, %v4042_v14  ;;  %v4044_v55 = vpop.permute.xlu0 %4043  ;;  %v13931_v2 = vld [vmem:[#allocation72_spill] sm:$0xff] }
 0x47f   :  { %6287 = vst.msk [vmem:[%s12925_s3 + $0x29c] sm:$0xf] %vm6119_vm2, %v7021_v43  ;;  %v5082_v39 = vmax.f32 %v4841_v18, 0.0  ;;  %v4595_v63 = vmax.f32 %v11708_v53, %v4044_v55  ;;  %4157 = vrot.lane.b32.xlu1 %v12399_v41, %s7856_s17  ;;  %v13932_v1 = vld [vmem:[#allocation196_spill] sm:$0xff]  ;;  %v13933_v18 = vld [vmem:[#allocation2_spill] sm:$0xff] }
 0x480   :  { %v7022_v13 = vpack.c.bf16 %v5081_v58, %v5081_v58  ;;  %v4842_v51 = vadd.f32 %v11676_v23, %v4594_v9  ;;  %4159 = vrot.lane.b32.xlu0 %v12404_v59, %s7856_s17  ;;  %v12423_v45 = vmax.f32 %v13932_v1, %v13931_v2  ;;  %v12428_v53 = vmax.f32 %v13934_v48, %v13933_v18  ;;  %v13937_v18 = vld [vmem:[#allocation3_spill] sm:$0xff]  ;;  %v13938_v48 = vld [vmem:[#allocation124_spill] sm:$0xff] }
 0x481   :  { %v7023_v14 = vpack.c.bf16 %v5082_v39, %v5082_v39  ;;  %v4843_v26 = vadd.f32 %v11676_v23, %v4595_v63  ;;  %v4046_v43 = vpop.permute.xlu1 %4045 }
 0x482   :  { %6288 = vst.msk [vmem:[%s12925_s3 + $0x2a0] sm:$0xf] %vm6119_vm2, %v7022_v13  ;;  %v5083_v58 = vmax.f32 %v4842_v51, 0.0  ;;  %v4596_v9 = vmax.f32 %v11728_v52, %v4046_v43  ;;  %v4048_v55 = vpop.permute.xlu0 %4047  ;;  %v13935_v13 = vld [vmem:[#allocation170_spill] sm:$0xff]  ;;  %v13936_v52 = vld [vmem:[#allocation199_spill] sm:$0xff] }
 0x483   :  { %6289 = vst.msk [vmem:[%s12925_s3 + $0x2a4] sm:$0xf] %vm6119_vm2, %v7023_v14  ;;  %v5084_v39 = vmax.f32 %v4843_v26, 0.0  ;;  %v4597_v63 = vmax.f32 %v11732_v7, %v4048_v55  ;;  %4161 = vrot.lane.b32.xlu1 %v12423_v45, %s7856_s17  ;;  %v12447_v51 = vmax.f32 %v13936_v52, %v13935_v13  ;;  %v12452_v14 = vld [vmem:[%s12924_s2] ss:$0 sm:$0xff] }
 0x484   :  { %v7024_v2 = vpack.c.bf16 %v5083_v58, %v5083_v58  ;;  %v4844_v1 = vadd.f32 %v11676_v23, %v4596_v9  ;;  %4163 = vrot.lane.b32.xlu0 %v12428_v53, %s7856_s17  ;;  %v12457_v58 = vmax.f32 %v13938_v48, %v13937_v18  ;;  %v13943_v48 = vld [vmem:[#allocation134_spill] sm:$0xff] }
 0x485   :  { %v7025_v43 = vpack.c.bf16 %v5084_v39, %v5084_v39  ;;  %v4845_v7 = vadd.f32 %v12452_v14, %v4597_v63  ;;  %v4050_v26 = vpop.permute.xlu1 %4049 }
 0x486   :  { %6290 = vst.msk [vmem:[%s12925_s3 + $0x2a8] sm:$0xf] %vm6119_vm2, %v7024_v2  ;;  %v5085_v23 = vmax.f32 %v4844_v1, 0.0  ;;  %v4598_v9 = vmax.f32 %v11752_v32, %v4050_v26  ;;  %v4052_v55 = vpop.permute.xlu0 %4051  ;;  %v13939_v2 = vld [vmem:[#allocation79_spill] sm:$0xff]  ;;  %v13940_v32 = vld [vmem:[#allocation202_spill] sm:$0xff] }
 0x487   :  { %6291 = vst.msk [vmem:[%s12925_s3 + $0x2ac] sm:$0xf] %vm6119_vm2, %v7025_v43  ;;  %v5086_v39 = vmax.f32 %v4845_v7, 0.0  ;;  %v4599_v63 = vmax.f32 %v11756_v56, %v4052_v55  ;;  %4165 = vrot.lane.b32.xlu1 %v12447_v51, %s7856_s17  ;;  %v12476_v1 = vmax.f32 %v13940_v32, %v13939_v2  ;;  %v13942_v7 = vld [vmem:[#allocation5_spill] sm:$0xff] }
 0x488   :  { %v7026_v13 = vpack.c.bf16 %v5085_v23, %v5085_v23  ;;  %v4846_v52 = vadd.f32 %v12452_v14, %v4598_v9  ;;  %4167 = vrot.lane.b32.xlu0 %v12457_v58, %s7856_s17  ;;  %v12481_v56 = vmax.f32 %v13943_v48, %v13942_v7  ;;  %v13948_v48 = vld [vmem:[#allocation138_spill] sm:$0xff] }
 0x489   :  { %13941 = vst [vmem:[#allocation120_spill] sm:$0xff] %v12476_v1  ;;  %v7027_v26 = vpack.c.bf16 %v5086_v39, %v5086_v39  ;;  %v4847_v18 = vadd.f32 %v12452_v14, %v4599_v63  ;;  %v4054_v43 = vpop.permute.xlu1 %4053 }
 0x48a   :  { %13944 = vst [vmem:[#allocation25_spill] sm:$0xff] %v12481_v56  ;;  %6292 = vst.msk [vmem:[%s12925_s3 + $0x2b0] sm:$0xf] %vm6119_vm2, %v7026_v13  ;;  %v5087_v23 = vmax.f32 %v4846_v52, 0.0  ;;  %v4600_v9 = vmax.f32 %v11776_v50, %v4054_v43  ;;  %v4056_v55 = vpop.permute.xlu0 %4055  ;;  %v13945_v13 = vld [vmem:[#allocation172_spill] sm:$0xff]  ;;  %v13946_v50 = vld [vmem:[#allocation206_spill] sm:$0xff] }
 0x48b   :  { %6293 = vst.msk [vmem:[%s12925_s3 + $0x2b4] sm:$0xf] %vm6119_vm2, %v7027_v26  ;;  %v5088_v39 = vmax.f32 %v4847_v18, 0.0  ;;  %v4601_v63 = vmax.f32 %v11780_v47, %v4056_v55  ;;  %4169 = vrot.lane.b32.xlu1 %v12476_v1, %s7856_s17  ;;  %v12500_v52 = vmax.f32 %v13946_v50, %v13945_v13  ;;  %v13947_v18 = vld [vmem:[#allocation14_spill] sm:$0xff]  ;;  %v13954_v1 = vld [vmem:[#allocation40_spill] sm:$0xff] }
 0x48c   :  { %v7028_v2 = vpack.c.bf16 %v5087_v23, %v5087_v23  ;;  %v4848_v32 = vadd.f32 %v12452_v14, %v4600_v9  ;;  %4171 = vrot.lane.b32.xlu0 %v12481_v56, %s7856_s17  ;;  %v12505_v47 = vmax.f32 %v13948_v48, %v13947_v18  ;;  %v13949_v9 = vld [vmem:[#allocation100_spill] sm:$0xff] }
 0x48d   :  { %v7029_v43 = vpack.c.bf16 %v5088_v39, %v5088_v39  ;;  %v4849_v7 = vadd.f32 %v12452_v14, %v4601_v63  ;;  %v4058_v26 = vpop.permute.xlu1 %4057  ;;  %v13950_v63 = vld [vmem:[#allocation15_spill] sm:$0xff] }
 0x48e   :  { %6294 = vst.msk [vmem:[%s12925_s3 + $0x2b8] sm:$0xf] %vm6119_vm2, %v7028_v2  ;;  %v5089_v23 = vmax.f32 %v4848_v32, 0.0  ;;  %v4602_v55 = vmax.f32 %v13949_v9, %v4058_v26  ;;  %v4060_v56 = vpop.permute.xlu0 %4059  ;;  %v13951_v2 = vld [vmem:[#allocation84_spill] sm:$0xff]  ;;  %v13952_v32 = vld [vmem:[#allocation210_spill] sm:$0xff] }
 0x48f   :  { %6295 = vst.msk [vmem:[%s12925_s3 + $0x2bc] sm:$0xf] %vm6119_vm2, %v7029_v43  ;;  %v5090_v39 = vmax.f32 %v4849_v7, 0.0  ;;  %v4603_v13 = vmax.f32 %v13950_v63, %v4060_v56  ;;  %4173 = vrot.lane.b32.xlu1 %v12500_v52, %s7856_s17  ;;  %v12524_v26 = vmax.f32 %v13952_v32, %v13951_v2  ;;  %v13953_v7 = vld [vmem:[#allocation88_spill] sm:$0xff] }
 0x490   :  { %v7030_v50 = vpack.c.bf16 %v5089_v23, %v5089_v23  ;;  %v4850_v18 = vadd.f32 %v12452_v14, %v4602_v55  ;;  %4175 = vrot.lane.b32.xlu0 %v12505_v47, %s7856_s17  ;;  %v12529_v56 = vmax.f32 %v13954_v1, %v13953_v7 }
 0x491   :  { %v7031_v48 = vpack.c.bf16 %v5090_v39, %v5090_v39  ;;  %v4851_v9 = vadd.f32 %v12452_v14, %v4603_v13  ;;  %v4062_v43 = vpop.permute.xlu1 %4061 }
 0x492   :  { %6296 = vst.msk [vmem:[%s12925_s3 + $0x2c0] sm:$0xf] %vm6119_vm2, %v7030_v50  ;;  %v5091_v23 = vmax.f32 %v4850_v18, 0.0  ;;  %v4604_v55 = vmax.f32 %v11824_v61, %v4062_v43  ;;  %v4064_v63 = vpop.permute.xlu0 %4063  ;;  %v13955_v50 = vld [vmem:[#allocation9_spill] sm:$0xff]  ;;  %v13956_v61 = vld [vmem:[#allocation214_spill] sm:$0xff] }
 0x493   :  { %6297 = vst.msk [vmem:[%s12925_s3 + $0x2c4] sm:$0xf] %vm6119_vm2, %v7031_v48  ;;  %v5092_v39 = vmax.f32 %v4851_v9, 0.0  ;;  %v4605_v13 = vmax.f32 %v11828_v35, %v4064_v63  ;;  %4177 = vrot.lane.b32.xlu1 %v12524_v26, %s7856_s17  ;;  %v12548_v18 = vmax.f32 %v13956_v61, %v13955_v50 }
 0x494   :  { %v7032_v1 = vpack.c.bf16 %v5091_v23, %v5091_v23  ;;  %v4852_v2 = vadd.f32 %v12452_v14, %v4604_v55  ;;  %4179 = vrot.lane.b32.xlu0 %v12529_v56, %s7856_s17 }
 0x495   :  { %v7033_v32 = vpack.c.bf16 %v5092_v39, %v5092_v39  ;;  %v4853_v43 = vadd.f32 %v12452_v14, %v4605_v13  ;;  %v4066_v48 = vpop.permute.xlu1 %4065 }
 0x496   :  { %6298 = vst.msk [vmem:[%s12925_s3 + $0x2c8] sm:$0xf] %vm6119_vm2, %v7032_v1  ;;  %v5093_v35 = vmax.f32 %v4852_v2, 0.0  ;;  %v4606_v9 = vmax.f32 %v11848_v40, %v4066_v48  ;;  %v4068_v7 = vpop.permute.xlu0 %4067 }
 0x497   :  { %6299 = vst.msk [vmem:[%s12925_s3 + $0x2cc] sm:$0xf] %vm6119_vm2, %v7033_v32  ;;  %v5094_v23 = vmax.f32 %v4853_v43, 0.0  ;;  %v4607_v55 = vmax.f32 %v11852_v57, %v4068_v7  ;;  %4181 = vrot.lane.b32.xlu1 %v12548_v18, %s7856_s17 }
 0x498   :  { %v7034_v63 = vpack.c.bf16 %v5093_v35, %v5093_v35  ;;  %v4854_v39 = vadd.f32 %v12452_v14, %v4606_v9 }
 0x499   :  { %v7035_v13 = vpack.c.bf16 %v5094_v23, %v5094_v23  ;;  %v4855_v1 = vadd.f32 %v12452_v14, %v4607_v55  ;;  %v4070_v2 = vpop.permute.xlu1 %4069 }
 0x49a   :  { %6300 = vst.msk [vmem:[%s12925_s3 + $0x2d0] sm:$0xf] %vm6119_vm2, %v7034_v63  ;;  %v5095_v40 = vmax.f32 %v4854_v39, 0.0  ;;  %v4608_v50 = vmax.f32 %v11872_v42, %v4070_v2  ;;  %v4072_v61 = vpop.permute.xlu0 %4071 }
 0x49b   :  { %6301 = vst.msk [vmem:[%s12925_s3 + $0x2d4] sm:$0xf] %vm6119_vm2, %v7035_v13  ;;  %v5096_v57 = vmax.f32 %v4855_v1, 0.0  ;;  %v4609_v32 = vmax.f32 %v11876_v6, %v4072_v61 }
 0x49c   :  { %v7036_v43 = vpack.c.bf16 %v5095_v40, %v5095_v40  ;;  %v4856_v48 = vadd.f32 %v12452_v14, %v4608_v50 }
 0x49d   :  { %v7037_v35 = vpack.c.bf16 %v5096_v57, %v5096_v57  ;;  %v4857_v9 = vadd.f32 %v12452_v14, %v4609_v32  ;;  %v4074_v7 = vpop.permute.xlu1 %4073 }
 0x49e   :  { %6302 = vst.msk [vmem:[%s12925_s3 + $0x2d8] sm:$0xf] %vm6119_vm2, %v7036_v43  ;;  %v5097_v42 = vmax.f32 %v4856_v48, 0.0  ;;  %v4610_v23 = vmax.f32 %v11896_v24, %v4074_v7  ;;  %v4076_v55 = vpop.permute.xlu0 %4075  ;;  %v13957_v7 = vld [vmem:[#allocation104_spill] sm:$0xff] }
 0x49f   :  { %6303 = vst.msk [vmem:[%s12925_s3 + $0x2dc] sm:$0xf] %vm6119_vm2, %v7037_v35  ;;  %v5098_v6 = vmax.f32 %v4857_v9, 0.0  ;;  %v4611_v63 = vmax.f32 %v11900_v22, %v4076_v55  ;;  %v13958_v55 = vld [vmem:[#allocation17_spill] sm:$0xff] }
 0x4a0   :  { %v7038_v39 = vpack.c.bf16 %v5097_v42, %v5097_v42  ;;  %v4858_v13 = vadd.f32 %v12452_v14, %v4610_v23 }
 0x4a1   :  { %v7039_v1 = vpack.c.bf16 %v5098_v6, %v5098_v6  ;;  %v4859_v2 = vadd.f32 %v12452_v14, %v4611_v63  ;;  %v4078_v40 = vpop.permute.xlu1 %4077 }
 0x4a2   :  { %6304 = vst.msk [vmem:[%s12925_s3 + $0x2e0] sm:$0xf] %vm6119_vm2, %v7038_v39  ;;  %v5099_v24 = vmax.f32 %v4858_v13, 0.0  ;;  %v4612_v50 = vmax.f32 %v11920_v12, %v4078_v40  ;;  %v4080_v61 = vpop.permute.xlu0 %4079 }
 0x4a3   :  { %6305 = vst.msk [vmem:[%s12925_s3 + $0x2e4] sm:$0xf] %vm6119_vm2, %v7039_v1  ;;  %v5100_v22 = vmax.f32 %v4859_v2, 0.0  ;;  %v4613_v57 = vmax.f32 %v11924_v25, %v4080_v61 }
 0x4a4   :  { %v7040_v32 = vpack.c.bf16 %v5099_v24, %v5099_v24  ;;  %v4860_v43 = vadd.f32 %v12452_v14, %v4612_v50 }
 0x4a5   :  { %v7041_v48 = vpack.c.bf16 %v5100_v22, %v5100_v22  ;;  %v4861_v35 = vadd.f32 %v12452_v14, %v4613_v57  ;;  %v4082_v9 = vpop.permute.xlu1 %4081 }
 0x4a6   :  { %6306 = vst.msk [vmem:[%s12925_s3 + $0x2e8] sm:$0xf] %vm6119_vm2, %v7040_v32  ;;  %v5101_v12 = vmax.f32 %v4860_v43, 0.0  ;;  %v4614_v42 = vmax.f32 %v13957_v7, %v4082_v9  ;;  %v4084_v23 = vpop.permute.xlu0 %4083 }
 0x4a7   :  { %6307 = vst.msk [vmem:[%s12925_s3 + $0x2ec] sm:$0xf] %vm6119_vm2, %v7041_v48  ;;  %v5102_v25 = vmax.f32 %v4861_v35, 0.0  ;;  %v4615_v6 = vmax.f32 %v13958_v55, %v4084_v23 }
 0x4a8   :  { %v7042_v63 = vpack.c.bf16 %v5101_v12, %v5101_v12  ;;  %v4862_v39 = vadd.f32 %v12452_v14, %v4614_v42 }
 0x4a9   :  { %v7043_v13 = vpack.c.bf16 %v5102_v25, %v5102_v25  ;;  %v4863_v1 = vadd.f32 %v12452_v14, %v4615_v6  ;;  %v4086_v2 = vpop.permute.xlu1 %4085 }
 0x4aa   :  { %6308 = vst.msk [vmem:[%s12925_s3 + $0x2f0] sm:$0xf] %vm6119_vm2, %v7042_v63  ;;  %v5103_v40 = vmax.f32 %v4862_v39, 0.0  ;;  %v4616_v24 = vmax.f32 %v11968_v60, %v4086_v2  ;;  %v4088_v50 = vpop.permute.xlu0 %4087 }
 0x4ab   :  { %6309 = vst.msk [vmem:[%s12925_s3 + $0x2f4] sm:$0xf] %vm6119_vm2, %v7043_v13  ;;  %v5104_v61 = vmax.f32 %v4863_v1, 0.0  ;;  %v4617_v22 = vmax.f32 %v11972_v0, %v4088_v50 }
 0x4ac   :  { %v7044_v57 = vpack.c.bf16 %v5103_v40, %v5103_v40  ;;  %v4864_v32 = vadd.f32 %v12452_v14, %v4616_v24 }
 0x4ad   :  { %v7045_v43 = vpack.c.bf16 %v5104_v61, %v5104_v61  ;;  %v4865_v48 = vadd.f32 %v12452_v14, %v4617_v22  ;;  %v4090_v35 = vpop.permute.xlu1 %4089 }
 0x4ae   :  { %6310 = vst.msk [vmem:[%s12925_s3 + $0x2f8] sm:$0xf] %vm6119_vm2, %v7044_v57  ;;  %v5105_v60 = vmax.f32 %v4864_v32, 0.0  ;;  %v4618_v9 = vmax.f32 %v11992_v49, %v4090_v35  ;;  %v4092_v12 = vpop.permute.xlu0 %4091 }
 0x4af   :  { %6311 = vst.msk [vmem:[%s12925_s3 + $0x2fc] sm:$0xf] %vm6119_vm2, %v7045_v43  ;;  %v5106_v0 = vmax.f32 %v4865_v48, 0.0  ;;  %v4619_v7 = vmax.f32 %v11996_v38, %v4092_v12 }
 0x4b0   :  { %v7046_v42 = vpack.c.bf16 %v5105_v60, %v5105_v60  ;;  %v4866_v23 = vadd.f32 %v12452_v14, %v4618_v9 }
 0x4b1   :  { %v7047_v25 = vpack.c.bf16 %v5106_v0, %v5106_v0  ;;  %v4867_v55 = vadd.f32 %v12452_v14, %v4619_v7  ;;  %v4094_v6 = vpop.permute.xlu1 %4093 }
 0x4b2   :  { %6312 = vst.msk [vmem:[%s12925_s3 + $0x300] sm:$0xf] %vm6119_vm2, %v7046_v42  ;;  %v5107_v49 = vmax.f32 %v4866_v23, 0.0  ;;  %v4620_v63 = vmax.f32 %v12016_v16, %v4094_v6  ;;  %v4096_v39 = vpop.permute.xlu0 %4095 }
 0x4b3   :  { %6313 = vst.msk [vmem:[%s12925_s3 + $0x304] sm:$0xf] %vm6119_vm2, %v7047_v25  ;;  %v5108_v38 = vmax.f32 %v4867_v55, 0.0  ;;  %v4621_v13 = vmax.f32 %v12020_v11, %v4096_v39 }
 0x4b4   :  { %v7048_v1 = vpack.c.bf16 %v5107_v49, %v5107_v49  ;;  %v4868_v2 = vadd.f32 %v12452_v14, %v4620_v63 }
 0x4b5   :  { %v7049_v40 = vpack.c.bf16 %v5108_v38, %v5108_v38  ;;  %v4869_v24 = vadd.f32 %v12452_v14, %v4621_v13  ;;  %v4098_v50 = vpop.permute.xlu1 %4097 }
 0x4b6   :  { %6314 = vst.msk [vmem:[%s12925_s3 + $0x308] sm:$0xf] %vm6119_vm2, %v7048_v1  ;;  %v5109_v16 = vmax.f32 %v4868_v2, 0.0  ;;  %v4622_v61 = vmax.f32 %v12040_v27, %v4098_v50  ;;  %v4100_v22 = vpop.permute.xlu0 %4099 }
 0x4b7   :  { %6315 = vst.msk [vmem:[%s12925_s3 + $0x30c] sm:$0xf] %vm6119_vm2, %v7049_v40  ;;  %v5110_v11 = vmax.f32 %v4869_v24, 0.0  ;;  %v4623_v57 = vmax.f32 %v12044_v34, %v4100_v22 }
 0x4b8   :  { %v7050_v32 = vpack.c.bf16 %v5109_v16, %v5109_v16  ;;  %v4870_v43 = vadd.f32 %v12452_v14, %v4622_v61 }
 0x4b9   :  { %v7051_v48 = vpack.c.bf16 %v5110_v11, %v5110_v11  ;;  %v4871_v35 = vadd.f32 %v12452_v14, %v4623_v57  ;;  %v4102_v60 = vpop.permute.xlu1 %4101 }
 0x4ba   :  { %6316 = vst.msk [vmem:[%s12925_s3 + $0x310] sm:$0xf] %vm6119_vm2, %v7050_v32  ;;  %v5111_v27 = vmax.f32 %v4870_v43, 0.0  ;;  %v4624_v9 = vmax.f32 %v12064_v10, %v4102_v60  ;;  %v4104_v12 = vpop.permute.xlu0 %4103 }
 0x4bb   :  { %6317 = vst.msk [vmem:[%s12925_s3 + $0x314] sm:$0xf] %vm6119_vm2, %v7051_v48  ;;  %v5112_v34 = vmax.f32 %v4871_v35, 0.0  ;;  %v4625_v0 = vmax.f32 %v12068_v15, %v4104_v12 }
 0x4bc   :  { %v7052_v7 = vpack.c.bf16 %v5111_v27, %v5111_v27  ;;  %v4872_v42 = vadd.f32 %v12452_v14, %v4624_v9 }
 0x4bd   :  { %v7053_v23 = vpack.c.bf16 %v5112_v34, %v5112_v34  ;;  %v4873_v25 = vadd.f32 %v12452_v14, %v4625_v0  ;;  %v4106_v55 = vpop.permute.xlu1 %4105 }
 0x4be   :  { %6318 = vst.msk [vmem:[%s12925_s3 + $0x318] sm:$0xf] %vm6119_vm2, %v7052_v7  ;;  %v5113_v10 = vmax.f32 %v4872_v42, 0.0  ;;  %v4626_v6 = vmax.f32 %v12088_v19, %v4106_v55  ;;  %v4108_v49 = vpop.permute.xlu0 %4107 }
 0x4bf   :  { %6319 = vst.msk [vmem:[%s12925_s3 + $0x31c] sm:$0xf] %vm6119_vm2, %v7053_v23  ;;  %v5114_v15 = vmax.f32 %v4873_v25, 0.0  ;;  %v4627_v63 = vmax.f32 %v12092_v8, %v4108_v49 }
 0x4c0   :  { %v7054_v39 = vpack.c.bf16 %v5113_v10, %v5113_v10  ;;  %v4874_v38 = vadd.f32 %v12452_v14, %v4626_v6 }
 0x4c1   :  { %v7055_v13 = vpack.c.bf16 %v5114_v15, %v5114_v15  ;;  %v4875_v1 = vadd.f32 %v12452_v14, %v4627_v63  ;;  %v4110_v2 = vpop.permute.xlu1 %4109 }
 0x4c2   :  { %6320 = vst.msk [vmem:[%s12925_s3 + $0x320] sm:$0xf] %vm6119_vm2, %v7054_v39  ;;  %v5115_v19 = vmax.f32 %v4874_v38, 0.0  ;;  %v4628_v40 = vmax.f32 %v12112_v62, %v4110_v2  ;;  %v4112_v24 = vpop.permute.xlu0 %4111 }
 0x4c3   :  { %6321 = vst.msk [vmem:[%s12925_s3 + $0x324] sm:$0xf] %vm6119_vm2, %v7055_v13  ;;  %v5116_v8 = vmax.f32 %v4875_v1, 0.0  ;;  %v4629_v50 = vmax.f32 %v12116_v54, %v4112_v24 }
 0x4c4   :  { %v7056_v16 = vpack.c.bf16 %v5115_v19, %v5115_v19  ;;  %v4876_v61 = vadd.f32 %v12452_v14, %v4628_v40  ;;  %v13959_v40 = vld [vmem:[#allocation107_spill] sm:$0xff] }
 0x4c5   :  { %v7057_v22 = vpack.c.bf16 %v5116_v8, %v5116_v8  ;;  %v4877_v11 = vadd.f32 %v12452_v14, %v4629_v50  ;;  %v4114_v57 = vpop.permute.xlu1 %4113 }
 0x4c6   :  { %6322 = vst.msk [vmem:[%s12925_s3 + $0x328] sm:$0xf] %vm6119_vm2, %v7056_v16  ;;  %v5117_v62 = vmax.f32 %v4876_v61, 0.0  ;;  %v4630_v32 = vmax.f32 %v12136_v5, %v4114_v57  ;;  %v4116_v43 = vpop.permute.xlu0 %4115 }
 0x4c7   :  { %6323 = vst.msk [vmem:[%s12925_s3 + $0x32c] sm:$0xf] %vm6119_vm2, %v7057_v22  ;;  %v5118_v54 = vmax.f32 %v4877_v11, 0.0  ;;  %v4631_v48 = vmax.f32 %v12140_v30, %v4116_v43 }
 0x4c8   :  { %v7058_v35 = vpack.c.bf16 %v5117_v62, %v5117_v62  ;;  %v4878_v60 = vadd.f32 %v12452_v14, %v4630_v32  ;;  %v13960_v32 = vld [vmem:[#allocation19_spill] sm:$0xff] }
 0x4c9   :  { %v7059_v27 = vpack.c.bf16 %v5118_v54, %v5118_v54  ;;  %v4879_v9 = vadd.f32 %v12452_v14, %v4631_v48  ;;  %v4118_v12 = vpop.permute.xlu1 %4117 }
 0x4ca   :  { %6324 = vst.msk [vmem:[%s12925_s3 + $0x330] sm:$0xf] %vm6119_vm2, %v7058_v35  ;;  %v5119_v5 = vmax.f32 %v4878_v60, 0.0  ;;  %v4632_v34 = vmax.f32 %v12160_v37, %v4118_v12  ;;  %v4120_v0 = vpop.permute.xlu0 %4119 }
 0x4cb   :  { %6325 = vst.msk [vmem:[%s12925_s3 + $0x334] sm:$0xf] %vm6119_vm2, %v7059_v27  ;;  %v5120_v30 = vmax.f32 %v4879_v9, 0.0  ;;  %v4633_v7 = vmax.f32 %v12164_v17, %v4120_v0 }
 0x4cc   :  { %v7060_v42 = vpack.c.bf16 %v5119_v5, %v5119_v5  ;;  %v4880_v23 = vadd.f32 %v12452_v14, %v4632_v34 }
 0x4cd   :  { %v7061_v25 = vpack.c.bf16 %v5120_v30, %v5120_v30  ;;  %v4881_v55 = vadd.f32 %v12452_v14, %v4633_v7  ;;  %v4122_v10 = vpop.permute.xlu1 %4121 }
 0x4ce   :  { %6326 = vst.msk [vmem:[%s12925_s3 + $0x338] sm:$0xf] %vm6119_vm2, %v7060_v42  ;;  %v5121_v37 = vmax.f32 %v4880_v23, 0.0  ;;  %v4634_v6 = vmax.f32 %v12184_v46, %v4122_v10  ;;  %v4124_v49 = vpop.permute.xlu0 %4123  ;;  %v13961_v10 = vld [vmem:[#allocation111_spill] sm:$0xff] }
 0x4cf   :  { %6327 = vst.msk [vmem:[%s12925_s3 + $0x33c] sm:$0xf] %vm6119_vm2, %v7061_v25  ;;  %v5122_v17 = vmax.f32 %v4881_v55, 0.0  ;;  %v4635_v15 = vmax.f32 %v12188_v21, %v4124_v49 }
 0x4d0   :  { %v7062_v63 = vpack.c.bf16 %v5121_v37, %v5121_v37  ;;  %v4882_v39 = vadd.f32 %v12452_v14, %v4634_v6 }
 0x4d1   :  { %v7063_v38 = vpack.c.bf16 %v5122_v17, %v5122_v17  ;;  %v4883_v13 = vadd.f32 %v12452_v14, %v4635_v15  ;;  %v4126_v1 = vpop.permute.xlu1 %4125 }
 0x4d2   :  { %6328 = vst.msk [vmem:[%s12925_s3 + $0x340] sm:$0xf] %vm6119_vm2, %v7062_v63  ;;  %v5123_v46 = vmax.f32 %v4882_v39, 0.0  ;;  %v4636_v2 = vmax.f32 %v12208_v36, %v4126_v1  ;;  %v4128_v19 = vpop.permute.xlu0 %4127  ;;  %v13962_v39 = vld [vmem:[#allocation21_spill] sm:$0xff] }
 0x4d3   :  { %6329 = vst.msk [vmem:[%s12925_s3 + $0x344] sm:$0xf] %vm6119_vm2, %v7063_v38  ;;  %v5124_v21 = vmax.f32 %v4883_v13, 0.0  ;;  %v4637_v24 = vmax.f32 %v13959_v40, %v4128_v19 }
 0x4d4   :  { %v7064_v8 = vpack.c.bf16 %v5123_v46, %v5123_v46  ;;  %v4884_v50 = vadd.f32 %v12452_v14, %v4636_v2  ;;  %v13963_v46 = vld [vmem:[#allocation186_spill] sm:$0xff] }
 0x4d5   :  { %v7065_v16 = vpack.c.bf16 %v5124_v21, %v5124_v21  ;;  %v4885_v61 = vadd.f32 %v12452_v14, %v4637_v24  ;;  %v4130_v22 = vpop.permute.xlu1 %4129 }
 0x4d6   :  { %6330 = vst.msk [vmem:[%s12925_s3 + $0x348] sm:$0xf] %vm6119_vm2, %v7064_v8  ;;  %v5125_v36 = vmax.f32 %v4884_v50, 0.0  ;;  %v4638_v11 = vmax.f32 %v12232_v4, %v4130_v22  ;;  %v4132_v57 = vpop.permute.xlu0 %4131 }
 0x4d7   :  { %6331 = vst.msk [vmem:[%s12925_s3 + $0x34c] sm:$0xf] %vm6119_vm2, %v7065_v16  ;;  %v5126_v62 = vmax.f32 %v4885_v61, 0.0  ;;  %v4639_v43 = vmax.f32 %v13960_v32, %v4132_v57  ;;  %v13964_v16 = vld [vmem:[#allocation116_spill] sm:$0xff] }
 0x4d8   :  { %v7066_v54 = vpack.c.bf16 %v5125_v36, %v5125_v36  ;;  %v4886_v48 = vadd.f32 %v12452_v14, %v4638_v11  ;;  %v13965_v11 = vld [vmem:[#allocation23_spill] sm:$0xff] }
 0x4d9   :  { %v7067_v35 = vpack.c.bf16 %v5126_v62, %v5126_v62  ;;  %v4887_v60 = vadd.f32 %v12452_v14, %v4639_v43  ;;  %v4134_v27 = vpop.permute.xlu1 %4133 }
 0x4da   :  { %6332 = vst.msk [vmem:[%s12925_s3 + $0x350] sm:$0xf] %vm6119_vm2, %v7066_v54  ;;  %v5127_v4 = vmax.f32 %v4886_v48, 0.0  ;;  %v4640_v9 = vmax.f32 %v12256_v31, %v4134_v27  ;;  %v4136_v12 = vpop.permute.xlu0 %4135 }
 0x4db   :  { %6333 = vst.msk [vmem:[%s12925_s3 + $0x354] sm:$0xf] %vm6119_vm2, %v7067_v35  ;;  %v5128_v5 = vmax.f32 %v4887_v60, 0.0  ;;  %v4641_v34 = vmax.f32 %v12260_v28, %v4136_v12 }
 0x4dc   :  { %v7068_v0 = vpack.c.bf16 %v5127_v4, %v5127_v4  ;;  %v4888_v30 = vadd.f32 %v12452_v14, %v4640_v9 }
 0x4dd   :  { %v7069_v7 = vpack.c.bf16 %v5128_v5, %v5128_v5  ;;  %v4889_v42 = vadd.f32 %v12452_v14, %v4641_v34  ;;  %v4138_v23 = vpop.permute.xlu1 %4137 }
 0x4de   :  { %6334 = vst.msk [vmem:[%s12925_s3 + $0x358] sm:$0xf] %vm6119_vm2, %v7068_v0  ;;  %v5129_v31 = vmax.f32 %v4888_v30, 0.0  ;;  %v4642_v25 = vmax.f32 %v12280_v33, %v4138_v23  ;;  %v4140_v55 = vpop.permute.xlu0 %4139 }
 0x4df   :  { %6335 = vst.msk [vmem:[%s12925_s3 + $0x35c] sm:$0xf] %vm6119_vm2, %v7069_v7  ;;  %v5130_v28 = vmax.f32 %v4889_v42, 0.0  ;;  %v4643_v37 = vmax.f32 %v13961_v10, %v4140_v55 }
 0x4e0   :  { %v7070_v6 = vpack.c.bf16 %v5129_v31, %v5129_v31  ;;  %v4890_v49 = vadd.f32 %v12452_v14, %v4642_v25 }
 0x4e1   :  { %v7071_v17 = vpack.c.bf16 %v5130_v28, %v5130_v28  ;;  %v4891_v15 = vadd.f32 %v12452_v14, %v4643_v37  ;;  %v4142_v63 = vpop.permute.xlu1 %4141 }
 0x4e2   :  { %6336 = vst.msk [vmem:[%s12925_s3 + $0x360] sm:$0xf] %vm6119_vm2, %v7070_v6  ;;  %v5131_v33 = vmax.f32 %v4890_v49, 0.0  ;;  %v4644_v38 = vmax.f32 %v13962_v39, %v4142_v63  ;;  %v4144_v13 = vpop.permute.xlu0 %4143 }
 0x4e3   :  { %6337 = vst.msk [vmem:[%s12925_s3 + $0x364] sm:$0xf] %vm6119_vm2, %v7071_v17  ;;  %v5132_v1 = vmax.f32 %v4891_v15, 0.0  ;;  %v4645_v2 = vmax.f32 %v13963_v46, %v4144_v13 }
 0x4e4   :  { %v7072_v19 = vpack.c.bf16 %v5131_v33, %v5131_v33  ;;  %v4892_v21 = vadd.f32 %v12452_v14, %v4644_v38 }
 0x4e5   :  { %v7073_v40 = vpack.c.bf16 %v5132_v1, %v5132_v1  ;;  %v4893_v24 = vadd.f32 %v12452_v14, %v4645_v2  ;;  %v4146_v8 = vpop.permute.xlu1 %4145 }
 0x4e6   :  { %6338 = vst.msk [vmem:[%s12925_s3 + $0x368] sm:$0xf] %vm6119_vm2, %v7072_v19  ;;  %v5133_v50 = vmax.f32 %v4892_v21, 0.0  ;;  %v4646_v61 = vmax.f32 %v13964_v16, %v4146_v8  ;;  %v4148_v22 = vpop.permute.xlu0 %4147 }
 0x4e7   :  { %6339 = vst.msk [vmem:[%s12925_s3 + $0x36c] sm:$0xf] %vm6119_vm2, %v7073_v40  ;;  %v5134_v36 = vmax.f32 %v4893_v24, 0.0  ;;  %v4647_v57 = vmax.f32 %v13965_v11, %v4148_v22 }
 0x4e8   :  { %v7074_v62 = vpack.c.bf16 %v5133_v50, %v5133_v50  ;;  %v4894_v32 = vadd.f32 %v12452_v14, %v4646_v61 }
 0x4e9   :  { %v7075_v43 = vpack.c.bf16 %v5134_v36, %v5134_v36  ;;  %v4895_v54 = vadd.f32 %v12452_v14, %v4647_v57  ;;  %v4150_v48 = vpop.permute.xlu1 %4149  ;;  %v13966_v57 = vld [vmem:[#allocation120_spill] sm:$0xff] }
 0x4ea   :  { %6340 = vst.msk [vmem:[%s12925_s3 + $0x370] sm:$0xf] %vm6119_vm2, %v7074_v62  ;;  %v5135_v35 = vmax.f32 %v4894_v32, 0.0  ;;  %v4648_v60 = vmax.f32 %v12351_v20, %v4150_v48  ;;  %v4152_v27 = vpop.permute.xlu0 %4151 }
 0x4eb   :  { %6341 = vst.msk [vmem:[%s12925_s3 + $0x374] sm:$0xf] %vm6119_vm2, %v7075_v43  ;;  %v5136_v4 = vmax.f32 %v4895_v54, 0.0  ;;  %v4649_v9 = vmax.f32 %v12356_v29, %v4152_v27  ;;  %v13967_v43 = vld [vmem:[#allocation25_spill] sm:$0xff] }
 0x4ec   :  { %v7076_v12 = vpack.c.bf16 %v5135_v35, %v5135_v35  ;;  %v4896_v5 = vadd.f32 %v12452_v14, %v4648_v60 }
 0x4ed   :  { %v7077_v34 = vpack.c.bf16 %v5136_v4, %v5136_v4  ;;  %v4897_v0 = vadd.f32 %v12452_v14, %v4649_v9  ;;  %v4154_v30 = vpop.permute.xlu1 %4153 }
 0x4ee   :  { %6342 = vst.msk [vmem:[%s12925_s3 + $0x378] sm:$0xf] %vm6119_vm2, %v7076_v12  ;;  %v5137_v20 = vmax.f32 %v4896_v5, 0.0  ;;  %v4650_v7 = vmax.f32 %v12375_v3, %v4154_v30  ;;  %v4156_v42 = vpop.permute.xlu0 %4155 }
 0x4ef   :  { %6343 = vst.msk [vmem:[%s12925_s3 + $0x37c] sm:$0xf] %vm6119_vm2, %v7077_v34  ;;  %v5138_v29 = vmax.f32 %v4897_v0, 0.0  ;;  %v4651_v23 = vmax.f32 %v12380_v44, %v4156_v42 }
 0x4f0   :  { %v7078_v31 = vpack.c.bf16 %v5137_v20, %v5137_v20  ;;  %v4898_v25 = vadd.f32 %v12452_v14, %v4650_v7 }
 0x4f1   :  { %v7079_v55 = vpack.c.bf16 %v5138_v29, %v5138_v29  ;;  %v4899_v28 = vadd.f32 %v12452_v14, %v4651_v23  ;;  %v4158_v10 = vpop.permute.xlu1 %4157 }
 0x4f2   :  { %6344 = vst.msk [vmem:[%s12925_s3 + $0x380] sm:$0xf] %vm6119_vm2, %v7078_v31  ;;  %v5139_v3 = vmax.f32 %v4898_v25, 0.0  ;;  %v4652_v37 = vmax.f32 %v12399_v41, %v4158_v10  ;;  %v4160_v6 = vpop.permute.xlu0 %4159 }
 0x4f3   :  { %6345 = vst.msk [vmem:[%s12925_s3 + $0x384] sm:$0xf] %vm6119_vm2, %v7079_v55  ;;  %v5140_v44 = vmax.f32 %v4899_v28, 0.0  ;;  %v4653_v49 = vmax.f32 %v12404_v59, %v4160_v6 }
 0x4f4   :  { %v7080_v17 = vpack.c.bf16 %v5139_v3, %v5139_v3  ;;  %v4900_v15 = vadd.f32 %v12452_v14, %v4652_v37 }
 0x4f5   :  { %v7081_v63 = vpack.c.bf16 %v5140_v44, %v5140_v44  ;;  %v4901_v33 = vadd.f32 %v12452_v14, %v4653_v49  ;;  %v4162_v39 = vpop.permute.xlu1 %4161 }
 0x4f6   :  { %6346 = vst.msk [vmem:[%s12925_s3 + $0x388] sm:$0xf] %vm6119_vm2, %v7080_v17  ;;  %v5141_v41 = vmax.f32 %v4900_v15, 0.0  ;;  %v4654_v38 = vmax.f32 %v12423_v45, %v4162_v39  ;;  %v4164_v13 = vpop.permute.xlu0 %4163 }
 0x4f7   :  { %6347 = vst.msk [vmem:[%s12925_s3 + $0x38c] sm:$0xf] %vm6119_vm2, %v7081_v63  ;;  %v5142_v59 = vmax.f32 %v4901_v33, 0.0  ;;  %v4655_v1 = vmax.f32 %v12428_v53, %v4164_v13 }
 0x4f8   :  { %v7082_v46 = vpack.c.bf16 %v5141_v41, %v5141_v41  ;;  %v4902_v2 = vadd.f32 %v12452_v14, %v4654_v38 }
 0x4f9   :  { %v7083_v19 = vpack.c.bf16 %v5142_v59, %v5142_v59  ;;  %v4903_v21 = vadd.f32 %v12452_v14, %v4655_v1  ;;  %v4166_v40 = vpop.permute.xlu1 %4165 }
 0x4fa   :  { %6348 = vst.msk [vmem:[%s12925_s3 + $0x390] sm:$0xf] %vm6119_vm2, %v7082_v46  ;;  %v5143_v45 = vmax.f32 %v4902_v2, 0.0  ;;  %v4656_v24 = vmax.f32 %v12447_v51, %v4166_v40  ;;  %v4168_v8 = vpop.permute.xlu0 %4167 }
 0x4fb   :  { %6349 = vst.msk [vmem:[%s12925_s3 + $0x394] sm:$0xf] %vm6119_vm2, %v7083_v19  ;;  %v5144_v53 = vmax.f32 %v4903_v21, 0.0  ;;  %v4657_v50 = vmax.f32 %v12457_v58, %v4168_v8 }
 0x4fc   :  { %v7084_v16 = vpack.c.bf16 %v5143_v45, %v5143_v45  ;;  %v4904_v61 = vadd.f32 %v12452_v14, %v4656_v24 }
 0x4fd   :  { %v7085_v22 = vpack.c.bf16 %v5144_v53, %v5144_v53  ;;  %v4905_v36 = vadd.f32 %v12452_v14, %v4657_v50  ;;  %v4170_v11 = vpop.permute.xlu1 %4169 }
 0x4fe   :  { %6350 = vst.msk [vmem:[%s12925_s3 + $0x398] sm:$0xf] %vm6119_vm2, %v7084_v16  ;;  %v5145_v51 = vmax.f32 %v4904_v61, 0.0  ;;  %v4658_v62 = vmax.f32 %v13966_v57, %v4170_v11  ;;  %v4172_v32 = vpop.permute.xlu0 %4171 }
 0x4ff   :  { %6351 = vst.msk [vmem:[%s12925_s3 + $0x39c] sm:$0xf] %vm6119_vm2, %v7085_v22  ;;  %v5146_v58 = vmax.f32 %v4905_v36, 0.0  ;;  %v4659_v54 = vmax.f32 %v13967_v43, %v4172_v32 }
 0x500   :  { %v7086_v48 = vpack.c.bf16 %v5145_v51, %v5145_v51  ;;  %v4906_v35 = vadd.f32 %v12452_v14, %v4658_v62 }
 0x501   :  { %v7087_v60 = vpack.c.bf16 %v5146_v58, %v5146_v58  ;;  %v4907_v27 = vadd.f32 %v12452_v14, %v4659_v54  ;;  %v4174_v4 = vpop.permute.xlu1 %4173 }
 0x502   :  { %6352 = vst.msk [vmem:[%s12925_s3 + $0x3a0] sm:$0xf] %vm6119_vm2, %v7086_v48  ;;  %v5147_v9 = vmax.f32 %v4906_v35, 0.0  ;;  %v4660_v12 = vmax.f32 %v12500_v52, %v4174_v4  ;;  %v4176_v5 = vpop.permute.xlu0 %4175 }
 0x503   :  { %6353 = vst.msk [vmem:[%s12925_s3 + $0x3a4] sm:$0xf] %vm6119_vm2, %v7087_v60  ;;  %v5148_v34 = vmax.f32 %v4907_v27, 0.0  ;;  %v4661_v0 = vmax.f32 %v12505_v47, %v4176_v5 }
 0x504   :  { %v7088_v30 = vpack.c.bf16 %v5147_v9, %v5147_v9  ;;  %v4908_v20 = vadd.f32 %v12452_v14, %v4660_v12 }
 0x505   :  { %v7089_v7 = vpack.c.bf16 %v5148_v34, %v5148_v34  ;;  %v4909_v42 = vadd.f32 %v12452_v14, %v4661_v0  ;;  %v4178_v29 = vpop.permute.xlu1 %4177 }
 0x506   :  { %6354 = vst.msk [vmem:[%s12925_s3 + $0x3a8] sm:$0xf] %vm6119_vm2, %v7088_v30  ;;  %v5149_v52 = vmax.f32 %v4908_v20, 0.0  ;;  %v4662_v23 = vmax.f32 %v12524_v26, %v4178_v29  ;;  %v4180_v31 = vpop.permute.xlu0 %4179 }
 0x507   :  { %6355 = vst.msk [vmem:[%s12925_s3 + $0x3ac] sm:$0xf] %vm6119_vm2, %v7089_v7  ;;  %v5150_v47 = vmax.f32 %v4909_v42, 0.0  ;;  %v4663_v25 = vmax.f32 %v12529_v56, %v4180_v31 }
 0x508   :  { %v7090_v55 = vpack.c.bf16 %v5149_v52, %v5149_v52  ;;  %v4910_v28 = vadd.f32 %v12452_v14, %v4662_v23 }
 0x509   :  { %v7091_v10 = vpack.c.bf16 %v5150_v47, %v5150_v47  ;;  %v4911_v3 = vadd.f32 %v12452_v14, %v4663_v25  ;;  %v4182_v37 = vpop.permute.xlu1 %4181 }
 0x50a   :  { %6356 = vst.msk [vmem:[%s12925_s3 + $0x3b0] sm:$0xf] %vm6119_vm2, %v7090_v55  ;;  %v5151_v26 = vmax.f32 %v4910_v28, 0.0  ;;  %v4664_v6 = vmax.f32 %v12548_v18, %v4182_v37 }
 0x50b   :  { %6357 = vst.msk [vmem:[%s12925_s3 + $0x3b4] sm:$0xf] %vm6119_vm2, %v7091_v10  ;;  %v5152_v56 = vmax.f32 %v4911_v3, 0.0 }
 0x50c   :  { %v7092_v44 = vpack.c.bf16 %v5151_v26, %v5151_v26  ;;  %v4912_v49 = vadd.f32 %v12452_v14, %v4664_v6 }
 0x50d   :  { %v7093_v17 = vpack.c.bf16 %v5152_v56, %v5152_v56 }
 0x50e   :  { %6358 = vst.msk [vmem:[%s12925_s3 + $0x3b8] sm:$0xf] %vm6119_vm2, %v7092_v44  ;;  %v5153_v15 = vmax.f32 %v4912_v49, 0.0 }
 0x50f   :  { %6359 = vst.msk [vmem:[%s12925_s3 + $0x3bc] sm:$0xf] %vm6119_vm2, %v7093_v17 }
 0x510   :  { %v7094_v18 = vpack.c.bf16 %v5153_v15, %v5153_v15 }
 0x512   :  { %6361 = vst.msk [vmem:[%s12925_s3 + $0x3c0] sm:$0x1] %vm6360_vm3, %v7094_v18 }

// kernel: domain_classifier_forward.3
= control target key start
LH: loop header
LB: loop body
LE: loop exit
PB: predicated region body
PF: predicated region fallthrough
CT: control target
= control target key end

     0   :  { %s9804_s27 = smov 64   ;;  %vm9805_vm0 = vmmov 0   ;;  %vm3239_vm1 = vcmask 523264   ;;  %vm7268_vm2 = vcmask 1024   ;;  %s12457_s1 = inlined_call_operand.vmem [shape: bf16[2048,256], index: 1, kind: input, shape index: {}]   ;;  %s12458_s0 = inlined_call_operand.vmem [shape: bf16[98,2048], index: 0, kind: input, shape index: {}]   ;;  %s12459_s3 = inlined_call_operand.vmem [shape: bf16[49,64,128], index: 3, kind: input, shape index: {}]   ;;  %s12460_s2 = inlined_call_operand.vmem [shape: f32[1,64], index: 2, kind: input, shape index: {}]   ;;  %s12461_s5 = inlined_call_operand.vmem [shape: bf16[128,128], index: 5, kind: input, shape index: {}]   ;;  %s12462_s7 = inlined_call_operand.vmem [shape: bf16[128,128], index: 7, kind: input, shape index: {}]   ;;  %s12463_s4 = inlined_call_operand.vmem [shape: f32[1,128], index: 4, kind: input, shape index: {}]   ;;  %s12464_s8 = inlined_call_operand.<no memory space> [shape: f32[1,1], index: 8, kind: input, shape index: {}]   ;;  %s12465_s6 = inlined_call_operand.vmem [shape: f32[1,128], index: 6, kind: input, shape index: {}]   ;;  %s12466_s9 = inlined_call_operand.vmem [shape: f32[2,1], index: 9, kind: output, shape index: {}]  }
   0x1   :  { %v9186_v0 = vld [vmem:[%s12457_s1 + $0x74] ss:$8 sps:$4 sm:$0xff]   ;;  %v9190_v2 = vld [vmem:[%s12457_s1 + $0x70] ss:$8 sps:$4 sm:$0xff]   ;;  %v9192_v4 = vld [vmem:[%s12457_s1 + $0x64] ss:$8 sps:$4 sm:$0xff]  }
   0x2   :  { %v9188_v1 = vld [vmem:[%s12457_s1 + $0x174] ss:$8 sps:$4 sm:$0xff]   ;;  %2211 = vmatprep.subr.bf16.mxu0 %v9186_v0  ;;  %v9191_v3 = vld [vmem:[%s12457_s1 + $0x170] ss:$8 sps:$4 sm:$0xff]   ;;  %v9194_v5 = vld [vmem:[%s12457_s1 + $0x164] ss:$8 sps:$4 sm:$0xff]  }
   0x3   :  { %2312 = vmatprep.subr.bf16.mxu1 %v9188_v1  ;;  %2212 = vmatpush1.bf16.msra.mxu0 %v9190_v2  ;;  %v9196_v6 = vld [vmem:[%s12457_s1 + $0x60] ss:$8 sps:$4 sm:$0xff]   ;;  %v9198_v8 = vld [vmem:[%s12457_s1 + $0x54] ss:$8 sps:$4 sm:$0xff]   ;;  %v9202_v10 = vld [vmem:[%s12457_s1 + $0x50] ss:$8 sps:$4 sm:$0xff]  }
   0x4   :  { %2313 = vmatpush1.bf16.msra.mxu1 %v9191_v3  ;;  %2213 = vmatprep.subr.bf16.mxu0 %v9192_v4  ;;  %v9197_v7 = vld [vmem:[%s12457_s1 + $0x160] ss:$8 sps:$4 sm:$0xff]   ;;  %v9200_v9 = vld [vmem:[%s12457_s1 + $0x154] ss:$8 sps:$4 sm:$0xff]   ;;  %v9203_v11 = vld [vmem:[%s12457_s1 + $0x150] ss:$8 sps:$4 sm:$0xff]  }
   0x5   :  { %2314 = vmatprep.subr.bf16.mxu1 %v9194_v5  ;;  %v9204_v12 = vld [vmem:[%s12457_s1 + $0x44] ss:$8 sps:$4 sm:$0xff]   ;;  %v9208_v14 = vld [vmem:[%s12457_s1 + $0x40] ss:$8 sps:$4 sm:$0xff]   ;;  %v9210_v16 = vld [vmem:[%s12457_s1 + $0x34] ss:$8 sps:$4 sm:$0xff]  }
   0x6   :  { %v9206_v13 = vld [vmem:[%s12457_s1 + $0x144] ss:$8 sps:$4 sm:$0xff]   ;;  %v9209_v15 = vld [vmem:[%s12457_s1 + $0x140] ss:$8 sps:$4 sm:$0xff]   ;;  %v9212_v17 = vld [vmem:[%s12457_s1 + $0x134] ss:$8 sps:$4 sm:$0xff]  }
   0x7   :  { %2214 = vmatpush1.bf16.msra.mxu0 %v9196_v6  ;;  %v9214_v18 = vld [vmem:[%s12457_s1 + $0x30] ss:$8 sps:$4 sm:$0xff]   ;;  %v9216_v20 = vld [vmem:[%s12457_s1 + $0x24] ss:$8 sps:$4 sm:$0xff]   ;;  %v9220_v22 = vld [vmem:[%s12457_s1 + $0x20] ss:$8 sps:$4 sm:$0xff]  }
   0x8   :  { %2315 = vmatpush1.bf16.msra.mxu1 %v9197_v7  ;;  %2215 = vmatprep.subr.bf16.mxu0 %v9198_v8  ;;  %v9215_v19 = vld [vmem:[%s12457_s1 + $0x130] ss:$8 sps:$4 sm:$0xff]   ;;  %v9218_v21 = vld [vmem:[%s12457_s1 + $0x124] ss:$8 sps:$4 sm:$0xff]   ;;  %v9221_v23 = vld [vmem:[%s12457_s1 + $0x120] ss:$8 sps:$4 sm:$0xff]  }
   0x9   :  { %2316 = vmatprep.subr.bf16.mxu1 %v9200_v9  ;;  %v9222_v24 = vld [vmem:[%s12457_s1 + $0x14] ss:$8 sps:$4 sm:$0xff]   ;;  %v9226_v26 = vld [vmem:[%s12457_s1 + $0x10] ss:$8 sps:$4 sm:$0xff]   ;;  %v9228_v28 = vld [vmem:[%s12457_s1 + $0x4] ss:$8 sps:$4 sm:$0xff]  }
   0xa   :  { %v9224_v25 = vld [vmem:[%s12457_s1 + $0x114] ss:$8 sps:$4 sm:$0xff]   ;;  %v9227_v27 = vld [vmem:[%s12457_s1 + $0x110] ss:$8 sps:$4 sm:$0xff]   ;;  %v9230_v29 = vld [vmem:[%s12457_s1 + $0x104] ss:$8 sps:$4 sm:$0xff]  }
   0xb   :  { %2216 = vmatpush1.bf16.msra.mxu0 %v9202_v10  ;;  %v9232_v30 = vld [vmem:[%s12457_s1] ss:$8 sps:$4 sm:$0xff]   ;;  %v9234_v32 = vld [vmem:[%s12457_s1 + $0xf4] ss:$8 sps:$4 sm:$0xff]   ;;  %v9238_v34 = vld [vmem:[%s12457_s1 + $0xf0] ss:$8 sps:$4 sm:$0xff]  }
   0xc   :  { %2317 = vmatpush1.bf16.msra.mxu1 %v9203_v11  ;;  %2217 = vmatprep.subr.bf16.mxu0 %v9204_v12  ;;  %v9233_v31 = vld [vmem:[%s12457_s1 + $0x100] ss:$8 sps:$4 sm:$0xff]   ;;  %v9236_v33 = vld [vmem:[%s12457_s1 + $0x1f4] ss:$8 sps:$4 sm:$0xff]   ;;  %v9239_v35 = vld [vmem:[%s12457_s1 + $0x1f0] ss:$8 sps:$4 sm:$0xff]  }
   0xd   :  { %2318 = vmatprep.subr.bf16.mxu1 %v9206_v13  ;;  %v9240_v36 = vld [vmem:[%s12457_s1 + $0xe4] ss:$8 sps:$4 sm:$0xff]   ;;  %v9244_v38 = vld [vmem:[%s12457_s1 + $0xe0] ss:$8 sps:$4 sm:$0xff]   ;;  %v9246_v40 = vld [vmem:[%s12457_s1 + $0xd4] ss:$8 sps:$4 sm:$0xff]  }
   0xe   :  { %v9242_v37 = vld [vmem:[%s12457_s1 + $0x1e4] ss:$8 sps:$4 sm:$0xff]   ;;  %v9245_v39 = vld [vmem:[%s12457_s1 + $0x1e0] ss:$8 sps:$4 sm:$0xff]   ;;  %v9248_v41 = vld [vmem:[%s12457_s1 + $0x1d4] ss:$8 sps:$4 sm:$0xff]  }
   0xf   :  { %2218 = vmatpush1.bf16.msra.mxu0 %v9208_v14  ;;  %v9250_v42 = vld [vmem:[%s12457_s1 + $0xd0] ss:$8 sps:$4 sm:$0xff]   ;;  %v9252_v44 = vld [vmem:[%s12457_s1 + $0xc4] ss:$8 sps:$4 sm:$0xff]   ;;  %v9256_v46 = vld [vmem:[%s12457_s1 + $0xc0] ss:$8 sps:$4 sm:$0xff]  }
  0x10   :  { %2319 = vmatpush1.bf16.msra.mxu1 %v9209_v15  ;;  %2219 = vmatprep.subr.bf16.mxu0 %v9210_v16  ;;  %v9251_v43 = vld [vmem:[%s12457_s1 + $0x1d0] ss:$8 sps:$4 sm:$0xff]   ;;  %v9254_v45 = vld [vmem:[%s12457_s1 + $0x1c4] ss:$8 sps:$4 sm:$0xff]   ;;  %v9257_v47 = vld [vmem:[%s12457_s1 + $0x1c0] ss:$8 sps:$4 sm:$0xff]  }
  0x11   :  { %2320 = vmatprep.subr.bf16.mxu1 %v9212_v17  ;;  %v35_v48 = vld [vmem:[%s12458_s0] sm:$0xff]  ;;  %v36_v50 = vld [vmem:[%s12458_s0 + $0x8] sm:$0xff]  ;;  %v9258_v52 = vld [vmem:[%s12457_s1 + $0xb4] ss:$8 sps:$4 sm:$0xff]  }
  0x12   :  { %v43_v49 = vld [vmem:[%s12458_s0 + $0x40] sm:$0xff]  ;;  %v44_v51 = vld [vmem:[%s12458_s0 + $0x48] sm:$0xff]  ;;  %v9260_v54 = vld [vmem:[%s12457_s1 + $0x1b4] ss:$8 sps:$4 sm:$0xff]  }
  0x13   :  { %2220 = vmatpush1.bf16.msra.mxu0 %v9214_v18  ;;  %v7275_v53 = vcombine.high %v35_v48, %v43_v49  ;;  %v7277_v55 = vcombine.high %v36_v50, %v44_v51  ;;  %v9262_v56 = vld [vmem:[%s12457_s1 + $0xb0] ss:$8 sps:$4 sm:$0xff]   ;;  %v9264_v58 = vld [vmem:[%s12457_s1 + $0xa4] ss:$8 sps:$4 sm:$0xff]   ;;  %v9268_v60 = vld [vmem:[%s12457_s1 + $0xa0] ss:$8 sps:$4 sm:$0xff]   ;;  %v7274_v11 = vcombine.low %v35_v48, %v43_v49  ;;  %v7276_v12 = vcombine.low %v36_v50, %v44_v51 }
  0x14   :  { %2321 = vmatpush1.bf16.msra.mxu1 %v9215_v19  ;;  %2221 = vmatprep.subr.bf16.mxu0 %v9216_v20  ;;  %v9263_v57 = vld [vmem:[%s12457_s1 + $0x1b0] ss:$8 sps:$4 sm:$0xff]   ;;  %v9266_v59 = vld [vmem:[%s12457_s1 + $0x1a4] ss:$8 sps:$4 sm:$0xff]   ;;  %v9269_v61 = vld [vmem:[%s12457_s1 + $0x1a0] ss:$8 sps:$4 sm:$0xff]  }
  0x15   :  { %2322 = vmatprep.subr.bf16.mxu1 %v9218_v21  ;;  %2243 = vmatprep.mubr.bf16.mxu0 %v7275_v53  ;;  %v9270_v62 = vld [vmem:[%s12457_s1 + $0x94] ss:$8 sps:$4 sm:$0xff]   ;;  %v9274_v0 = vld [vmem:[%s12457_s1 + $0x90] ss:$8 sps:$4 sm:$0xff]   ;;  %v9276_v2 = vld [vmem:[%s12457_s1 + $0x84] ss:$8 sps:$4 sm:$0xff]  }
  0x16   :  { %2344 = vmatprep.mubr.bf16.mxu1 %v7277_v55  ;;  %v9272_v63 = vld [vmem:[%s12457_s1 + $0x194] ss:$8 sps:$4 sm:$0xff]   ;;  %v9275_v1 = vld [vmem:[%s12457_s1 + $0x190] ss:$8 sps:$4 sm:$0xff]   ;;  %v9278_v3 = vld [vmem:[%s12457_s1 + $0x184] ss:$8 sps:$4 sm:$0xff]  }
  0x17   :  { %2222 = vmatpush1.bf16.msra.mxu0 %v9220_v22  ;;  %v9280_v4 = vld [vmem:[%s12457_s1 + $0x80] ss:$8 sps:$4 sm:$0xff]   ;;  %v9284_v6 = vld [vmem:[%s12457_s1 + $0x274] ss:$8 sps:$4 sm:$0xff]   ;;  %v9282_v8 = vld [vmem:[%s12457_s1 + $0x270] ss:$8 sps:$4 sm:$0xff]  }
  0x18   :  { %2323 = vmatpush1.bf16.msra.mxu1 %v9221_v23  ;;  %2223 = vmatprep.subr.bf16.mxu0 %v9222_v24  ;;  %v9281_v5 = vld [vmem:[%s12457_s1 + $0x180] ss:$8 sps:$4 sm:$0xff]   ;;  %v9287_v7 = vld [vmem:[%s12457_s1 + $0x374] ss:$8 sps:$4 sm:$0xff]   ;;  %v9285_v15 = vld [vmem:[%s12457_s1 + $0x370] ss:$8 sps:$4 sm:$0xff]  }
  0x19   :  { %2324 = vmatprep.subr.bf16.mxu1 %v9224_v25  ;;  %v51_v9 = vld [vmem:[%s12458_s0 + $0x80] sm:$0xff]  ;;  %v52_v13 = vld [vmem:[%s12458_s0 + $0x88] sm:$0xff]  ;;  %v9296_v22 = vld [vmem:[%s12457_s1 + $0x254] ss:$8 sps:$4 sm:$0xff]  }
  0x1a   :  { %v59_v10 = vld [vmem:[%s12458_s0 + $0xc0] sm:$0xff]  ;;  %v60_v14 = vld [vmem:[%s12458_s0 + $0xc8] sm:$0xff]  ;;  %v9299_v23 = vld [vmem:[%s12457_s1 + $0x354] ss:$8 sps:$4 sm:$0xff]  }
  0x1b   :  { %2224 = vmatpush1.bf16.msra.mxu0 %v9226_v26  ;;  %v9290_v16 = vld [vmem:[%s12457_s1 + $0x264] ss:$8 sps:$4 sm:$0xff]   ;;  %v7291_v18 = vcombine.high %v51_v9, %v59_v10  ;;  %v7293_v19 = vcombine.high %v52_v13, %v60_v14  ;;  %v9288_v20 = vld [vmem:[%s12457_s1 + $0x260] ss:$8 sps:$4 sm:$0xff]   ;;  %v7290_v26 = vcombine.low %v51_v9, %v59_v10  ;;  %v9323_v55 = vld [vmem:[%s12457_s1 + $0x314] ss:$8 sps:$4 sm:$0xff]  }
  0x1c   :  { %2325 = vmatpush1.bf16.msra.mxu1 %v9227_v27  ;;  %2225 = vmatprep.subr.bf16.mxu0 %v9228_v28  ;;  %v9293_v17 = vld [vmem:[%s12457_s1 + $0x364] ss:$8 sps:$4 sm:$0xff]   ;;  %v9291_v21 = vld [vmem:[%s12457_s1 + $0x360] ss:$8 sps:$4 sm:$0xff]   ;;  %v7292_v27 = vcombine.low %v52_v13, %v60_v14  ;;  %v9330_v14 = vld [vmem:[%s12457_s1 + $0x2f0] ss:$8 sps:$4 sm:$0xff]  }
  0x1d   :  { %2326 = vmatprep.subr.bf16.mxu1 %v9230_v29  ;;  %v67_v24 = vld [vmem:[%s12458_s0 + $0x100] sm:$0xff]  ;;  %v68_v28 = vld [vmem:[%s12458_s0 + $0x108] sm:$0xff] }
  0x1e   :  { %v75_v25 = vld [vmem:[%s12458_s0 + $0x140] sm:$0xff]  ;;  %v76_v29 = vld [vmem:[%s12458_s0 + $0x148] sm:$0xff] }
  0x1f   :  { %2226 = vmatpush1.bf16.msra.mxu0 %v9232_v30  ;;  %v9294_v30 = vld [vmem:[%s12457_s1 + $0x250] ss:$8 sps:$4 sm:$0xff]   ;;  %v9314_v48 = vld [vmem:[%s12457_s1 + $0x224] ss:$8 sps:$4 sm:$0xff]   ;;  %v9315_v53 = vld [vmem:[%s12457_s1 + $0x320] ss:$8 sps:$4 sm:$0xff]  }
  0x20   :  { %2327 = vmatpush1.bf16.msra.mxu1 %v9233_v31  ;;  %2227 = vmatprep.subr.bf16.mxu0 %v9234_v32  ;;  %v9297_v31 = vld [vmem:[%s12457_s1 + $0x350] ss:$8 sps:$4 sm:$0xff]   ;;  %v9302_v32 = vld [vmem:[%s12457_s1 + $0x244] ss:$8 sps:$4 sm:$0xff]  }
  0x21   :  { %2328 = vmatprep.subr.bf16.mxu1 %v9236_v33  ;;  %v9305_v33 = vld [vmem:[%s12457_s1 + $0x344] ss:$8 sps:$4 sm:$0xff]  }
  0x22   :  { %v9317_v49 = vld [vmem:[%s12457_s1 + $0x324] ss:$8 sps:$4 sm:$0xff]  }
  0x23   :  { %2228 = vmatpush2.bf16.msra.mxu0 %v9238_v34  ;;  %v7307_v34 = vcombine.high %v67_v24, %v75_v25  ;;  %v123_v9 = vld [vmem:[%s12458_s0 + $0x2c0] sm:$0xff]  ;;  %v116_v10 = vld [vmem:[%s12458_s0 + $0x288] sm:$0xff] }
  0x24   :  { %2329 = vmatpush2.bf16.msra.mxu1 %v9239_v35  ;;  %2229 = vmatprep.subr.bf16.mxu0 %v9240_v36  ;;  %v7309_v35 = vcombine.high %v68_v28, %v76_v29  ;;  %v9300_v36 = vld [vmem:[%s12457_s1 + $0x240] ss:$8 sps:$4 sm:$0xff]  }
  0x25   :  { %2330 = vmatprep.subr.bf16.mxu1 %v9242_v37  ;;  %v9303_v37 = vld [vmem:[%s12457_s1 + $0x340] ss:$8 sps:$4 sm:$0xff]  }
  0x26   :  { %v124_v13 = vld [vmem:[%s12458_s0 + $0x2c8] sm:$0xff] }
  0x27   :  { %2230 = vmatpush2.bf16.msra.mxu0 %v9244_v38  ;;  %v9308_v38 = vld [vmem:[%s12457_s1 + $0x234] ss:$8 sps:$4 sm:$0xff]  }
  0x28   :  { %2331 = vmatpush2.bf16.msra.mxu1 %v9245_v39  ;;  %2231 = vmatprep.subr.bf16.mxu0 %v9246_v40  ;;  %v9311_v39 = vld [vmem:[%s12457_s1 + $0x334] ss:$8 sps:$4 sm:$0xff]   ;;  %v9306_v40 = vld [vmem:[%s12457_s1 + $0x230] ss:$8 sps:$4 sm:$0xff]  }
  0x29   :  { %2332 = vmatprep.subr.bf16.mxu1 %v9248_v41  ;;  %v9309_v41 = vld [vmem:[%s12457_s1 + $0x330] ss:$8 sps:$4 sm:$0xff]  }
  0x2b   :  { %2232 = vmatpush2.bf16.msra.mxu0 %v9250_v42  ;;  %v83_v42 = vld [vmem:[%s12458_s0 + $0x180] sm:$0xff] }
  0x2c   :  { %2333 = vmatpush2.bf16.msra.mxu1 %v9251_v43  ;;  %2233 = vmatprep.subr.bf16.mxu0 %v9252_v44  ;;  %v7306_v43 = vcombine.low %v67_v24, %v75_v25  ;;  %v7308_v44 = vcombine.low %v68_v28, %v76_v29  ;;  %v7356_v25 = vcombine.low %v116_v10, %v124_v13  ;;  %v9342_v28 = vld [vmem:[%s12457_s1 + $0x2d0] ss:$8 sps:$4 sm:$0xff]  }
  0x2d   :  { %2334 = vmatprep.subr.bf16.mxu1 %v9254_v45  ;;  %v91_v45 = vld [vmem:[%s12458_s0 + $0x1c0] sm:$0xff]  ;;  %v9345_v29 = vld [vmem:[%s12457_s1 + $0x3d0] ss:$8 sps:$4 sm:$0xff]  }
  0x2e   :  { %v7323_v50 = vcombine.high %v83_v42, %v91_v45 }
  0x2f   :  { %2234 = vmatpush2.bf16.msra.mxu0 %v9256_v46  ;;  %v84_v46 = vld [vmem:[%s12458_s0 + $0x188] sm:$0xff] }
  0x30   :  { %2335 = vmatpush2.bf16.msra.mxu1 %v9257_v47  ;;  %2235 = vmatprep.subr.bf16.mxu0 %v9258_v52  ;;  %v92_v47 = vld [vmem:[%s12458_s0 + $0x1c8] sm:$0xff] }
  0x31   :  { %2336 = vmatprep.subr.bf16.mxu1 %v9260_v54  ;;  %v7325_v51 = vcombine.high %v84_v46, %v92_v47  ;;  %v9312_v52 = vld [vmem:[%s12457_s1 + $0x220] ss:$8 sps:$4 sm:$0xff]   ;;  %v9320_v54 = vld [vmem:[%s12457_s1 + $0x214] ss:$8 sps:$4 sm:$0xff]  }
  0x33   :  { %2236 = vmatpush2.bf16.msra.mxu0 %v9262_v56  ;;  %v99_v56 = vld [vmem:[%s12458_s0 + $0x200] sm:$0xff] }
  0x34   :  { %2337 = vmatpush2.bf16.msra.mxu1 %v9263_v57  ;;  %2237 = vmatprep.subr.bf16.mxu0 %v9264_v58  ;;  %v107_v57 = vld [vmem:[%s12458_s0 + $0x240] sm:$0xff]  ;;  %v100_v58 = vld [vmem:[%s12458_s0 + $0x208] sm:$0xff] }
  0x35   :  { %2338 = vmatprep.subr.bf16.mxu1 %v9266_v59  ;;  %v7322_v59 = vcombine.low %v83_v42, %v91_v45  ;;  %v9357_v45 = vld [vmem:[%s12457_s1 + $0x3b0] ss:$8 sps:$4 sm:$0xff]  }
  0x37   :  { %2238 = vmatpush2.bf16.msra.mxu0 %v9268_v60  ;;  %v7324_v60 = vcombine.low %v84_v46, %v92_v47  ;;  %v9365_v46 = vld [vmem:[%s12457_s1 + $0x2a4] ss:$8 sps:$4 sm:$0xff]  }
  0x38   :  { %2339 = vmatpush2.bf16.msra.mxu1 %v9269_v61  ;;  %2239 = vmatprep.subr.bf16.mxu0 %v9270_v62  ;;  %v108_v61 = vld [vmem:[%s12458_s0 + $0x248] sm:$0xff]  ;;  %v9318_v62 = vld [vmem:[%s12457_s1 + $0x210] ss:$8 sps:$4 sm:$0xff]  }
  0x39   :  { %2340 = vmatprep.subr.bf16.mxu1 %v9272_v63  ;;  %v9321_v63 = vld [vmem:[%s12457_s1 + $0x310] ss:$8 sps:$4 sm:$0xff]   ;;  %v9368_v47 = vld [vmem:[%s12457_s1 + $0x3a4] ss:$8 sps:$4 sm:$0xff]  }
  0x3b   :  { %2240 = vmatpush2.bf16.msra.mxu0 %v9274_v0  ;;  %v9326_v0 = vld [vmem:[%s12457_s1 + $0x204] ss:$8 sps:$4 sm:$0xff]  }
  0x3c   :  { %2341 = vmatpush2.bf16.msra.mxu1 %v9275_v1  ;;  %2241 = vmatprep.subr.bf16.mxu0 %v9276_v2  ;;  %v9329_v1 = vld [vmem:[%s12457_s1 + $0x304] ss:$8 sps:$4 sm:$0xff]   ;;  %v7339_v2 = vcombine.high %v99_v56, %v107_v57 }
  0x3d   :  { %2342 = vmatprep.subr.bf16.mxu1 %v9278_v3  ;;  %v7341_v3 = vcombine.high %v100_v58, %v108_v61 }
  0x3f   :  { %2242 = vmatpush2.bf16.msra.mxu0 %v9280_v4  ;;  %v9324_v4 = vld [vmem:[%s12457_s1 + $0x200] ss:$8 sps:$4 sm:$0xff]  }
  0x40   :  { %2343 = vmatpush2.bf16.msra.mxu1 %v9281_v5  ;;  %2413 = vmatprep.subr.bf16.mxu0 %v9284_v6  ;;  %v9327_v5 = vld [vmem:[%s12457_s1 + $0x300] ss:$8 sps:$4 sm:$0xff]   ;;  %v9332_v6 = vld [vmem:[%s12457_s1 + $0x2f4] ss:$8 sps:$4 sm:$0xff]  }
  0x41   :  { %2514 = vmatprep.subr.bf16.mxu1 %v9287_v7  ;;  %v9335_v7 = vld [vmem:[%s12457_s1 + $0x3f4] ss:$8 sps:$4 sm:$0xff]  }
  0x42   :  { %2244 = vmatmul.mubr.bf16.vlgmr.msra.gmra.mxu0 %v7274_v11  ;;  %v7338_v11 = vcombine.low %v99_v56, %v107_v57  ;;  %v9378_v56 = vld [vmem:[%s12457_s1 + $0x284] ss:$8 sps:$4 sm:$0xff]  }
  0x43   :  { %2345 = vmatmul.mubr.bf16.vlgmr.msra.gmra.mxu1 %v7276_v12  ;;  %2414 = vmatpush1.bf16.msra.mxu0 %v9282_v8  ;;  %v115_v8 = vld [vmem:[%s12458_s0 + $0x280] sm:$0xff]  ;;  %v7340_v12 = vcombine.low %v100_v58, %v108_v61  ;;  %v9387_v61 = vld [vmem:[%s12457_s1 + $0x574] ss:$8 sps:$4 sm:$0xff]  }
  0x44   :  { %2515 = vmatpush1.bf16.msra.mxu1 %v9285_v15  ;;  %2415 = vmatprep.subr.bf16.mxu0 %v9290_v16  ;;  %v9333_v15 = vld [vmem:[%s12457_s1 + $0x3f0] ss:$8 sps:$4 sm:$0xff]   ;;  %v9338_v16 = vld [vmem:[%s12457_s1 + $0x2e4] ss:$8 sps:$4 sm:$0xff]   ;;  %v7354_v24 = vcombine.low %v115_v8, %v123_v9  ;;  %v9376_v58 = vld [vmem:[%s12457_s1 + $0x280] ss:$8 sps:$4 sm:$0xff]  }
  0x45   :  { %2516 = vmatprep.subr.bf16.mxu1 %v9293_v17  ;;  %2253 = vmatprep.mubr.bf16.mxu0 %v7291_v18  ;;  %v9341_v17 = vld [vmem:[%s12457_s1 + $0x3e4] ss:$8 sps:$4 sm:$0xff]   ;;  %v7355_v18 = vcombine.high %v115_v8, %v123_v9 }
  0x46   :  { %2354 = vmatprep.mubr.bf16.mxu1 %v7293_v19  ;;  %v7357_v19 = vcombine.high %v116_v10, %v124_v13  ;;  %v9381_v57 = vld [vmem:[%s12457_s1 + $0x384] ss:$8 sps:$4 sm:$0xff]   ;;  %v9388_v10 = vld [vmem:[%s12457_s1 + $0x460] ss:$8 sps:$4 sm:$0xff]   ;;  %v9399_v13 = vld [vmem:[%s12457_s1 + $0x554] ss:$8 sps:$4 sm:$0xff]  }
  0x47   :  { %2416 = vmatpush1.bf16.msra.mxu0 %v9288_v20  ;;  %v9336_v20 = vld [vmem:[%s12457_s1 + $0x2e0] ss:$8 sps:$4 sm:$0xff]  }
  0x48   :  { %2517 = vmatpush1.bf16.msra.mxu1 %v9291_v21  ;;  %2417 = vmatprep.subr.bf16.mxu0 %v9296_v22  ;;  %v9339_v21 = vld [vmem:[%s12457_s1 + $0x3e0] ss:$8 sps:$4 sm:$0xff]   ;;  %v9344_v22 = vld [vmem:[%s12457_s1 + $0x2d4] ss:$8 sps:$4 sm:$0xff]  }
  0x49   :  { %2518 = vmatprep.subr.bf16.mxu1 %v9299_v23  ;;  %v9347_v23 = vld [vmem:[%s12457_s1 + $0x3d4] ss:$8 sps:$4 sm:$0xff]  }
  0x4a   :  { %2254 = vmatmul.mubr.bf16.gmra.mxu0 %v7290_v26  ;;  %v131_v26 = vld [vmem:[%s12458_s0 + $0x300] sm:$0x11] }
  0x4b   :  { %2355 = vmatmul.mubr.bf16.gmra.mxu1 %v7292_v27  ;;  %2418 = vmatpush1.bf16.msra.mxu0 %v9294_v30  ;;  %v132_v27 = vld [vmem:[%s12458_s0 + $0x308] sm:$0x11] }
  0x4c   :  { %2519 = vmatpush1.bf16.msra.mxu1 %v9297_v31  ;;  %2419 = vmatprep.subr.bf16.mxu0 %v9302_v32  ;;  %v9350_v30 = vld [vmem:[%s12457_s1 + $0x2c4] ss:$8 sps:$4 sm:$0xff]   ;;  %v7371_v32 = vcombine.high %v131_v26, %v131_v26  ;;  %v7372_v42 = vcombine.low %v132_v27, %v132_v27 }
  0x4d   :  { %2520 = vmatprep.subr.bf16.mxu1 %v9305_v33  ;;  %2263 = vmatprep.mubr.bf16.mxu0 %v7307_v34  ;;  %v9353_v31 = vld [vmem:[%s12457_s1 + $0x3c4] ss:$8 sps:$4 sm:$0xff]   ;;  %v7373_v33 = vcombine.high %v132_v27, %v132_v27  ;;  %v9348_v34 = vld [vmem:[%s12457_s1 + $0x2c0] ss:$8 sps:$4 sm:$0xff]  }
  0x4e   :  { %2364 = vmatprep.mubr.bf16.mxu1 %v7309_v35  ;;  %v9351_v35 = vld [vmem:[%s12457_s1 + $0x3c0] ss:$8 sps:$4 sm:$0xff]  }
  0x4f   :  { %2420 = vmatpush1.bf16.msra.mxu0 %v9300_v36  ;;  %v9356_v36 = vld [vmem:[%s12457_s1 + $0x2b4] ss:$8 sps:$4 sm:$0xff]   ;;  %v9403_v27 = vld [vmem:[%s12457_s1 + $0x540] ss:$8 sps:$4 sm:$0xff]  }
  0x50   :  { %2521 = vmatpush1.bf16.msra.mxu1 %v9303_v37  ;;  %2421 = vmatprep.subr.bf16.mxu0 %v9308_v38  ;;  %v9359_v37 = vld [vmem:[%s12457_s1 + $0x3b4] ss:$8 sps:$4 sm:$0xff]  }
  0x51   :  { %2522 = vmatprep.subr.bf16.mxu1 %v9311_v39  ;;  %v37_v38 = vld [vmem:[%s12458_s0 + $0x10] sm:$0xff] }
  0x52   :  { %2264 = vmatmul.mubr.bf16.gmra.mxu0 %v7306_v43  ;;  %v45_v39 = vld [vmem:[%s12458_s0 + $0x50] sm:$0xff]  ;;  %v46_v43 = vld [vmem:[%s12458_s0 + $0x58] sm:$0xff] }
  0x53   :  { %2365 = vmatmul.mubr.bf16.gmra.mxu1 %v7308_v44  ;;  %2422 = vmatpush1.bf16.msra.mxu0 %v9306_v40  ;;  %v38_v40 = vld [vmem:[%s12458_s0 + $0x18] sm:$0xff] }
  0x54   :  { %2523 = vmatpush1.bf16.msra.mxu1 %v9309_v41  ;;  %2423 = vmatprep.subr.bf16.mxu0 %v9314_v48  ;;  %v7370_v41 = vcombine.low %v131_v26, %v131_v26  ;;  %v9354_v44 = vld [vmem:[%s12457_s1 + $0x2b0] ss:$8 sps:$4 sm:$0xff]   ;;  %v7279_v48 = vcombine.high %v37_v38, %v45_v39  ;;  %v9400_v26 = vld [vmem:[%s12457_s1 + $0x440] ss:$8 sps:$4 sm:$0xff]  }
  0x55   :  { %2524 = vmatprep.subr.bf16.mxu1 %v9317_v49  ;;  %2273 = vmatprep.mubr.bf16.mxu0 %v7323_v50  ;;  %v7281_v49 = vcombine.high %v38_v40, %v46_v43  ;;  %v9363_v50 = vld [vmem:[%s12457_s1 + $0x2a0] ss:$8 sps:$4 sm:$0xff]  }
  0x56   :  { %2374 = vmatprep.mubr.bf16.mxu1 %v7325_v51  ;;  %v9366_v51 = vld [vmem:[%s12457_s1 + $0x3a0] ss:$8 sps:$4 sm:$0xff]  }
  0x57   :  { %2424 = vmatpush1.bf16.msra.mxu0 %v9312_v52  ;;  %v9372_v52 = vld [vmem:[%s12457_s1 + $0x294] ss:$8 sps:$4 sm:$0xff]  }
  0x58   :  { %2525 = vmatpush1.bf16.msra.mxu1 %v9315_v53  ;;  %2425 = vmatprep.subr.bf16.mxu0 %v9320_v54  ;;  %v9375_v53 = vld [vmem:[%s12457_s1 + $0x394] ss:$8 sps:$4 sm:$0xff]   ;;  %v9370_v54 = vld [vmem:[%s12457_s1 + $0x290] ss:$8 sps:$4 sm:$0xff]  }
  0x59   :  { %2526 = vmatprep.subr.bf16.mxu1 %v9323_v55  ;;  %v9373_v55 = vld [vmem:[%s12457_s1 + $0x390] ss:$8 sps:$4 sm:$0xff]  }
  0x5a   :  { %2274 = vmatmul.mubr.bf16.gmra.mxu0 %v7322_v59  ;;  %v9379_v59 = vld [vmem:[%s12457_s1 + $0x380] ss:$8 sps:$4 sm:$0xff]  }
  0x5b   :  { %2375 = vmatmul.mubr.bf16.gmra.mxu1 %v7324_v60  ;;  %2426 = vmatpush1.bf16.msra.mxu0 %v9318_v62  ;;  %v9384_v60 = vld [vmem:[%s12457_s1 + $0x474] ss:$8 sps:$4 sm:$0xff]   ;;  %v9382_v62 = vld [vmem:[%s12457_s1 + $0x470] ss:$8 sps:$4 sm:$0xff]  }
  0x5c   :  { %2527 = vmatpush1.bf16.msra.mxu1 %v9321_v63  ;;  %2427 = vmatprep.subr.bf16.mxu0 %v9326_v0  ;;  %v9385_v63 = vld [vmem:[%s12457_s1 + $0x570] ss:$8 sps:$4 sm:$0xff]  }
  0x5d   :  { %2528 = vmatprep.subr.bf16.mxu1 %v9329_v1  ;;  %2283 = vmatprep.mubr.bf16.mxu0 %v7339_v2  ;;  %v53_v0 = vld [vmem:[%s12458_s0 + $0x90] sm:$0xff]  ;;  %v7278_v1 = vcombine.low %v37_v38, %v45_v39  ;;  %v7280_v2 = vcombine.low %v38_v40, %v46_v43  ;;  %v9414_v38 = vld [vmem:[%s12457_s1 + $0x424] ss:$8 sps:$4 sm:$0xff]   ;;  %v9415_v43 = vld [vmem:[%s12457_s1 + $0x520] ss:$8 sps:$4 sm:$0xff]  }
  0x5e   :  { %2384 = vmatprep.mubr.bf16.mxu1 %v7341_v3  ;;  %v61_v3 = vld [vmem:[%s12458_s0 + $0xd0] sm:$0xff]  ;;  %v9417_v39 = vld [vmem:[%s12457_s1 + $0x524] ss:$8 sps:$4 sm:$0xff]  }
  0x5f   :  { %2428 = vmatpush1.bf16.msra.mxu0 %v9324_v4  ;;  %v54_v4 = vld [vmem:[%s12458_s0 + $0x98] sm:$0xff]  ;;  %v7295_v8 = vcombine.high %v53_v0, %v61_v3 }
  0x60   :  { %2529 = vmatpush1.bf16.msra.mxu1 %v9327_v5  ;;  %2429 = vmatprep.subr.bf16.mxu0 %v9332_v6  ;;  %v62_v5 = vld [vmem:[%s12458_s0 + $0xd8] sm:$0xff]  ;;  %v9390_v6 = vld [vmem:[%s12457_s1 + $0x464] ss:$8 sps:$4 sm:$0xff]  }
  0x61   :  { %2530 = vmatprep.subr.bf16.mxu1 %v9335_v7  ;;  %v9393_v7 = vld [vmem:[%s12457_s1 + $0x564] ss:$8 sps:$4 sm:$0xff]   ;;  %v7297_v9 = vcombine.high %v54_v4, %v62_v5 }
  0x62   :  { %2284 = vmatmul.mubr.bf16.gmra.mxu0 %v7338_v11  ;;  %v9391_v11 = vld [vmem:[%s12457_s1 + $0x560] ss:$8 sps:$4 sm:$0xff]  }
  0x63   :  { %2385 = vmatmul.mubr.bf16.gmra.mxu1 %v7340_v12  ;;  %2430 = vmatpush2.bf16.msra.mxu0 %v9330_v14  ;;  %v9396_v12 = vld [vmem:[%s12457_s1 + $0x454] ss:$8 sps:$4 sm:$0xff]  }
  0x64   :  { %2531 = vmatpush2.bf16.msra.mxu1 %v9333_v15  ;;  %2431 = vmatprep.subr.bf16.mxu0 %v9338_v16  ;;  %v69_v14 = vld [vmem:[%s12458_s0 + $0x110] sm:$0xff] }
  0x65   :  { %2532 = vmatprep.subr.bf16.mxu1 %v9341_v17  ;;  %2293 = vmatprep.mubr.bf16.mxu0 %v7355_v18  ;;  %v9394_v15 = vld [vmem:[%s12457_s1 + $0x450] ss:$8 sps:$4 sm:$0xff]   ;;  %v7294_v17 = vcombine.low %v53_v0, %v61_v3  ;;  %v7296_v18 = vcombine.low %v54_v4, %v62_v5 }
  0x66   :  { %2394 = vmatprep.mubr.bf16.mxu1 %v7357_v19  ;;  %v77_v16 = vld [vmem:[%s12458_s0 + $0x150] sm:$0xff]  ;;  %v70_v19 = vld [vmem:[%s12458_s0 + $0x118] sm:$0xff] }
  0x67   :  { %2432 = vmatpush2.bf16.msra.mxu0 %v9336_v20  ;;  %v78_v20 = vld [vmem:[%s12458_s0 + $0x158] sm:$0xff] }
  0x68   :  { %2533 = vmatpush2.bf16.msra.mxu1 %v9339_v21  ;;  %2433 = vmatprep.subr.bf16.mxu0 %v9344_v22  ;;  %v9397_v21 = vld [vmem:[%s12457_s1 + $0x550] ss:$8 sps:$4 sm:$0xff]   ;;  %v9402_v22 = vld [vmem:[%s12457_s1 + $0x444] ss:$8 sps:$4 sm:$0xff]  }
  0x69   :  { %2534 = vmatprep.subr.bf16.mxu1 %v9347_v23  ;;  %v9405_v23 = vld [vmem:[%s12457_s1 + $0x544] ss:$8 sps:$4 sm:$0xff]   ;;  %v118_v0 = vld [vmem:[%s12458_s0 + $0x298] sm:$0xff] }
  0x6a   :  { %2294 = vmatmul.mubr.bf16.gmra.mxu0 %v7354_v24  ;;  %v7311_v24 = vcombine.high %v69_v14, %v77_v16  ;;  %v126_v3 = vld [vmem:[%s12458_s0 + $0x2d8] sm:$0xff] }
  0x6b   :  { %2395 = vmatmul.mubr.bf16.gmra.mxu1 %v7356_v25  ;;  %2434 = vmatpush2.bf16.msra.mxu0 %v9342_v28  ;;  %v7313_v25 = vcombine.high %v70_v19, %v78_v20  ;;  %v9408_v28 = vld [vmem:[%s12457_s1 + $0x434] ss:$8 sps:$4 sm:$0xff]   ;;  %v9430_v4 = vld [vmem:[%s12457_s1 + $0x4f0] ss:$8 sps:$4 sm:$0xff]  }
  0x6c   :  { %2535 = vmatpush2.bf16.msra.mxu1 %v9345_v29  ;;  %2435 = vmatprep.subr.bf16.mxu0 %v9350_v30  ;;  %v9411_v29 = vld [vmem:[%s12457_s1 + $0x534] ss:$8 sps:$4 sm:$0xff]   ;;  %v9406_v30 = vld [vmem:[%s12457_s1 + $0x430] ss:$8 sps:$4 sm:$0xff]  }
  0x6d   :  { %2536 = vmatprep.subr.bf16.mxu1 %v9353_v31  ;;  %2303 = vmatprep.mubr.bf16.mxu0 %v7371_v32  ;;  %v85_v31 = vld [vmem:[%s12458_s0 + $0x190] sm:$0xff] }
  0x6e   :  { %2404 = vmatprep.mubr.bf16.mxu1 %v7373_v33  ;;  %v93_v32 = vld [vmem:[%s12458_s0 + $0x1d0] sm:$0xff]  ;;  %v7310_v33 = vcombine.low %v69_v14, %v77_v16  ;;  %v7360_v16 = vcombine.low %v118_v0, %v126_v3 }
  0x6f   :  { %2436 = vmatpush2.bf16.msra.mxu0 %v9348_v34  ;;  %v7312_v34 = vcombine.low %v70_v19, %v78_v20  ;;  %v7327_v40 = vcombine.high %v85_v31, %v93_v32  ;;  %v9433_v5 = vld [vmem:[%s12457_s1 + $0x5f0] ss:$8 sps:$4 sm:$0xff]   ;;  %v9450_v20 = vld [vmem:[%s12457_s1 + $0x4c4] ss:$8 sps:$4 sm:$0xff]  }
  0x70   :  { %2537 = vmatpush2.bf16.msra.mxu1 %v9351_v35  ;;  %2437 = vmatprep.subr.bf16.mxu0 %v9356_v36  ;;  %v86_v35 = vld [vmem:[%s12458_s0 + $0x198] sm:$0xff]  ;;  %v133_v14 = vld [vmem:[%s12458_s0 + $0x310] sm:$0x11] }
  0x71   :  { %2538 = vmatprep.subr.bf16.mxu1 %v9359_v37  ;;  %v94_v36 = vld [vmem:[%s12458_s0 + $0x1d8] sm:$0xff] }
  0x72   :  { %2304 = vmatmul.mubr.bf16.gmra.mxu0 %v7370_v41  ;;  %v9409_v37 = vld [vmem:[%s12457_s1 + $0x530] ss:$8 sps:$4 sm:$0xff]   ;;  %v7329_v41 = vcombine.high %v86_v35, %v94_v36 }
  0x73   :  { %2405 = vmatmul.mubr.bf16.gmra.mxu1 %v7372_v42  ;;  %2438 = vmatpush2.bf16.msra.mxu0 %v9354_v44  ;;  %v9412_v42 = vld [vmem:[%s12457_s1 + $0x420] ss:$8 sps:$4 sm:$0xff]   ;;  %v9420_v44 = vld [vmem:[%s12457_s1 + $0x414] ss:$8 sps:$4 sm:$0xff]   ;;  %v9445_v19 = vld [vmem:[%s12457_s1 + $0x5d0] ss:$8 sps:$4 sm:$0xff]  }
  0x74   :  { %2539 = vmatpush2.bf16.msra.mxu1 %v9357_v45  ;;  %2439 = vmatprep.subr.bf16.mxu0 %v9365_v46  ;;  %v9423_v45 = vld [vmem:[%s12457_s1 + $0x514] ss:$8 sps:$4 sm:$0xff]  }
  0x75   :  { %2540 = vmatprep.subr.bf16.mxu1 %v9368_v47  ;;  %2445 = vmatprep.mubr.bf16.mxu0 %v7279_v48  ;;  %v101_v46 = vld [vmem:[%s12458_s0 + $0x210] sm:$0xff]  ;;  %v7326_v48 = vcombine.low %v85_v31, %v93_v32  ;;  %v7374_v31 = vcombine.low %v133_v14, %v133_v14 }
  0x76   :  { %2546 = vmatprep.mubr.bf16.mxu1 %v7281_v49  ;;  %v109_v47 = vld [vmem:[%s12458_s0 + $0x250] sm:$0xff]  ;;  %v7328_v49 = vcombine.low %v86_v35, %v94_v36  ;;  %v48_v35 = vld [vmem:[%s12458_s0 + $0x68] sm:$0xff] }
  0x77   :  { %2440 = vmatpush2.bf16.msra.mxu0 %v9363_v50  ;;  %v102_v50 = vld [vmem:[%s12458_s0 + $0x218] sm:$0xff]  ;;  %v9466_v36 = vld [vmem:[%s12457_s1 + $0x4a4] ss:$8 sps:$4 sm:$0xff]  }
  0x78   :  { %2541 = vmatpush2.bf16.msra.mxu1 %v9366_v51  ;;  %2441 = vmatprep.subr.bf16.mxu0 %v9372_v52  ;;  %v110_v51 = vld [vmem:[%s12458_s0 + $0x258] sm:$0xff] }
  0x79   :  { %2542 = vmatprep.subr.bf16.mxu1 %v9375_v53  ;;  %v9418_v52 = vld [vmem:[%s12457_s1 + $0x410] ss:$8 sps:$4 sm:$0xff]  }
  0x7a   :  { %v9421_v53 = vld [vmem:[%s12457_s1 + $0x510] ss:$8 sps:$4 sm:$0xff]  }
  0x7b   :  { %2442 = vmatpush2.bf16.msra.mxu0 %v9370_v54  ;;  %v9426_v54 = vld [vmem:[%s12457_s1 + $0x404] ss:$8 sps:$4 sm:$0xff]  }
  0x7c   :  { %2543 = vmatpush2.bf16.msra.mxu1 %v9373_v55  ;;  %2443 = vmatprep.subr.bf16.mxu0 %v9378_v56  ;;  %v9429_v55 = vld [vmem:[%s12457_s1 + $0x504] ss:$8 sps:$4 sm:$0xff]   ;;  %v7343_v56 = vcombine.high %v101_v46, %v109_v47 }
  0x7d   :  { %2544 = vmatprep.subr.bf16.mxu1 %v9381_v57  ;;  %v7345_v57 = vcombine.high %v102_v50, %v110_v51 }
  0x7f   :  { %2444 = vmatpush2.bf16.msra.mxu0 %v9376_v58  ;;  %v9424_v58 = vld [vmem:[%s12457_s1 + $0x400] ss:$8 sps:$4 sm:$0xff]  }
  0x80   :  { %2545 = vmatpush2.bf16.msra.mxu1 %v9379_v59  ;;  %2615 = vmatprep.subr.bf16.mxu0 %v9384_v60  ;;  %v9427_v59 = vld [vmem:[%s12457_s1 + $0x500] ss:$8 sps:$4 sm:$0xff]   ;;  %v9432_v60 = vld [vmem:[%s12457_s1 + $0x4f4] ss:$8 sps:$4 sm:$0xff]  }
  0x81   :  { %2716 = vmatprep.subr.bf16.mxu1 %v9387_v61  ;;  %v9435_v61 = vld [vmem:[%s12457_s1 + $0x5f4] ss:$8 sps:$4 sm:$0xff]  }
  0x82   :  { %2446 = vmatmul.mubr.bf16.vlgmr.msra.gmra.mxu0 %v7278_v1  ;;  %v7342_v1 = vcombine.low %v101_v46, %v109_v47  ;;  %v9478_v46 = vld [vmem:[%s12457_s1 + $0x484] ss:$8 sps:$4 sm:$0xff]  }
  0x83   :  { %2547 = vmatmul.mubr.bf16.vlgmr.msra.gmra.mxu1 %v7280_v2  ;;  %2616 = vmatpush1.bf16.msra.mxu0 %v9382_v62  ;;  %v117_v62 = vld [vmem:[%s12458_s0 + $0x290] sm:$0xff]  ;;  %v7344_v2 = vcombine.low %v102_v50, %v110_v51  ;;  %v9481_v47 = vld [vmem:[%s12457_s1 + $0x584] ss:$8 sps:$4 sm:$0xff]  }
  0x84   :  { %2717 = vmatpush1.bf16.msra.mxu1 %v9385_v63  ;;  %2617 = vmatprep.subr.bf16.mxu0 %v9390_v6  ;;  %v125_v63 = vld [vmem:[%s12458_s0 + $0x2d0] sm:$0xff]  ;;  %v9438_v6 = vld [vmem:[%s12457_s1 + $0x4e4] ss:$8 sps:$4 sm:$0xff]  }
  0x85   :  { %2718 = vmatprep.subr.bf16.mxu1 %v9393_v7  ;;  %2455 = vmatprep.mubr.bf16.mxu0 %v7295_v8  ;;  %v9441_v7 = vld [vmem:[%s12457_s1 + $0x5e4] ss:$8 sps:$4 sm:$0xff]   ;;  %v7359_v8 = vcombine.high %v117_v62, %v125_v63  ;;  %v9484_v50 = vld [vmem:[%s12457_s1 + $0x674] ss:$8 sps:$4 sm:$0xff]  }
  0x86   :  { %2556 = vmatprep.mubr.bf16.mxu1 %v7297_v9  ;;  %v7361_v9 = vcombine.high %v118_v0, %v126_v3  ;;  %v9487_v51 = vld [vmem:[%s12457_s1 + $0x774] ss:$8 sps:$4 sm:$0xff]   ;;  %v9488_v0 = vld [vmem:[%s12457_s1 + $0x660] ss:$8 sps:$4 sm:$0xff]  }
  0x87   :  { %2618 = vmatpush1.bf16.msra.mxu0 %v9388_v10  ;;  %v9436_v10 = vld [vmem:[%s12457_s1 + $0x4e0] ss:$8 sps:$4 sm:$0xff]   ;;  %v9499_v3 = vld [vmem:[%s12457_s1 + $0x754] ss:$8 sps:$4 sm:$0xff]  }
  0x88   :  { %2719 = vmatpush1.bf16.msra.mxu1 %v9391_v11  ;;  %2619 = vmatprep.subr.bf16.mxu0 %v9396_v12  ;;  %v9439_v11 = vld [vmem:[%s12457_s1 + $0x5e0] ss:$8 sps:$4 sm:$0xff]   ;;  %v9444_v12 = vld [vmem:[%s12457_s1 + $0x4d4] ss:$8 sps:$4 sm:$0xff]  }
  0x89   :  { %2720 = vmatprep.subr.bf16.mxu1 %v9399_v13  ;;  %v9447_v13 = vld [vmem:[%s12457_s1 + $0x5d4] ss:$8 sps:$4 sm:$0xff]  }
  0x8a   :  { %2456 = vmatmul.mubr.bf16.gmra.mxu0 %v7294_v17  ;;  %v134_v17 = vld [vmem:[%s12458_s0 + $0x318] sm:$0x11] }
  0x8b   :  { %2557 = vmatmul.mubr.bf16.gmra.mxu1 %v7296_v18  ;;  %2620 = vmatpush1.bf16.msra.mxu0 %v9394_v15  ;;  %v7358_v15 = vcombine.low %v117_v62, %v125_v63  ;;  %v9442_v18 = vld [vmem:[%s12457_s1 + $0x4d0] ss:$8 sps:$4 sm:$0xff]   ;;  %v7376_v32 = vcombine.low %v134_v17, %v134_v17 }
  0x8c   :  { %2721 = vmatpush1.bf16.msra.mxu1 %v9397_v21  ;;  %2621 = vmatprep.subr.bf16.mxu0 %v9402_v22  ;;  %v9453_v21 = vld [vmem:[%s12457_s1 + $0x5c4] ss:$8 sps:$4 sm:$0xff]   ;;  %v7375_v22 = vcombine.high %v133_v14, %v133_v14 }
  0x8d   :  { %2722 = vmatprep.subr.bf16.mxu1 %v9405_v23  ;;  %2465 = vmatprep.mubr.bf16.mxu0 %v7311_v24  ;;  %v7377_v23 = vcombine.high %v134_v17, %v134_v17  ;;  %v9448_v24 = vld [vmem:[%s12457_s1 + $0x4c0] ss:$8 sps:$4 sm:$0xff]  }
  0x8e   :  { %2566 = vmatprep.mubr.bf16.mxu1 %v7313_v25  ;;  %v9451_v25 = vld [vmem:[%s12457_s1 + $0x5c0] ss:$8 sps:$4 sm:$0xff]  }
  0x8f   :  { %2622 = vmatpush1.bf16.msra.mxu0 %v9400_v26  ;;  %v9458_v26 = vld [vmem:[%s12457_s1 + $0x4b4] ss:$8 sps:$4 sm:$0xff]   ;;  %v9503_v17 = vld [vmem:[%s12457_s1 + $0x740] ss:$8 sps:$4 sm:$0xff]  }
  0x90   :  { %2723 = vmatpush1.bf16.msra.mxu1 %v9403_v27  ;;  %2623 = vmatprep.subr.bf16.mxu0 %v9408_v28  ;;  %v9461_v27 = vld [vmem:[%s12457_s1 + $0x5b4] ss:$8 sps:$4 sm:$0xff]   ;;  %v9456_v28 = vld [vmem:[%s12457_s1 + $0x4b0] ss:$8 sps:$4 sm:$0xff]  }
  0x91   :  { %2724 = vmatprep.subr.bf16.mxu1 %v9411_v29  ;;  %v9459_v29 = vld [vmem:[%s12457_s1 + $0x5b0] ss:$8 sps:$4 sm:$0xff]  }
  0x92   :  { %2466 = vmatmul.mubr.bf16.gmra.mxu0 %v7310_v33  ;;  %v47_v33 = vld [vmem:[%s12458_s0 + $0x60] sm:$0xff] }
  0x93   :  { %2567 = vmatmul.mubr.bf16.gmra.mxu1 %v7312_v34  ;;  %2624 = vmatpush1.bf16.msra.mxu0 %v9406_v30  ;;  %v39_v30 = vld [vmem:[%s12458_s0 + $0x20] sm:$0xff]  ;;  %v40_v34 = vld [vmem:[%s12458_s0 + $0x28] sm:$0xff] }
  0x94   :  { %2725 = vmatpush1.bf16.msra.mxu1 %v9409_v37  ;;  %2625 = vmatprep.subr.bf16.mxu0 %v9414_v38  ;;  %v9469_v37 = vld [vmem:[%s12457_s1 + $0x5a4] ss:$8 sps:$4 sm:$0xff]   ;;  %v7283_v38 = vcombine.high %v39_v30, %v47_v33 }
  0x95   :  { %2726 = vmatprep.subr.bf16.mxu1 %v9417_v39  ;;  %2475 = vmatprep.mubr.bf16.mxu0 %v7327_v40  ;;  %v7285_v39 = vcombine.high %v40_v34, %v48_v35  ;;  %v9464_v40 = vld [vmem:[%s12457_s1 + $0x4a0] ss:$8 sps:$4 sm:$0xff]  }
  0x96   :  { %2576 = vmatprep.mubr.bf16.mxu1 %v7329_v41  ;;  %v9467_v41 = vld [vmem:[%s12457_s1 + $0x5a0] ss:$8 sps:$4 sm:$0xff]  }
  0x97   :  { %2626 = vmatpush1.bf16.msra.mxu0 %v9412_v42  ;;  %v9472_v42 = vld [vmem:[%s12457_s1 + $0x494] ss:$8 sps:$4 sm:$0xff]  }
  0x98   :  { %2727 = vmatpush1.bf16.msra.mxu1 %v9415_v43  ;;  %2627 = vmatprep.subr.bf16.mxu0 %v9420_v44  ;;  %v9475_v43 = vld [vmem:[%s12457_s1 + $0x594] ss:$8 sps:$4 sm:$0xff]   ;;  %v9470_v44 = vld [vmem:[%s12457_s1 + $0x490] ss:$8 sps:$4 sm:$0xff]  }
  0x99   :  { %2728 = vmatprep.subr.bf16.mxu1 %v9423_v45  ;;  %v9473_v45 = vld [vmem:[%s12457_s1 + $0x590] ss:$8 sps:$4 sm:$0xff]  }
  0x9a   :  { %2476 = vmatmul.mubr.bf16.gmra.mxu0 %v7326_v48  ;;  %v9476_v48 = vld [vmem:[%s12457_s1 + $0x480] ss:$8 sps:$4 sm:$0xff]  }
  0x9b   :  { %2577 = vmatmul.mubr.bf16.gmra.mxu1 %v7328_v49  ;;  %2628 = vmatpush1.bf16.msra.mxu0 %v9418_v52  ;;  %v9479_v49 = vld [vmem:[%s12457_s1 + $0x580] ss:$8 sps:$4 sm:$0xff]  }
  0x9c   :  { %2729 = vmatpush1.bf16.msra.mxu1 %v9421_v53  ;;  %2629 = vmatprep.subr.bf16.mxu0 %v9426_v54  ;;  %v55_v52 = vld [vmem:[%s12458_s0 + $0xa0] sm:$0xff]  ;;  %v56_v54 = vld [vmem:[%s12458_s0 + $0xa8] sm:$0xff] }
  0x9d   :  { %2730 = vmatprep.subr.bf16.mxu1 %v9429_v55  ;;  %2485 = vmatprep.mubr.bf16.mxu0 %v7343_v56  ;;  %v63_v53 = vld [vmem:[%s12458_s0 + $0xe0] sm:$0xff]  ;;  %v7282_v55 = vcombine.low %v39_v30, %v47_v33  ;;  %v7284_v56 = vcombine.low %v40_v34, %v48_v35  ;;  %v9520_v34 = vld [vmem:[%s12457_s1 + $0x614] ss:$8 sps:$4 sm:$0xff]  }
  0x9e   :  { %2586 = vmatprep.mubr.bf16.mxu1 %v7345_v57  ;;  %v64_v57 = vld [vmem:[%s12458_s0 + $0xe8] sm:$0xff]  ;;  %v7299_v62 = vcombine.high %v55_v52, %v63_v53  ;;  %v9523_v35 = vld [vmem:[%s12457_s1 + $0x714] ss:$8 sps:$4 sm:$0xff]  }
  0x9f   :  { %2630 = vmatpush1.bf16.msra.mxu0 %v9424_v58  ;;  %v9482_v58 = vld [vmem:[%s12457_s1 + $0x670] ss:$8 sps:$4 sm:$0xff]   ;;  %v7301_v63 = vcombine.high %v56_v54, %v64_v57  ;;  %v9515_v33 = vld [vmem:[%s12457_s1 + $0x720] ss:$8 sps:$4 sm:$0xff]  }
  0xa0   :  { %2731 = vmatpush1.bf16.msra.mxu1 %v9427_v59  ;;  %2631 = vmatprep.subr.bf16.mxu0 %v9432_v60  ;;  %v9485_v59 = vld [vmem:[%s12457_s1 + $0x770] ss:$8 sps:$4 sm:$0xff]   ;;  %v9490_v60 = vld [vmem:[%s12457_s1 + $0x664] ss:$8 sps:$4 sm:$0xff]  }
  0xa1   :  { %2732 = vmatprep.subr.bf16.mxu1 %v9435_v61  ;;  %v9493_v61 = vld [vmem:[%s12457_s1 + $0x764] ss:$8 sps:$4 sm:$0xff]  }
  0xa2   :  { %2486 = vmatmul.mubr.bf16.gmra.mxu0 %v7342_v1  ;;  %v9491_v1 = vld [vmem:[%s12457_s1 + $0x760] ss:$8 sps:$4 sm:$0xff]  }
  0xa3   :  { %2587 = vmatmul.mubr.bf16.gmra.mxu1 %v7344_v2  ;;  %2632 = vmatpush2.bf16.msra.mxu0 %v9430_v4  ;;  %v9496_v2 = vld [vmem:[%s12457_s1 + $0x654] ss:$8 sps:$4 sm:$0xff]   ;;  %v71_v4 = vld [vmem:[%s12458_s0 + $0x120] sm:$0xff] }
  0xa4   :  { %2733 = vmatpush2.bf16.msra.mxu1 %v9433_v5  ;;  %2633 = vmatprep.subr.bf16.mxu0 %v9438_v6  ;;  %v7298_v5 = vcombine.low %v55_v52, %v63_v53  ;;  %v7300_v6 = vcombine.low %v56_v54, %v64_v57  ;;  %v119_v52 = vld [vmem:[%s12458_s0 + $0x2a0] sm:$0xff]  ;;  %v128_v57 = vld [vmem:[%s12458_s0 + $0x2e8] sm:$0xff] }
  0xa5   :  { %2734 = vmatprep.subr.bf16.mxu1 %v9441_v7  ;;  %2495 = vmatprep.mubr.bf16.mxu0 %v7359_v8  ;;  %v79_v7 = vld [vmem:[%s12458_s0 + $0x160] sm:$0xff]  ;;  %v72_v8 = vld [vmem:[%s12458_s0 + $0x128] sm:$0xff] }
  0xa6   :  { %2596 = vmatprep.mubr.bf16.mxu1 %v7361_v9  ;;  %v80_v9 = vld [vmem:[%s12458_s0 + $0x168] sm:$0xff]  ;;  %v7315_v14 = vcombine.high %v71_v4, %v79_v7 }
  0xa7   :  { %2634 = vmatpush2.bf16.msra.mxu0 %v9436_v10  ;;  %v9494_v10 = vld [vmem:[%s12457_s1 + $0x650] ss:$8 sps:$4 sm:$0xff]  }
  0xa8   :  { %2735 = vmatpush2.bf16.msra.mxu1 %v9439_v11  ;;  %2635 = vmatprep.subr.bf16.mxu0 %v9444_v12  ;;  %v9497_v11 = vld [vmem:[%s12457_s1 + $0x750] ss:$8 sps:$4 sm:$0xff]   ;;  %v9502_v12 = vld [vmem:[%s12457_s1 + $0x644] ss:$8 sps:$4 sm:$0xff]  }
  0xa9   :  { %2736 = vmatprep.subr.bf16.mxu1 %v9447_v13  ;;  %v9505_v13 = vld [vmem:[%s12457_s1 + $0x744] ss:$8 sps:$4 sm:$0xff]  }
  0xaa   :  { %2496 = vmatmul.mubr.bf16.gmra.mxu0 %v7358_v15  ;;  %v7317_v15 = vcombine.high %v72_v8, %v80_v9 }
  0xab   :  { %2597 = vmatmul.mubr.bf16.gmra.mxu1 %v7360_v16  ;;  %2636 = vmatpush2.bf16.msra.mxu0 %v9442_v18  ;;  %v9500_v16 = vld [vmem:[%s12457_s1 + $0x640] ss:$8 sps:$4 sm:$0xff]   ;;  %v9508_v18 = vld [vmem:[%s12457_s1 + $0x634] ss:$8 sps:$4 sm:$0xff]  }
  0xac   :  { %2737 = vmatpush2.bf16.msra.mxu1 %v9445_v19  ;;  %2637 = vmatprep.subr.bf16.mxu0 %v9450_v20  ;;  %v9511_v19 = vld [vmem:[%s12457_s1 + $0x734] ss:$8 sps:$4 sm:$0xff]   ;;  %v87_v20 = vld [vmem:[%s12458_s0 + $0x1a0] sm:$0xff] }
  0xad   :  { %2738 = vmatprep.subr.bf16.mxu1 %v9453_v21  ;;  %2505 = vmatprep.mubr.bf16.mxu0 %v7375_v22  ;;  %v7314_v21 = vcombine.low %v71_v4, %v79_v7  ;;  %v7316_v22 = vcombine.low %v72_v8, %v80_v9  ;;  %v136_v7 = vld [vmem:[%s12458_s0 + $0x328] sm:$0x11]  ;;  %v9542_v8 = vld [vmem:[%s12457_s1 + $0x6d0] ss:$8 sps:$4 sm:$0xff]  }
  0xae   :  { %2606 = vmatprep.mubr.bf16.mxu1 %v7377_v23  ;;  %v95_v23 = vld [vmem:[%s12458_s0 + $0x1e0] sm:$0xff]  ;;  %v9545_v9 = vld [vmem:[%s12457_s1 + $0x7d0] ss:$8 sps:$4 sm:$0xff]  }
  0xaf   :  { %2638 = vmatpush2.bf16.msra.mxu0 %v9448_v24  ;;  %v88_v24 = vld [vmem:[%s12458_s0 + $0x1a8] sm:$0xff]  ;;  %v7331_v30 = vcombine.high %v87_v20, %v95_v23 }
  0xb0   :  { %2739 = vmatpush2.bf16.msra.mxu1 %v9451_v25  ;;  %2639 = vmatprep.subr.bf16.mxu0 %v9458_v26  ;;  %v96_v25 = vld [vmem:[%s12458_s0 + $0x1e8] sm:$0xff]  ;;  %v9506_v26 = vld [vmem:[%s12457_s1 + $0x630] ss:$8 sps:$4 sm:$0xff]  }
  0xb1   :  { %2740 = vmatprep.subr.bf16.mxu1 %v9461_v27  ;;  %v9509_v27 = vld [vmem:[%s12457_s1 + $0x730] ss:$8 sps:$4 sm:$0xff]  }
  0xb2   :  { %2506 = vmatmul.mubr.bf16.gmra.mxu0 %v7374_v31  ;;  %v7333_v31 = vcombine.high %v88_v24, %v96_v25 }
  0xb3   :  { %2607 = vmatmul.mubr.bf16.gmra.mxu1 %v7376_v32  ;;  %2640 = vmatpush2.bf16.msra.mxu0 %v9456_v28  ;;  %v9514_v28 = vld [vmem:[%s12457_s1 + $0x624] ss:$8 sps:$4 sm:$0xff]   ;;  %v9512_v32 = vld [vmem:[%s12457_s1 + $0x620] ss:$8 sps:$4 sm:$0xff]  }
  0xb4   :  { %2741 = vmatpush2.bf16.msra.mxu1 %v9459_v29  ;;  %2641 = vmatprep.subr.bf16.mxu0 %v9466_v36  ;;  %v9517_v29 = vld [vmem:[%s12457_s1 + $0x724] ss:$8 sps:$4 sm:$0xff]  }
  0xb5   :  { %2742 = vmatprep.subr.bf16.mxu1 %v9469_v37  ;;  %2647 = vmatprep.mubr.bf16.mxu0 %v7283_v38  ;;  %v103_v36 = vld [vmem:[%s12458_s0 + $0x220] sm:$0xff]  ;;  %v7330_v37 = vcombine.low %v87_v20, %v95_v23  ;;  %v7332_v38 = vcombine.low %v88_v24, %v96_v25  ;;  %v7380_v20 = vcombine.low %v136_v7, %v136_v7  ;;  %v50_v23 = vld [vmem:[%s12458_s0 + $0x78] sm:$0xff] }
  0xb6   :  { %2748 = vmatprep.mubr.bf16.mxu1 %v7285_v39  ;;  %v111_v39 = vld [vmem:[%s12458_s0 + $0x260] sm:$0xff]  ;;  %v9556_v24 = vld [vmem:[%s12457_s1 + $0x6b0] ss:$8 sps:$4 sm:$0xff]  }
  0xb7   :  { %2642 = vmatpush2.bf16.msra.mxu0 %v9464_v40  ;;  %v104_v40 = vld [vmem:[%s12458_s0 + $0x228] sm:$0xff]  ;;  %v7346_v53 = vcombine.low %v103_v36, %v111_v39  ;;  %v9559_v25 = vld [vmem:[%s12457_s1 + $0x7b0] ss:$8 sps:$4 sm:$0xff]  }
  0xb8   :  { %2743 = vmatpush2.bf16.msra.mxu1 %v9467_v41  ;;  %2643 = vmatprep.subr.bf16.mxu0 %v9472_v42  ;;  %v112_v41 = vld [vmem:[%s12458_s0 + $0x268] sm:$0xff]  ;;  %v9518_v42 = vld [vmem:[%s12457_s1 + $0x610] ss:$8 sps:$4 sm:$0xff]  }
  0xb9   :  { %2744 = vmatprep.subr.bf16.mxu1 %v9475_v43  ;;  %v9521_v43 = vld [vmem:[%s12457_s1 + $0x710] ss:$8 sps:$4 sm:$0xff]   ;;  %v7348_v54 = vcombine.low %v104_v40, %v112_v41 }
  0xbb   :  { %2644 = vmatpush2.bf16.msra.mxu0 %v9470_v44  ;;  %v9526_v44 = vld [vmem:[%s12457_s1 + $0x604] ss:$8 sps:$4 sm:$0xff]  }
  0xbc   :  { %2745 = vmatpush2.bf16.msra.mxu1 %v9473_v45  ;;  %2645 = vmatprep.subr.bf16.mxu0 %v9478_v46  ;;  %v9529_v45 = vld [vmem:[%s12457_s1 + $0x704] ss:$8 sps:$4 sm:$0xff]   ;;  %v7347_v46 = vcombine.high %v103_v36, %v111_v39  ;;  %v9579_v39 = vld [vmem:[%s12457_s1 + $0x780] ss:$8 sps:$4 sm:$0xff]  }
  0xbd   :  { %2746 = vmatprep.subr.bf16.mxu1 %v9481_v47  ;;  %v7349_v47 = vcombine.high %v104_v40, %v112_v41  ;;  %v9578_v36 = vld [vmem:[%s12457_s1 + $0x684] ss:$8 sps:$4 sm:$0xff]   ;;  %v57_v40 = vld [vmem:[%s12458_s0 + $0xb0] sm:$0xff] }
  0xbe   :  { %v65_v41 = vld [vmem:[%s12458_s0 + $0xf0] sm:$0xff] }
  0xbf   :  { %2646 = vmatpush2.bf16.msra.mxu0 %v9476_v48  ;;  %v9524_v48 = vld [vmem:[%s12457_s1 + $0x600] ss:$8 sps:$4 sm:$0xff]  }
  0xc0   :  { %2747 = vmatpush2.bf16.msra.mxu1 %v9479_v49  ;;  %2817 = vmatprep.subr.bf16.mxu0 %v9484_v50  ;;  %v9527_v49 = vld [vmem:[%s12457_s1 + $0x700] ss:$8 sps:$4 sm:$0xff]   ;;  %v9532_v50 = vld [vmem:[%s12457_s1 + $0x6f4] ss:$8 sps:$4 sm:$0xff]  }
  0xc1   :  { %2918 = vmatprep.subr.bf16.mxu1 %v9487_v51  ;;  %v9535_v51 = vld [vmem:[%s12457_s1 + $0x7f4] ss:$8 sps:$4 sm:$0xff]  }
  0xc2   :  { %2648 = vmatmul.mubr.bf16.vlgmr.msra.gmra.mxu0 %v7282_v55  ;;  %v127_v55 = vld [vmem:[%s12458_s0 + $0x2e0] sm:$0xff] }
  0xc3   :  { %2749 = vmatmul.mubr.bf16.vlgmr.msra.gmra.mxu1 %v7284_v56  ;;  %2818 = vmatpush1.bf16.msra.mxu0 %v9482_v58  ;;  %v120_v56 = vld [vmem:[%s12458_s0 + $0x2a8] sm:$0xff]  ;;  %v9530_v58 = vld [vmem:[%s12457_s1 + $0x6f0] ss:$8 sps:$4 sm:$0xff]   ;;  %v7362_v4 = vcombine.low %v119_v52, %v127_v55 }
  0xc4   :  { %2919 = vmatpush1.bf16.msra.mxu1 %v9485_v59  ;;  %2819 = vmatprep.subr.bf16.mxu0 %v9490_v60  ;;  %v9533_v59 = vld [vmem:[%s12457_s1 + $0x7f0] ss:$8 sps:$4 sm:$0xff]   ;;  %v9538_v60 = vld [vmem:[%s12457_s1 + $0x6e4] ss:$8 sps:$4 sm:$0xff]  }
  0xc5   :  { %2920 = vmatprep.subr.bf16.mxu1 %v9493_v61  ;;  %2657 = vmatprep.mubr.bf16.mxu0 %v7299_v62  ;;  %v9541_v61 = vld [vmem:[%s12457_s1 + $0x7e4] ss:$8 sps:$4 sm:$0xff]   ;;  %v7363_v62 = vcombine.high %v119_v52, %v127_v55  ;;  %v74_v55 = vld [vmem:[%s12458_s0 + $0x138] sm:$0xff] }
  0xc6   :  { %2758 = vmatprep.mubr.bf16.mxu1 %v7301_v63  ;;  %v7365_v63 = vcombine.high %v120_v56, %v128_v57 }
  0xc7   :  { %2820 = vmatpush1.bf16.msra.mxu0 %v9488_v0  ;;  %v9536_v0 = vld [vmem:[%s12457_s1 + $0x6e0] ss:$8 sps:$4 sm:$0xff]  }
  0xc8   :  { %2921 = vmatpush1.bf16.msra.mxu1 %v9491_v1  ;;  %2821 = vmatprep.subr.bf16.mxu0 %v9496_v2  ;;  %v9539_v1 = vld [vmem:[%s12457_s1 + $0x7e0] ss:$8 sps:$4 sm:$0xff]   ;;  %v9544_v2 = vld [vmem:[%s12457_s1 + $0x6d4] ss:$8 sps:$4 sm:$0xff]  }
  0xc9   :  { %2922 = vmatprep.subr.bf16.mxu1 %v9499_v3  ;;  %v9547_v3 = vld [vmem:[%s12457_s1 + $0x7d4] ss:$8 sps:$4 sm:$0xff]  }
  0xca   :  { %2658 = vmatmul.mubr.bf16.gmra.mxu0 %v7298_v5  ;;  %v7364_v5 = vcombine.low %v120_v56, %v128_v57  ;;  %v82_v56 = vld [vmem:[%s12458_s0 + $0x178] sm:$0xff] }
  0xcb   :  { %2759 = vmatmul.mubr.bf16.gmra.mxu1 %v7300_v6  ;;  %2822 = vmatpush1.bf16.msra.mxu0 %v9494_v10  ;;  %v135_v6 = vld [vmem:[%s12458_s0 + $0x320] sm:$0x11] }
  0xcc   :  { %2923 = vmatpush1.bf16.msra.mxu1 %v9497_v11  ;;  %2823 = vmatprep.subr.bf16.mxu0 %v9502_v12  ;;  %v9550_v10 = vld [vmem:[%s12457_s1 + $0x6c4] ss:$8 sps:$4 sm:$0xff]   ;;  %v7379_v12 = vcombine.high %v135_v6, %v135_v6 }
  0xcd   :  { %2924 = vmatprep.subr.bf16.mxu1 %v9505_v13  ;;  %2667 = vmatprep.mubr.bf16.mxu0 %v7315_v14  ;;  %v9553_v11 = vld [vmem:[%s12457_s1 + $0x7c4] ss:$8 sps:$4 sm:$0xff]   ;;  %v7381_v13 = vcombine.high %v136_v7, %v136_v7  ;;  %v9548_v14 = vld [vmem:[%s12457_s1 + $0x6c0] ss:$8 sps:$4 sm:$0xff]  }
  0xce   :  { %2768 = vmatprep.mubr.bf16.mxu1 %v7317_v15  ;;  %v9551_v15 = vld [vmem:[%s12457_s1 + $0x7c0] ss:$8 sps:$4 sm:$0xff]  }
  0xcf   :  { %2824 = vmatpush1.bf16.msra.mxu0 %v9500_v16  ;;  %v9558_v16 = vld [vmem:[%s12457_s1 + $0x6b4] ss:$8 sps:$4 sm:$0xff]  }
  0xd0   :  { %2925 = vmatpush1.bf16.msra.mxu1 %v9503_v17  ;;  %2825 = vmatprep.subr.bf16.mxu0 %v9508_v18  ;;  %v9561_v17 = vld [vmem:[%s12457_s1 + $0x7b4] ss:$8 sps:$4 sm:$0xff]  }
  0xd1   :  { %2926 = vmatprep.subr.bf16.mxu1 %v9511_v19  ;;  %v41_v18 = vld [vmem:[%s12458_s0 + $0x30] sm:$0xff]  ;;  %v7378_v19 = vcombine.low %v135_v6, %v135_v6 }
  0xd2   :  { %2668 = vmatmul.mubr.bf16.gmra.mxu0 %v7314_v21  ;;  %v49_v21 = vld [vmem:[%s12458_s0 + $0x70] sm:$0xff] }
  0xd3   :  { %2769 = vmatmul.mubr.bf16.gmra.mxu1 %v7316_v22  ;;  %2826 = vmatpush1.bf16.msra.mxu0 %v9506_v26  ;;  %v42_v22 = vld [vmem:[%s12458_s0 + $0x38] sm:$0xff]  ;;  %v9566_v26 = vld [vmem:[%s12457_s1 + $0x6a4] ss:$8 sps:$4 sm:$0xff]   ;;  %v89_v6 = vld [vmem:[%s12458_s0 + $0x1b0] sm:$0xff] }
  0xd4   :  { %2927 = vmatpush1.bf16.msra.mxu1 %v9509_v27  ;;  %2827 = vmatprep.subr.bf16.mxu0 %v9514_v28  ;;  %v9569_v27 = vld [vmem:[%s12457_s1 + $0x7a4] ss:$8 sps:$4 sm:$0xff]   ;;  %v7287_v28 = vcombine.high %v41_v18, %v49_v21 }
  0xd5   :  { %2928 = vmatprep.subr.bf16.mxu1 %v9517_v29  ;;  %2677 = vmatprep.mubr.bf16.mxu0 %v7331_v30  ;;  %v7289_v29 = vcombine.high %v42_v22, %v50_v23  ;;  %v9564_v30 = vld [vmem:[%s12457_s1 + $0x6a0] ss:$8 sps:$4 sm:$0xff]  }
  0xd6   :  { %2778 = vmatprep.mubr.bf16.mxu1 %v7333_v31  ;;  %v9567_v31 = vld [vmem:[%s12457_s1 + $0x7a0] ss:$8 sps:$4 sm:$0xff]  }
  0xd7   :  { %2828 = vmatpush1.bf16.msra.mxu0 %v9512_v32  ;;  %v9572_v32 = vld [vmem:[%s12457_s1 + $0x694] ss:$8 sps:$4 sm:$0xff]  }
  0xd8   :  { %2929 = vmatpush1.bf16.msra.mxu1 %v9515_v33  ;;  %2829 = vmatprep.subr.bf16.mxu0 %v9520_v34  ;;  %v9575_v33 = vld [vmem:[%s12457_s1 + $0x794] ss:$8 sps:$4 sm:$0xff]   ;;  %v9570_v34 = vld [vmem:[%s12457_s1 + $0x690] ss:$8 sps:$4 sm:$0xff]  }
  0xd9   :  { %2930 = vmatprep.subr.bf16.mxu1 %v9523_v35  ;;  %v9573_v35 = vld [vmem:[%s12457_s1 + $0x790] ss:$8 sps:$4 sm:$0xff]  }
  0xda   :  { %2678 = vmatmul.mubr.bf16.gmra.mxu0 %v7330_v37  ;;  %v9581_v37 = vld [vmem:[%s12457_s1 + $0x784] ss:$8 sps:$4 sm:$0xff]  }
  0xdb   :  { %2779 = vmatmul.mubr.bf16.gmra.mxu1 %v7332_v38  ;;  %2830 = vmatpush1.bf16.msra.mxu0 %v9518_v42  ;;  %v9576_v38 = vld [vmem:[%s12457_s1 + $0x680] ss:$8 sps:$4 sm:$0xff]   ;;  %v58_v42 = vld [vmem:[%s12458_s0 + $0xb8] sm:$0xff] }
  0xdc   :  { %2931 = vmatpush1.bf16.msra.mxu1 %v9521_v43  ;;  %2831 = vmatprep.subr.bf16.mxu0 %v9526_v44  ;;  %v66_v43 = vld [vmem:[%s12458_s0 + $0xf8] sm:$0xff]  ;;  %v7286_v44 = vcombine.low %v41_v18, %v49_v21 }
  0xdd   :  { %2932 = vmatprep.subr.bf16.mxu1 %v9529_v45  ;;  %2687 = vmatprep.mubr.bf16.mxu0 %v7347_v46  ;;  %v7288_v45 = vcombine.low %v42_v22, %v50_v23  ;;  %v7303_v46 = vcombine.high %v57_v40, %v65_v41 }
  0xde   :  { %2788 = vmatprep.mubr.bf16.mxu1 %v7349_v47  ;;  %v7305_v47 = vcombine.high %v58_v42, %v66_v43 }
  0xdf   :  { %2832 = vmatpush1.bf16.msra.mxu0 %v9524_v48 }
  0xe0   :  { %2933 = vmatpush1.bf16.msra.mxu1 %v9527_v49  ;;  %2833 = vmatprep.subr.bf16.mxu0 %v9532_v50 }
  0xe1   :  { %2934 = vmatprep.subr.bf16.mxu1 %v9535_v51  ;;  %v73_v51 = vld [vmem:[%s12458_s0 + $0x130] sm:$0xff] }
  0xe2   :  { %2688 = vmatmul.mubr.bf16.gmra.mxu0 %v7346_v53 }
  0xe3   :  { %2789 = vmatmul.mubr.bf16.gmra.mxu1 %v7348_v54  ;;  %2834 = vmatpush2.bf16.msra.mxu0 %v9530_v58  ;;  %v81_v54 = vld [vmem:[%s12458_s0 + $0x170] sm:$0xff] }
  0xe4   :  { %2935 = vmatpush2.bf16.msra.mxu1 %v9533_v59  ;;  %2835 = vmatprep.subr.bf16.mxu0 %v9538_v60  ;;  %v7302_v60 = vcombine.low %v57_v40, %v65_v41 }
  0xe5   :  { %2936 = vmatprep.subr.bf16.mxu1 %v9541_v61  ;;  %2697 = vmatprep.mubr.bf16.mxu0 %v7363_v62  ;;  %v7304_v61 = vcombine.low %v58_v42, %v66_v43 }
  0xe6   :  { %2798 = vmatprep.mubr.bf16.mxu1 %v7365_v63  ;;  %v7319_v63 = vcombine.high %v73_v51, %v81_v54 }
  0xe7   :  { %2836 = vmatpush2.bf16.msra.mxu0 %v9536_v0  ;;  %v7321_v0 = vcombine.high %v74_v55, %v82_v56 }
  0xe8   :  { %2937 = vmatpush2.bf16.msra.mxu1 %v9539_v1  ;;  %2837 = vmatprep.subr.bf16.mxu0 %v9544_v2 }
  0xe9   :  { %2938 = vmatprep.subr.bf16.mxu1 %v9547_v3 }
  0xea   :  { %2698 = vmatmul.mubr.bf16.gmra.mxu0 %v7362_v4 }
  0xeb   :  { %2799 = vmatmul.mubr.bf16.gmra.mxu1 %v7364_v5  ;;  %2838 = vmatpush2.bf16.msra.mxu0 %v9542_v8 }
  0xec   :  { %2939 = vmatpush2.bf16.msra.mxu1 %v9545_v9  ;;  %2839 = vmatprep.subr.bf16.mxu0 %v9550_v10  ;;  %v97_v9 = vld [vmem:[%s12458_s0 + $0x1f0] sm:$0xff]  ;;  %v90_v10 = vld [vmem:[%s12458_s0 + $0x1b8] sm:$0xff] }
  0xed   :  { %2940 = vmatprep.subr.bf16.mxu1 %v9553_v11  ;;  %2707 = vmatprep.mubr.bf16.mxu0 %v7379_v12  ;;  %v98_v11 = vld [vmem:[%s12458_s0 + $0x1f8] sm:$0xff]  ;;  %v7335_v18 = vcombine.high %v89_v6, %v97_v9 }
  0xee   :  { %2808 = vmatprep.mubr.bf16.mxu1 %v7381_v13 }
  0xef   :  { %2840 = vmatpush2.bf16.msra.mxu0 %v9548_v14 }
  0xf0   :  { %2941 = vmatpush2.bf16.msra.mxu1 %v9551_v15  ;;  %2841 = vmatprep.subr.bf16.mxu0 %v9558_v16  ;;  %v7318_v15 = vcombine.low %v73_v51, %v81_v54  ;;  %v7320_v16 = vcombine.low %v74_v55, %v82_v56 }
  0xf1   :  { %2942 = vmatprep.subr.bf16.mxu1 %v9561_v17 }
  0xf2   :  { %2708 = vmatmul.mubr.bf16.gmra.mxu0 %v7378_v19  ;;  %v7337_v19 = vcombine.high %v90_v10, %v98_v11 }
  0xf3   :  { %2809 = vmatmul.mubr.bf16.gmra.mxu1 %v7380_v20  ;;  %2842 = vmatpush2.bf16.msra.mxu0 %v9556_v24 }
  0xf4   :  { %2943 = vmatpush2.bf16.msra.mxu1 %v9559_v25  ;;  %2843 = vmatprep.subr.bf16.mxu0 %v9566_v26  ;;  %v105_v25 = vld [vmem:[%s12458_s0 + $0x230] sm:$0xff] }
  0xf5   :  { %2944 = vmatprep.subr.bf16.mxu1 %v9569_v27  ;;  %2849 = vmatprep.mubr.bf16.mxu0 %v7287_v28  ;;  %v113_v28 = vld [vmem:[%s12458_s0 + $0x270] sm:$0xff] }
  0xf6   :  { %2950 = vmatprep.mubr.bf16.mxu1 %v7289_v29  ;;  %v106_v29 = vld [vmem:[%s12458_s0 + $0x238] sm:$0xff]  ;;  %v7350_v54 = vcombine.low %v105_v25, %v113_v28 }
  0xf7   :  { %2844 = vmatpush2.bf16.msra.mxu0 %v9564_v30  ;;  %v114_v30 = vld [vmem:[%s12458_s0 + $0x278] sm:$0xff] }
  0xf8   :  { %2945 = vmatpush2.bf16.msra.mxu1 %v9567_v31  ;;  %2845 = vmatprep.subr.bf16.mxu0 %v9572_v32  ;;  %v7352_v55 = vcombine.low %v106_v29, %v114_v30 }
  0xf9   :  { %2946 = vmatprep.subr.bf16.mxu1 %v9575_v33 }
  0xfb   :  { %2846 = vmatpush2.bf16.msra.mxu0 %v9570_v34  ;;  %v7334_v34 = vcombine.low %v89_v6, %v97_v9 }
  0xfc   :  { %2947 = vmatpush2.bf16.msra.mxu1 %v9573_v35  ;;  %2847 = vmatprep.subr.bf16.mxu0 %v9578_v36  ;;  %v7336_v35 = vcombine.low %v90_v10, %v98_v11 }
  0xfd   :  { %2948 = vmatprep.subr.bf16.mxu1 %v9581_v37  ;;  %v7351_v37 = vcombine.high %v105_v25, %v113_v28 }
  0xff   :  { %2848 = vmatpush2.bf16.msra.mxu0 %v9576_v38  ;;  %v7353_v38 = vcombine.high %v106_v29, %v114_v30 }
 0x100   :  { %2949 = vmatpush2.bf16.msra.mxu1 %v9579_v39 }
 0x102   :  { %v2245_v48 = vpop.f32.mrf.mxu0  ;;  %2850 = vmatmul.mubr.bf16.vlgmr.msra.gmra.mxu0 %v7286_v44  ;;  %v121_v44 = vld [vmem:[%s12458_s0 + $0x2b0] sm:$0xff] }
 0x103   :  { %v2346_v49 = vpop.f32.mrf.mxu1  ;;  %2951 = vmatmul.mubr.bf16.vlgmr.msra.gmra.mxu1 %v7288_v45  ;;  %2859 = vmatprep.mubr.bf16.mxu0 %v7303_v46 }
 0x104   :  { %v10882_v50 = vadd.f32 %v2346_v49, %v2245_v48  ;;  %2960 = vmatprep.mubr.bf16.mxu1 %v7305_v47  ;;  %v2247_v52 = vpop.f32.mrf.mxu0  ;;  %v129_v47 = vld [vmem:[%s12458_s0 + $0x2f0] sm:$0xff]  ;;  %v122_v48 = vld [vmem:[%s12458_s0 + $0x2b8] sm:$0xff] }
 0x105   :  { %v2348_v53 = vpop.f32.mrf.mxu1  ;;  %v130_v49 = vld [vmem:[%s12458_s0 + $0x2f8] sm:$0xff] }
 0x106   :  { %v10896_v57 = vadd.f32 %v2348_v53, %v2247_v52  ;;  %v2249_v58 = vpop.f32.mrf.mxu0 }
 0x107   :  { %v2350_v59 = vpop.f32.mrf.mxu1 }
 0x108   :  { %v10898_v62 = vadd.f32 %v2350_v59, %v2249_v58  ;;  %v10900_v1 = vpop.f32.mrf.mxu0  ;;  %v7367_v58 = vcombine.high %v121_v44, %v129_v47  ;;  %v7369_v59 = vcombine.high %v122_v48, %v130_v49 }
 0x109   :  { %v10902_v2 = vpop.f32.mrf.mxu1 }
 0x10a   :  { %2860 = vmatmul.mubr.bf16.gmra.mxu0 %v7302_v60  ;;  %v2255_v3 = vpop.f32.mrf.mxu0 }
 0x10b   :  { %2961 = vmatmul.mubr.bf16.gmra.mxu1 %v7304_v61  ;;  %v2356_v4 = vpop.f32.mrf.mxu1  ;;  %2869 = vmatprep.mubr.bf16.mxu0 %v7319_v63 }
 0x10c   :  { %v10904_v5 = vadd.f32 %v2356_v4, %v2255_v3  ;;  %2970 = vmatprep.mubr.bf16.mxu1 %v7321_v0  ;;  %v2257_v7 = vpop.f32.mrf.mxu0 }
 0x10d   :  { %v2358_v8 = vpop.f32.mrf.mxu1 }
 0x10e   :  { %v10918_v12 = vadd.f32 %v2358_v8, %v2257_v7  ;;  %v2259_v13 = vpop.f32.mrf.mxu0  ;;  %v137_v7 = vld [vmem:[%s12458_s0 + $0x330] sm:$0x11]  ;;  %v138_v8 = vld [vmem:[%s12458_s0 + $0x338] sm:$0x11] }
 0x10f   :  { %v2360_v14 = vpop.f32.mrf.mxu1 }
 0x110   :  { %v10920_v17 = vadd.f32 %v2360_v14, %v2259_v13  ;;  %v10922_v20 = vpop.f32.mrf.mxu0  ;;  %v7366_v13 = vcombine.low %v121_v44, %v129_v47  ;;  %v7368_v14 = vcombine.low %v122_v48, %v130_v49 }
 0x111   :  { %v10924_v21 = vpop.f32.mrf.mxu1 }
 0x112   :  { %2870 = vmatmul.mubr.bf16.gmra.mxu0 %v7318_v15  ;;  %v2265_v22 = vpop.f32.mrf.mxu0 }
 0x113   :  { %2971 = vmatmul.mubr.bf16.gmra.mxu1 %v7320_v16  ;;  %v2366_v23 = vpop.f32.mrf.mxu1  ;;  %2879 = vmatprep.mubr.bf16.mxu0 %v7335_v18  ;;  %v7383_v16 = vcombine.high %v137_v7, %v137_v7  ;;  %v7385_v18 = vcombine.high %v138_v8, %v138_v8 }
 0x114   :  { %v10926_v24 = vadd.f32 %v2366_v23, %v2265_v22  ;;  %2980 = vmatprep.mubr.bf16.mxu1 %v7337_v19  ;;  %v2267_v26 = vpop.f32.mrf.mxu0 }
 0x115   :  { %v2368_v27 = vpop.f32.mrf.mxu1 }
 0x116   :  { %v10940_v31 = vadd.f32 %v2368_v27, %v2267_v26  ;;  %v2269_v32 = vpop.f32.mrf.mxu0 }
 0x117   :  { %v2370_v33 = vpop.f32.mrf.mxu1 }
 0x118   :  { %v10942_v36 = vadd.f32 %v2370_v33, %v2269_v32  ;;  %v10944_v39 = vpop.f32.mrf.mxu0  ;;  %v7382_v33 = vcombine.low %v137_v7, %v137_v7 }
 0x119   :  { %v10946_v40 = vpop.f32.mrf.mxu1 }
 0x11a   :  { %2880 = vmatmul.mubr.bf16.gmra.mxu0 %v7334_v34  ;;  %v2275_v41 = vpop.f32.mrf.mxu0  ;;  %v7384_v34 = vcombine.low %v138_v8, %v138_v8 }
 0x11b   :  { %2981 = vmatmul.mubr.bf16.gmra.mxu1 %v7336_v35  ;;  %v2376_v42 = vpop.f32.mrf.mxu1  ;;  %2889 = vmatprep.mubr.bf16.mxu0 %v7351_v37 }
 0x11c   :  { %v10948_v43 = vadd.f32 %v2376_v42, %v2275_v41  ;;  %2990 = vmatprep.mubr.bf16.mxu1 %v7353_v38  ;;  %v2277_v45 = vpop.f32.mrf.mxu0 }
 0x11d   :  { %v2378_v46 = vpop.f32.mrf.mxu1 }
 0x11e   :  { %v10962_v51 = vadd.f32 %v2378_v46, %v2277_v45  ;;  %v2279_v52 = vpop.f32.mrf.mxu0 }
 0x11f   :  { %v2380_v53 = vpop.f32.mrf.mxu1 }
 0x120   :  { %v10964_v56 = vadd.f32 %v2380_v53, %v2279_v52  ;;  %v10966_v60 = vpop.f32.mrf.mxu0 }
 0x121   :  { %v10968_v61 = vpop.f32.mrf.mxu1 }
 0x122   :  { %2890 = vmatmul.mubr.bf16.gmra.mxu0 %v7350_v54  ;;  %v2285_v63 = vpop.f32.mrf.mxu0 }
 0x123   :  { %2991 = vmatmul.mubr.bf16.gmra.mxu1 %v7352_v55  ;;  %v2386_v0 = vpop.f32.mrf.mxu1  ;;  %2899 = vmatprep.mubr.bf16.mxu0 %v7367_v58 }
 0x124   :  { %v10970_v3 = vadd.f32 %v2386_v0, %v2285_v63  ;;  %3000 = vmatprep.mubr.bf16.mxu1 %v7369_v59  ;;  %v2287_v4 = vpop.f32.mrf.mxu0 }
 0x125   :  { %v2388_v6 = vpop.f32.mrf.mxu1 }
 0x126   :  { %v10978_v9 = vadd.f32 %v2388_v6, %v2287_v4  ;;  %v2289_v10 = vpop.f32.mrf.mxu0 }
 0x127   :  { %v2390_v11 = vpop.f32.mrf.mxu1 }
 0x128   :  { %v10980_v15 = vadd.f32 %v2390_v11, %v2289_v10  ;;  %v10982_v19 = vpop.f32.mrf.mxu0 }
 0x129   :  { %12469 = vst [vmem:[#allocation3_spill] sm:$0xff] %v10982_v19  ;;  %v10984_v22 = vpop.f32.mrf.mxu1 }
 0x12a   :  { %12470 = vst [vmem:[#allocation4_spill] sm:$0xff] %v10984_v22  ;;  %2900 = vmatmul.mubr.bf16.gmra.mxu0 %v7366_v13  ;;  %v2295_v23 = vpop.f32.mrf.mxu0 }
 0x12b   :  { %3001 = vmatmul.mubr.bf16.gmra.mxu1 %v7368_v14  ;;  %v2396_v25 = vpop.f32.mrf.mxu1  ;;  %2909 = vmatprep.mubr.bf16.mxu0 %v7383_v16 }
 0x12c   :  { %v10986_v26 = vadd.f32 %v2396_v25, %v2295_v23  ;;  %3010 = vmatprep.mubr.bf16.mxu1 %v7385_v18  ;;  %v2297_v27 = vpop.f32.mrf.mxu0 }
 0x12d   :  { %v2398_v28 = vpop.f32.mrf.mxu1 }
 0x12e   :  { %v10988_v29 = vadd.f32 %v2398_v28, %v2297_v27  ;;  %v2299_v30 = vpop.f32.mrf.mxu0 }
 0x12f   :  { %v2400_v32 = vpop.f32.mrf.mxu1 }
 0x130   :  { %v10990_v35 = vadd.f32 %v2400_v32, %v2299_v30  ;;  %v10992_v37 = vpop.f32.mrf.mxu0 }
 0x131   :  { %12471 = vst [vmem:[#allocation5_spill] sm:$0xff] %v10992_v37  ;;  %v10994_v38 = vpop.f32.mrf.mxu1 }
 0x132   :  { %12472 = vst [vmem:[#allocation6_spill] sm:$0xff] %v10994_v38  ;;  %2910 = vmatmul.mubr.bf16.gmra.mxu0 %v7382_v33  ;;  %v2305_v41 = vpop.f32.mrf.mxu0 }
 0x133   :  { %3011 = vmatmul.mubr.bf16.gmra.mxu1 %v7384_v34  ;;  %v2406_v42 = vpop.f32.mrf.mxu1 }
 0x134   :  { %v10996_v44 = vadd.f32 %v2406_v42, %v2305_v41  ;;  %v2307_v45 = vpop.f32.mrf.mxu0 }
 0x135   :  { %v2408_v46 = vpop.f32.mrf.mxu1 }
 0x136   :  { %v10998_v47 = vadd.f32 %v2408_v46, %v2307_v45  ;;  %v2309_v48 = vpop.f32.mrf.mxu0 }
 0x137   :  { %v2410_v49 = vpop.f32.mrf.mxu1 }
 0x138   :  { %v2310_v52 = vpop.f32.mrf.mxu0 }
 0x139   :  { %v2411_v53 = vpop.f32.mrf.mxu1 }
 0x142   :  { %v2447_v54 = vpop.f32.mrf.mxu0 }
 0x143   :  { %v2548_v55 = vpop.f32.mrf.mxu1  ;;  %v2448_v58 = vadd.f32 %v2447_v54, %v10882_v50 }
 0x144   :  { %v2449_v59 = vpop.f32.mrf.mxu0 }
 0x145   :  { %v2550_v63 = vpop.f32.mrf.mxu1  ;;  %v11001_v0 = vadd.f32 %v2548_v55, %v2448_v58  ;;  %v2450_v4 = vadd.f32 %v2449_v59, %v10896_v57 }
 0x146   :  { %v2451_v6 = vpop.f32.mrf.mxu0 }
 0x147   :  { %v2552_v7 = vpop.f32.mrf.mxu1  ;;  %v11004_v8 = vadd.f32 %v2550_v63, %v2450_v4  ;;  %v2452_v10 = vadd.f32 %v2451_v6, %v10898_v62 }
 0x148   :  { %v11007_v11 = vpop.f32.mrf.mxu0 }
 0x149   :  { %v11009_v13 = vpop.f32.mrf.mxu1  ;;  %v11011_v14 = vadd.f32 %v2552_v7, %v2452_v10 }
 0x14a   :  { %v2457_v16 = vpop.f32.mrf.mxu0 }
 0x14b   :  { %v2558_v50 = vpop.f32.mrf.mxu1  ;;  %v2458_v18 = vadd.f32 %v2457_v16, %v10904_v5 }
 0x14c   :  { %v2459_v23 = vpop.f32.mrf.mxu0 }
 0x14d   :  { %v2560_v25 = vpop.f32.mrf.mxu1  ;;  %v2460_v57 = vadd.f32 %v2459_v23, %v10918_v12  ;;  %v11015_v27 = vadd.f32 %v2558_v50, %v2458_v18 }
 0x14e   :  { %v2461_v28 = vpop.f32.mrf.mxu0 }
 0x14f   :  { %v2562_v30 = vpop.f32.mrf.mxu1  ;;  %v2462_v62 = vadd.f32 %v2461_v28, %v10920_v17  ;;  %v11018_v32 = vadd.f32 %v2560_v25, %v2460_v57 }
 0x150   :  { %v11020_v33 = vpop.f32.mrf.mxu0 }
 0x151   :  { %v11022_v34 = vpop.f32.mrf.mxu1  ;;  %v11024_v41 = vadd.f32 %v2562_v30, %v2462_v62 }
 0x152   :  { %v2467_v42 = vpop.f32.mrf.mxu0 }
 0x153   :  { %v2568_v5 = vpop.f32.mrf.mxu1  ;;  %v2468_v45 = vadd.f32 %v2467_v42, %v10926_v24 }
 0x154   :  { %v2469_v46 = vpop.f32.mrf.mxu0 }
 0x155   :  { %v2570_v12 = vpop.f32.mrf.mxu1  ;;  %v2470_v48 = vadd.f32 %v2469_v46, %v10940_v31  ;;  %v11028_v49 = vadd.f32 %v2568_v5, %v2468_v45 }
 0x156   :  { %v2471_v52 = vpop.f32.mrf.mxu0 }
 0x157   :  { %v2572_v17 = vpop.f32.mrf.mxu1  ;;  %v2472_v53 = vadd.f32 %v2471_v52, %v10942_v36  ;;  %v11031_v54 = vadd.f32 %v2570_v12, %v2470_v48 }
 0x158   :  { %v11033_v55 = vpop.f32.mrf.mxu0 }
 0x159   :  { %v11035_v58 = vpop.f32.mrf.mxu1  ;;  %v11037_v59 = vadd.f32 %v2572_v17, %v2472_v53 }
 0x15a   :  { %v2477_v63 = vpop.f32.mrf.mxu0 }
 0x15b   :  { %v2578_v24 = vpop.f32.mrf.mxu1  ;;  %v2478_v4 = vadd.f32 %v2477_v63, %v10948_v43 }
 0x15c   :  { %v2479_v6 = vpop.f32.mrf.mxu0 }
 0x15d   :  { %v2580_v31 = vpop.f32.mrf.mxu1  ;;  %v2480_v7 = vadd.f32 %v2479_v6, %v10962_v51  ;;  %v11041_v10 = vadd.f32 %v2578_v24, %v2478_v4 }
 0x15e   :  { %v2481_v16 = vpop.f32.mrf.mxu0 }
 0x15f   :  { %v2582_v36 = vpop.f32.mrf.mxu1  ;;  %v2482_v50 = vadd.f32 %v2481_v16, %v10964_v56  ;;  %v11044_v18 = vadd.f32 %v2580_v31, %v2480_v7 }
 0x160   :  { %v11046_v23 = vpop.f32.mrf.mxu0 }
 0x161   :  { %v11048_v25 = vpop.f32.mrf.mxu1  ;;  %v11050_v57 = vadd.f32 %v2582_v36, %v2482_v50 }
 0x162   :  { %v2487_v28 = vpop.f32.mrf.mxu0 }
 0x163   :  { %v2588_v43 = vpop.f32.mrf.mxu1  ;;  %v2488_v30 = vadd.f32 %v2487_v28, %v10970_v3 }
 0x164   :  { %v2489_v62 = vpop.f32.mrf.mxu0 }
 0x165   :  { %v2590_v51 = vpop.f32.mrf.mxu1  ;;  %v2490_v42 = vadd.f32 %v2489_v62, %v10978_v9  ;;  %v11054_v5 = vadd.f32 %v2588_v43, %v2488_v30 }
 0x166   :  { %v2491_v45 = vpop.f32.mrf.mxu0 }
 0x167   :  { %12473 = vst [vmem:[#allocation7_spill] sm:$0xff] %v11054_v5  ;;  %v2592_v56 = vpop.f32.mrf.mxu1  ;;  %v2492_v46 = vadd.f32 %v2491_v45, %v10980_v15  ;;  %v11057_v12 = vadd.f32 %v2590_v51, %v2490_v42 }
 0x168   :  { %v11059_v48 = vpop.f32.mrf.mxu0 }
 0x169   :  { %12474 = vst [vmem:[#allocation8_spill] sm:$0xff] %v11059_v48  ;;  %v11061_v52 = vpop.f32.mrf.mxu1  ;;  %v11063_v17 = vadd.f32 %v2592_v56, %v2492_v46 }
 0x16a   :  { %12475 = vst [vmem:[#allocation9_spill] sm:$0xff] %v11061_v52  ;;  %v2497_v53 = vpop.f32.mrf.mxu0 }
 0x16b   :  { %12476 = vst [vmem:[#allocation10_spill] sm:$0xff] %v11063_v17  ;;  %v2598_v3 = vpop.f32.mrf.mxu1  ;;  %v2498_v63 = vadd.f32 %v2497_v53, %v10986_v26 }
 0x16c   :  { %v2499_v24 = vpop.f32.mrf.mxu0 }
 0x16d   :  { %v2600_v9 = vpop.f32.mrf.mxu1  ;;  %v2500_v4 = vadd.f32 %v2499_v24, %v10988_v29  ;;  %v11067_v6 = vadd.f32 %v2598_v3, %v2498_v63  ;;  %v12467_v3 = vmov 0.0   ;;  %v9586_v63 = vld [vmem:[%s12459_s3 + $0x38] sm:$0xff]   ;;  %v9589_v24 = vld [vmem:[%s12459_s3 + $0x28] sm:$0xff]  }
 0x16e   :  { %v2501_v31 = vpop.f32.mrf.mxu0  ;;  %8555 = vmatprep.subr.bf16.mxu0 %v12467_v3  ;;  %8567 = vmatprep.subr.bf16.mxu1 %v12467_v3 }
 0x16f   :  { %12477 = vst [vmem:[#allocation11_spill] sm:$0xff] %v11067_v6  ;;  %v2602_v15 = vpop.f32.mrf.mxu1  ;;  %v2502_v7 = vadd.f32 %v2501_v31, %v10990_v35  ;;  %v11070_v16 = vadd.f32 %v2600_v9, %v2500_v4  ;;  %8556 = vmatpush3.bf16.msra.mxu0 %v9586_v63  ;;  %v9590_v9 = vld [vmem:[%s12459_s3 + $0x10] sm:$0xff]  }
 0x170   :  { %v11072_v36 = vpop.f32.mrf.mxu0  ;;  %8557 = vmatprep.subr.bf16.mxu0 %v12467_v3 }
 0x171   :  { %12478 = vst [vmem:[#allocation12_spill] sm:$0xff] %v11072_v36  ;;  %v11074_v50 = vpop.f32.mrf.mxu1  ;;  %v11076_v28 = vadd.f32 %v2602_v15, %v2502_v7 }
 0x172   :  { %12479 = vst [vmem:[#allocation13_spill] sm:$0xff] %v11074_v50  ;;  %v2507_v43 = vpop.f32.mrf.mxu0 }
 0x173   :  { %12480 = vst [vmem:[#allocation14_spill] sm:$0xff] %v11076_v28  ;;  %v2608_v26 = vpop.f32.mrf.mxu1  ;;  %v2508_v30 = vadd.f32 %v2507_v43, %v10996_v44  ;;  %v9587_v44 = vld [vmem:[%s12459_s3 + $0x30] sm:$0xff]  }
 0x174   :  { %v2509_v62 = vpop.f32.mrf.mxu0  ;;  %8558 = vmatpush3.bf16.msra.mxu0 %v9587_v44 }
 0x175   :  { %v2610_v29 = vpop.f32.mrf.mxu1  ;;  %v2510_v51 = vadd.f32 %v2509_v62, %v10998_v47  ;;  %v11080_v42 = vadd.f32 %v2608_v26, %v2508_v30  ;;  %v9588_v47 = vld [vmem:[%s12459_s3 + $0x18] sm:$0xff]   ;;  %8559 = vmatprep.subr.bf16.mxu0 %v12467_v3 }
 0x176   :  { %v2511_v45 = vpop.f32.mrf.mxu0  ;;  %8568 = vmatpush3.bf16.msra.mxu1 %v9588_v47 }
 0x177   :  { %12481 = vst [vmem:[#allocation15_spill] sm:$0xff] %v11080_v42  ;;  %v2612_v35 = vpop.f32.mrf.mxu1  ;;  %v11082_v56 = vadd.f32 %v2610_v29, %v2510_v51  ;;  %8569 = vmatprep.subr.bf16.mxu1 %v12467_v3 }
 0x178   :  { %v2512_v46 = vpop.f32.mrf.mxu0  ;;  %8560 = vmatpush3.bf16.msra.mxu0 %v9589_v24 }
 0x179   :  { %v2613_v53 = vpop.f32.mrf.mxu1  ;;  %8561 = vmatprep.subr.bf16.mxu0 %v12467_v3 }
 0x17a   :  { %8570 = vmatpush3.bf16.msra.mxu1 %v9590_v9 }
 0x17b   :  { %8571 = vmatprep.subr.bf16.mxu1 %v12467_v3 }
 0x182   :  { %v11103_v4 = vpop.f32.mrf.mxu0 }
 0x183   :  { %v11105_v31 = vpop.f32.mrf.mxu1 }
 0x184   :  { %v2651_v15 = vpop.f32.mrf.mxu0 }
 0x185   :  { %v2752_v7 = vpop.f32.mrf.mxu1  ;;  %v2652_v43 = vadd.f32 %v2651_v15, %v11004_v8 }
 0x186   :  { %v11110_v26 = vpop.f32.mrf.mxu0 }
 0x187   :  { %v11112_v30 = vpop.f32.mrf.mxu1  ;;  %v11114_v62 = vadd.f32 %v2752_v7, %v2652_v43 }
 0x188   :  { %v11117_v29 = vpop.f32.mrf.mxu0 }
 0x189   :  { %v11119_v51 = vpop.f32.mrf.mxu1 }
 0x18a   :  { %v11121_v45 = vpop.f32.mrf.mxu0 }
 0x18b   :  { %v11123_v35 = vpop.f32.mrf.mxu1 }
 0x18c   :  { %v2661_v8 = vpop.f32.mrf.mxu0 }
 0x18d   :  { %v2762_v46 = vpop.f32.mrf.mxu1  ;;  %v2662_v53 = vadd.f32 %v2661_v8, %v11018_v32 }
 0x18e   :  { %v11126_v63 = vpop.f32.mrf.mxu0 }
 0x18f   :  { %v11128_v44 = vpop.f32.mrf.mxu1  ;;  %v11130_v47 = vadd.f32 %v2762_v46, %v2662_v53 }
 0x190   :  { %v11132_v24 = vpop.f32.mrf.mxu0 }
 0x191   :  { %v11134_v9 = vpop.f32.mrf.mxu1 }
 0x192   :  { %v11136_v15 = vpop.f32.mrf.mxu0 }
 0x193   :  { %v11138_v7 = vpop.f32.mrf.mxu1 }
 0x194   :  { %v2671_v43 = vpop.f32.mrf.mxu0 }
 0x195   :  { %v2772_v3 = vpop.f32.mrf.mxu1  ;;  %v2672_v42 = vadd.f32 %v2671_v43, %v11031_v54 }
 0x196   :  { %v11141_v28 = vpop.f32.mrf.mxu0 }
 0x197   :  { %v11143_v32 = vpop.f32.mrf.mxu1  ;;  %v11145_v8 = vadd.f32 %v2772_v3, %v2672_v42 }
 0x198   :  { %v11147_v46 = vpop.f32.mrf.mxu0 }
 0x199   :  { %v11149_v53 = vpop.f32.mrf.mxu1 }
 0x19a   :  { %v11151_v50 = vpop.f32.mrf.mxu0 }
 0x19b   :  { %v11153_v6 = vpop.f32.mrf.mxu1 }
 0x19c   :  { %12482 = vst [vmem:[#allocation16_spill] sm:$0xff] %v11153_v6  ;;  %v2681_v36 = vpop.f32.mrf.mxu0 }
 0x19d   :  { %v2782_v38 = vpop.f32.mrf.mxu1  ;;  %v2682_v37 = vadd.f32 %v2681_v36, %v11044_v18 }
 0x19e   :  { %v11156_v17 = vpop.f32.mrf.mxu0 }
 0x19f   :  { %v11158_v54 = vpop.f32.mrf.mxu1  ;;  %v11160_v43 = vadd.f32 %v2782_v38, %v2682_v37 }
 0x1a0   :  { %12483 = vst [vmem:[#allocation17_spill] sm:$0xff] %v11158_v54  ;;  %v11162_v42 = vpop.f32.mrf.mxu0 }
 0x1a1   :  { %12484 = vst [vmem:[#allocation18_spill] sm:$0xff] %v11160_v43  ;;  %12485 = vst [vmem:[#allocation19_spill] sm:$0xff] %v11162_v42  ;;  %v11164_v3 = vpop.f32.mrf.mxu1 }
 0x1a2   :  { %12486 = vst [vmem:[#allocation20_spill] sm:$0xff] %v11164_v3  ;;  %v11166_v52 = vpop.f32.mrf.mxu0 }
 0x1a3   :  { %12487 = vst [vmem:[#allocation21_spill] sm:$0xff] %v11166_v52  ;;  %v11168_v5 = vpop.f32.mrf.mxu1 }
 0x1a4   :  { %12488 = vst [vmem:[#allocation22_spill] sm:$0xff] %v11168_v5  ;;  %v2691_v48 = vpop.f32.mrf.mxu0 }
 0x1a5   :  { %v2792_v22 = vpop.f32.mrf.mxu1  ;;  %v2692_v19 = vadd.f32 %v2691_v48, %v11057_v12 }
 0x1a6   :  { %v11171_v6 = vpop.f32.mrf.mxu0 }
 0x1a7   :  { %v11173_v18 = vpop.f32.mrf.mxu1  ;;  %v11175_v36 = vadd.f32 %v2792_v22, %v2692_v19 }
 0x1a8   :  { %12489 = vst [vmem:[#allocation23_spill] sm:$0xff] %v11173_v18  ;;  %v11177_v37 = vpop.f32.mrf.mxu0 }
 0x1a9   :  { %12490 = vst [vmem:[#allocation24_spill] sm:$0xff] %v11175_v36  ;;  %12491 = vst [vmem:[#allocation25_spill] sm:$0xff] %v11177_v37  ;;  %v11179_v38 = vpop.f32.mrf.mxu1 }
 0x1aa   :  { %12492 = vst [vmem:[#allocation26_spill] sm:$0xff] %v11179_v38  ;;  %v11181_v43 = vpop.f32.mrf.mxu0 }
 0x1ab   :  { %12493 = vst [vmem:[#allocation27_spill] sm:$0xff] %v11181_v43  ;;  %v11183_v3 = vpop.f32.mrf.mxu1 }
 0x1ac   :  { %12494 = vst [vmem:[#allocation28_spill] sm:$0xff] %v11183_v3  ;;  %v2701_v52 = vpop.f32.mrf.mxu0 }
 0x1ad   :  { %v2802_v5 = vpop.f32.mrf.mxu1  ;;  %v2702_v54 = vadd.f32 %v2701_v52, %v11070_v16 }
 0x1ae   :  { %v11186_v42 = vpop.f32.mrf.mxu0 }
 0x1af   :  { %12495 = vst [vmem:[#allocation29_spill] sm:$0xff] %v11186_v42  ;;  %v11188_v12 = vpop.f32.mrf.mxu1  ;;  %v11190_v48 = vadd.f32 %v2802_v5, %v2702_v54  ;;  %v9591_v5 = vld [vmem:[%s12459_s3 + $0x20] sm:$0xff]   ;;  %v9592_v54 = vld [vmem:[%s12459_s3 + $0x8] sm:$0xff]  }
 0x1b0   :  { %12496 = vst [vmem:[#allocation30_spill] sm:$0xff] %v11188_v12  ;;  %v11192_v19 = vpop.f32.mrf.mxu0  ;;  %8562 = vmatpush3.bf16.msra.mxu0 %v9591_v5  ;;  %8572 = vmatpush3.bf16.msra.mxu1 %v9592_v54 }
 0x1b1   :  { %v11194_v22 = vpop.f32.mrf.mxu1 }
 0x1b2   :  { %v11196_v36 = vpop.f32.mrf.mxu0 }
 0x1b3   :  { %v11198_v38 = vpop.f32.mrf.mxu1 }
 0x1b4   :  { %12497 = vst [vmem:[#allocation31_spill] sm:$0xff] %v11198_v38  ;;  %v2711_v43 = vpop.f32.mrf.mxu0  ;;  %v2353_v38 = vadd.f32 %v10902_v2, %v10900_v1  ;;  %v2363_v1 = vadd.f32 %v10924_v21, %v10922_v20 }
 0x1b5   :  { %v2812_v3 = vpop.f32.mrf.mxu1  ;;  %v2712_v18 = vadd.f32 %v2711_v43, %v11082_v56  ;;  %v2650_v43 = vadd.f32 %v11103_v4, %v11001_v0  ;;  %v9593_v0 = vld [vmem:[%s12459_s3] sm:$0xff]  }
 0x1b6   :  { %v2713_v37 = vpop.f32.mrf.mxu0  ;;  %v2454_v56 = vadd.f32 %v11007_v11, %v2353_v38  ;;  %v2464_v38 = vadd.f32 %v11020_v33, %v2363_v1 }
 0x1b7   :  { %v2814_v52 = vpop.f32.mrf.mxu1  ;;  %v11201_v16 = vadd.f32 %v2812_v3, %v2712_v18  ;;  %v2751_v18 = vadd.f32 %v11105_v31, %v2650_v43  ;;  %v2654_v37 = vadd.f32 %v11110_v26, %v11011_v14  ;;  %v2660_v14 = vadd.f32 %v11121_v45, %v11015_v27 }
 0x1b8   :  { %v2714_v42 = vpop.f32.mrf.mxu0  ;;  %v2555_v3 = vadd.f32 %v11009_v13, %v2454_v56  ;;  %v2565_v33 = vadd.f32 %v11022_v34, %v2464_v38  ;;  %v2664_v27 = vadd.f32 %v11126_v63, %v11024_v41  ;;  %v2373_v34 = vadd.f32 %v10946_v40, %v10944_v39 }
 0x1b9   :  { %v2815_v12 = vpop.f32.mrf.mxu1  ;;  %v12498_v42 = vmov 0.0   ;;  %v2755_v31 = vadd.f32 %v11112_v30, %v2654_v37  ;;  %v2670_v39 = vadd.f32 %v11136_v15, %v11028_v49  ;;  %v2674_v49 = vadd.f32 %v11141_v28, %v11037_v59 }
 0x1ba   :  { %8573 = vmatprep.subr.bf16.mxu1 %v12498_v42  ;;  %8579 = vmatprep.subr.bf16.mxu0 %v12498_v42  ;;  %v2656_v11 = vadd.f32 %v11117_v29, %v2555_v3  ;;  %v2666_v3 = vadd.f32 %v11132_v24, %v2565_v33  ;;  %v2765_v37 = vadd.f32 %v11128_v44, %v2664_v27 }
 0x1bb   :  { %8574 = vmatpush3.bf16.msra.mxu1 %v9593_v0  ;;  %8575 = vmatprep.mubr.msk.bf16.mxu1 %vm9805_vm0, %v12498_v42  ;;  %v2771_v15 = vadd.f32 %v11138_v7, %v2670_v39  ;;  %v2775_v28 = vadd.f32 %v11143_v32, %v2674_v49 }
 0x1bc   :  { %8591 = vmatprep.subr.bf16.mxu1 %v12498_v42  ;;  %v2757_v29 = vadd.f32 %v11119_v51, %v2656_v11  ;;  %8563 = vmatprep.mubr.msk.bf16.mxu0 %vm9805_vm0, %v12498_v42 }
 0x1c2   :  { %v2851_v2 = vpop.f32.mrf.mxu0 }
 0x1c3   :  { %v2952_v12 = vpop.f32.mrf.mxu1  ;;  %v2852_v4 = vadd.f32 %v2851_v2, %v2751_v18 }
 0x1c4   :  { %v2853_v13 = vpop.f32.mrf.mxu0 }
 0x1c5   :  { %v2954_v52 = vpop.f32.mrf.mxu1  ;;  %v11230_v20 = vadd.f32 %v2952_v12, %v2852_v4  ;;  %v2854_v21 = vadd.f32 %v2853_v13, %v11114_v62  ;;  %v2761_v62 = vadd.f32 %v11123_v35, %v2660_v14  ;;  %v2474_v35 = vadd.f32 %v11033_v55, %v2373_v34  ;;  %v12500_v34 = vld [vmem:[#allocation3_spill] sm:$0xff] }
 0x1c6   :  { %v2855_v26 = vpop.f32.mrf.mxu0  ;;  %v2767_v4 = vadd.f32 %v11134_v9, %v2666_v3 }
 0x1c7   :  { %v2956_v5 = vpop.f32.mrf.mxu1  ;;  %v2856_v54 = vadd.f32 %v2855_v26, %v2755_v31  ;;  %3032 = vrot.lane.b32.xlu0 %v11230_v20, %s9804_s27  ;;  %v11245_v51 = vadd.f32 %v2954_v52, %v2854_v21  ;;  %v2575_v55 = vadd.f32 %v11035_v58, %v2474_v35  ;;  %v2383_v31 = vadd.f32 %v10968_v61, %v10966_v60  ;;  %v12502_v35 = vld [vmem:[#allocation19_spill] sm:$0xff] }
 0x1c8   :  { %v2857_v30 = vpop.f32.mrf.mxu0  ;;  %v2680_v60 = vadd.f32 %v11151_v50, %v11041_v10  ;;  %v2684_v10 = vadd.f32 %v11156_v17, %v11050_v57  ;;  %v12503_v57 = vld [vmem:[#allocation8_spill] sm:$0xff] }
 0x1c9   :  { %v2958_v45 = vpop.f32.mrf.mxu1  ;;  %v11247_v56 = vadd.f32 %v2956_v5, %v2856_v54  ;;  %v2858_v43 = vadd.f32 %v2857_v30, %v2757_v29  ;;  %v2676_v26 = vadd.f32 %v11147_v46, %v2575_v55  ;;  %v2484_v59 = vadd.f32 %v11046_v23, %v2383_v31  ;;  %v12507_v55 = vld [vmem:[#allocation18_spill] sm:$0xff] }
 0x1ca   :  { %v2861_v41 = vpop.f32.mrf.mxu0 }
 0x1cb   :  { %v2962_v63 = vpop.f32.mrf.mxu1  ;;  %v2862_v18 = vadd.f32 %v2861_v41, %v2761_v62  ;;  %3034 = vrot.lane.b32.xlu1 %v11247_v56, %s9804_s27  ;;  %3097 = vrot.lane.b32.xlu0 %v11245_v51, %s9804_s27  ;;  %v11260_v40 = vadd.f32 %v2958_v45, %v2858_v43  ;;  %v2777_v27 = vadd.f32 %v11149_v53, %v2676_v26  ;;  %v12501_v41 = vld [vmem:[#allocation4_spill] sm:$0xff] }
 0x1cc   :  { %v2863_v1 = vpop.f32.mrf.mxu0  ;;  %v2585_v23 = vadd.f32 %v11048_v25, %v2484_v59 }
 0x1cd   :  { %v2964_v2 = vpop.f32.mrf.mxu1  ;;  %v2864_v24 = vadd.f32 %v2863_v1, %v11130_v47  ;;  %v11263_v12 = vadd.f32 %v2962_v63, %v2862_v18  ;;  %v2393_v63 = vadd.f32 %v12501_v41, %v12500_v34  ;;  %v12504_v1 = vld [vmem:[#allocation17_spill] sm:$0xff]  ;;  %v12516_v34 = vld [vmem:[#allocation23_spill] sm:$0xff] }
 0x1ce   :  { %v2865_v0 = vpop.f32.mrf.mxu0 }
 0x1cf   :  { %v2966_v11 = vpop.f32.mrf.mxu1  ;;  %v2866_v38 = vadd.f32 %v2865_v0, %v2765_v37  ;;  %3099 = vrot.lane.b32.xlu1 %v11260_v40, %s9804_s27  ;;  %3036 = vrot.lane.b32.xlu0 %v11263_v12, %s9804_s27  ;;  %v11274_v13 = vadd.f32 %v2964_v2, %v2864_v24  ;;  %v2686_v37 = vadd.f32 %v12502_v35, %v2585_v23  ;;  %v12505_v0 = vld [vmem:[#allocation7_spill] sm:$0xff] }
 0x1d0   :  { %v2867_v44 = vpop.f32.mrf.mxu0  ;;  %v2494_v17 = vadd.f32 %v12503_v57, %v2393_v63  ;;  %v2785_v2 = vadd.f32 %v12504_v1, %v2684_v10  ;;  %v12518_v35 = vld [vmem:[#allocation27_spill] sm:$0xff]  ;;  %v12519_v57 = vld [vmem:[#allocation24_spill] sm:$0xff] }
 0x1d1   :  { %v2968_v47 = vpop.f32.mrf.mxu1  ;;  %v2868_v52 = vadd.f32 %v2867_v44, %v2767_v4  ;;  %v11276_v9 = vadd.f32 %v2966_v11, %v2866_v38  ;;  %v12506_v11 = vld [vmem:[#allocation21_spill] sm:$0xff] }
 0x1d2   :  { %v2871_v14 = vpop.f32.mrf.mxu0  ;;  %v2690_v4 = vadd.f32 %v12506_v11, %v12505_v0 }
 0x1d3   :  { %v2972_v21 = vpop.f32.mrf.mxu1  ;;  %v2872_v58 = vadd.f32 %v2871_v14, %v2771_v15  ;;  %3101 = vrot.lane.b32.xlu1 %v11274_v13, %s9804_s27  ;;  %3038 = vrot.lane.b32.xlu0 %v11276_v9, %s9804_s27  ;;  %v11289_v61 = vadd.f32 %v2968_v47, %v2868_v52  ;;  %v12508_v52 = vld [vmem:[#allocation20_spill] sm:$0xff] }
 0x1d4   :  { %v2873_v7 = vpop.f32.mrf.mxu0  ;;  %v2787_v31 = vadd.f32 %v12508_v52, %v2686_v37 }
 0x1d5   :  { %v2974_v5 = vpop.f32.mrf.mxu1  ;;  %v2874_v46 = vadd.f32 %v2873_v7, %v11145_v8  ;;  %v11292_v29 = vadd.f32 %v2972_v21, %v2872_v58  ;;  %v12499_v8 = vld [vmem:[#allocation16_spill] sm:$0xff]  ;;  %v12509_v21 = vld [vmem:[#allocation9_spill] sm:$0xff]  ;;  %v12510_v58 = vld [vmem:[#allocation10_spill] sm:$0xff] }
 0x1d6   :  { %v2875_v54 = vpop.f32.mrf.mxu0  ;;  %v2781_v45 = vadd.f32 %v12499_v8, %v2680_v60  ;;  %v2595_v26 = vadd.f32 %v12509_v21, %v2494_v17  ;;  %v2694_v59 = vadd.f32 %v11171_v6, %v12510_v58  ;;  %v12515_v6 = vld [vmem:[#allocation12_spill] sm:$0xff] }
 0x1d7   :  { %v2976_v33 = vpop.f32.mrf.mxu1  ;;  %v2876_v30 = vadd.f32 %v2875_v54, %v2775_v28  ;;  %3103 = vrot.lane.b32.xlu1 %v11289_v61, %s9804_s27  ;;  %3040 = vrot.lane.b32.xlu0 %v11292_v29, %s9804_s27  ;;  %v11303_v62 = vadd.f32 %v2974_v5, %v2874_v46  ;;  %v12511_v5 = vld [vmem:[#allocation22_spill] sm:$0xff] }
 0x1d8   :  { %v2877_v50 = vpop.f32.mrf.mxu0  ;;  %v2791_v60 = vadd.f32 %v12511_v5, %v2690_v4  ;;  %v2795_v41 = vadd.f32 %v12516_v34, %v2694_v59  ;;  %v12521_v4 = vld [vmem:[#allocation13_spill] sm:$0xff] }
 0x1d9   :  { %v2978_v32 = vpop.f32.mrf.mxu1  ;;  %v2878_v43 = vadd.f32 %v2877_v50, %v2777_v27  ;;  %v11305_v53 = vadd.f32 %v2976_v33, %v2876_v30  ;;  %v12512_v27 = vld [vmem:[#allocation5_spill] sm:$0xff]  ;;  %v12513_v30 = vld [vmem:[#allocation6_spill] sm:$0xff] }
 0x1da   :  { %v2881_v3 = vpop.f32.mrf.mxu0  ;;  %v2403_v23 = vadd.f32 %v12513_v30, %v12512_v27 }
 0x1db   :  { %v2982_v18 = vpop.f32.mrf.mxu1  ;;  %v2882_v25 = vadd.f32 %v2881_v3, %v2781_v45  ;;  %3105 = vrot.lane.b32.xlu1 %v11303_v62, %s9804_s27  ;;  %3042 = vrot.lane.b32.xlu0 %v11305_v53, %s9804_s27  ;;  %v11318_v38 = vadd.f32 %v2978_v32, %v2878_v43  ;;  %v12514_v32 = vld [vmem:[#allocation25_spill] sm:$0xff] }
 0x1dc   :  { %v2883_v39 = vpop.f32.mrf.mxu0  ;;  %v2696_v8 = vadd.f32 %v12514_v32, %v2595_v26  ;;  %v2504_v43 = vadd.f32 %v12515_v6, %v2403_v23 }
 0x1dd   :  { %v2984_v24 = vpop.f32.mrf.mxu1  ;;  %v2884_v49 = vadd.f32 %v2883_v39, %v12507_v55  ;;  %v11321_v44 = vadd.f32 %v2982_v18, %v2882_v25  ;;  %v12517_v18 = vld [vmem:[#allocation11_spill] sm:$0xff] }
 0x1de   :  { %v2885_v47 = vpop.f32.mrf.mxu0  ;;  %v2700_v37 = vadd.f32 %v12518_v35, %v12517_v18  ;;  %v2605_v55 = vadd.f32 %v12521_v4, %v2504_v43 }
 0x1df   :  { %v2986_v15 = vpop.f32.mrf.mxu1  ;;  %v2886_v14 = vadd.f32 %v2885_v47, %v2785_v2  ;;  %3107 = vrot.lane.b32.xlu1 %v11318_v38, %s9804_s27  ;;  %3044 = vrot.lane.b32.xlu0 %v11321_v44, %s9804_s27  ;;  %v11332_v46 = vadd.f32 %v2984_v24, %v2884_v49  ;;  %v12520_v24 = vld [vmem:[#allocation26_spill] sm:$0xff]  ;;  %v12523_v47 = vld [vmem:[#allocation29_spill] sm:$0xff] }
 0x1e0   :  { %v2887_v28 = vpop.f32.mrf.mxu0  ;;  %v2797_v0 = vadd.f32 %v12520_v24, %v2696_v8  ;;  %v12522_v49 = vld [vmem:[#allocation14_spill] sm:$0xff]  ;;  %v2706_v5 = vadd.f32 %v11192_v19, %v2605_v55 }
 0x1e1   :  { %v2988_v7 = vpop.f32.mrf.mxu1  ;;  %v2888_v54 = vadd.f32 %v2887_v28, %v2787_v31  ;;  %v11334_v33 = vadd.f32 %v2986_v15, %v2886_v14  ;;  %v2704_v15 = vadd.f32 %v12523_v47, %v12522_v49  ;;  %v12524_v14 = vld [vmem:[#allocation28_spill] sm:$0xff] }
 0x1e2   :  { %v2891_v10 = vpop.f32.mrf.mxu0  ;;  %v2801_v21 = vadd.f32 %v12524_v14, %v2700_v37  ;;  %v2807_v43 = vadd.f32 %v11194_v22, %v2706_v5  ;;  %v11410_v14 = vld [vmem:[%s12460_s2] ss:$0 sm:$0xff] }
 0x1e3   :  { %v2992_v50 = vpop.f32.mrf.mxu1  ;;  %v2892_v45 = vadd.f32 %v2891_v10, %v2791_v60  ;;  %3109 = vrot.lane.b32.xlu1 %v11332_v46, %s9804_s27  ;;  %3046 = vrot.lane.b32.xlu0 %v11334_v33, %s9804_s27  ;;  %v11347_v25 = vadd.f32 %v2988_v7, %v2888_v54  ;;  %v12525_v54 = vld [vmem:[#allocation30_spill] sm:$0xff]  ;;  %v12526_v10 = vld [vmem:[#allocation15_spill] sm:$0xff] }
 0x1e4   :  { %v2893_v63 = vpop.f32.mrf.mxu0  ;;  %v2805_v27 = vadd.f32 %v12525_v54, %v2704_v15  ;;  %v9596_v54 = vld [vmem:[%s12459_s3 + $0x70] sm:$0xff]  }
 0x1e5   :  { %v2994_v3 = vpop.f32.mrf.mxu1  ;;  %v2894_v17 = vadd.f32 %v2893_v63, %v12519_v57  ;;  %v11350_v1 = vadd.f32 %v2992_v50, %v2892_v45  ;;  %v2710_v50 = vadd.f32 %v11196_v36, %v12526_v10  ;;  %v12527_v36 = vld [vmem:[#allocation31_spill] sm:$0xff] }
 0x1e6   :  { %v2895_v2 = vpop.f32.mrf.mxu0  ;;  %v9599_v10 = vld [vmem:[%s12459_s3 + $0x48] sm:$0xff]  }
 0x1e7   :  { %v2996_v39 = vpop.f32.mrf.mxu1  ;;  %v2896_v11 = vadd.f32 %v2895_v2, %v2795_v41  ;;  %3111 = vrot.lane.b32.xlu1 %v11347_v25, %s9804_s27  ;;  %3048 = vrot.lane.b32.xlu0 %v11350_v1, %s9804_s27  ;;  %v11361_v26 = vadd.f32 %v2994_v3, %v2894_v17  ;;  %v2811_v3 = vadd.f32 %v12527_v36, %v2710_v50  ;;  %v9600_v50 = vld [vmem:[%s12459_s3 + $0x60] sm:$0xff]  }
 0x1e8   :  { %v2897_v52 = vpop.f32.mrf.mxu0 }
 0x1e9   :  { %v2998_v31 = vpop.f32.mrf.mxu1  ;;  %v2898_v58 = vadd.f32 %v2897_v52, %v2797_v0  ;;  %v11363_v59 = vadd.f32 %v2996_v39, %v2896_v11 }
 0x1ea   :  { %v2901_v28 = vpop.f32.mrf.mxu0 }
 0x1eb   :  { %v3002_v7 = vpop.f32.mrf.mxu1  ;;  %v2902_v60 = vadd.f32 %v2901_v28, %v2801_v21  ;;  %3113 = vrot.lane.b32.xlu1 %v11361_v26, %s9804_s27  ;;  %3050 = vrot.lane.b32.xlu0 %v11363_v59, %s9804_s27  ;;  %v11373_v32 = vadd.f32 %v2998_v31, %v2898_v58 }
 0x1ec   :  { %v2903_v30 = vpop.f32.mrf.mxu0 }
 0x1ed   :  { %v3004_v23 = vpop.f32.mrf.mxu1  ;;  %v2904_v8 = vadd.f32 %v2903_v30, %v11190_v48  ;;  %v11376_v45 = vadd.f32 %v3002_v7, %v2902_v60  ;;  %v9594_v7 = vld [vmem:[%s12459_s3 + $0x78] sm:$0xff]   ;;  %v9598_v30 = vld [vmem:[%s12459_s3 + $0x68] sm:$0xff]  }
 0x1ee   :  { %v2905_v19 = vpop.f32.mrf.mxu0 }
 0x1ef   :  { %v3006_v6 = vpop.f32.mrf.mxu1  ;;  %v2906_v34 = vadd.f32 %v2905_v19, %v2805_v27  ;;  %3115 = vrot.lane.b32.xlu1 %v11373_v32, %s9804_s27  ;;  %3052 = vrot.lane.b32.xlu0 %v11376_v45, %s9804_s27  ;;  %v11384_v18 = vadd.f32 %v3004_v23, %v2904_v8  ;;  %v9597_v27 = vld [vmem:[%s12459_s3 + $0x50] sm:$0xff]   ;;  %v9601_v19 = vld [vmem:[%s12459_s3 + $0x40] sm:$0xff]  }
 0x1f0   :  { %v2907_v41 = vpop.f32.mrf.mxu0 }
 0x1f1   :  { %v3008_v63 = vpop.f32.mrf.mxu1  ;;  %v2908_v48 = vadd.f32 %v2907_v41, %v2807_v43  ;;  %v11386_v35 = vadd.f32 %v3006_v6, %v2906_v34  ;;  %v9602_v43 = vld [vmem:[%s12459_s3 + $0xb8] sm:$0xff]  }
 0x1f2   :  { %v2911_v37 = vpop.f32.mrf.mxu0 }
 0x1f3   :  { %v3012_v57 = vpop.f32.mrf.mxu1  ;;  %v2912_v17 = vadd.f32 %v2911_v37, %v2811_v3  ;;  %3117 = vrot.lane.b32.xlu1 %v11384_v18, %s9804_s27  ;;  %3054 = vrot.lane.b32.xlu0 %v11386_v35, %s9804_s27  ;;  %v11392_v39 = vadd.f32 %v3008_v63, %v2908_v48  ;;  %v9605_v3 = vld [vmem:[%s12459_s3 + $0x90] sm:$0xff]   ;;  %v9606_v48 = vld [vmem:[%s12459_s3 + $0xa8] sm:$0xff]  }
 0x1f4   :  { %v2913_v22 = vpop.f32.mrf.mxu0 }
 0x1f5   :  { %v3014_v2 = vpop.f32.mrf.mxu1  ;;  %v2914_v24 = vadd.f32 %v2913_v22, %v11201_v16  ;;  %v11395_v0 = vadd.f32 %v3012_v57, %v2912_v17  ;;  %v9607_v57 = vld [vmem:[%s12459_s3 + $0x88] sm:$0xff]   ;;  %v9608_v17 = vld [vmem:[%s12459_s3 + $0xa0] sm:$0xff]  }
 0x1f6   :  { %v2915_v11 = vpop.f32.mrf.mxu0 }
 0x1f7   :  { %v3016_v4 = vpop.f32.mrf.mxu1  ;;  %3119 = vrot.lane.b32.xlu1 %v11392_v39, %s9804_s27  ;;  %3056 = vrot.lane.b32.xlu0 %v11395_v0, %s9804_s27  ;;  %v11401_v47 = vadd.f32 %v3014_v2, %v2914_v24  ;;  %v9609_v2 = vld [vmem:[%s12459_s3 + $0x80] sm:$0xff]   ;;  %v9610_v24 = vld [vmem:[%s12459_s3 + $0xf8] sm:$0xff]  }
 0x1f8   :  { %v2916_v55 = vpop.f32.mrf.mxu0  ;;  %v9611_v4 = vld [vmem:[%s12459_s3 + $0xd8] sm:$0xff]  }
 0x1f9   :  { %v3017_v49 = vpop.f32.mrf.mxu1  ;;  %v9612_v55 = vld [vmem:[%s12459_s3 + $0xf0] sm:$0xff]  }
 0x1fa   :  { %v9613_v49 = vld [vmem:[%s12459_s3 + $0xd0] sm:$0xff]  }
 0x1fb   :  { %3121 = vrot.lane.b32.xlu1 %v11401_v47, %s9804_s27 }
 0x239   :  { %v3033_v15 = vpop.permute.xlu0 %3032 }
 0x23a   :  { %v3071_v16 = vmax.f32 %v11230_v20, %v3033_v15  ;;  %v9595_v20 = vld [vmem:[%s12459_s3 + $0x58] sm:$0xff]   ;;  %v9614_v15 = vld [vmem:[%s12459_s3 + $0xe8] sm:$0xff]  }
 0x23d   :  { %v3098_v52 = vpop.permute.xlu0 %3097  ;;  %v3035_v60 = vpop.permute.xlu1 %3034 }
 0x23e   :  { %v3136_v31 = vmax.f32 %v11245_v51, %v3098_v52  ;;  %v3072_v6 = vmax.f32 %v11247_v56, %v3035_v60  ;;  %v9604_v56 = vld [vmem:[%s12459_s3 + $0xb0] sm:$0xff]  }
 0x240   :  { %v3149_v21 = vmax.f32 %v3071_v16, %v3136_v31  ;;  %v9615_v16 = vld [vmem:[%s12459_s3 + $0xc8] sm:$0xff]  }
 0x241   :  { %v3100_v23 = vpop.permute.xlu1 %3099  ;;  %v3037_v31 = vpop.permute.xlu0 %3036 }
 0x242   :  { %v3169_v58 = vadd.f32 %v11410_v14, %v3149_v21  ;;  %v3137_v8 = vmax.f32 %v11260_v40, %v3100_v23  ;;  %v9603_v40 = vld [vmem:[%s12459_s3 + $0x98] sm:$0xff]   ;;  %v9616_v21 = vld [vmem:[%s12459_s3 + $0xe0] sm:$0xff]  }
 0x244   :  { %v3182_v28 = vmax.f32 %v3169_v58, 0.0  ;;  %v3150_v41 = vmax.f32 %v3072_v6, %v3137_v8  ;;  %v9626_v6 = vld [vmem:[%s12459_s3 + $0x178] sm:$0xff]  }
 0x245   :  { %v3102_v52 = vpop.permute.xlu1 %3101 }
 0x246   :  { %v3195_v5 = vpack.c.bf16 %v3182_v28, %v3182_v28  ;;  %v3170_v36 = vadd.f32 %v11410_v14, %v3150_v41  ;;  %v3138_v58 = vmax.f32 %v11274_v13, %v3102_v52  ;;  %v9617_v28 = vld [vmem:[%s12459_s3 + $0xc0] sm:$0xff]   ;;  %v9619_v13 = vld [vmem:[%s12459_s3 + $0x118] sm:$0xff]   ;;  %v9628_v41 = vld [vmem:[%s12459_s3 + $0x170] sm:$0xff]  }
 0x247   :  { %v9639_v52 = vld [vmem:[%s12459_s3 + $0x188] sm:$0xff]  }
 0x248   :  { %v3214_v51 = vrot.slane %v3195_v5, 1  ;;  %8576 = vmatmul.mubr.msk.bf16.vlgmr.msra.gmra.mxu1 %vm3239_vm1, %v3195_v5  ;;  %v3437_v34 = vrot.slane %v3195_v5, 3  ;;  %v3359_v63 = vrot.slane %v3195_v5, 2  ;;  %v3183_v37 = vmax.f32 %v3170_v36, 0.0  ;;  %v9618_v5 = vld [vmem:[%s12459_s3 + $0x138] sm:$0xff]   ;;  %v9631_v36 = vld [vmem:[%s12459_s3 + $0x148] sm:$0xff]  }
 0x249   :  { %8592 = vmatpush3.bf16.msra.mxu1 %v9594_v7  ;;  %8599 = vmatprep.mubr.msk.bf16.mxu1 %vm9805_vm0, %v12498_v42  ;;  %v3073_v7 = vmax.f32 %v11263_v12, %v3037_v31  ;;  %v9620_v12 = vld [vmem:[%s12459_s3 + $0x130] sm:$0xff]  }
 0x24a   :  { %8564 = vmatmul.mubr.msk.bf16.vlgmr.msra.gmra.mxu0 %vm3239_vm1, %v3214_v51  ;;  %8593 = vmatprep.subr.bf16.mxu1 %v12498_v42  ;;  %v3506_v22 = vpack.c.bf16 %v3183_v37, %v3183_v37 }
 0x24b   :  { %8580 = vmatpush3.bf16.msra.mxu0 %v9595_v20  ;;  %8587 = vmatprep.mubr.msk.bf16.mxu0 %vm9805_vm0, %v12498_v42  ;;  %v3151_v51 = vmax.f32 %v3073_v7, %v3138_v58  ;;  %v9642_v58 = vld [vmem:[%s12459_s3 + $0x1f8] sm:$0xff]  }
 0x24c   :  { %8581 = vmatprep.subr.bf16.mxu0 %v12498_v42  ;;  %v3594_v11 = vrot.slane %v3506_v22, 1  ;;  %v3750_v20 = vrot.slane %v3506_v22, 3  ;;  %v3672_v60 = vrot.slane %v3506_v22, 2  ;;  %v9643_v7 = vld [vmem:[%s12459_s3 + $0x1d8] sm:$0xff]  }
 0x24d   :  { %8594 = vmatpush3.bf16.msra.mxu1 %v9596_v54  ;;  %v3171_v54 = vadd.f32 %v11410_v14, %v3151_v51  ;;  %v9646_v51 = vld [vmem:[%s12459_s3 + $0x1e8] sm:$0xff]  }
 0x24e   :  { %8595 = vmatprep.subr.bf16.mxu1 %v12498_v42 }
 0x24f   :  { %8582 = vmatpush3.bf16.msra.mxu0 %v9597_v27  ;;  %v9621_v27 = vld [vmem:[%s12459_s3 + $0x110] sm:$0xff]   ;;  %v3184_v23 = vmax.f32 %v3171_v54, 0.0  ;;  %v9648_v54 = vld [vmem:[%s12459_s3 + $0x1e0] sm:$0xff]  }
 0x250   :  { %8583 = vmatprep.subr.bf16.mxu0 %v12498_v42 }
 0x251   :  { %8596 = vmatpush3.bf16.msra.mxu1 %v9598_v30  ;;  %v9622_v30 = vld [vmem:[%s12459_s3 + $0x128] sm:$0xff]   ;;  %v3819_v8 = vpack.c.bf16 %v3184_v23, %v3184_v23 }
 0x252   :  { %8597 = vmatprep.subr.bf16.mxu1 %v12498_v42 }
 0x253   :  { %8584 = vmatpush3.bf16.msra.mxu0 %v9599_v10  ;;  %v9623_v10 = vld [vmem:[%s12459_s3 + $0x108] sm:$0xff]  }
 0x254   :  { %8585 = vmatprep.subr.bf16.mxu0 %v12498_v42 }
 0x255   :  { %8598 = vmatpush3.bf16.msra.mxu1 %v9600_v50  ;;  %v9624_v50 = vld [vmem:[%s12459_s3 + $0x120] sm:$0xff]  }
 0x256   :  { %8615 = vmatprep.subr.bf16.mxu1 %v12498_v42 }
 0x257   :  { %8586 = vmatpush3.bf16.msra.mxu0 %v9601_v19  ;;  %v9625_v19 = vld [vmem:[%s12459_s3 + $0x100] sm:$0xff]  }
 0x258   :  { %8600 = vmatmul.mubr.msk.bf16.vlgmr.msra.gmra.mxu1 %vm3239_vm1, %v3437_v34  ;;  %8603 = vmatprep.subr.bf16.mxu0 %v12498_v42  ;;  %v9627_v34 = vld [vmem:[%s12459_s3 + $0x158] sm:$0xff]  }
 0x259   :  { %8616 = vmatpush3.bf16.msra.mxu1 %v9602_v43  ;;  %8623 = vmatprep.mubr.msk.bf16.mxu1 %vm9805_vm0, %v12498_v42  ;;  %v3907_v43 = vrot.slane %v3819_v8, 1 }
 0x25a   :  { %8588 = vmatmul.mubr.msk.bf16.vlgmr.msra.gmra.mxu0 %vm3239_vm1, %v3359_v63  ;;  %8617 = vmatprep.subr.bf16.mxu1 %v12498_v42  ;;  %v9630_v63 = vld [vmem:[%s12459_s3 + $0x168] sm:$0xff]  }
 0x25b   :  { %8604 = vmatpush3.bf16.msra.mxu0 %v9603_v40  ;;  %8611 = vmatprep.mubr.msk.bf16.mxu0 %vm9805_vm0, %v12498_v42  ;;  %v9629_v40 = vld [vmem:[%s12459_s3 + $0x150] sm:$0xff]  }
 0x25c   :  { %8605 = vmatprep.subr.bf16.mxu0 %v12498_v42 }
 0x25d   :  { %8618 = vmatpush3.bf16.msra.mxu1 %v9604_v56  ;;  %v3104_v56 = vpop.permute.xlu1 %3103 }
 0x25e   :  { %8619 = vmatprep.subr.bf16.mxu1 %v12498_v42  ;;  %v3139_v37 = vmax.f32 %v11289_v61, %v3104_v56  ;;  %v9635_v61 = vld [vmem:[%s12459_s3 + $0x198] sm:$0xff]  }
 0x25f   :  { %8606 = vmatpush3.bf16.msra.mxu0 %v9605_v3  ;;  %v3039_v3 = vpop.permute.xlu0 %3038 }
 0x260   :  { %8607 = vmatprep.subr.bf16.mxu0 %v12498_v42 }
 0x261   :  { %8620 = vmatpush3.bf16.msra.mxu1 %v9606_v48  ;;  %v9632_v48 = vld [vmem:[%s12459_s3 + $0x160] sm:$0xff]  }
 0x262   :  { %8621 = vmatprep.subr.bf16.mxu1 %v12498_v42 }
 0x263   :  { %8608 = vmatpush3.bf16.msra.mxu0 %v9607_v57  ;;  %v9633_v57 = vld [vmem:[%s12459_s3 + $0x140] sm:$0xff]  }
 0x264   :  { %8609 = vmatprep.subr.bf16.mxu0 %v12498_v42 }
 0x265   :  { %8622 = vmatpush3.bf16.msra.mxu1 %v9608_v17  ;;  %v3074_v17 = vmax.f32 %v11276_v9, %v3039_v3  ;;  %v9636_v9 = vld [vmem:[%s12459_s3 + $0x1b0] sm:$0xff]   ;;  %v9658_v3 = vld [vmem:[%s12459_s3 + $0x278] sm:$0xff]  }
 0x266   :  { %8639 = vmatprep.subr.bf16.mxu1 %v12498_v42 }
 0x267   :  { %8610 = vmatpush3.bf16.msra.mxu0 %v9609_v2  ;;  %v4063_v2 = vrot.slane %v3819_v8, 3 }
 0x268   :  { %8624 = vmatmul.mubr.msk.bf16.vlgmr.msra.gmra.mxu1 %vm3239_vm1, %v3594_v11  ;;  %8627 = vmatprep.subr.bf16.mxu0 %v12498_v42  ;;  %v3985_v11 = vrot.slane %v3819_v8, 2 }
 0x269   :  { %8640 = vmatpush3.bf16.msra.mxu1 %v9610_v24  ;;  %8647 = vmatprep.mubr.msk.bf16.mxu1 %vm9805_vm0, %v12498_v42  ;;  %v3152_v24 = vmax.f32 %v3074_v17, %v3139_v37  ;;  %v9659_v37 = vld [vmem:[%s12459_s3 + $0x258] sm:$0xff]   ;;  %v9661_v17 = vld [vmem:[%s12459_s3 + $0x250] sm:$0xff]  }
 0x26a   :  { %8612 = vmatmul.mubr.msk.bf16.vlgmr.msra.gmra.mxu0 %vm3239_vm1, %v3506_v22  ;;  %8641 = vmatprep.subr.bf16.mxu1 %v12498_v42  ;;  %v9634_v22 = vld [vmem:[%s12459_s3 + $0x1b8] sm:$0xff]  }
 0x26b   :  { %8628 = vmatpush3.bf16.msra.mxu0 %v9611_v4  ;;  %8635 = vmatprep.mubr.msk.bf16.mxu0 %vm9805_vm0, %v12498_v42  ;;  %v3172_v4 = vadd.f32 %v11410_v14, %v3152_v24  ;;  %v9663_v24 = vld [vmem:[%s12459_s3 + $0x248] sm:$0xff]  }
 0x26c   :  { %8629 = vmatprep.subr.bf16.mxu0 %v12498_v42 }
 0x26d   :  { %8642 = vmatpush3.bf16.msra.mxu1 %v9612_v55  ;;  %v9637_v55 = vld [vmem:[%s12459_s3 + $0x190] sm:$0xff]  }
 0x26e   :  { %8643 = vmatprep.subr.bf16.mxu1 %v12498_v42 }
 0x26f   :  { %8630 = vmatpush3.bf16.msra.mxu0 %v9613_v49  ;;  %v9638_v49 = vld [vmem:[%s12459_s3 + $0x1a8] sm:$0xff]  }
 0x270   :  { %8631 = vmatprep.subr.bf16.mxu0 %v12498_v42 }
 0x271   :  { %8644 = vmatpush3.bf16.msra.mxu1 %v9614_v15  ;;  %v3185_v15 = vmax.f32 %v3172_v4, 0.0  ;;  %v9665_v4 = vld [vmem:[%s12459_s3 + $0x240] sm:$0xff]  }
 0x272   :  { %8645 = vmatprep.subr.bf16.mxu1 %v12498_v42 }
 0x273   :  { %8632 = vmatpush3.bf16.msra.mxu0 %v9615_v16  ;;  %v9640_v16 = vld [vmem:[%s12459_s3 + $0x1a0] sm:$0xff]   ;;  %v4132_v31 = vpack.c.bf16 %v3185_v15, %v3185_v15 }
 0x274   :  { %8633 = vmatprep.subr.bf16.mxu0 %v12498_v42 }
 0x275   :  { %8646 = vmatpush3.bf16.msra.mxu1 %v9616_v21  ;;  %v9641_v21 = vld [vmem:[%s12459_s3 + $0x180] sm:$0xff]  }
 0x276   :  { %8663 = vmatprep.subr.bf16.mxu1 %v12498_v42 }
 0x277   :  { %8634 = vmatpush3.bf16.msra.mxu0 %v9617_v28  ;;  %v4220_v28 = vrot.slane %v4132_v31, 1 }
 0x278   :  { %8648 = vmatmul.mubr.msk.bf16.vlgmr.msra.gmra.mxu1 %vm3239_vm1, %v3750_v20  ;;  %8651 = vmatprep.subr.bf16.mxu0 %v12498_v42  ;;  %v9645_v20 = vld [vmem:[%s12459_s3 + $0x1d0] sm:$0xff]  }
 0x279   :  { %8664 = vmatpush3.bf16.msra.mxu1 %v9618_v5  ;;  %8671 = vmatprep.mubr.msk.bf16.mxu1 %vm9805_vm0, %v12498_v42  ;;  %v9644_v5 = vld [vmem:[%s12459_s3 + $0x1f0] sm:$0xff]  }
 0x27a   :  { %8636 = vmatmul.mubr.msk.bf16.vlgmr.msra.gmra.mxu0 %vm3239_vm1, %v3672_v60  ;;  %8665 = vmatprep.subr.bf16.mxu1 %v12498_v42  ;;  %v9647_v60 = vld [vmem:[%s12459_s3 + $0x1c8] sm:$0xff]  }
 0x27b   :  { %8652 = vmatpush3.bf16.msra.mxu0 %v9619_v13  ;;  %8659 = vmatprep.mubr.msk.bf16.mxu0 %vm9805_vm0, %v12498_v42  ;;  %v3106_v13 = vpop.permute.xlu1 %3105 }
 0x27c   :  { %8653 = vmatprep.subr.bf16.mxu0 %v12498_v42 }
 0x27d   :  { %8666 = vmatpush3.bf16.msra.mxu1 %v9620_v12  ;;  %v3041_v12 = vpop.permute.xlu0 %3040 }
 0x27e   :  { %8667 = vmatprep.subr.bf16.mxu1 %v12498_v42  ;;  %v3075_v23 = vmax.f32 %v11292_v29, %v3041_v12  ;;  %v9652_v29 = vld [vmem:[%s12459_s3 + $0x230] sm:$0xff]   ;;  %v9675_v12 = vld [vmem:[%s12459_s3 + $0x2d8] sm:$0xff]  }
 0x27f   :  { %8654 = vmatpush3.bf16.msra.mxu0 %v9621_v27  ;;  %v3140_v27 = vmax.f32 %v11303_v62, %v3106_v13  ;;  %v9651_v62 = vld [vmem:[%s12459_s3 + $0x218] sm:$0xff]  }
 0x280   :  { %8655 = vmatprep.subr.bf16.mxu0 %v12498_v42  ;;  %v9674_v13 = vld [vmem:[%s12459_s3 + $0x2f8] sm:$0xff]  }
 0x281   :  { %8668 = vmatpush3.bf16.msra.mxu1 %v9622_v30  ;;  %v9649_v30 = vld [vmem:[%s12459_s3 + $0x1c0] sm:$0xff]  }
 0x282   :  { %8669 = vmatprep.subr.bf16.mxu1 %v12498_v42 }
 0x283   :  { %8656 = vmatpush3.bf16.msra.mxu0 %v9623_v10  ;;  %v9650_v10 = vld [vmem:[%s12459_s3 + $0x238] sm:$0xff]  }
 0x284   :  { %8657 = vmatprep.subr.bf16.mxu0 %v12498_v42 }
 0x285   :  { %8670 = vmatpush3.bf16.msra.mxu1 %v9624_v50  ;;  %v4376_v50 = vrot.slane %v4132_v31, 3 }
 0x286   :  { %8687 = vmatprep.subr.bf16.mxu1 %v12498_v42 }
 0x287   :  { %8658 = vmatpush3.bf16.msra.mxu0 %v9625_v19  ;;  %v4298_v19 = vrot.slane %v4132_v31, 2 }
 0x288   :  { %8672 = vmatmul.mubr.msk.bf16.vlgmr.msra.gmra.mxu1 %vm3239_vm1, %v3907_v43  ;;  %8675 = vmatprep.subr.bf16.mxu0 %v12498_v42  ;;  %v9653_v43 = vld [vmem:[%s12459_s3 + $0x210] sm:$0xff]  }
 0x289   :  { %8688 = vmatpush3.bf16.msra.mxu1 %v9626_v6  ;;  %8695 = vmatprep.mubr.msk.bf16.mxu1 %vm9805_vm0, %v12498_v42 }
 0x28a   :  { %8660 = vmatmul.mubr.msk.bf16.vlgmr.msra.gmra.mxu0 %vm3239_vm1, %v3819_v8  ;;  %8689 = vmatprep.subr.bf16.mxu1 %v12498_v42  ;;  %v3153_v8 = vmax.f32 %v3075_v23, %v3140_v27  ;;  %v9677_v27 = vld [vmem:[%s12459_s3 + $0x2d0] sm:$0xff]  }
 0x28b   :  { %8676 = vmatpush3.bf16.msra.mxu0 %v9627_v34  ;;  %8683 = vmatprep.mubr.msk.bf16.mxu0 %vm9805_vm0, %v12498_v42  ;;  %v9654_v34 = vld [vmem:[%s12459_s3 + $0x228] sm:$0xff]  }
 0x28c   :  { %8677 = vmatprep.subr.bf16.mxu0 %v12498_v42  ;;  %v3173_v6 = vadd.f32 %v11410_v14, %v3153_v8  ;;  %v9680_v8 = vld [vmem:[%s12459_s3 + $0x2e0] sm:$0xff]  }
 0x28d   :  { %8690 = vmatpush3.bf16.msra.mxu1 %v9628_v41 }
 0x28e   :  { %8691 = vmatprep.subr.bf16.mxu1 %v12498_v42  ;;  %v3186_v41 = vmax.f32 %v3173_v6, 0.0  ;;  %v9682_v6 = vld [vmem:[%s12459_s3 + $0x338] sm:$0xff]  }
 0x28f   :  { %8678 = vmatpush3.bf16.msra.mxu0 %v9629_v40  ;;  %v9655_v40 = vld [vmem:[%s12459_s3 + $0x208] sm:$0xff]  }
 0x290   :  { %8679 = vmatprep.subr.bf16.mxu0 %v12498_v42  ;;  %v4445_v56 = vpack.c.bf16 %v3186_v41, %v3186_v41 }
 0x291   :  { %8692 = vmatpush3.bf16.msra.mxu1 %v9630_v63  ;;  %v9656_v63 = vld [vmem:[%s12459_s3 + $0x220] sm:$0xff]  }
 0x292   :  { %8693 = vmatprep.subr.bf16.mxu1 %v12498_v42  ;;  %v4689_v15 = vrot.slane %v4445_v56, 3 }
 0x293   :  { %8680 = vmatpush3.bf16.msra.mxu0 %v9631_v36  ;;  %v9657_v36 = vld [vmem:[%s12459_s3 + $0x200] sm:$0xff]  }
 0x294   :  { %8681 = vmatprep.subr.bf16.mxu0 %v12498_v42 }
 0x295   :  { %8694 = vmatpush3.bf16.msra.mxu1 %v9632_v48  ;;  %v4533_v48 = vrot.slane %v4445_v56, 1 }
 0x296   :  { %8711 = vmatprep.subr.bf16.mxu1 %v12498_v42 }
 0x297   :  { %8682 = vmatpush3.bf16.msra.mxu0 %v9633_v57  ;;  %v9660_v57 = vld [vmem:[%s12459_s3 + $0x270] sm:$0xff]  }
 0x298   :  { %8696 = vmatmul.mubr.msk.bf16.vlgmr.msra.gmra.mxu1 %vm3239_vm1, %v4063_v2  ;;  %8699 = vmatprep.subr.bf16.mxu0 %v12498_v42  ;;  %v3108_v2 = vpop.permute.xlu1 %3107 }
 0x299   :  { %8712 = vmatpush3.bf16.msra.mxu1 %v9634_v22  ;;  %8719 = vmatprep.mubr.msk.bf16.mxu1 %vm9805_vm0, %v12498_v42  ;;  %v9662_v22 = vld [vmem:[%s12459_s3 + $0x268] sm:$0xff]  }
 0x29a   :  { %8684 = vmatmul.mubr.msk.bf16.vlgmr.msra.gmra.mxu0 %vm3239_vm1, %v3985_v11  ;;  %8713 = vmatprep.subr.bf16.mxu1 %v12498_v42  ;;  %v9664_v11 = vld [vmem:[%s12459_s3 + $0x260] sm:$0xff]  }
 0x29b   :  { %8700 = vmatpush3.bf16.msra.mxu0 %v9635_v61  ;;  %8707 = vmatprep.mubr.msk.bf16.mxu0 %vm9805_vm0, %v12498_v42  ;;  %v3043_v61 = vpop.permute.xlu0 %3042 }
 0x29c   :  { %8701 = vmatprep.subr.bf16.mxu0 %v12498_v42  ;;  %v3110_v23 = vpop.permute.xlu1 %3109 }
 0x29d   :  { %8714 = vmatpush3.bf16.msra.mxu1 %v9636_v9  ;;  %v3141_v9 = vmax.f32 %v11318_v38, %v3108_v2  ;;  %v9667_v38 = vld [vmem:[%s12459_s3 + $0x298] sm:$0xff]  }
 0x29e   :  { %8715 = vmatprep.subr.bf16.mxu1 %v12498_v42  ;;  %v9691_v2 = vld [vmem:[%s12459_s3 + $0x358] sm:$0xff]  }
 0x29f   :  { %8702 = vmatpush3.bf16.msra.mxu0 %v9637_v55  ;;  %v3076_v55 = vmax.f32 %v11305_v53, %v3043_v61  ;;  %v9668_v53 = vld [vmem:[%s12459_s3 + $0x2b0] sm:$0xff]  }
 0x2a0   :  { %8703 = vmatprep.subr.bf16.mxu0 %v12498_v42  ;;  %v9692_v61 = vld [vmem:[%s12459_s3 + $0x370] sm:$0xff]  }
 0x2a1   :  { %8716 = vmatpush3.bf16.msra.mxu1 %v9638_v49  ;;  %v9666_v49 = vld [vmem:[%s12459_s3 + $0x2b8] sm:$0xff]  }
 0x2a2   :  { %8717 = vmatprep.subr.bf16.mxu1 %v12498_v42 }
 0x2a3   :  { %8704 = vmatpush3.bf16.msra.mxu0 %v9639_v52  ;;  %v3154_v52 = vmax.f32 %v3076_v55, %v3141_v9  ;;  %v9693_v55 = vld [vmem:[%s12459_s3 + $0x350] sm:$0xff]  }
 0x2a4   :  { %8705 = vmatprep.subr.bf16.mxu0 %v12498_v42 }
 0x2a5   :  { %8718 = vmatpush3.bf16.msra.mxu1 %v9640_v16  ;;  %v4611_v16 = vrot.slane %v4445_v56, 2 }
 0x2a6   :  { %8735 = vmatprep.subr.bf16.mxu1 %v12498_v42 }
 0x2a7   :  { %8706 = vmatpush3.bf16.msra.mxu0 %v9641_v21  ;;  %v9669_v21 = vld [vmem:[%s12459_s3 + $0x290] sm:$0xff]  }
 0x2a8   :  { %8720 = vmatmul.mubr.msk.bf16.vlgmr.msra.gmra.mxu1 %vm3239_vm1, %v4220_v28  ;;  %8723 = vmatprep.subr.bf16.mxu0 %v12498_v42 }
 0x2a9   :  { %8736 = vmatpush3.bf16.msra.mxu1 %v9642_v58  ;;  %8743 = vmatprep.mubr.msk.bf16.mxu1 %vm9805_vm0, %v12498_v42  ;;  %v9670_v58 = vld [vmem:[%s12459_s3 + $0x2a8] sm:$0xff]  }
 0x2aa   :  { %8708 = vmatmul.mubr.msk.bf16.vlgmr.msra.gmra.mxu0 %vm3239_vm1, %v4132_v31  ;;  %8737 = vmatprep.subr.bf16.mxu1 %v12498_v42  ;;  %v3174_v31 = vadd.f32 %v11410_v14, %v3154_v52  ;;  %v9694_v52 = vld [vmem:[%s12459_s3 + $0x368] sm:$0xff]  }
 0x2ab   :  { %8724 = vmatpush3.bf16.msra.mxu0 %v9643_v7  ;;  %8731 = vmatprep.mubr.msk.bf16.mxu0 %vm9805_vm0, %v12498_v42  ;;  %v9671_v7 = vld [vmem:[%s12459_s3 + $0x288] sm:$0xff]  }
 0x2ac   :  { %8725 = vmatprep.subr.bf16.mxu0 %v12498_v42  ;;  %v3187_v28 = vmax.f32 %v3174_v31, 0.0  ;;  %v9695_v31 = vld [vmem:[%s12459_s3 + $0x348] sm:$0xff]  }
 0x2ad   :  { %8738 = vmatpush3.bf16.msra.mxu1 %v9644_v5  ;;  %v9672_v5 = vld [vmem:[%s12459_s3 + $0x2a0] sm:$0xff]  }
 0x2ae   :  { %8739 = vmatprep.subr.bf16.mxu1 %v12498_v42 }
 0x2af   :  { %8726 = vmatpush3.bf16.msra.mxu0 %v9645_v20  ;;  %v4758_v20 = vpack.c.bf16 %v3187_v28, %v3187_v28  ;;  %v9696_v28 = vld [vmem:[%s12459_s3 + $0x360] sm:$0xff]  }
 0x2b0   :  { %8727 = vmatprep.subr.bf16.mxu0 %v12498_v42 }
 0x2b1   :  { %8740 = vmatpush3.bf16.msra.mxu1 %v9646_v51  ;;  %v9673_v51 = vld [vmem:[%s12459_s3 + $0x280] sm:$0xff]   ;;  %v4924_v41 = vrot.slane %v4758_v20, 2 }
 0x2b2   :  { %8741 = vmatprep.subr.bf16.mxu1 %v12498_v42 }
 0x2b3   :  { %8728 = vmatpush3.bf16.msra.mxu0 %v9647_v60  ;;  %v4846_v60 = vrot.slane %v4758_v20, 1 }
 0x2b4   :  { %8729 = vmatprep.subr.bf16.mxu0 %v12498_v42 }
 0x2b5   :  { %8742 = vmatpush3.bf16.msra.mxu1 %v9648_v54  ;;  %v9676_v54 = vld [vmem:[%s12459_s3 + $0x2f0] sm:$0xff]  }
 0x2b6   :  { %8759 = vmatprep.subr.bf16.mxu1 %v12498_v42 }
 0x2b7   :  { %8730 = vmatpush3.bf16.msra.mxu0 %v9649_v30  ;;  %v9678_v30 = vld [vmem:[%s12459_s3 + $0x2e8] sm:$0xff]  }
 0x2b8   :  { %8744 = vmatmul.mubr.msk.bf16.vlgmr.msra.gmra.mxu1 %vm3239_vm1, %v4376_v50  ;;  %8747 = vmatprep.subr.bf16.mxu0 %v12498_v42  ;;  %v3045_v50 = vpop.permute.xlu0 %3044 }
 0x2b9   :  { %8760 = vmatpush3.bf16.msra.mxu1 %v9650_v10  ;;  %8767 = vmatprep.mubr.msk.bf16.mxu1 %vm9805_vm0, %v12498_v42  ;;  %v9679_v10 = vld [vmem:[%s12459_s3 + $0x2c8] sm:$0xff]  }
 0x2ba   :  { %8732 = vmatmul.mubr.msk.bf16.vlgmr.msra.gmra.mxu0 %vm3239_vm1, %v4298_v19  ;;  %8761 = vmatprep.subr.bf16.mxu1 %v12498_v42  ;;  %v9681_v19 = vld [vmem:[%s12459_s3 + $0x2c0] sm:$0xff]  }
 0x2bb   :  { %8748 = vmatpush3.bf16.msra.mxu0 %v9651_v62  ;;  %8755 = vmatprep.mubr.msk.bf16.mxu0 %vm9805_vm0, %v12498_v42  ;;  %v3142_v62 = vmax.f32 %v11332_v46, %v3110_v23  ;;  %v9683_v46 = vld [vmem:[%s12459_s3 + $0x318] sm:$0xff]  }
 0x2bc   :  { %8749 = vmatprep.subr.bf16.mxu0 %v12498_v42 }
 0x2bd   :  { %8762 = vmatpush3.bf16.msra.mxu1 %v9652_v29  ;;  %v3077_v29 = vmax.f32 %v11321_v44, %v3045_v50  ;;  %v9684_v44 = vld [vmem:[%s12459_s3 + $0x330] sm:$0xff]  }
 0x2be   :  { %8763 = vmatprep.subr.bf16.mxu1 %v12498_v42  ;;  %v9701_v50 = vld [vmem:[%s12459_s3 + $0x390] sm:$0xff]  }
 0x2bf   :  { %8750 = vmatpush3.bf16.msra.mxu0 %v9653_v43  ;;  %v5002_v43 = vrot.slane %v4758_v20, 3 }
 0x2c0   :  { %8751 = vmatprep.subr.bf16.mxu0 %v12498_v42 }
 0x2c1   :  { %8764 = vmatpush3.bf16.msra.mxu1 %v9654_v34  ;;  %v3155_v34 = vmax.f32 %v3077_v29, %v3142_v62 }
 0x2c2   :  { %8765 = vmatprep.subr.bf16.mxu1 %v12498_v42 }
 0x2c3   :  { %8752 = vmatpush3.bf16.msra.mxu0 %v9655_v40  ;;  %v3175_v40 = vadd.f32 %v11410_v14, %v3155_v34  ;;  %v9703_v34 = vld [vmem:[%s12459_s3 + $0x388] sm:$0xff]  }
 0x2c4   :  { %8753 = vmatprep.subr.bf16.mxu0 %v12498_v42 }
 0x2c5   :  { %8766 = vmatpush3.bf16.msra.mxu1 %v9656_v63  ;;  %v9685_v63 = vld [vmem:[%s12459_s3 + $0x310] sm:$0xff]  }
 0x2c6   :  { %8783 = vmatprep.subr.bf16.mxu1 %v12498_v42 }
 0x2c7   :  { %8754 = vmatpush3.bf16.msra.mxu0 %v9657_v36  ;;  %v3188_v36 = vmax.f32 %v3175_v40, 0.0  ;;  %v9705_v40 = vld [vmem:[%s12459_s3 + $0x380] sm:$0xff]  }
 0x2c8   :  { %8768 = vmatmul.mubr.msk.bf16.vlgmr.msra.gmra.mxu1 %vm3239_vm1, %v4533_v48  ;;  %8771 = vmatprep.subr.bf16.mxu0 %v12498_v42  ;;  %v9688_v48 = vld [vmem:[%s12459_s3 + $0x320] sm:$0xff]  }
 0x2c9   :  { %8784 = vmatpush3.bf16.msra.mxu1 %v9658_v3  ;;  %8791 = vmatprep.mubr.msk.bf16.mxu1 %vm9805_vm0, %v12498_v42  ;;  %v9687_v3 = vld [vmem:[%s12459_s3 + $0x308] sm:$0xff]  }
 0x2ca   :  { %8756 = vmatmul.mubr.msk.bf16.vlgmr.msra.gmra.mxu0 %vm3239_vm1, %v4445_v56  ;;  %8785 = vmatprep.subr.bf16.mxu1 %v12498_v42  ;;  %v9686_v56 = vld [vmem:[%s12459_s3 + $0x328] sm:$0xff]  }
 0x2cb   :  { %8772 = vmatpush3.bf16.msra.mxu0 %v9659_v37  ;;  %8779 = vmatprep.mubr.msk.bf16.mxu0 %vm9805_vm0, %v12498_v42  ;;  %v11880_v37 = vpack.c.bf16 %v3188_v36, %v3188_v36  ;;  %v9707_v36 = vld [vmem:[%s12459_s3 + $0x3d8] sm:$0xff]  }
 0x2cc   :  { %8773 = vmatprep.subr.bf16.mxu0 %v12498_v42 }
 0x2cd   :  { %8786 = vmatpush3.bf16.msra.mxu1 %v9660_v57  ;;  %v9689_v57 = vld [vmem:[%s12459_s3 + $0x300] sm:$0xff]  }
 0x2ce   :  { %8787 = vmatprep.subr.bf16.mxu1 %v12498_v42 }
 0x2cf   :  { %8774 = vmatpush3.bf16.msra.mxu0 %v9661_v17  ;;  %v9690_v17 = vld [vmem:[%s12459_s3 + $0x378] sm:$0xff]  }
 0x2d0   :  { %8775 = vmatprep.subr.bf16.mxu0 %v12498_v42 }
 0x2d1   :  { %8788 = vmatpush3.bf16.msra.mxu1 %v9662_v22  ;;  %v5159_v22 = vrot.slane %v11880_v37, 1 }
 0x2d2   :  { %8789 = vmatprep.subr.bf16.mxu1 %v12498_v42 }
 0x2d3   :  { %8776 = vmatpush3.bf16.msra.mxu0 %v9663_v24 }
 0x2d4   :  { %8777 = vmatprep.subr.bf16.mxu0 %v12498_v42 }
 0x2d5   :  { %8790 = vmatpush3.bf16.msra.mxu1 %v9664_v11 }
 0x2d6   :  { %8807 = vmatprep.subr.bf16.mxu1 %v12498_v42 }
 0x2d7   :  { %8778 = vmatpush3.bf16.msra.mxu0 %v9665_v4 }
 0x2d8   :  { %8792 = vmatmul.mubr.msk.bf16.vlgmr.msra.gmra.mxu1 %vm3239_vm1, %v4689_v15  ;;  %8795 = vmatprep.subr.bf16.mxu0 %v12498_v42 }
 0x2d9   :  { %8808 = vmatpush3.bf16.msra.mxu1 %v9666_v49  ;;  %8815 = vmatprep.mubr.msk.bf16.mxu1 %vm9805_vm0, %v12498_v42 }
 0x2da   :  { %8780 = vmatmul.mubr.msk.bf16.vlgmr.msra.gmra.mxu0 %vm3239_vm1, %v4611_v16  ;;  %8809 = vmatprep.subr.bf16.mxu1 %v12498_v42 }
 0x2db   :  { %8796 = vmatpush3.bf16.msra.mxu0 %v9667_v38  ;;  %8803 = vmatprep.mubr.msk.bf16.mxu0 %vm9805_vm0, %v12498_v42 }
 0x2dc   :  { %8797 = vmatprep.subr.bf16.mxu0 %v12498_v42 }
 0x2dd   :  { %8810 = vmatpush3.bf16.msra.mxu1 %v9668_v53  ;;  %v3112_v53 = vpop.permute.xlu1 %3111 }
 0x2de   :  { %8811 = vmatprep.subr.bf16.mxu1 %v12498_v42 }
 0x2df   :  { %8798 = vmatpush3.bf16.msra.mxu0 %v9669_v21 }
 0x2e0   :  { %8799 = vmatprep.subr.bf16.mxu0 %v12498_v42 }
 0x2e1   :  { %8812 = vmatpush3.bf16.msra.mxu1 %v9670_v58  ;;  %v3047_v58 = vpop.permute.xlu0 %3046 }
 0x2e2   :  { %8813 = vmatprep.subr.bf16.mxu1 %v12498_v42 }
 0x2e3   :  { %8800 = vmatpush3.bf16.msra.mxu0 %v9671_v7  ;;  %v3143_v7 = vmax.f32 %v11347_v25, %v3112_v53  ;;  %v9699_v25 = vld [vmem:[%s12459_s3 + $0x398] sm:$0xff]   ;;  %v9713_v53 = vld [vmem:[%s12459_s3 + $0x3c0] sm:$0xff]  }
 0x2e4   :  { %8801 = vmatprep.subr.bf16.mxu0 %v12498_v42 }
 0x2e5   :  { %8814 = vmatpush3.bf16.msra.mxu1 %v9672_v5  ;;  %v9697_v5 = vld [vmem:[%s12459_s3 + $0x340] sm:$0xff]  }
 0x2e6   :  { %8831 = vmatprep.subr.bf16.mxu1 %v12498_v42 }
 0x2e7   :  { %8802 = vmatpush3.bf16.msra.mxu0 %v9673_v51  ;;  %v9698_v51 = vld [vmem:[%s12459_s3 + $0x3b8] sm:$0xff]  }
 0x2e8   :  { %8816 = vmatmul.mubr.msk.bf16.vlgmr.msra.gmra.mxu1 %vm3239_vm1, %v4846_v60  ;;  %8819 = vmatprep.subr.bf16.mxu0 %v12498_v42 }
 0x2e9   :  { %8832 = vmatpush3.bf16.msra.mxu1 %v9674_v13  ;;  %8839 = vmatprep.mubr.msk.bf16.mxu1 %vm9805_vm0, %v12498_v42  ;;  %v5315_v13 = vrot.slane %v11880_v37, 3 }
 0x2ea   :  { %8804 = vmatmul.mubr.msk.bf16.vlgmr.msra.gmra.mxu0 %vm3239_vm1, %v4758_v20  ;;  %8833 = vmatprep.subr.bf16.mxu1 %v12498_v42  ;;  %v3078_v20 = vmax.f32 %v11334_v33, %v3047_v58 }
 0x2eb   :  { %8820 = vmatpush3.bf16.msra.mxu0 %v9675_v12  ;;  %8827 = vmatprep.mubr.msk.bf16.mxu0 %vm9805_vm0, %v12498_v42  ;;  %v5237_v12 = vrot.slane %v11880_v37, 2 }
 0x2ec   :  { %8821 = vmatprep.subr.bf16.mxu0 %v12498_v42  ;;  %v3156_v60 = vmax.f32 %v3078_v20, %v3143_v7  ;;  %v12033_v20 = vld [vmem:[%s12460_s2] ss:$0 sm:$0xff] }
 0x2ed   :  { %8834 = vmatpush3.bf16.msra.mxu1 %v9676_v54  ;;  %v9700_v54 = vld [vmem:[%s12459_s3 + $0x3b0] sm:$0xff]  }
 0x2ee   :  { %8835 = vmatprep.subr.bf16.mxu1 %v12498_v42 }
 0x2ef   :  { %8822 = vmatpush3.bf16.msra.mxu0 %v9677_v27  ;;  %v3176_v27 = vadd.f32 %v11410_v14, %v3156_v60  ;;  %v9702_v14 = vld [vmem:[%s12459_s3 + $0x3a8] sm:$0xff]  }
 0x2f0   :  { %8823 = vmatprep.subr.bf16.mxu0 %v12498_v42 }
 0x2f1   :  { %8836 = vmatpush3.bf16.msra.mxu1 %v9678_v30  ;;  %v3189_v29 = vmax.f32 %v3176_v27, 0.0  ;;  %v9718_v27 = vld [vmem:[%s12459_s3 + $0x428] sm:$0xff]  }
 0x2f2   :  { %8837 = vmatprep.subr.bf16.mxu1 %v12498_v42 }
 0x2f3   :  { %8824 = vmatpush3.bf16.msra.mxu0 %v9679_v10 }
 0x2f4   :  { %8825 = vmatprep.subr.bf16.mxu0 %v12498_v42 }
 0x2f5   :  { %8838 = vmatpush3.bf16.msra.mxu1 %v9680_v8 }
 0x2f6   :  { %8855 = vmatprep.subr.bf16.mxu1 %v12498_v42 }
 0x2f7   :  { %8826 = vmatpush3.bf16.msra.mxu0 %v9681_v19 }
 0x2f8   :  { %8840 = vmatmul.mubr.msk.bf16.vlgmr.msra.gmra.mxu1 %vm3239_vm1, %v5002_v43  ;;  %8843 = vmatprep.subr.bf16.mxu0 %v12498_v42 }
 0x2f9   :  { %8856 = vmatpush3.bf16.msra.mxu1 %v9682_v6  ;;  %8863 = vmatprep.mubr.msk.bf16.mxu1 %vm9805_vm0, %v12498_v42 }
 0x2fa   :  { %8828 = vmatmul.mubr.msk.bf16.vlgmr.msra.gmra.mxu0 %vm3239_vm1, %v4924_v41  ;;  %8857 = vmatprep.subr.bf16.mxu1 %v12498_v42  ;;  %v9704_v41 = vld [vmem:[%s12459_s3 + $0x3a0] sm:$0xff]  }
 0x2fb   :  { %8844 = vmatpush3.bf16.msra.mxu0 %v9683_v46  ;;  %8851 = vmatprep.mubr.msk.bf16.mxu0 %vm9805_vm0, %v12498_v42 }
 0x2fc   :  { %8845 = vmatprep.subr.bf16.mxu0 %v12498_v42 }
 0x2fd   :  { %8858 = vmatpush3.bf16.msra.mxu1 %v9684_v44  ;;  %v11965_v44 = vpack.c.bf16 %v3189_v29, %v3189_v29  ;;  %v9721_v29 = vld [vmem:[%s12459_s3 + $0x400] sm:$0xff]  }
 0x2fe   :  { %8859 = vmatprep.subr.bf16.mxu1 %v12498_v42 }
 0x2ff   :  { %8846 = vmatpush3.bf16.msra.mxu0 %v9685_v63  ;;  %v9706_v63 = vld [vmem:[%s12459_s3 + $0x3f8] sm:$0xff]   ;;  %v5628_v58 = vrot.slane %v11965_v44, 3  ;;  %v5550_v7 = vrot.slane %v11965_v44, 2 }
 0x300   :  { %8847 = vmatprep.subr.bf16.mxu0 %v12498_v42 }
 0x301   :  { %8860 = vmatpush3.bf16.msra.mxu1 %v9686_v56  ;;  %v5472_v56 = vrot.slane %v11965_v44, 1 }
 0x302   :  { %8861 = vmatprep.subr.bf16.mxu1 %v12498_v42 }
 0x303   :  { %8848 = vmatpush3.bf16.msra.mxu0 %v9687_v3 }
 0x304   :  { %8849 = vmatprep.subr.bf16.mxu0 %v12498_v42 }
 0x305   :  { %8862 = vmatpush3.bf16.msra.mxu1 %v9688_v48  ;;  %v9708_v48 = vld [vmem:[%s12459_s3 + $0x3f0] sm:$0xff]  }
 0x306   :  { %8879 = vmatprep.subr.bf16.mxu1 %v12498_v42 }
 0x307   :  { %8850 = vmatpush3.bf16.msra.mxu0 %v9689_v57 }
 0x308   :  { %8864 = vmatmul.mubr.msk.bf16.vlgmr.msra.gmra.mxu1 %vm3239_vm1, %v5159_v22  ;;  %v3344_v24 = vpop.f32.mrf.mxu1  ;;  %8867 = vmatprep.subr.bf16.mxu0 %v12498_v42  ;;  %v9709_v22 = vld [vmem:[%s12459_s3 + $0x3d0] sm:$0xff]  }
 0x309   :  { %8880 = vmatpush3.bf16.msra.mxu1 %v9690_v17  ;;  %8887 = vmatprep.mubr.msk.bf16.mxu1 %vm9805_vm0, %v12498_v42 }
 0x30a   :  { %8852 = vmatmul.mubr.msk.bf16.vlgmr.msra.gmra.mxu0 %vm3239_vm1, %v11880_v37  ;;  %v3277_v11 = vpop.f32.mrf.mxu0  ;;  %v8577_v9 = vpop.f32.mrf.mxu1  ;;  %8881 = vmatprep.subr.bf16.mxu1 %v12498_v42 }
 0x30b   :  { %v3345_v4 = vadd.f32 %v3344_v24, %v3277_v11  ;;  %8868 = vmatpush3.bf16.msra.mxu0 %v9691_v2  ;;  %8875 = vmatprep.mubr.msk.bf16.mxu0 %vm9805_vm0, %v12498_v42 }
 0x30c   :  { %v8565_v49 = vpop.f32.mrf.mxu0  ;;  %v3347_v15 = vpop.f32.mrf.mxu1  ;;  %8869 = vmatprep.subr.bf16.mxu0 %v12498_v42 }
 0x30d   :  { %8882 = vmatpush3.bf16.msra.mxu1 %v9692_v61  ;;  %v9710_v61 = vld [vmem:[%s12459_s3 + $0x3e8] sm:$0xff]  }
 0x30e   :  { %v3280_v38 = vpop.f32.mrf.mxu0  ;;  %v8578_v16 = vpop.f32.mrf.mxu1  ;;  %8883 = vmatprep.subr.bf16.mxu1 %v12498_v42  ;;  %v9711_v49 = vld [vmem:[%s12459_s3 + $0x3c8] sm:$0xff]  }
 0x30f   :  { %8870 = vmatpush3.bf16.msra.mxu0 %v9693_v55  ;;  %v3114_v55 = vpop.permute.xlu1 %3113  ;;  %v9712_v38 = vld [vmem:[%s12459_s3 + $0x3e0] sm:$0xff]  }
 0x310   :  { %v8566_v21 = vpop.f32.mrf.mxu0  ;;  %8871 = vmatprep.subr.bf16.mxu0 %v12498_v42  ;;  %v3144_v16 = vmax.f32 %v11361_v26, %v3114_v55  ;;  %v9715_v26 = vld [vmem:[%s12459_s3 + $0x418] sm:$0xff]  }
 0x311   :  { %8884 = vmatpush3.bf16.msra.mxu1 %v9694_v52  ;;  %v3049_v52 = vpop.permute.xlu0 %3048  ;;  %v9714_v21 = vld [vmem:[%s12459_s3 + $0x438] sm:$0xff]  }
 0x312   :  { %8885 = vmatprep.subr.bf16.mxu1 %v12498_v42 }
 0x313   :  { %8872 = vmatpush3.bf16.msra.mxu0 %v9695_v31  ;;  %v3079_v31 = vmax.f32 %v11350_v1, %v3049_v52 }
 0x314   :  { %8873 = vmatprep.subr.bf16.mxu0 %v12498_v42 }
 0x315   :  { %8886 = vmatpush3.bf16.msra.mxu1 %v9696_v28  ;;  %v3157_v28 = vmax.f32 %v3079_v31, %v3144_v16  ;;  %v9732_v16 = vld [vmem:[%s12459_s3 + $0x4b0] sm:$0xff]  }
 0x316   :  { %8903 = vmatprep.subr.bf16.mxu1 %v12498_v42 }
 0x317   :  { %8874 = vmatpush3.bf16.msra.mxu0 %v9697_v5  ;;  %v9716_v5 = vld [vmem:[%s12459_s3 + $0x430] sm:$0xff]  }
 0x318   :  { %v3499_v33 = vpop.f32.mrf.mxu1  ;;  %8888 = vmatmul.mubr.msk.bf16.vlgmr.msra.gmra.mxu1 %vm3239_vm1, %v5315_v13  ;;  %8891 = vmatprep.subr.bf16.mxu0 %v12498_v42 }
 0x319   :  { %8904 = vmatpush3.bf16.msra.mxu1 %v9698_v51  ;;  %8911 = vmatprep.mubr.msk.bf16.mxu1 %vm9805_vm0, %v12498_v42  ;;  %v3177_v51 = vadd.f32 %v12033_v20, %v3157_v28  ;;  %v9733_v28 = vld [vmem:[%s12459_s3 + $0x490] sm:$0xff]  }
 0x31a   :  { %v3421_v30 = vpop.f32.mrf.mxu0  ;;  %v8601_v23 = vpop.f32.mrf.mxu1  ;;  %8876 = vmatmul.mubr.msk.bf16.vlgmr.msra.gmra.mxu0 %vm3239_vm1, %v5237_v12  ;;  %8905 = vmatprep.subr.bf16.mxu1 %v12498_v42  ;;  %v9717_v12 = vld [vmem:[%s12459_s3 + $0x410] sm:$0xff]  }
 0x31b   :  { %v3427_v10 = vadd.f32 %v3421_v30, %v3345_v4  ;;  %8892 = vmatpush3.bf16.msra.mxu0 %v9699_v25  ;;  %8899 = vmatprep.mubr.msk.bf16.mxu0 %vm9805_vm0, %v12498_v42  ;;  %v3190_v23 = vmax.f32 %v3177_v51, 0.0 }
 0x31c   :  { %v8589_v8 = vpop.f32.mrf.mxu0  ;;  %v3502_v62 = vpop.f32.mrf.mxu1  ;;  %8893 = vmatprep.subr.bf16.mxu0 %v12498_v42 }
 0x31d   :  { %8906 = vmatpush3.bf16.msra.mxu1 %v9700_v54  ;;  %v3505_v19 = vadd.f32 %v3499_v33, %v3427_v10  ;;  %v9719_v8 = vld [vmem:[%s12459_s3 + $0x408] sm:$0xff]  }
 0x31e   :  { %v3424_v6 = vpop.f32.mrf.mxu0  ;;  %v8602_v43 = vpop.f32.mrf.mxu1  ;;  %8907 = vmatprep.subr.bf16.mxu1 %v12498_v42 }
 0x31f   :  { %8894 = vmatpush3.bf16.msra.mxu0 %v9701_v50  ;;  %v9722_v6 = vld [vmem:[%s12459_s3 + $0x478] sm:$0xff]  }
 0x320   :  { %v8590_v46 = vpop.f32.mrf.mxu0  ;;  %8895 = vmatprep.subr.bf16.mxu0 %v12498_v42 }
 0x321   :  { %8908 = vmatpush3.bf16.msra.mxu1 %v9702_v14  ;;  %v9720_v14 = vld [vmem:[%s12459_s3 + $0x420] sm:$0xff]  }
 0x322   :  { %8909 = vmatprep.subr.bf16.mxu1 %v12498_v42 }
 0x323   :  { %8896 = vmatpush3.bf16.msra.mxu0 %v9703_v34  ;;  %v9723_v34 = vld [vmem:[%s12459_s3 + $0x458] sm:$0xff]  }
 0x324   :  { %8897 = vmatprep.subr.bf16.mxu0 %v12498_v42 }
 0x325   :  { %8910 = vmatpush3.bf16.msra.mxu1 %v9704_v41  ;;  %v9724_v41 = vld [vmem:[%s12459_s3 + $0x470] sm:$0xff]  }
 0x326   :  { %8927 = vmatprep.subr.bf16.mxu1 %v12498_v42 }
 0x327   :  { %8898 = vmatpush3.bf16.msra.mxu0 %v9705_v40 }
 0x328   :  { %v3656_v3 = vpop.f32.mrf.mxu1  ;;  %8912 = vmatmul.mubr.msk.bf16.vlgmr.msra.gmra.mxu1 %vm3239_vm1, %v5472_v56  ;;  %8915 = vmatprep.subr.bf16.mxu0 %v12498_v42  ;;  %v9725_v56 = vld [vmem:[%s12459_s3 + $0x450] sm:$0xff]  }
 0x329   :  { %8928 = vmatpush3.bf16.msra.mxu1 %v9706_v63  ;;  %8935 = vmatprep.mubr.msk.bf16.mxu1 %vm9805_vm0, %v12498_v42 }
 0x32a   :  { %v3577_v37 = vpop.f32.mrf.mxu0  ;;  %v8625_v57 = vpop.f32.mrf.mxu1  ;;  %8900 = vmatmul.mubr.msk.bf16.vlgmr.msra.gmra.mxu0 %vm3239_vm1, %v11965_v44  ;;  %8929 = vmatprep.subr.bf16.mxu1 %v12498_v42 }
 0x32b   :  { %v3583_v17 = vadd.f32 %v3577_v37, %v3505_v19  ;;  %8916 = vmatpush3.bf16.msra.mxu0 %v9707_v36  ;;  %8923 = vmatprep.mubr.msk.bf16.mxu0 %vm9805_vm0, %v12498_v42  ;;  %v12055_v19 = vpack.c.bf16 %v3190_v23, %v3190_v23 }
 0x32c   :  { %v8613_v2 = vpop.f32.mrf.mxu0  ;;  %v3659_v24 = vpop.f32.mrf.mxu1  ;;  %8917 = vmatprep.subr.bf16.mxu0 %v12498_v42 }
 0x32d   :  { %8930 = vmatpush3.bf16.msra.mxu1 %v9708_v48  ;;  %v3662_v11 = vadd.f32 %v3656_v3, %v3583_v17  ;;  %v5785_v43 = vrot.slane %v12055_v19, 1  ;;  %v9726_v48 = vld [vmem:[%s12459_s3 + $0x468] sm:$0xff]  }
 0x32e   :  { %v3580_v9 = vpop.f32.mrf.mxu0  ;;  %v8626_v4 = vpop.f32.mrf.mxu1  ;;  %8931 = vmatprep.subr.bf16.mxu1 %v12498_v42  ;;  %v9727_v2 = vld [vmem:[%s12459_s3 + $0x448] sm:$0xff]  }
 0x32f   :  { %8918 = vmatpush3.bf16.msra.mxu0 %v9709_v22  ;;  %v3116_v22 = vpop.permute.xlu1 %3115  ;;  %v9729_v4 = vld [vmem:[%s12459_s3 + $0x440] sm:$0xff]  }
 0x330   :  { %v8614_v15 = vpop.f32.mrf.mxu0  ;;  %8919 = vmatprep.subr.bf16.mxu0 %v12498_v42  ;;  %v3145_v9 = vmax.f32 %v11373_v32, %v3116_v22  ;;  %v9731_v32 = vld [vmem:[%s12459_s3 + $0x498] sm:$0xff]  }
 0x331   :  { %8932 = vmatpush3.bf16.msra.mxu1 %v9710_v61  ;;  %v3051_v61 = vpop.permute.xlu0 %3050  ;;  %v5941_v15 = vrot.slane %v12055_v19, 3 }
 0x332   :  { %8933 = vmatprep.subr.bf16.mxu1 %v12498_v42  ;;  %v3080_v55 = vmax.f32 %v11363_v59, %v3051_v61  ;;  %v9748_v61 = vld [vmem:[%s12459_s3 + $0x530] sm:$0xff]  }
 0x333   :  { %8920 = vmatpush3.bf16.msra.mxu0 %v9711_v49  ;;  %v9730_v49 = vld [vmem:[%s12459_s3 + $0x4b8] sm:$0xff]  }
 0x334   :  { %8921 = vmatprep.subr.bf16.mxu0 %v12498_v42  ;;  %v3158_v52 = vmax.f32 %v3080_v55, %v3145_v9 }
 0x335   :  { %8934 = vmatpush3.bf16.msra.mxu1 %v9712_v38  ;;  %v5863_v38 = vrot.slane %v12055_v19, 2 }
 0x336   :  { %8951 = vmatprep.subr.bf16.mxu1 %v12498_v42 }
 0x337   :  { %8922 = vmatpush3.bf16.msra.mxu0 %v9713_v53  ;;  %v3178_v53 = vadd.f32 %v12033_v20, %v3158_v52 }
 0x338   :  { %v3812_v1 = vpop.f32.mrf.mxu1  ;;  %8936 = vmatmul.mubr.msk.bf16.vlgmr.msra.gmra.mxu1 %vm3239_vm1, %v5628_v58  ;;  %8939 = vmatprep.subr.bf16.mxu0 %v12498_v42 }
 0x339   :  { %8952 = vmatpush3.bf16.msra.mxu1 %v9714_v21  ;;  %8959 = vmatprep.mubr.msk.bf16.mxu1 %vm9805_vm0, %v12498_v42  ;;  %v3191_v51 = vmax.f32 %v3178_v53, 0.0 }
 0x33a   :  { %v3734_v13 = vpop.f32.mrf.mxu0  ;;  %v8649_v60 = vpop.f32.mrf.mxu1  ;;  %8924 = vmatmul.mubr.msk.bf16.vlgmr.msra.gmra.mxu0 %vm3239_vm1, %v5550_v7  ;;  %8953 = vmatprep.subr.bf16.mxu1 %v12498_v42 }
 0x33b   :  { %v3740_v25 = vadd.f32 %v3734_v13, %v3662_v11  ;;  %8940 = vmatpush3.bf16.msra.mxu0 %v9715_v26  ;;  %8947 = vmatprep.mubr.msk.bf16.mxu0 %vm9805_vm0, %v12498_v42  ;;  %v9728_v11 = vld [vmem:[%s12459_s3 + $0x460] sm:$0xff]  }
 0x33c   :  { %v8637_v33 = vpop.f32.mrf.mxu0  ;;  %v3815_v54 = vpop.f32.mrf.mxu1  ;;  %8941 = vmatprep.subr.bf16.mxu0 %v12498_v42 }
 0x33d   :  { %8954 = vmatpush3.bf16.msra.mxu1 %v9716_v5  ;;  %v3818_v30 = vadd.f32 %v3812_v1, %v3740_v25  ;;  %v9734_v1 = vld [vmem:[%s12459_s3 + $0x4a8] sm:$0xff]   ;;  %v9736_v33 = vld [vmem:[%s12459_s3 + $0x4a0] sm:$0xff]   ;;  %v12140_v54 = vpack.c.bf16 %v3191_v51, %v3191_v51 }
 0x33e   :  { %v3737_v10 = vpop.f32.mrf.mxu0  ;;  %v8650_v50 = vpop.f32.mrf.mxu1  ;;  %8955 = vmatprep.subr.bf16.mxu1 %v12498_v42  ;;  %v9735_v25 = vld [vmem:[%s12459_s3 + $0x488] sm:$0xff]  }
 0x33f   :  { %8942 = vmatpush3.bf16.msra.mxu0 %v9717_v12  ;;  %v6098_v23 = vrot.slane %v12140_v54, 1  ;;  %v9739_v10 = vld [vmem:[%s12459_s3 + $0x4d8] sm:$0xff]   ;;  %v6254_v22 = vrot.slane %v12140_v54, 3 }
 0x340   :  { %v8638_v62 = vpop.f32.mrf.mxu0  ;;  %8943 = vmatprep.subr.bf16.mxu0 %v12498_v42 }
 0x341   :  { %8956 = vmatpush3.bf16.msra.mxu1 %v9718_v27  ;;  %v9737_v27 = vld [vmem:[%s12459_s3 + $0x480] sm:$0xff]  }
 0x342   :  { %8957 = vmatprep.subr.bf16.mxu1 %v12498_v42 }
 0x343   :  { %8944 = vmatpush3.bf16.msra.mxu0 %v9719_v8  ;;  %v9740_v8 = vld [vmem:[%s12459_s3 + $0x4f0] sm:$0xff]  }
 0x344   :  { %8945 = vmatprep.subr.bf16.mxu0 %v12498_v42 }
 0x345   :  { %8958 = vmatpush3.bf16.msra.mxu1 %v9720_v14 }
 0x346   :  { %8975 = vmatprep.subr.bf16.mxu1 %v12498_v42 }
 0x347   :  { %8946 = vmatpush3.bf16.msra.mxu0 %v9721_v29  ;;  %v9741_v29 = vld [vmem:[%s12459_s3 + $0x4d0] sm:$0xff]  }
 0x348   :  { %v3969_v46 = vpop.f32.mrf.mxu1  ;;  %8960 = vmatmul.mubr.msk.bf16.vlgmr.msra.gmra.mxu1 %vm3239_vm1, %v5785_v43  ;;  %8963 = vmatprep.subr.bf16.mxu0 %v12498_v42 }
 0x349   :  { %8976 = vmatpush3.bf16.msra.mxu1 %v9722_v6  ;;  %8983 = vmatprep.mubr.msk.bf16.mxu1 %vm9805_vm0, %v12498_v42 }
 0x34a   :  { %v3890_v44 = vpop.f32.mrf.mxu0  ;;  %v8673_v40 = vpop.f32.mrf.mxu1  ;;  %8948 = vmatmul.mubr.msk.bf16.vlgmr.msra.gmra.mxu0 %vm3239_vm1, %v12055_v19  ;;  %8977 = vmatprep.subr.bf16.mxu1 %v12498_v42 }
 0x34b   :  { %v3896_v63 = vadd.f32 %v3890_v44, %v3818_v30  ;;  %8964 = vmatpush3.bf16.msra.mxu0 %v9723_v34  ;;  %8971 = vmatprep.mubr.msk.bf16.mxu0 %vm9805_vm0, %v12498_v42  ;;  %v9738_v30 = vld [vmem:[%s12459_s3 + $0x4f8] sm:$0xff]   ;;  %v9742_v34 = vld [vmem:[%s12459_s3 + $0x4e8] sm:$0xff]   ;;  %v3118_v40 = vpop.permute.xlu1 %3117 }
 0x34c   :  { %v8661_v36 = vpop.f32.mrf.mxu0  ;;  %v3972_v3 = vpop.f32.mrf.mxu1  ;;  %8965 = vmatprep.subr.bf16.mxu0 %v12498_v42 }
 0x34d   :  { %8978 = vmatpush3.bf16.msra.mxu1 %v9724_v41  ;;  %v3975_v37 = vadd.f32 %v3969_v46, %v3896_v63  ;;  %v9743_v63 = vld [vmem:[%s12459_s3 + $0x4c8] sm:$0xff]   ;;  %v3053_v36 = vpop.permute.xlu0 %3052  ;;  %v9744_v3 = vld [vmem:[%s12459_s3 + $0x4e0] sm:$0xff]  }
 0x34e   :  { %v3893_v57 = vpop.f32.mrf.mxu0  ;;  %v8674_v17 = vpop.f32.mrf.mxu1  ;;  %8979 = vmatprep.subr.bf16.mxu1 %v12498_v42 }
 0x34f   :  { %8966 = vmatpush3.bf16.msra.mxu0 %v9725_v56  ;;  %v3081_v57 = vmax.f32 %v11376_v45, %v3053_v36  ;;  %v9746_v17 = vld [vmem:[%s12459_s3 + $0x538] sm:$0xff]  }
 0x350   :  { %v8662_v24 = vpop.f32.mrf.mxu0  ;;  %8967 = vmatprep.subr.bf16.mxu0 %v12498_v42 }
 0x351   :  { %8980 = vmatpush3.bf16.msra.mxu1 %v9726_v48  ;;  %v3146_v48 = vmax.f32 %v11384_v18, %v3118_v40  ;;  %v9747_v18 = vld [vmem:[%s12459_s3 + $0x518] sm:$0xff]   ;;  %v6176_v24 = vrot.slane %v12140_v54, 2 }
 0x352   :  { %8981 = vmatprep.subr.bf16.mxu1 %v12498_v42 }
 0x353   :  { %8968 = vmatpush3.bf16.msra.mxu0 %v9727_v2  ;;  %v3159_v2 = vmax.f32 %v3081_v57, %v3146_v48 }
 0x354   :  { %8969 = vmatprep.subr.bf16.mxu0 %v12498_v42 }
 0x355   :  { %8982 = vmatpush3.bf16.msra.mxu1 %v9728_v11  ;;  %v3179_v11 = vadd.f32 %v12033_v20, %v3159_v2 }
 0x356   :  { %8999 = vmatprep.subr.bf16.mxu1 %v12498_v42 }
 0x357   :  { %8970 = vmatpush3.bf16.msra.mxu0 %v9729_v4 }
 0x358   :  { %v4125_v59 = vpop.f32.mrf.mxu1  ;;  %8984 = vmatmul.mubr.msk.bf16.vlgmr.msra.gmra.mxu1 %vm3239_vm1, %v5941_v15  ;;  %8987 = vmatprep.subr.bf16.mxu0 %v12498_v42 }
 0x359   :  { %9000 = vmatpush3.bf16.msra.mxu1 %v9730_v49  ;;  %9007 = vmatprep.mubr.msk.bf16.mxu1 %vm9805_vm0, %v12498_v42  ;;  %v9749_v49 = vld [vmem:[%s12459_s3 + $0x510] sm:$0xff]  }
 0x35a   :  { %v4047_v31 = vpop.f32.mrf.mxu0  ;;  %v8697_v21 = vpop.f32.mrf.mxu1  ;;  %8972 = vmatmul.mubr.msk.bf16.vlgmr.msra.gmra.mxu0 %vm3239_vm1, %v5863_v38  ;;  %9001 = vmatprep.subr.bf16.mxu1 %v12498_v42 }
 0x35b   :  { %v4053_v58 = vadd.f32 %v4047_v31, %v3975_v37  ;;  %8988 = vmatpush3.bf16.msra.mxu0 %v9731_v32  ;;  %8995 = vmatprep.mubr.msk.bf16.mxu0 %vm9805_vm0, %v12498_v42  ;;  %v9745_v37 = vld [vmem:[%s12459_s3 + $0x4c0] sm:$0xff]   ;;  %v9750_v32 = vld [vmem:[%s12459_s3 + $0x528] sm:$0xff]  }
 0x35c   :  { %v8685_v26 = vpop.f32.mrf.mxu0  ;;  %v4128_v7 = vpop.f32.mrf.mxu1  ;;  %8989 = vmatprep.subr.bf16.mxu0 %v12498_v42  ;;  %v9751_v31 = vld [vmem:[%s12459_s3 + $0x508] sm:$0xff]  }
 0x35d   :  { %9002 = vmatpush3.bf16.msra.mxu1 %v9732_v16  ;;  %v4131_v5 = vadd.f32 %v4125_v59, %v4053_v58  ;;  %v3192_v59 = vmax.f32 %v3179_v11, 0.0  ;;  %v9752_v58 = vld [vmem:[%s12459_s3 + $0x520] sm:$0xff]   ;;  %v9754_v7 = vld [vmem:[%s12459_s3 + $0x578] sm:$0xff]  }
 0x35e   :  { %v4050_v13 = vpop.f32.mrf.mxu0  ;;  %v8698_v60 = vpop.f32.mrf.mxu1  ;;  %9003 = vmatprep.subr.bf16.mxu1 %v12498_v42  ;;  %v9753_v26 = vld [vmem:[%s12459_s3 + $0x500] sm:$0xff]  }
 0x35f   :  { %8990 = vmatpush3.bf16.msra.mxu0 %v9733_v28  ;;  %v12225_v28 = vpack.c.bf16 %v3192_v59, %v3192_v59  ;;  %v9756_v13 = vld [vmem:[%s12459_s3 + $0x570] sm:$0xff]  }
 0x360   :  { %v8686_v12 = vpop.f32.mrf.mxu0  ;;  %8991 = vmatprep.subr.bf16.mxu0 %v12498_v42 }
 0x361   :  { %9004 = vmatpush3.bf16.msra.mxu1 %v9734_v1  ;;  %v6411_v1 = vrot.slane %v12225_v28, 1  ;;  %v6489_v40 = vrot.slane %v12225_v28, 2 }
 0x362   :  { %9005 = vmatprep.subr.bf16.mxu1 %v12498_v42 }
 0x363   :  { %8992 = vmatpush3.bf16.msra.mxu0 %v9735_v25 }
 0x364   :  { %8993 = vmatprep.subr.bf16.mxu0 %v12498_v42 }
 0x365   :  { %9006 = vmatpush3.bf16.msra.mxu1 %v9736_v33  ;;  %v9757_v33 = vld [vmem:[%s12459_s3 + $0x550] sm:$0xff]  }
 0x366   :  { %9023 = vmatprep.subr.bf16.mxu1 %v12498_v42 }
 0x367   :  { %8994 = vmatpush3.bf16.msra.mxu0 %v9737_v27 }
 0x368   :  { %v4282_v50 = vpop.f32.mrf.mxu1  ;;  %9008 = vmatmul.mubr.msk.bf16.vlgmr.msra.gmra.mxu1 %vm3239_vm1, %v6098_v23  ;;  %9011 = vmatprep.subr.bf16.mxu0 %v12498_v42 }
 0x369   :  { %9024 = vmatpush3.bf16.msra.mxu1 %v9738_v30  ;;  %9031 = vmatprep.mubr.msk.bf16.mxu1 %vm9805_vm0, %v12498_v42  ;;  %v9758_v30 = vld [vmem:[%s12459_s3 + $0x568] sm:$0xff]  }
 0x36a   :  { %v4203_v62 = vpop.f32.mrf.mxu0  ;;  %v8721_v14 = vpop.f32.mrf.mxu1  ;;  %8996 = vmatmul.mubr.msk.bf16.vlgmr.msra.gmra.mxu0 %vm3239_vm1, %v12140_v54  ;;  %9025 = vmatprep.subr.bf16.mxu1 %v12498_v42 }
 0x36b   :  { %v4209_v19 = vadd.f32 %v4203_v62, %v4131_v5  ;;  %9012 = vmatpush3.bf16.msra.mxu0 %v9739_v10  ;;  %9019 = vmatprep.mubr.msk.bf16.mxu0 %vm9805_vm0, %v12498_v42  ;;  %v9755_v5 = vld [vmem:[%s12459_s3 + $0x558] sm:$0xff]   ;;  %v9759_v62 = vld [vmem:[%s12459_s3 + $0x548] sm:$0xff]  }
 0x36c   :  { %v8709_v6 = vpop.f32.mrf.mxu0  ;;  %v4285_v43 = vpop.f32.mrf.mxu1  ;;  %9013 = vmatprep.subr.bf16.mxu0 %v12498_v42 }
 0x36d   :  { %9026 = vmatpush3.bf16.msra.mxu1 %v9740_v8  ;;  %v4288_v46 = vadd.f32 %v4282_v50, %v4209_v19  ;;  %v3120_v8 = vpop.permute.xlu1 %3119  ;;  %v3055_v19 = vpop.permute.xlu0 %3054  ;;  %v9761_v43 = vld [vmem:[%s12459_s3 + $0x540] sm:$0xff]  }
 0x36e   :  { %v4206_v41 = vpop.f32.mrf.mxu0  ;;  %v8722_v44 = vpop.f32.mrf.mxu1  ;;  %9027 = vmatprep.subr.bf16.mxu1 %v12498_v42  ;;  %v3147_v6 = vmax.f32 %v11392_v39, %v3120_v8  ;;  %v9763_v39 = vld [vmem:[%s12459_s3 + $0x598] sm:$0xff]  }
 0x36f   :  { %9014 = vmatpush3.bf16.msra.mxu0 %v9741_v29  ;;  %v9760_v29 = vld [vmem:[%s12459_s3 + $0x560] sm:$0xff]   ;;  %v6567_v41 = vrot.slane %v12225_v28, 3 }
 0x370   :  { %v8710_v56 = vpop.f32.mrf.mxu0  ;;  %9015 = vmatprep.subr.bf16.mxu0 %v12498_v42 }
 0x371   :  { %9028 = vmatpush3.bf16.msra.mxu1 %v9742_v34  ;;  %v3082_v34 = vmax.f32 %v11386_v35, %v3055_v19 }
 0x372   :  { %9029 = vmatprep.subr.bf16.mxu1 %v12498_v42 }
 0x373   :  { %9016 = vmatpush3.bf16.msra.mxu0 %v9743_v63  ;;  %v3160_v44 = vmax.f32 %v3082_v34, %v3147_v6  ;;  %v9764_v63 = vld [vmem:[%s12459_s3 + $0x5b0] sm:$0xff]   ;;  %v9780_v34 = vld [vmem:[%s12459_s3 + $0x608] sm:$0xff]  }
 0x374   :  { %9017 = vmatprep.subr.bf16.mxu0 %v12498_v42 }
 0x375   :  { %9030 = vmatpush3.bf16.msra.mxu1 %v9744_v3  ;;  %v3180_v56 = vadd.f32 %v12033_v20, %v3160_v44  ;;  %v9781_v44 = vld [vmem:[%s12459_s3 + $0x600] sm:$0xff]  }
 0x376   :  { %9047 = vmatprep.subr.bf16.mxu1 %v12498_v42 }
 0x377   :  { %9018 = vmatpush3.bf16.msra.mxu0 %v9745_v37  ;;  %v9765_v37 = vld [vmem:[%s12459_s3 + $0x590] sm:$0xff]  }
 0x378   :  { %v4438_v45 = vpop.f32.mrf.mxu1  ;;  %9032 = vmatmul.mubr.msk.bf16.vlgmr.msra.gmra.mxu1 %vm3239_vm1, %v6254_v22  ;;  %9035 = vmatprep.subr.bf16.mxu0 %v12498_v42  ;;  %v9766_v22 = vld [vmem:[%s12459_s3 + $0x5a8] sm:$0xff]  }
 0x379   :  { %9048 = vmatpush3.bf16.msra.mxu1 %v9746_v17  ;;  %9055 = vmatprep.mubr.msk.bf16.mxu1 %vm9805_vm0, %v12498_v42 }
 0x37a   :  { %v4360_v9 = vpop.f32.mrf.mxu0  ;;  %v8745_v4 = vpop.f32.mrf.mxu1  ;;  %9020 = vmatmul.mubr.msk.bf16.vlgmr.msra.gmra.mxu0 %vm3239_vm1, %v6176_v24  ;;  %9049 = vmatprep.subr.bf16.mxu1 %v12498_v42 }
 0x37b   :  { %v4366_v55 = vadd.f32 %v4360_v9, %v4288_v46  ;;  %9036 = vmatpush3.bf16.msra.mxu0 %v9747_v18  ;;  %9043 = vmatprep.mubr.msk.bf16.mxu0 %vm9805_vm0, %v12498_v42  ;;  %v9762_v46 = vld [vmem:[%s12459_s3 + $0x5b8] sm:$0xff]   ;;  %v3193_v18 = vmax.f32 %v3180_v56, 0.0  ;;  %v9768_v9 = vld [vmem:[%s12459_s3 + $0x5a0] sm:$0xff]  }
 0x37c   :  { %v8733_v15 = vpop.f32.mrf.mxu0  ;;  %v4441_v52 = vpop.f32.mrf.mxu1  ;;  %9037 = vmatprep.subr.bf16.mxu0 %v12498_v42 }
 0x37d   :  { %9050 = vmatpush3.bf16.msra.mxu1 %v9748_v61  ;;  %v4444_v38 = vadd.f32 %v4438_v45, %v4366_v55  ;;  %v9767_v61 = vld [vmem:[%s12459_s3 + $0x588] sm:$0xff]   ;;  %v6636_v4 = vpack.c.bf16 %v3193_v18, %v3193_v18  ;;  %v9769_v55 = vld [vmem:[%s12459_s3 + $0x580] sm:$0xff]   ;;  %v9771_v52 = vld [vmem:[%s12459_s3 + $0x5d8] sm:$0xff]  }
 0x37e   :  { %v4363_v16 = vpop.f32.mrf.mxu0  ;;  %v8746_v53 = vpop.f32.mrf.mxu1  ;;  %9051 = vmatprep.subr.bf16.mxu1 %v12498_v42 }
 0x37f   :  { %9038 = vmatpush3.bf16.msra.mxu0 %v9749_v49  ;;  %v9770_v49 = vld [vmem:[%s12459_s3 + $0x5f8] sm:$0xff]   ;;  %v6724_v15 = vrot.slane %v6636_v4, 1 }
 0x380   :  { %v8734_v21 = vpop.f32.mrf.mxu0  ;;  %9039 = vmatprep.subr.bf16.mxu0 %v12498_v42 }
 0x381   :  { %9052 = vmatpush3.bf16.msra.mxu1 %v9750_v32 }
 0x382   :  { %9053 = vmatprep.subr.bf16.mxu1 %v12498_v42 }
 0x383   :  { %9040 = vmatpush3.bf16.msra.mxu0 %v9751_v31  ;;  %v9773_v31 = vld [vmem:[%s12459_s3 + $0x5d0] sm:$0xff]  }
 0x384   :  { %9041 = vmatprep.subr.bf16.mxu0 %v12498_v42 }
 0x385   :  { %9054 = vmatpush3.bf16.msra.mxu1 %v9752_v58 }
 0x386   :  { %9071 = vmatprep.subr.bf16.mxu1 %v12498_v42 }
 0x387   :  { %9042 = vmatpush3.bf16.msra.mxu0 %v9753_v26 }
 0x388   :  { %v4595_v51 = vpop.f32.mrf.mxu1  ;;  %9056 = vmatmul.mubr.msk.bf16.vlgmr.msra.gmra.mxu1 %vm3239_vm1, %v6411_v1  ;;  %9059 = vmatprep.subr.bf16.mxu0 %v12498_v42 }
 0x389   :  { %9072 = vmatpush3.bf16.msra.mxu1 %v9754_v7  ;;  %9079 = vmatprep.mubr.msk.bf16.mxu1 %vm9805_vm0, %v12498_v42 }
 0x38a   :  { %v4516_v60 = vpop.f32.mrf.mxu0  ;;  %v8769_v25 = vpop.f32.mrf.mxu1  ;;  %9044 = vmatmul.mubr.msk.bf16.vlgmr.msra.gmra.mxu0 %vm3239_vm1, %v12225_v28  ;;  %9073 = vmatprep.subr.bf16.mxu1 %v12498_v42  ;;  %v9774_v28 = vld [vmem:[%s12459_s3 + $0x5e8] sm:$0xff]  }
 0x38b   :  { %v4522_v12 = vadd.f32 %v4516_v60, %v4444_v38  ;;  %9060 = vmatpush3.bf16.msra.mxu0 %v9755_v5  ;;  %9067 = vmatprep.mubr.msk.bf16.mxu0 %vm9805_vm0, %v12498_v42  ;;  %v9772_v38 = vld [vmem:[%s12459_s3 + $0x5f0] sm:$0xff]   ;;  %v9775_v5 = vld [vmem:[%s12459_s3 + $0x5c8] sm:$0xff]   ;;  %v9777_v60 = vld [vmem:[%s12459_s3 + $0x5c0] sm:$0xff]   ;;  %v3122_v25 = vpop.permute.xlu1 %3121 }
 0x38c   :  { %v8757_v54 = vpop.f32.mrf.mxu0  ;;  %v4598_v27 = vpop.f32.mrf.mxu1  ;;  %9061 = vmatprep.subr.bf16.mxu0 %v12498_v42 }
 0x38d   :  { %9074 = vmatpush3.bf16.msra.mxu1 %v9756_v13  ;;  %v4601_v23 = vadd.f32 %v4595_v51, %v4522_v12  ;;  %v9776_v13 = vld [vmem:[%s12459_s3 + $0x5e0] sm:$0xff]   ;;  %v6880_v12 = vrot.slane %v6636_v4, 3  ;;  %v9778_v54 = vld [vmem:[%s12459_s3 + $0x618] sm:$0xff]   ;;  %v6802_v27 = vrot.slane %v6636_v4, 2 }
 0x38e   :  { %v4519_v10 = vpop.f32.mrf.mxu0  ;;  %v8770_v50 = vpop.f32.mrf.mxu1  ;;  %9075 = vmatprep.subr.bf16.mxu1 %v12498_v42 }
 0x38f   :  { %9062 = vmatpush3.bf16.msra.mxu0 %v9757_v33  ;;  %v3057_v33 = vpop.permute.xlu0 %3056 }
 0x390   :  { %v8758_v14 = vpop.f32.mrf.mxu0  ;;  %9063 = vmatprep.subr.bf16.mxu0 %v12498_v42  ;;  %v3083_v10 = vmax.f32 %v11395_v0, %v3057_v33 }
 0x391   :  { %9076 = vmatpush3.bf16.msra.mxu1 %v9758_v30  ;;  %v3148_v30 = vmax.f32 %v11401_v47, %v3122_v25  ;;  %v9779_v47 = vld [vmem:[%s12459_s3 + $0x610] sm:$0xff]  }
 0x392   :  { %9077 = vmatprep.subr.bf16.mxu1 %v12498_v42 }
 0x393   :  { %9064 = vmatpush3.bf16.msra.mxu0 %v9759_v62  ;;  %v3161_v14 = vmax.f32 %v3083_v10, %v3148_v30  ;;  %v9786_v30 = vld [vmem:[%s12461_s5 + $0x18] sm:$0xff]  }
 0x394   :  { %9065 = vmatprep.subr.bf16.mxu0 %v12498_v42 }
 0x395   :  { %9078 = vmatpush3.bf16.msra.mxu1 %v9760_v29 }
 0x396   :  { %9095 = vmatprep.subr.bf16.mxu1 %v12498_v42 }
 0x397   :  { %9066 = vmatpush3.bf16.msra.mxu0 %v9761_v43 }
 0x398   :  { %v4751_v35 = vpop.f32.mrf.mxu1  ;;  %9080 = vmatmul.mubr.msk.bf16.vlgmr.msra.gmra.mxu1 %vm3239_vm1, %v6567_v41  ;;  %9083 = vmatprep.subr.bf16.mxu0 %v12498_v42 }
 0x399   :  { %9096 = vmatpush3.bf16.msra.mxu1 %v9762_v46  ;;  %9103 = vmatprep.mubr.msk.bf16.mxu1 %vm9805_vm0, %v12498_v42  ;;  %v3181_v46 = vadd.f32 %v12033_v20, %v3161_v14 }
 0x39a   :  { %v4673_v36 = vpop.f32.mrf.mxu0  ;;  %v8793_v3 = vpop.f32.mrf.mxu1  ;;  %9068 = vmatmul.mubr.msk.bf16.vlgmr.msra.gmra.mxu0 %vm3239_vm1, %v6489_v40  ;;  %9097 = vmatprep.subr.bf16.mxu1 %v12498_v42 }
 0x39b   :  { %v4679_v48 = vadd.f32 %v4673_v36, %v4601_v23  ;;  %9084 = vmatpush3.bf16.msra.mxu0 %v9763_v39  ;;  %9091 = vmatprep.mubr.msk.bf16.mxu0 %vm9805_vm0, %v12498_v42  ;;  %v3194_v39 = vmax.f32 %v3181_v46, 0.0  ;;  %v9790_v46 = vld [vmem:[%s12462_s7 + $0x38] sm:$0xff]  }
 0x39c   :  { %v8781_v57 = vpop.f32.mrf.mxu0  ;;  %v4754_v17 = vpop.f32.mrf.mxu1  ;;  %9085 = vmatprep.subr.bf16.mxu0 %v12498_v42 }
 0x39d   :  { %9098 = vmatpush3.bf16.msra.mxu1 %v9764_v63  ;;  %v4757_v2 = vadd.f32 %v4751_v35, %v4679_v48  ;;  %v6949_v40 = vpack.c.bf16 %v3194_v39, %v3194_v39 }
 0x39e   :  { %v4676_v24 = vpop.f32.mrf.mxu0  ;;  %v8794_v45 = vpop.f32.mrf.mxu1  ;;  %9099 = vmatprep.subr.bf16.mxu1 %v12498_v42 }
 0x39f   :  { %9086 = vmatpush3.bf16.msra.mxu0 %v9765_v37 }
 0x3a0   :  { %v8782_v11 = vpop.f32.mrf.mxu0  ;;  %9087 = vmatprep.subr.bf16.mxu0 %v12498_v42 }
 0x3a1   :  { %9100 = vmatpush3.bf16.msra.mxu1 %v9766_v22 }
 0x3a2   :  { %9101 = vmatprep.subr.bf16.mxu1 %v12498_v42 }
 0x3a3   :  { %9088 = vmatpush3.bf16.msra.mxu0 %v9767_v61 }
 0x3a4   :  { %9089 = vmatprep.subr.bf16.mxu0 %v12498_v42 }
 0x3a5   :  { %9102 = vmatpush3.bf16.msra.mxu1 %v9768_v9 }
 0x3a6   :  { %9119 = vmatprep.subr.bf16.mxu1 %v12498_v42 }
 0x3a7   :  { %9090 = vmatpush3.bf16.msra.mxu0 %v9769_v55 }
 0x3a8   :  { %v4908_v32 = vpop.f32.mrf.mxu1  ;;  %9104 = vmatmul.mubr.msk.bf16.vlgmr.msra.gmra.mxu1 %vm3239_vm1, %v6724_v15  ;;  %9107 = vmatprep.subr.bf16.mxu0 %v12498_v42 }
 0x3a9   :  { %9120 = vmatpush3.bf16.msra.mxu1 %v9770_v49  ;;  %9127 = vmatprep.mubr.msk.bf16.mxu1 %vm9805_vm0, %v12498_v42 }
 0x3aa   :  { %v4829_v59 = vpop.f32.mrf.mxu0  ;;  %v8817_v16 = vpop.f32.mrf.mxu1  ;;  %9092 = vmatmul.mubr.msk.bf16.vlgmr.msra.gmra.mxu0 %vm3239_vm1, %v6636_v4  ;;  %9121 = vmatprep.subr.bf16.mxu1 %v12498_v42 }
 0x3ab   :  { %v4835_v53 = vadd.f32 %v4829_v59, %v4757_v2  ;;  %9108 = vmatpush3.bf16.msra.mxu0 %v9771_v52  ;;  %9115 = vmatprep.mubr.msk.bf16.mxu0 %vm9805_vm0, %v12498_v42 }
 0x3ac   :  { %v8805_v21 = vpop.f32.mrf.mxu0  ;;  %v4911_v58 = vpop.f32.mrf.mxu1  ;;  %9109 = vmatprep.subr.bf16.mxu0 %v12498_v42 }
 0x3ad   :  { %9122 = vmatpush3.bf16.msra.mxu1 %v9772_v38  ;;  %v4914_v26 = vadd.f32 %v4908_v32, %v4835_v53  ;;  %v9782_v58 = vld [vmem:[%s12461_s5 + $0x38] sm:$0xff]  }
 0x3ae   :  { %v4832_v7 = vpop.f32.mrf.mxu0  ;;  %v8818_v1 = vpop.f32.mrf.mxu1  ;;  %9123 = vmatprep.subr.bf16.mxu1 %v12498_v42 }
 0x3af   :  { %9110 = vmatpush3.bf16.msra.mxu0 %v9773_v31 }
 0x3b0   :  { %v8806_v51 = vpop.f32.mrf.mxu0  ;;  %9111 = vmatprep.subr.bf16.mxu0 %v12498_v42 }
 0x3b1   :  { %9124 = vmatpush3.bf16.msra.mxu1 %v9774_v28  ;;  %v9783_v28 = vld [vmem:[%s12461_s5 + $0x30] sm:$0xff]  }
 0x3b2   :  { %9125 = vmatprep.subr.bf16.mxu1 %v12498_v42 }
 0x3b3   :  { %9112 = vmatpush3.bf16.msra.mxu0 %v9775_v5  ;;  %v9784_v5 = vld [vmem:[%s12461_s5 + $0x28] sm:$0xff]  }
 0x3b4   :  { %9113 = vmatprep.subr.bf16.mxu0 %v12498_v42 }
 0x3b5   :  { %9126 = vmatpush3.bf16.msra.mxu1 %v9776_v13 }
 0x3b6   :  { %9143 = vmatprep.subr.bf16.mxu1 %v12498_v42 }
 0x3b7   :  { %9114 = vmatpush3.bf16.msra.mxu0 %v9777_v60 }
 0x3b8   :  { %v5064_v23 = vpop.f32.mrf.mxu1  ;;  %9128 = vmatmul.mubr.msk.bf16.vlgmr.msra.gmra.mxu1 %vm3239_vm1, %v6880_v12  ;;  %9131 = vmatprep.subr.bf16.mxu0 %v12498_v42 }
 0x3b9   :  { %9159 = vmatprep.mubr.msk.bf16.mxu1 %vm9805_vm0, %v12498_v42  ;;  %9144 = vmatpush3.bf16.msra.mxu1 %v9782_v58 }
 0x3ba   :  { %v4986_v50 = vpop.f32.mrf.mxu0  ;;  %v8841_v8 = vpop.f32.mrf.mxu1  ;;  %9116 = vmatmul.mubr.msk.bf16.vlgmr.msra.gmra.mxu0 %vm3239_vm1, %v6802_v27  ;;  %9145 = vmatprep.subr.bf16.mxu1 %v12498_v42 }
 0x3bb   :  { %v4992_v62 = vadd.f32 %v4986_v50, %v4914_v26  ;;  %9132 = vmatpush3.bf16.msra.mxu0 %v9778_v54  ;;  %9139 = vmatprep.mubr.msk.bf16.mxu0 %vm9805_vm0, %v12498_v42  ;;  %v9785_v54 = vld [vmem:[%s12461_s5 + $0x20] sm:$0xff]  }
 0x3bc   :  { %v8829_v19 = vpop.f32.mrf.mxu0  ;;  %v5067_v29 = vpop.f32.mrf.mxu1  ;;  %9133 = vmatprep.subr.bf16.mxu0 %v12498_v42 }
 0x3bd   :  { %v5070_v6 = vadd.f32 %v5064_v23, %v4992_v62  ;;  %9146 = vmatpush3.bf16.msra.mxu1 %v9783_v28  ;;  %v9787_v23 = vld [vmem:[%s12461_s5 + $0x10] sm:$0xff]   ;;  %v9788_v62 = vld [vmem:[%s12461_s5 + $0x8] sm:$0xff]  }
 0x3be   :  { %v4989_v0 = vpop.f32.mrf.mxu0  ;;  %v8842_v43 = vpop.f32.mrf.mxu1  ;;  %9147 = vmatprep.subr.bf16.mxu1 %v12498_v42 }
 0x3bf   :  { %9134 = vmatpush3.bf16.msra.mxu0 %v9779_v47  ;;  %v9789_v43 = vld [vmem:[%s12461_s5] sm:$0xff]  }
 0x3c0   :  { %v8830_v41 = vpop.f32.mrf.mxu0  ;;  %9135 = vmatprep.subr.bf16.mxu0 %v12498_v42 }
 0x3c1   :  { %9148 = vmatpush3.bf16.msra.mxu1 %v9784_v5  ;;  %v9791_v41 = vld [vmem:[%s12462_s7 + $0x30] sm:$0xff]  }
 0x3c2   :  { %9149 = vmatprep.subr.bf16.mxu1 %v12498_v42 }
 0x3c3   :  { %9136 = vmatpush3.bf16.msra.mxu0 %v9780_v34 }
 0x3c4   :  { %9137 = vmatprep.subr.bf16.mxu0 %v12498_v42 }
 0x3c5   :  { %9150 = vmatpush3.bf16.msra.mxu1 %v9785_v54 }
 0x3c6   :  { %9151 = vmatprep.subr.bf16.mxu1 %v12498_v42 }
 0x3c7   :  { %9138 = vmatpush3.bf16.msra.mxu0 %v9781_v44 }
 0x3c8   :  { %v5221_v35 = vpop.f32.mrf.mxu1  ;;  %9163 = vmatprep.subr.bf16.mxu0 %v12498_v42 }
 0x3c9   :  { %9152 = vmatpush3.bf16.msra.mxu1 %v9786_v30 }
 0x3ca   :  { %v5142_v63 = vpop.f32.mrf.mxu0  ;;  %v8865_v56 = vpop.f32.mrf.mxu1  ;;  %9140 = vmatmul.mubr.msk.bf16.vlgmr.msra.gmra.mxu0 %vm3239_vm1, %v6949_v40  ;;  %9153 = vmatprep.subr.bf16.mxu1 %v12498_v42 }
 0x3cb   :  { %v5148_v20 = vadd.f32 %v5142_v63, %v5070_v6  ;;  %9179 = vmatprep.mubr.msk.bf16.mxu0 %vm9805_vm0, %v12498_v42  ;;  %9164 = vmatpush3.bf16.msra.mxu0 %v9790_v46 }
 0x3cc   :  { %v8853_v36 = vpop.f32.mrf.mxu0  ;;  %v5224_v3 = vpop.f32.mrf.mxu1  ;;  %9165 = vmatprep.subr.bf16.mxu0 %v12498_v42 }
 0x3cd   :  { %v5227_v48 = vadd.f32 %v5221_v35, %v5148_v20  ;;  %9154 = vmatpush3.bf16.msra.mxu1 %v9787_v23  ;;  %v9792_v35 = vld [vmem:[%s12462_s7 + $0x28] sm:$0xff]  }
 0x3ce   :  { %v5145_v37 = vpop.f32.mrf.mxu0  ;;  %v8866_v57 = vpop.f32.mrf.mxu1  ;;  %9155 = vmatprep.subr.bf16.mxu1 %v12498_v42 }
 0x3cf   :  { %9166 = vmatpush3.bf16.msra.mxu0 %v9791_v41  ;;  %v9793_v37 = vld [vmem:[%s12462_s7 + $0x20] sm:$0xff]  }
 0x3d0   :  { %v8854_v17 = vpop.f32.mrf.mxu0  ;;  %9167 = vmatprep.subr.bf16.mxu0 %v12498_v42 }
 0x3d1   :  { %9156 = vmatpush3.bf16.msra.mxu1 %v9788_v62  ;;  %v9794_v17 = vld [vmem:[%s12462_s7 + $0x18] sm:$0xff]  }
 0x3d2   :  { %9157 = vmatprep.subr.bf16.mxu1 %v12498_v42 }
 0x3d3   :  { %9168 = vmatpush3.bf16.msra.mxu0 %v9792_v35 }
 0x3d4   :  { %9169 = vmatprep.subr.bf16.mxu0 %v12498_v42 }
 0x3d5   :  { %9158 = vmatpush3.bf16.msra.mxu1 %v9789_v43 }
 0x3d7   :  { %9170 = vmatpush3.bf16.msra.mxu0 %v9793_v37 }
 0x3d8   :  { %v5377_v22 = vpop.f32.mrf.mxu1  ;;  %9171 = vmatprep.subr.bf16.mxu0 %v12498_v42 }
 0x3da   :  { %v5299_v2 = vpop.f32.mrf.mxu0  ;;  %v8889_v18 = vpop.f32.mrf.mxu1 }
 0x3db   :  { %v5305_v24 = vadd.f32 %v5299_v2, %v5227_v48  ;;  %9172 = vmatpush3.bf16.msra.mxu0 %v9794_v17  ;;  %v8272_v17 = vld [vmem:[%s12463_s4] ss:$0 sm:$0xff] }
 0x3dc   :  { %v8877_v45 = vpop.f32.mrf.mxu0  ;;  %v5380_v61 = vpop.f32.mrf.mxu1  ;;  %9173 = vmatprep.subr.bf16.mxu0 %v12498_v42 }
 0x3dd   :  { %v5383_v11 = vadd.f32 %v5377_v22, %v5305_v24  ;;  %v9795_v22 = vld [vmem:[%s12462_s7 + $0x10] sm:$0xff]  }
 0x3de   :  { %v5302_v9 = vpop.f32.mrf.mxu0  ;;  %v8890_v4 = vpop.f32.mrf.mxu1 }
 0x3df   :  { %9174 = vmatpush3.bf16.msra.mxu0 %v9795_v22 }
 0x3e0   :  { %v8878_v55 = vpop.f32.mrf.mxu0  ;;  %9175 = vmatprep.subr.bf16.mxu0 %v12498_v42 }
 0x3e8   :  { %v5534_v49 = vpop.f32.mrf.mxu1 }
 0x3ea   :  { %v5455_v15 = vpop.f32.mrf.mxu0  ;;  %v8913_v52 = vpop.f32.mrf.mxu1 }
 0x3eb   :  { %v5461_v32 = vadd.f32 %v5455_v15, %v5383_v11 }
 0x3ec   :  { %v8901_v38 = vpop.f32.mrf.mxu0  ;;  %v5537_v59 = vpop.f32.mrf.mxu1 }
 0x3ed   :  { %v5540_v16 = vadd.f32 %v5534_v49, %v5461_v32 }
 0x3ee   :  { %v5458_v53 = vpop.f32.mrf.mxu0  ;;  %v8914_v31 = vpop.f32.mrf.mxu1 }
 0x3f0   :  { %v8902_v21 = vpop.f32.mrf.mxu0 }
 0x3f8   :  { %v5690_v26 = vpop.f32.mrf.mxu1 }
 0x3fa   :  { %v5612_v7 = vpop.f32.mrf.mxu0  ;;  %v8937_v1 = vpop.f32.mrf.mxu1 }
 0x3fb   :  { %v5618_v51 = vadd.f32 %v5612_v7, %v5540_v16 }
 0x3fc   :  { %v8925_v13 = vpop.f32.mrf.mxu0  ;;  %v5693_v60 = vpop.f32.mrf.mxu1 }
 0x3fd   :  { %v5696_v25 = vadd.f32 %v5690_v26, %v5618_v51 }
 0x3fe   :  { %v5615_v12 = vpop.f32.mrf.mxu0  ;;  %v8938_v33 = vpop.f32.mrf.mxu1 }
 0x400   :  { %v8926_v27 = vpop.f32.mrf.mxu0 }
 0x408   :  { %v5847_v10 = vpop.f32.mrf.mxu1 }
 0x40a   :  { %v5768_v50 = vpop.f32.mrf.mxu0  ;;  %v8961_v8 = vpop.f32.mrf.mxu1 }
 0x40b   :  { %v5774_v47 = vadd.f32 %v5768_v50, %v5696_v25 }
 0x40c   :  { %v8949_v14 = vpop.f32.mrf.mxu0  ;;  %v5850_v19 = vpop.f32.mrf.mxu1 }
 0x40d   :  { %v5853_v29 = vadd.f32 %v5847_v10, %v5774_v47 }
 0x40e   :  { %v5771_v6 = vpop.f32.mrf.mxu0  ;;  %v8962_v0 = vpop.f32.mrf.mxu1 }
 0x410   :  { %v8950_v34 = vpop.f32.mrf.mxu0 }
 0x418   :  { %v6003_v44 = vpop.f32.mrf.mxu1 }
 0x41a   :  { %v5925_v39 = vpop.f32.mrf.mxu0  ;;  %v8985_v40 = vpop.f32.mrf.mxu1 }
 0x41b   :  { %v5931_v63 = vadd.f32 %v5925_v39, %v5853_v29 }
 0x41c   :  { %v8973_v56 = vpop.f32.mrf.mxu0  ;;  %v6006_v20 = vpop.f32.mrf.mxu1 }
 0x41d   :  { %v6009_v36 = vadd.f32 %v6003_v44, %v5931_v63 }
 0x41e   :  { %v5928_v3 = vpop.f32.mrf.mxu0  ;;  %v8986_v48 = vpop.f32.mrf.mxu1 }
 0x420   :  { %v8974_v57 = vpop.f32.mrf.mxu0 }
 0x428   :  { %v6160_v2 = vpop.f32.mrf.mxu1 }
 0x42a   :  { %v6081_v18 = vpop.f32.mrf.mxu0  ;;  %v9009_v24 = vpop.f32.mrf.mxu1 }
 0x42b   :  { %v6087_v45 = vadd.f32 %v6081_v18, %v6009_v36 }
 0x42c   :  { %v8997_v61 = vpop.f32.mrf.mxu0  ;;  %v6163_v11 = vpop.f32.mrf.mxu1 }
 0x42d   :  { %v6166_v9 = vadd.f32 %v6160_v2, %v6087_v45 }
 0x42e   :  { %v6084_v4 = vpop.f32.mrf.mxu0  ;;  %v9010_v55 = vpop.f32.mrf.mxu1 }
 0x42f   :  { %v9797_v4 = vld [vmem:[%s12462_s7] sm:$0xff]   ;;  %v14_v55 = vstv %s12464_s8 }
 0x430   :  { %v8998_v49 = vpop.f32.mrf.mxu0  ;;  %15 = vst [vmem:[#allocation2] sm:$0x1] %v14_v55 }
 0x431   :  { %v8273_v49 = vld [vmem:[%s12465_s6] ss:$0 sm:$0xff] }
 0x438   :  { %v6316_v15 = vpop.f32.mrf.mxu1 }
 0x43a   :  { %v6238_v52 = vpop.f32.mrf.mxu0  ;;  %v9033_v32 = vpop.f32.mrf.mxu1 }
 0x43b   :  { %v6244_v38 = vadd.f32 %v6238_v52, %v6166_v9  ;;  %v9796_v9 = vld [vmem:[%s12462_s7 + $0x8] sm:$0xff]  }
 0x43c   :  { %v9021_v59 = vpop.f32.mrf.mxu0  ;;  %v6319_v16 = vpop.f32.mrf.mxu1  ;;  %9176 = vmatpush3.bf16.msra.mxu0 %v9796_v9 }
 0x43d   :  { %v6322_v53 = vadd.f32 %v6316_v15, %v6244_v38  ;;  %9177 = vmatprep.subr.bf16.mxu0 %v12498_v42 }
 0x43e   :  { %v6241_v31 = vpop.f32.mrf.mxu0  ;;  %v9034_v21 = vpop.f32.mrf.mxu1 }
 0x440   :  { %v9022_v58 = vpop.f32.mrf.mxu0  ;;  %9178 = vmatpush3.bf16.msra.mxu0 %v9797_v4 }
 0x448   :  { %v6473_v28 = vpop.f32.mrf.mxu1 }
 0x44a   :  { %v6394_v26 = vpop.f32.mrf.mxu0  ;;  %v9057_v7 = vpop.f32.mrf.mxu1 }
 0x44b   :  { %v6400_v0 = vadd.f32 %v6394_v26, %v6322_v53  ;;  %v8290_v53 = vld [vmem:[#allocation2] ss:$0 sm:$0xff] }
 0x44c   :  { %v9045_v1 = vpop.f32.mrf.mxu0  ;;  %v6476_v5 = vpop.f32.mrf.mxu1 }
 0x44d   :  { %v6479_v43 = vadd.f32 %v6473_v28, %v6400_v0 }
 0x44e   :  { %v6397_v51 = vpop.f32.mrf.mxu0  ;;  %v9058_v13 = vpop.f32.mrf.mxu1 }
 0x450   :  { %v9046_v60 = vpop.f32.mrf.mxu0 }
 0x458   :  { %v6629_v25 = vpop.f32.mrf.mxu1 }
 0x45a   :  { %v6551_v12 = vpop.f32.mrf.mxu0  ;;  %v9081_v33 = vpop.f32.mrf.mxu1 }
 0x45b   :  { %v6557_v46 = vadd.f32 %v6551_v12, %v6479_v43 }
 0x45c   :  { %v9069_v54 = vpop.f32.mrf.mxu0  ;;  %v6632_v27 = vpop.f32.mrf.mxu1 }
 0x45d   :  { %v6635_v35 = vadd.f32 %v6629_v25, %v6557_v46 }
 0x45e   :  { %v6554_v30 = vpop.f32.mrf.mxu0  ;;  %v9082_v23 = vpop.f32.mrf.mxu1 }
 0x460   :  { %v9070_v10 = vpop.f32.mrf.mxu0 }
 0x468   :  { %v6786_v50 = vpop.f32.mrf.mxu1 }
 0x46a   :  { %v6707_v8 = vpop.f32.mrf.mxu0  ;;  %v9105_v62 = vpop.f32.mrf.mxu1 }
 0x46b   :  { %v6713_v20 = vadd.f32 %v6707_v8, %v6635_v35 }
 0x46c   :  { %v9093_v47 = vpop.f32.mrf.mxu0  ;;  %v6789_v14 = vpop.f32.mrf.mxu1 }
 0x46d   :  { %v6792_v3 = vadd.f32 %v6786_v50, %v6713_v20 }
 0x46e   :  { %v6710_v19 = vpop.f32.mrf.mxu0  ;;  %v9106_v29 = vpop.f32.mrf.mxu1 }
 0x470   :  { %v9094_v6 = vpop.f32.mrf.mxu0 }
 0x478   :  { %v6942_v34 = vpop.f32.mrf.mxu1 }
 0x47a   :  { %v6864_v41 = vpop.f32.mrf.mxu0  ;;  %v9129_v44 = vpop.f32.mrf.mxu1 }
 0x47b   :  { %v6870_v48 = vadd.f32 %v6864_v41, %v6792_v3 }
 0x47c   :  { %v9117_v39 = vpop.f32.mrf.mxu0  ;;  %v6945_v40 = vpop.f32.mrf.mxu1 }
 0x47d   :  { %v6948_v37 = vadd.f32 %v6942_v34, %v6870_v48 }
 0x47e   :  { %v6867_v63 = vpop.f32.mrf.mxu0  ;;  %v9130_v56 = vpop.f32.mrf.mxu1 }
 0x480   :  { %v9118_v36 = vpop.f32.mrf.mxu0 }
 0x48a   :  { %v7020_v57 = vpop.f32.mrf.mxu0 }
 0x48b   :  { %v7026_v22 = vadd.f32 %v7020_v57, %v6948_v37 }
 0x48c   :  { %v9141_v2 = vpop.f32.mrf.mxu0 }
 0x48d   :  { %v7034_v18 = vadd.f32 %v8272_v17, %v7026_v22 }
 0x48e   :  { %v7023_v24 = vpop.f32.mrf.mxu0 }
 0x48f   :  { %v7035_v45 = vmax.f32 %v7034_v18, 0.0 }
 0x490   :  { %v9142_v61 = vpop.f32.mrf.mxu0 }
 0x491   :  { %v7036_v11 = vpack.c.bf16 %v7035_v45, %v7035_v45 }
 0x493   :  { %9160 = vmatmul.mubr.bf16.vlgmr.msra.gmra.mxu1 %v7036_v11 }
 0x553   :  { %v7142_v15 = vpop.f32.mrf.mxu1 }
 0x554   :  { %v7143_v52 = vadd.f32 %v8273_v49, %v7142_v15 }
 0x555   :  { %v9161_v32 = vpop.f32.mrf.mxu1 }
 0x556   :  { %v7148_v38 = vmax.f32 %v7143_v52, 0.0 }
 0x557   :  { %v7145_v59 = vpop.f32.mrf.mxu1 }
 0x558   :  { %v7149_v42 = vpack.c.bf16 %v7148_v38, %v7148_v38 }
 0x559   :  { %v9162_v16 = vpop.f32.mrf.mxu1 }
 0x55a   :  { %9180 = vmatmul.mubr.bf16.vlgmr.msra.gmra.mxu0 %v7149_v42 }
 0x61a   :  { %v7248_v31 = vpop.f32.mrf.mxu0 }
 0x61b   :  { %v7261_v21 = vadd.f32 %v8290_v53, %v7248_v31 }
 0x61c   :  { %v9181_v58 = vpop.f32.mrf.mxu0 }
 0x61d   :  { %v8291_v28 = vmul.f32 -1.442695, %v7261_v21 }
 0x61e   :  { %v7251_v26 = vpop.f32.mrf.mxu0 }
 0x61f   :  { %9798 = vpow2.f32 %v8291_v28 }
 0x620   :  { %v9182_v7 = vpop.f32.mrf.mxu0 }
 0x62c   :  { %v9799_v1 = vpop.eup %9798 }
 0x62d   :  { %v7265_v5 = vadd.f32 1.0, %v9799_v1 }
 0x62f   :  { %9800 = vrcp.f32 %v7265_v5 }
 0x63c   :  { %v9801_v51 = vpop.eup %9800 }
 0x63d   :  { %7269 = vst.msk [vmem:[%s12466_s9] sm:$0x3] %vm7268_vm2, %v9801_v51 }

</bundles_post_ra>
